<compile_context>
chip_gen: v7x
topology: tpu7x:2x2x1
jax: 0.10.0
libtpu: 0.0.40
codegen_flags: <defaults>
</compile_context>

<pallas_src>
import math
import functools

import jax
import jax.numpy as jnp
from jax import lax
from jax.experimental import pallas as pl
from jax.experimental.pallas import tpu as pltpu


NEG_INF = -1e30            # finite "minus infinity" -> no NaN rows from all-masked softmax
LN_EPS = 1e-5
MXU_DTYPE = jnp.bfloat16   # matmul-operand / weight dtype (jnp.float32 for exact fidelity)


def _tile_config():
    """Pick tile sizes / VMEM budget per TPU generation (v7x has only 64 MiB VMEM)."""
    try:
        vmem = pltpu.get_tpu_info().vmem_capacity_bytes
    except Exception:
        vmem = 64 * 1024 * 1024
    if vmem >= 100 * 1024 * 1024:      # v5e / v6e (128 MiB VMEM)
        return dict(row=512, col=512, ffn=512, q=256, vmem=64 * 1024 * 1024)
    return dict(row=256, col=256, ffn=256, q=128, vmem=32 * 1024 * 1024)   # v7x


TILES = _tile_config()


# ----------------------------------------------------------------------------
# Pallas kernels
# ----------------------------------------------------------------------------

def _matmul_bias_kernel(x_ref, w_ref, b_ref, o_ref):
    # o = x @ w + b   (operands cast to the weight dtype, f32 accumulation)
    o_ref[...] = (jnp.dot(x_ref[...].astype(w_ref.dtype), w_ref[...],
                          preferred_element_type=jnp.float32)
                  + b_ref[...]).astype(o_ref.dtype)


def _ln_matmul_bias_kernel(x_ref, g_ref, bln_ref, w_ref, b_ref, o_ref, xn_ref, *, eps):
    # o = LayerNorm(x) @ w + b ; LN computed once per row tile and cached in scratch.
    @pl.when(pl.program_id(1) == 0)
    def _compute_ln():
        x = x_ref[...].astype(jnp.float32)
        mean = jnp.mean(x, axis=-1, keepdims=True)
        var = jnp.mean(jnp.square(x - mean), axis=-1, keepdims=True)
        xn_ref[...] = (x - mean) * jax.lax.rsqrt(var + eps) * g_ref[...] + bln_ref[...]

    o_ref[...] = (jnp.dot(xn_ref[...].astype(w_ref.dtype), w_ref[...],
                          preferred_element_type=jnp.float32)
                  + b_ref[...]).astype(o_ref.dtype)


def _layernorm_kernel(x_ref, g_ref, b_ref, o_ref, *, eps):
    x = x_ref[...].astype(jnp.float32)
    mean = jnp.mean(x, axis=-1, keepdims=True)
    var = jnp.mean(jnp.square(x - mean), axis=-1, keepdims=True)
    o_ref[...] = ((x - mean) * jax.lax.rsqrt(var + eps) * g_ref[...]
                  + b_ref[...]).astype(o_ref.dtype)


def _ln_geglu_ffn_kernel(x_ref, g_ref, bln_ref, w1v_ref, b1v_ref,
                         w1g_ref, b1g_ref, w2_ref, b2_ref, o_ref,
                         acc_ref, xn_ref, *, eps):
    # out = x + ((LN(x) @ w1v + b1v) * gelu(LN(x) @ w1g + b1g)) @ w2 + b2
    # grid axis 1 tiles the 4H intermediate dimension ("arbitrary" reduction axis).
    j = pl.program_id(1)

    @pl.when(j == 0)
    def _init():
        x = x_ref[...].astype(jnp.float32)
        mean = jnp.mean(x, axis=-1, keepdims=True)
        var = jnp.mean(jnp.square(x - mean), axis=-1, keepdims=True)
        xn_ref[...] = (x - mean) * jax.lax.rsqrt(var + eps) * g_ref[...] + bln_ref[...]
        acc_ref[...] = jnp.zeros_like(acc_ref)

    xn = xn_ref[...].astype(w1v_ref.dtype)
    v = jnp.dot(xn, w1v_ref[...], preferred_element_type=jnp.float32) + b1v_ref[...]
    g = jnp.dot(xn, w1g_ref[...], preferred_element_type=jnp.float32) + b1g_ref[...]
    # tanh-approx GELU runs on the EUP slot (exact erf lowering is not guaranteed on Mosaic)
    hidden = (v * jax.nn.gelu(g, approximate=True)).astype(w2_ref.dtype)
    acc_ref[...] += jnp.dot(hidden, w2_ref[...], preferred_element_type=jnp.float32)

    @pl.when(j == pl.num_programs(1) - 1)
    def _finalize():
        o_ref[...] = (acc_ref[...] + b2_ref[...]
                      + x_ref[...].astype(jnp.float32)).astype(o_ref.dtype)


def _fused_rel_attention_kernel(qpart_ref, kv_ref, rq_ref, rk_ref, qidx_ref, kidx_ref,
                                kpad_ref, res_ref, wo_ref, bo_ref, o_ref, *,
                                num_heads, scale, causal,
                                q_col0, k_col0, v_col0, n_q_buckets, n_k_buckets):
    # Per (batch, q-tile): all heads processed, output projection + residual fused.
    #   qpart: [tq, Cq]  (contains the projected q columns starting at q_col0)
    #   kv   : [Lk, Ckv] (projected k columns at k_col0, v columns at v_col0)
    #   rq/rk: [Nq, H] / [Nk, H] relative-position tables (Q- / K-projected)
    #   qidx / kidx: [tq, Lk] int32 bucket indices (shared across batch & heads)
    #   kpad : [1, Lk] float, 1.0 where the key position is padded
    #   out  : [tq, H] = residual + (concat_h attn_h) @ wo + bo
    tq = qpart_ref.shape[0]
    Lk = kv_ref.shape[0]
    H = wo_ref.shape[1]
    hd = H // num_heads
    mxu = wo_ref.dtype
    dn_nt = (((1,), (1,)), ((), ()))   # A @ B.T
    dn_nn = (((1,), (0,)), ((), ()))   # A @ B

    # ---- head-invariant work, hoisted out of the head loop ----
    mask = jnp.where(kpad_ref[...] > 0.5, NEG_INF, 0.0)               # [1, Lk]
    mask = jnp.broadcast_to(mask, (tq, Lk))
    if causal:
        row = (jax.lax.broadcasted_iota(jnp.int32, (tq, Lk), 0)
               + pl.program_id(1) * tq)
        col = jax.lax.broadcasted_iota(jnp.int32, (tq, Lk), 1)
        mask = mask + jnp.where(col > row, NEG_INF, 0.0)

    qidx = qidx_ref[...]
    kidx = kidx_ref[...]
    k_sel = [kidx == n for n in range(n_k_buckets)]
    q_sel = [qidx == n for n in range(n_q_buckets)]

    # residual + output bias folded into the accumulator init
    acc = res_ref[...].astype(jnp.float32) + bo_ref[...]              # [tq, H]

    for h in range(num_heads):                                        # static unroll
        hsl = slice(h * hd, (h + 1) * hd)
        qh = (qpart_ref[:, q_col0 + h * hd: q_col0 + (h + 1) * hd] * scale).astype(mxu)
        kh = kv_ref[:, k_col0 + h * hd: k_col0 + (h + 1) * hd].astype(mxu)
        rqh = (rq_ref[:, hsl] * scale).astype(mxu)
        rkh = rk_ref[:, hsl].astype(mxu)

        # content-content, content->position table, position->content table (MXU)
        s = lax.dot_general(qh, kh, dn_nt, preferred_element_type=jnp.float32)    # [tq, Lk]
        cp = lax.dot_general(qh, rkh, dn_nt, preferred_element_type=jnp.float32)  # [tq, Nk]
        pcT = lax.dot_general(rqh, kh, dn_nt, preferred_element_type=jnp.float32)  # [Nq, Lk]

        # expand the small bucket tables over the score tile (compares hoisted above)
        for n in range(n_k_buckets):
            s = s + jnp.where(k_sel[n], cp[:, n:n + 1], 0.0)
        for n in range(n_q_buckets):
            s = s + jnp.where(q_sel[n], pcT[n:n + 1, :], 0.0)
        s = s + mask

        m = jnp.max(s, axis=-1, keepdims=True)
        p = jnp.exp(s - m)
        denom = jnp.sum(p, axis=-1, keepdims=True)

        vh = kv_ref[:, v_col0 + h * hd: v_col0 + (h + 1) * hd].astype(mxu)
        out_h = lax.dot_general(p.astype(mxu), vh, dn_nn,
                                preferred_element_type=jnp.float32)                # [tq, hd]
        out_h = out_h / denom                                                      # post-PV norm
        # fused output projection: accumulate this head's slice of wo
        acc = acc + lax.dot_general(out_h.astype(mxu), wo_ref[hsl, :], dn_nn,
                                    preferred_element_type=jnp.float32)

    o_ref[...] = acc.astype(o_ref.dtype)


# ----------------------------------------------------------------------------
# Pallas wrappers (tiled, pipelined)
# ----------------------------------------------------------------------------

def linear(x, w, b):
    """x:[M,K] @ w:[K,N] + b[:N], tiled over (rows, out-cols)."""
    M, K = x.shape
    N = w.shape[1]
    tm = min(M, TILES['row'])
    tn = min(N, TILES['col'])
    grid = (pl.cdiv(M, tm), pl.cdiv(N, tn))
    return pl.pallas_call(
        _matmul_bias_kernel,
        out_shape=jax.ShapeDtypeStruct((M, N), jnp.float32),
        grid=grid,
        in_specs=[pl.BlockSpec((tm, K), lambda i, j: (i, 0)),
                  pl.BlockSpec((K, tn), lambda i, j: (0, j)),
                  pl.BlockSpec((1, tn), lambda i, j: (0, j))],
        out_specs=pl.BlockSpec((tm, tn), lambda i, j: (i, j)),
        compiler_params=pltpu.CompilerParams(
            dimension_semantics=("parallel", "parallel"),
            vmem_limit_bytes=TILES['vmem']),
        cost_estimate=pl.CostEstimate(flops=2 * M * K * N, transcendentals=0,
                                      bytes_accessed=4 * M * K + 2 * K * N + 4 * M * N),
    )(x, w, b.reshape(1, N))


def ln_linear(x, gamma, beta, w, b, eps=LN_EPS):
    """LayerNorm(x) @ w + b; LN fused and cached per row tile (j axis is arbitrary)."""
    M, K = x.shape
    N = w.shape[1]
    tm = min(M, TILES['row'])
    tn = min(N, TILES['col'])
    grid = (pl.cdiv(M, tm), pl.cdiv(N, tn))
    return pl.pallas_call(
        functools.partial(_ln_matmul_bias_kernel, eps=eps),
        out_shape=jax.ShapeDtypeStruct((M, N), jnp.float32),
        grid=grid,
        in_specs=[pl.BlockSpec((tm, K), lambda i, j: (i, 0)),
                  pl.BlockSpec((1, K), lambda i, j: (0, 0)),
                  pl.BlockSpec((1, K), lambda i, j: (0, 0)),
                  pl.BlockSpec((K, tn), lambda i, j: (0, j)),
                  pl.BlockSpec((1, tn), lambda i, j: (0, j))],
        out_specs=pl.BlockSpec((tm, tn), lambda i, j: (i, j)),
        scratch_shapes=[pltpu.VMEM((tm, K), jnp.float32)],
        compiler_params=pltpu.CompilerParams(
            dimension_semantics=("parallel", "arbitrary"),
            vmem_limit_bytes=TILES['vmem']),
        cost_estimate=pl.CostEstimate(flops=2 * M * K * N, transcendentals=0,
                                      bytes_accessed=4 * M * K + 2 * K * N + 4 * M * N),
    )(x, gamma.reshape(1, K), beta.reshape(1, K), w, b.reshape(1, N))


def layer_norm(x3, gamma, beta, eps=LN_EPS):
    B, L, H = x3.shape
    M = B * L
    tm = min(M, TILES['row'])
    out = pl.pallas_call(
        functools.partial(_layernorm_kernel, eps=eps),
        out_shape=jax.ShapeDtypeStruct((M, H), jnp.float32),
        grid=(pl.cdiv(M, tm),),
        in_specs=[pl.BlockSpec((tm, H), lambda i: (i, 0)),
                  pl.BlockSpec((1, H), lambda i: (0, 0)),
                  pl.BlockSpec((1, H), lambda i: (0, 0))],
        out_specs=pl.BlockSpec((tm, H), lambda i: (i, 0)),
        compiler_params=pltpu.CompilerParams(
            dimension_semantics=("parallel",),
            vmem_limit_bytes=TILES['vmem']),
    )(x3.reshape(M, H), gamma.reshape(1, H), beta.reshape(1, H))
    return out.reshape(B, L, H)


def ln_ffn_residual(p, x3, gamma, beta, eps=LN_EPS):
    """x + FFN(LN(x)) with GEGLU; 4H intermediate tiled with a VMEM accumulator."""
    B, L, H = x3.shape
    M = B * L
    H4 = p['w2'].shape[0]
    x2 = x3.reshape(M, H)
    tm = min(M, TILES['row'])
    t4 = TILES['ffn']
    if H4 % t4 != 0:                     # reduction axis must not use padded blocks
        t4 = H4
    t4 = min(t4, H4)
    grid = (pl.cdiv(M, tm), pl.cdiv(H4, t4))
    out = pl.pallas_call(
        functools.partial(_ln_geglu_ffn_kernel, eps=eps),
        out_shape=jax.ShapeDtypeStruct((M, H), jnp.float32),
        grid=grid,
        in_specs=[pl.BlockSpec((tm, H), lambda i, j: (i, 0)),
                  pl.BlockSpec((1, H), lambda i, j: (0, 0)),
                  pl.BlockSpec((1, H), lambda i, j: (0, 0)),
                  pl.BlockSpec((H, t4), lambda i, j: (0, j)),
                  pl.BlockSpec((1, t4), lambda i, j: (0, j)),
                  pl.BlockSpec((H, t4), lambda i, j: (0, j)),
                  pl.BlockSpec((1, t4), lambda i, j: (0, j)),
                  pl.BlockSpec((t4, H), lambda i, j: (j, 0)),
                  pl.BlockSpec((1, H), lambda i, j: (0, 0))],
        out_specs=pl.BlockSpec((tm, H), lambda i, j: (i, 0)),
        scratch_shapes=[pltpu.VMEM((tm, H), jnp.float32),
                        pltpu.VMEM((tm, H), jnp.float32)],
        compiler_params=pltpu.CompilerParams(
            dimension_semantics=("parallel", "arbitrary"),
            vmem_limit_bytes=TILES['vmem']),
        cost_estimate=pl.CostEstimate(
            flops=6 * M * H * H4,
            transcendentals=M * H4,
            bytes_accessed=8 * M * H + 6 * H * H4 + 8 * H4 + 8 * H),
    )(x2, gamma.reshape(1, H), beta.reshape(1, H),
      p['w1v'], p['b1v'].reshape(1, H4), p['w1g'], p['b1g'].reshape(1, H4),
      p['w2'], p['b2'].reshape(1, H))
    return out.reshape(B, L, H)


def fused_rel_attention(qpart3, kv3, rq_tab, rk_tab, q_idx, k_idx, key_pad, residual3,
                        wo, bo, *, num_heads, scale, causal, q_col0, k_col0, v_col0):
    """qpart3:[B,Lq,Cq], kv3:[B,Lk,Ckv], rq_tab:[Nq,H], rk_tab:[Nk,H],
       q_idx/k_idx:[Lq,Lk] int32, key_pad:[B,1,Lk] f32, residual3:[B,Lq,H]
       -> residual + Attn @ wo + bo : [B,Lq,H]."""
    B, Lq, Cq = qpart3.shape
    Lk, Ckv = kv3.shape[1], kv3.shape[2]
    H = wo.shape[1]
    Nq, Nk = rq_tab.shape[0], rk_tab.shape[0]
    tq = min(Lq, TILES['q'])
    grid = (B, pl.cdiv(Lq, tq))
    kern = functools.partial(
        _fused_rel_attention_kernel,
        num_heads=num_heads, scale=scale, causal=causal,
        q_col0=q_col0, k_col0=k_col0, v_col0=v_col0,
        n_q_buckets=Nq, n_k_buckets=Nk)
    cost = pl.CostEstimate(
        flops=(4 * B * Lq * Lk * H + 2 * B * Lq * H * H
               + 2 * B * (Lq * Nk + Nq * Lk) * H),
        transcendentals=B * num_heads * Lq * Lk,
        bytes_accessed=(4 * B * (Lq * Cq + Lk * Ckv + 2 * Lq * H)
                        + 2 * H * H + 8 * Lq * Lk))
    return pl.pallas_call(
        kern,
        out_shape=jax.ShapeDtypeStruct((B, Lq, H), jnp.float32),
        grid=grid,
        in_specs=[
            pl.BlockSpec((None, tq, Cq), lambda b, i: (b, i, 0)),
            pl.BlockSpec((None, Lk, Ckv), lambda b, i: (b, 0, 0)),
            # tables / indices / weights: constant index_map -> stay resident in VMEM
            pl.BlockSpec((Nq, H), lambda b, i: (0, 0)),
            pl.BlockSpec((Nk, H), lambda b, i: (0, 0)),
            pl.BlockSpec((tq, Lk), lambda b, i: (i, 0)),
            pl.BlockSpec((tq, Lk), lambda b, i: (i, 0)),
            pl.BlockSpec((None, 1, Lk), lambda b, i: (b, 0, 0)),
            pl.BlockSpec((None, tq, H), lambda b, i: (b, i, 0)),
            pl.BlockSpec((H, H), lambda b, i: (0, 0)),
            pl.BlockSpec((1, H), lambda b, i: (0, 0)),
        ],
        out_specs=pl.BlockSpec((None, tq, H), lambda b, i: (b, i, 0)),
        compiler_params=pltpu.CompilerParams(
            dimension_semantics=("parallel", "parallel"),
            vmem_limit_bytes=TILES['vmem']),
        cost_estimate=cost,
    )(qpart3, kv3, rq_tab, rk_tab, q_idx, k_idx, key_pad, residual3, wo,
      bo.reshape(1, H))


# ----------------------------------------------------------------------------
# Relative-position bucketing (one-time integer glue, plain JAX)
# ----------------------------------------------------------------------------

def make_log_bucket_position(relative_pos, bucket_size, max_position):
    sign = jnp.sign(relative_pos)
    mid = bucket_size // 2
    abs_pos = jnp.where((relative_pos < mid) & (relative_pos > -mid),
                        mid - 1,
                        jnp.minimum(jnp.abs(relative_pos), max_position - 1))
    # clamp before the log only to keep intermediates finite on the branch the
    # final where discards (result identical to the torch reference).
    safe = jnp.maximum(abs_pos, 1).astype(jnp.float32)
    log_pos = (jnp.ceil(jnp.log(safe / mid)
                        / math.log((max_position - 1) / mid) * (mid - 1))
               .astype(jnp.int32) + mid)
    return jnp.where(abs_pos <= mid, relative_pos, log_pos * sign)


def make_position_indices(q_len, k_len, bucket_size, max_position):
    rel = (jnp.arange(q_len, dtype=jnp.int32)[:, None]
           - jnp.arange(k_len, dtype=jnp.int32)[None, :])
    bucket_pos = make_log_bucket_position(rel, bucket_size, max_position)
    return (bucket_size - 1 + bucket_pos).astype(jnp.int32)       # [Lq, Lk]


# ----------------------------------------------------------------------------
# RelativeMultiHeadAttention / DecoderLayer / Decoder forward (eval mode)
# ----------------------------------------------------------------------------

def relative_mha_self(p, x3, gamma, beta, rel_emb, q_idx, k_idx, key_pad, num_heads):
    """x + SelfAttn(LN(x)); fused LN + [H,3H] QKV, out-proj + residual fused in-kernel."""
    B, L, H = x3.shape
    scale = 1.0 / math.sqrt(H // num_heads)

    qkv = ln_linear(x3.reshape(B * L, H), gamma, beta,
                    p['wqkv'], p['bqkv']).reshape(B, L, 3 * H)

    # tiny relative-table projection: plain XLA (an overhead-dominated pallas_call otherwise)
    rel_proj = (jnp.dot(rel_emb.astype(p['wqkv'].dtype), p['wqkv'],
                        preferred_element_type=jnp.float32) + p['bqkv'])
    rq_tab = rel_proj[:, :H]
    rk_tab = rel_proj[:, H:2 * H]

    return fused_rel_attention(qkv, qkv, rq_tab, rk_tab, q_idx, k_idx, key_pad, x3,
                               p['wo'], p['bo'], num_heads=num_heads, scale=scale,
                               causal=True, q_col0=0, k_col0=H, v_col0=2 * H)


def relative_mha_cross(p, x3, gamma, beta, memory3, q_rel_emb, k_rel_emb,
                       q_idx, k_idx, key_pad, num_heads):
    """x + CrossAttn(LN(x), memory); fused LN+Q, fused [H,2H] KV, fused out-proj/residual."""
    B, Lq, H = x3.shape
    Lk = memory3.shape[1]
    scale = 1.0 / math.sqrt(H // num_heads)

    q3 = ln_linear(x3.reshape(B * Lq, H), gamma, beta,
                   p['wq'], p['bq']).reshape(B, Lq, H)
    kv3 = linear(memory3.reshape(B * Lk, H), p['wkv'], p['bkv']).reshape(B, Lk, 2 * H)

    rq_tab = (jnp.dot(q_rel_emb.astype(p['wq'].dtype), p['wq'],
                      preferred_element_type=jnp.float32) + p['bq'])
    rk_tab = (jnp.dot(k_rel_emb.astype(p['wk'].dtype), p['wk'],
                      preferred_element_type=jnp.float32) + p['bk'])

    return fused_rel_attention(q3, kv3, rq_tab, rk_tab, q_idx, k_idx, key_pad, x3,
                               p['wo'], p['bo'], num_heads=num_heads, scale=scale,
                               causal=False, q_col0=0, k_col0=0, v_col0=H)


def decoder_forward(params, x, x_padding_mask, x_relative_embeddings,
                    memory, memory_padding_mask, memory_relative_embeddings,
                    *, num_heads, output_bucket_size, input_bucket_size,
                    max_sequence_length=1024):
    B, Lq, H = x.shape
    Lk = memory.shape[1]

    # hoisted once (shared by every layer): bucket-index tables + float padding rows
    self_idx = make_position_indices(Lq, Lq, output_bucket_size, max_sequence_length)
    cross_q_idx = make_position_indices(Lq, Lk, output_bucket_size, max_sequence_length)
    cross_k_idx = make_position_indices(Lq, Lk, input_bucket_size, max_sequence_length)

    x_pad = (jnp.zeros((B, 1, Lq), jnp.float32) if x_padding_mask is None
             else x_padding_mask.astype(jnp.float32).reshape(B, 1, Lq))
    mem_pad = (jnp.zeros((B, 1, Lk), jnp.float32) if memory_padding_mask is None
               else memory_padding_mask.astype(jnp.float32).reshape(B, 1, Lk))

    for layer in params['layers']:
        x = relative_mha_self(layer['self_attn'], x, layer['ln1_g'], layer['ln1_b'],
                              x_relative_embeddings, self_idx, self_idx,
                              x_pad, num_heads)
        x = relative_mha_cross(layer['cross_attn'], x, layer['ln2_g'], layer['ln2_b'],
                               memory, x_relative_embeddings,
                               memory_relative_embeddings,
                               cross_q_idx, cross_k_idx, mem_pad, num_heads)
        x = ln_ffn_residual(layer['ffn'], x, layer['ln3_g'], layer['ln3_b'])

    return layer_norm(x, params['out_g'], params['out_b'])


# ----------------------------------------------------------------------------
# Deterministic parameter initialization (shapes / init mirror the module)
# ----------------------------------------------------------------------------

def _trunc_normal(k, shape, std):
    return std * jax.random.truncated_normal(k, -2.0, 2.0, shape, jnp.float32)


def _w(x):
    return x.astype(MXU_DTYPE)


def init_self_attention_params(key, H):
    std = math.sqrt(2.0 / (5.0 * H))
    bound = 1.0 / math.sqrt(H)
    ks = jax.random.split(key, 6)
    wq, wk, wv, wo = (_trunc_normal(ks[i], (H, H), std) for i in range(4))
    bq = jnp.zeros((H,), jnp.float32)                                   # zeroed in torch
    bk = jax.random.uniform(ks[4], (H,), jnp.float32, -bound, bound)    # default nn.Linear
    bv = jax.random.uniform(ks[5], (H,), jnp.float32, -bound, bound)
    return dict(wqkv=_w(jnp.concatenate([wq, wk, wv], axis=1)),
                bqkv=jnp.concatenate([bq, bk, bv]),
                wo=_w(wo), bo=jnp.zeros((H,), jnp.float32))


def init_cross_attention_params(key, H):
    std = math.sqrt(2.0 / (5.0 * H))
    bound = 1.0 / math.sqrt(H)
    ks = jax.random.split(key, 6)
    wq, wk, wv, wo = (_trunc_normal(ks[i], (H, H), std) for i in range(4))
    bk = jax.random.uniform(ks[4], (H,), jnp.float32, -bound, bound)
    bv = jax.random.uniform(ks[5], (H,), jnp.float32, -bound, bound)
    return dict(wq=_w(wq), bq=jnp.zeros((H,), jnp.float32),
                wk=_w(wk), bk=bk,                    # pre-split for rel-table projection
                wkv=_w(jnp.concatenate([wk, wv], axis=1)),
                bkv=jnp.concatenate([bk, bv]),
                wo=_w(wo), bo=jnp.zeros((H,), jnp.float32))


def init_ffn_params(key, H):
    std = math.sqrt(2.0 / (5.0 * H))
    k1, k2, k3 = jax.random.split(key, 3)
    # torch linear_1 is [H, 8H]; chunk(2) -> first half = value, second half = gate.
    return dict(
        w1v=_w(_trunc_normal(k1, (H, 4 * H), std)), b1v=jnp.zeros((4 * H,), jnp.float32),
        w1g=_w(_trunc_normal(k2, (H, 4 * H), std)), b1g=jnp.zeros((4 * H,), jnp.float32),
        w2=_w(_trunc_normal(k3, (4 * H, H), std)), b2=jnp.zeros((H,), jnp.float32),
    )


def init_decoder_params(key, num_layers, H):
    layers = []
    keys = jax.random.split(key, num_layers)
    for li in range(num_layers):
        k_self, k_cross, k_ffn = jax.random.split(keys[li], 3)
        layers.append(dict(
            self_attn=init_self_attention_params(k_self, H),
            ln1_g=jnp.ones((H,), jnp.float32), ln1_b=jnp.zeros((H,), jnp.float32),
            cross_attn=init_cross_attention_params(k_cross, H),
            ln2_g=jnp.ones((H,), jnp.float32), ln2_b=jnp.zeros((H,), jnp.float32),
            ffn=init_ffn_params(k_ffn, H),
            ln3_g=jnp.ones((H,), jnp.float32), ln3_b=jnp.zeros((H,), jnp.float32),
        ))
    return dict(layers=layers,
                out_g=jnp.ones((H,), jnp.float32),
                out_b=jnp.zeros((H,), jnp.float32))


# ----------------------------------------------------------------------------
# Main
# ----------------------------------------------------------------------------

if __name__ == "__main__":
    num_layers = 2
    hidden_size = 32
    num_heads = 4
    output_bucket_size = 4      # decoder-side bucket size
    input_bucket_size = 8       # encoder-memory-side bucket size
    B, Lq, Lk = 2, 8, 12

    key = jax.random.PRNGKey(0)
    k_params, k_x, k_mem, k_xrel, k_mrel = jax.random.split(key, 5)

    params = init_decoder_params(k_params, num_layers, hidden_size)

    x = jax.random.normal(k_x, (B, Lq, hidden_size), jnp.float32)
    memory = jax.random.normal(k_mem, (B, Lk, hidden_size), jnp.float32)
    # relative embedding tables: 2*bucket_size - 1 rows
    x_rel = jax.random.normal(k_xrel, (2 * output_bucket_size - 1, hidden_size),
                              jnp.float32)
    mem_rel = jax.random.normal(k_mrel, (2 * input_bucket_size - 1, hidden_size),
                                jnp.float32)

    # padding masks (True = padded)
    x_pad = jnp.zeros((B, Lq), jnp.bool_).at[1, 6:].set(True)
    mem_pad = jnp.zeros((B, Lk), jnp.bool_).at[0, 10:].set(True)

    fwd = jax.jit(functools.partial(
        decoder_forward,
        num_heads=num_heads,
        output_bucket_size=output_bucket_size,
        input_bucket_size=input_bucket_size))

    out = fwd(params, x, x_pad, x_rel, memory, mem_pad, mem_rel)
    out = jax.block_until_ready(out)
    assert out.shape == (B, Lq, hidden_size)
    assert bool(jnp.all(jnp.isfinite(out)))
    print("KERNEL_OK")
</pallas_src>

<mosaic_0001>
module attributes {stable_mosaic.version = 11 : i64} {
  func.func @_ln_matmul_bias_kernel(%arg0: i32, %arg1: i32, %arg2: memref<16x32xf32, #tpu.memory_space<vmem>>, %arg3: memref<1x32xf32, #tpu.memory_space<vmem>>, %arg4: memref<1x32xf32, #tpu.memory_space<vmem>>, %arg5: memref<32x32xbf16, #tpu.memory_space<vmem>>, %arg6: memref<1x32xf32, #tpu.memory_space<vmem>>, %arg7: memref<16x32xf32, #tpu.memory_space<vmem>>, %arg8: memref<16x32xf32, #tpu.memory_space<vmem>>) attributes {dimension_semantics = [#tpu.dimension_semantics<parallel>, #tpu.dimension_semantics<arbitrary>], iteration_bounds = array<i64: 1, 1>, scalar_prefetch = 0 : i64, scratch_operands = 1 : i64, tpu.core_type = #tpu.core_type<tc>, window_params = [{transform_indices = @transform_0, window_bounds = array<i64: 16, 32>}, {pipeline_mode = #tpu.pipeline_mode<synchronous>, transform_indices = @transform_1, window_bounds = array<i64: 1, 32>}, {pipeline_mode = #tpu.pipeline_mode<synchronous>, transform_indices = @transform_2, window_bounds = array<i64: 1, 32>}, {transform_indices = @transform_3, window_bounds = array<i64: 32, 32>}, {transform_indices = @transform_4, window_bounds = array<i64: 1, 32>}, {transform_indices = @transform_5, window_bounds = array<i64: 16, 32>}]} {
    %c0_i32 = arith.constant 0 : i32
    %0 = arith.cmpi eq, %arg1, %c0_i32 : i32
    %1 = arith.extui %0 : i1 to i32
    %c0_i32_0 = arith.constant 0 : i32
    %2 = arith.cmpi ne, %1, %c0_i32_0 : i32
    scf.if %2 {
      %c0_8 = arith.constant 0 : index
      %c0_9 = arith.constant 0 : index
      %11 = vector.load %arg2[%c0_8, %c0_9] : memref<16x32xf32, #tpu.memory_space<vmem>>, vector<16x32xf32>
      %cst_10 = arith.constant dense<0.000000e+00> : vector<16xf32>
      %12 = vector.multi_reduction <add>, %11, %cst_10 [1] : vector<16x32xf32> to vector<16xf32>
      %13 = vector.shape_cast %12 : vector<16xf32> to vector<16x1xf32>
      %cst_11 = arith.constant 3.200000e+01 : f32
      %14 = vector.broadcast %cst_11 : f32 to vector<16x1xf32>
      %15 = arith.divf %13, %14 : vector<16x1xf32>
      %16 = vector.broadcast %15 : vector<16x1xf32> to vector<16x32xf32>
      %17 = arith.subf %11, %16 : vector<16x32xf32>
      %18 = arith.mulf %17, %17 : vector<16x32xf32>
      %cst_12 = arith.constant dense<0.000000e+00> : vector<16xf32>
      %19 = vector.multi_reduction <add>, %18, %cst_12 [1] : vector<16x32xf32> to vector<16xf32>
      %20 = vector.shape_cast %19 : vector<16xf32> to vector<16x1xf32>
      %cst_13 = arith.constant 3.200000e+01 : f32
      %21 = vector.broadcast %cst_13 : f32 to vector<16x1xf32>
      %22 = arith.divf %20, %21 : vector<16x1xf32>
      %23 = vector.broadcast %15 : vector<16x1xf32> to vector<16x32xf32>
      %24 = arith.subf %11, %23 : vector<16x32xf32>
      %cst_14 = arith.constant 9.99999974E-6 : f32
      %25 = vector.broadcast %cst_14 : f32 to vector<16x1xf32>
      %26 = arith.addf %22, %25 : vector<16x1xf32>
      %27 = math.rsqrt %26 : vector<16x1xf32>
      %28 = vector.broadcast %27 : vector<16x1xf32> to vector<16x32xf32>
      %29 = arith.mulf %24, %28 : vector<16x32xf32>
      %c0_15 = arith.constant 0 : index
      %c0_16 = arith.constant 0 : index
      %30 = vector.load %arg3[%c0_15, %c0_16] : memref<1x32xf32, #tpu.memory_space<vmem>>, vector<1x32xf32>
      %31 = vector.broadcast %30 : vector<1x32xf32> to vector<16x32xf32>
      %32 = arith.mulf %29, %31 : vector<16x32xf32>
      %c0_17 = arith.constant 0 : index
      %c0_18 = arith.constant 0 : index
      %33 = vector.load %arg4[%c0_17, %c0_18] : memref<1x32xf32, #tpu.memory_space<vmem>>, vector<1x32xf32>
      %34 = vector.broadcast %33 : vector<1x32xf32> to vector<16x32xf32>
      %35 = arith.addf %32, %34 : vector<16x32xf32>
      %c0_19 = arith.constant 0 : index
      %c0_20 = arith.constant 0 : index
      %36 = vector.load %arg8[%c0_19, %c0_20] : memref<16x32xf32, #tpu.memory_space<vmem>>, vector<16x32xf32>
      tpu.vector_store %arg8[%c0_19, %c0_20], %35 {strides = array<i32>} : memref<16x32xf32, #tpu.memory_space<vmem>>, vector<16x32xf32>,
    } else {
    }
    %c0 = arith.constant 0 : index
    %c0_1 = arith.constant 0 : index
    %3 = vector.load %arg8[%c0, %c0_1] : memref<16x32xf32, #tpu.memory_space<vmem>>, vector<16x32xf32>
    %4 = arith.truncf %3 : vector<16x32xf32> to vector<16x32xbf16>
    %c0_2 = arith.constant 0 : index
    %c0_3 = arith.constant 0 : index
    %5 = vector.load %arg5[%c0_2, %c0_3] : memref<32x32xbf16, #tpu.memory_space<vmem>>, vector<32x32xbf16>
    %cst = arith.constant dense<0.000000e+00> : vector<16x32xf32>
    %6 = tpu.matmul %4, %5, %cst {dimension_numbers = #tpu.dot_dimension_numbers<[1], [0], [0], [1], [0, 0, 1, 1], [], []>} : vector<16x32xbf16>, vector<32x32xbf16>, vector<16x32xf32> -> vector<16x32xf32>
    %c0_4 = arith.constant 0 : index
    %c0_5 = arith.constant 0 : index
    %7 = vector.load %arg6[%c0_4, %c0_5] : memref<1x32xf32, #tpu.memory_space<vmem>>, vector<1x32xf32>
    %8 = vector.broadcast %7 : vector<1x32xf32> to vector<16x32xf32>
    %9 = arith.addf %6, %8 : vector<16x32xf32>
    %c0_6 = arith.constant 0 : index
    %c0_7 = arith.constant 0 : index
    %10 = vector.load %arg7[%c0_6, %c0_7] : memref<16x32xf32, #tpu.memory_space<vmem>>, vector<16x32xf32>
    tpu.vector_store %arg7[%c0_6, %c0_7], %9 {strides = array<i32>} : memref<16x32xf32, #tpu.memory_space<vmem>>, vector<16x32xf32>,
    return
  }
  func.func @transform_0(%arg0: i32, %arg1: i32) -> (i32, i32) {
    %c0_i32 = arith.constant 0 : i32
    %c0_i32_0 = arith.constant 0 : i32
    return %arg0, %c0_i32 : i32, i32
  }
  func.func @transform_1(%arg0: i32, %arg1: i32) -> (i32, i32) {
    %c0_i32 = arith.constant 0 : i32
    %c0_i32_0 = arith.constant 0 : i32
    %c0_i32_1 = arith.constant 0 : i32
    return %c0_i32, %c0_i32_0 : i32, i32
  }
  func.func @transform_2(%arg0: i32, %arg1: i32) -> (i32, i32) {
    %c0_i32 = arith.constant 0 : i32
    %c0_i32_0 = arith.constant 0 : i32
    %c0_i32_1 = arith.constant 0 : i32
    return %c0_i32, %c0_i32_0 : i32, i32
  }
  func.func @transform_3(%arg0: i32, %arg1: i32) -> (i32, i32) {
    %c0_i32 = arith.constant 0 : i32
    %c0_i32_0 = arith.constant 0 : i32
    return %c0_i32, %arg1 : i32, i32
  }
  func.func @transform_4(%arg0: i32, %arg1: i32) -> (i32, i32) {
    %c0_i32 = arith.constant 0 : i32
    %c0_i32_0 = arith.constant 0 : i32
    return %c0_i32, %arg1 : i32, i32
  }
  func.func @transform_5(%arg0: i32, %arg1: i32) -> (i32, i32) {
    %c0_i32 = arith.constant 0 : i32
    return %arg0, %arg1 : i32, i32
  }
}

module attributes {stable_mosaic.version = 11 : i64} {
  func.func @_ln_matmul_bias_kernel(%arg0: i32, %arg1: i32, %arg2: memref<16x32xf32, #tpu.memory_space<vmem>>, %arg3: memref<1x32xf32, #tpu.memory_space<vmem>>, %arg4: memref<1x32xf32, #tpu.memory_space<vmem>>, %arg5: memref<32x96xbf16, #tpu.memory_space<vmem>>, %arg6: memref<1x96xf32, #tpu.memory_space<vmem>>, %arg7: memref<16x96xf32, #tpu.memory_space<vmem>>, %arg8: memref<16x32xf32, #tpu.memory_space<vmem>>) attributes {dimension_semantics = [#tpu.dimension_semantics<parallel>, #tpu.dimension_semantics<arbitrary>], iteration_bounds = array<i64: 1, 1>, scalar_prefetch = 0 : i64, scratch_operands = 1 : i64, tpu.core_type = #tpu.core_type<tc>, window_params = [{transform_indices = @transform_0, window_bounds = array<i64: 16, 32>}, {pipeline_mode = #tpu.pipeline_mode<synchronous>, transform_indices = @transform_1, window_bounds = array<i64: 1, 32>}, {pipeline_mode = #tpu.pipeline_mode<synchronous>, transform_indices = @transform_2, window_bounds = array<i64: 1, 32>}, {transform_indices = @transform_3, window_bounds = array<i64: 32, 96>}, {transform_indices = @transform_4, window_bounds = array<i64: 1, 96>}, {transform_indices = @transform_5, window_bounds = array<i64: 16, 96>}]} {
    %c0_i32 = arith.constant 0 : i32
    %0 = arith.cmpi eq, %arg1, %c0_i32 : i32
    %1 = arith.extui %0 : i1 to i32
    %c0_i32_0 = arith.constant 0 : i32
    %2 = arith.cmpi ne, %1, %c0_i32_0 : i32
    scf.if %2 {
      %c0_8 = arith.constant 0 : index
      %c0_9 = arith.constant 0 : index
      %11 = vector.load %arg2[%c0_8, %c0_9] : memref<16x32xf32, #tpu.memory_space<vmem>>, vector<16x32xf32>
      %cst_10 = arith.constant dense<0.000000e+00> : vector<16xf32>
      %12 = vector.multi_reduction <add>, %11, %cst_10 [1] : vector<16x32xf32> to vector<16xf32>
      %13 = vector.shape_cast %12 : vector<16xf32> to vector<16x1xf32>
      %cst_11 = arith.constant 3.200000e+01 : f32
      %14 = vector.broadcast %cst_11 : f32 to vector<16x1xf32>
      %15 = arith.divf %13, %14 : vector<16x1xf32>
      %16 = vector.broadcast %15 : vector<16x1xf32> to vector<16x32xf32>
      %17 = arith.subf %11, %16 : vector<16x32xf32>
      %18 = arith.mulf %17, %17 : vector<16x32xf32>
      %cst_12 = arith.constant dense<0.000000e+00> : vector<16xf32>
      %19 = vector.multi_reduction <add>, %18, %cst_12 [1] : vector<16x32xf32> to vector<16xf32>
      %20 = vector.shape_cast %19 : vector<16xf32> to vector<16x1xf32>
      %cst_13 = arith.constant 3.200000e+01 : f32
      %21 = vector.broadcast %cst_13 : f32 to vector<16x1xf32>
      %22 = arith.divf %20, %21 : vector<16x1xf32>
      %23 = vector.broadcast %15 : vector<16x1xf32> to vector<16x32xf32>
      %24 = arith.subf %11, %23 : vector<16x32xf32>
      %cst_14 = arith.constant 9.99999974E-6 : f32
      %25 = vector.broadcast %cst_14 : f32 to vector<16x1xf32>
      %26 = arith.addf %22, %25 : vector<16x1xf32>
      %27 = math.rsqrt %26 : vector<16x1xf32>
      %28 = vector.broadcast %27 : vector<16x1xf32> to vector<16x32xf32>
      %29 = arith.mulf %24, %28 : vector<16x32xf32>
      %c0_15 = arith.constant 0 : index
      %c0_16 = arith.constant 0 : index
      %30 = vector.load %arg3[%c0_15, %c0_16] : memref<1x32xf32, #tpu.memory_space<vmem>>, vector<1x32xf32>
      %31 = vector.broadcast %30 : vector<1x32xf32> to vector<16x32xf32>
      %32 = arith.mulf %29, %31 : vector<16x32xf32>
      %c0_17 = arith.constant 0 : index
      %c0_18 = arith.constant 0 : index
      %33 = vector.load %arg4[%c0_17, %c0_18] : memref<1x32xf32, #tpu.memory_space<vmem>>, vector<1x32xf32>
      %34 = vector.broadcast %33 : vector<1x32xf32> to vector<16x32xf32>
      %35 = arith.addf %32, %34 : vector<16x32xf32>
      %c0_19 = arith.constant 0 : index
      %c0_20 = arith.constant 0 : index
      %36 = vector.load %arg8[%c0_19, %c0_20] : memref<16x32xf32, #tpu.memory_space<vmem>>, vector<16x32xf32>
      tpu.vector_store %arg8[%c0_19, %c0_20], %35 {strides = array<i32>} : memref<16x32xf32, #tpu.memory_space<vmem>>, vector<16x32xf32>,
    } else {
    }
    %c0 = arith.constant 0 : index
    %c0_1 = arith.constant 0 : index
    %3 = vector.load %arg8[%c0, %c0_1] : memref<16x32xf32, #tpu.memory_space<vmem>>, vector<16x32xf32>
    %4 = arith.truncf %3 : vector<16x32xf32> to vector<16x32xbf16>
    %c0_2 = arith.constant 0 : index
    %c0_3 = arith.constant 0 : index
    %5 = vector.load %arg5[%c0_2, %c0_3] : memref<32x96xbf16, #tpu.memory_space<vmem>>, vector<32x96xbf16>
    %cst = arith.constant dense<0.000000e+00> : vector<16x96xf32>
    %6 = tpu.matmul %4, %5, %cst {dimension_numbers = #tpu.dot_dimension_numbers<[1], [0], [0], [1], [0, 0, 1, 1], [], []>} : vector<16x32xbf16>, vector<32x96xbf16>, vector<16x96xf32> -> vector<16x96xf32>
    %c0_4 = arith.constant 0 : index
    %c0_5 = arith.constant 0 : index
    %7 = vector.load %arg6[%c0_4, %c0_5] : memref<1x96xf32, #tpu.memory_space<vmem>>, vector<1x96xf32>
    %8 = vector.broadcast %7 : vector<1x96xf32> to vector<16x96xf32>
    %9 = arith.addf %6, %8 : vector<16x96xf32>
    %c0_6 = arith.constant 0 : index
    %c0_7 = arith.constant 0 : index
    %10 = vector.load %arg7[%c0_6, %c0_7] : memref<16x96xf32, #tpu.memory_space<vmem>>, vector<16x96xf32>
    tpu.vector_store %arg7[%c0_6, %c0_7], %9 {strides = array<i32>} : memref<16x96xf32, #tpu.memory_space<vmem>>, vector<16x96xf32>,
    return
  }
  func.func @transform_0(%arg0: i32, %arg1: i32) -> (i32, i32) {
    %c0_i32 = arith.constant 0 : i32
    %c0_i32_0 = arith.constant 0 : i32
    return %arg0, %c0_i32 : i32, i32
  }
  func.func @transform_1(%arg0: i32, %arg1: i32) -> (i32, i32) {
    %c0_i32 = arith.constant 0 : i32
    %c0_i32_0 = arith.constant 0 : i32
    %c0_i32_1 = arith.constant 0 : i32
    return %c0_i32, %c0_i32_0 : i32, i32
  }
  func.func @transform_2(%arg0: i32, %arg1: i32) -> (i32, i32) {
    %c0_i32 = arith.constant 0 : i32
    %c0_i32_0 = arith.constant 0 : i32
    %c0_i32_1 = arith.constant 0 : i32
    return %c0_i32, %c0_i32_0 : i32, i32
  }
  func.func @transform_3(%arg0: i32, %arg1: i32) -> (i32, i32) {
    %c0_i32 = arith.constant 0 : i32
    %c0_i32_0 = arith.constant 0 : i32
    return %c0_i32, %arg1 : i32, i32
  }
  func.func @transform_4(%arg0: i32, %arg1: i32) -> (i32, i32) {
    %c0_i32 = arith.constant 0 : i32
    %c0_i32_0 = arith.constant 0 : i32
    return %c0_i32, %arg1 : i32, i32
  }
  func.func @transform_5(%arg0: i32, %arg1: i32) -> (i32, i32) {
    %c0_i32 = arith.constant 0 : i32
    return %arg0, %arg1 : i32, i32
  }
}

module attributes {stable_mosaic.version = 11 : i64} {
  func.func @_fused_rel_attention_kernel(%arg0: i32, %arg1: i32, %arg2: memref<1x8x96xf32, #tpu.memory_space<vmem>>, %arg3: memref<1x8x96xf32, #tpu.memory_space<vmem>>, %arg4: memref<7x32xf32, #tpu.memory_space<vmem>>, %arg5: memref<7x32xf32, #tpu.memory_space<vmem>>, %arg6: memref<8x8xi32, #tpu.memory_space<vmem>>, %arg7: memref<8x8xi32, #tpu.memory_space<vmem>>, %arg8: memref<1x1x8xf32, #tpu.memory_space<vmem>>, %arg9: memref<1x8x32xf32, #tpu.memory_space<vmem>>, %arg10: memref<32x32xbf16, #tpu.memory_space<vmem>>, %arg11: memref<1x32xf32, #tpu.memory_space<vmem>>, %arg12: memref<1x8x32xf32, #tpu.memory_space<vmem>>) attributes {dimension_semantics = [#tpu.dimension_semantics<parallel>, #tpu.dimension_semantics<parallel>], iteration_bounds = array<i64: 2, 1>, scalar_prefetch = 0 : i64, scratch_operands = 0 : i64, tpu.core_type = #tpu.core_type<tc>, window_params = [{transform_indices = @transform_0, window_bounds = array<i64: 1, 8, 96>}, {transform_indices = @transform_1, window_bounds = array<i64: 1, 8, 96>}, {pipeline_mode = #tpu.pipeline_mode<synchronous>, transform_indices = @transform_2, window_bounds = array<i64: 7, 32>}, {pipeline_mode = #tpu.pipeline_mode<synchronous>, transform_indices = @transform_3, window_bounds = array<i64: 7, 32>}, {transform_indices = @transform_4, window_bounds = array<i64: 8, 8>}, {transform_indices = @transform_5, window_bounds = array<i64: 8, 8>}, {transform_indices = @transform_6, window_bounds = array<i64: 1, 1, 8>}, {transform_indices = @transform_7, window_bounds = array<i64: 1, 8, 32>}, {pipeline_mode = #tpu.pipeline_mode<synchronous>, transform_indices = @transform_8, window_bounds = array<i64: 32, 32>}, {pipeline_mode = #tpu.pipeline_mode<synchronous>, transform_indices = @transform_9, window_bounds = array<i64: 1, 32>}, {transform_indices = @transform_10, window_bounds = array<i64: 1, 8, 32>}]} {
    %c0 = arith.constant 0 : index
    %c0_0 = arith.constant 0 : index
    %c0_1 = arith.constant 0 : index
    %0 = vector.load %arg8[%c0, %c0_0, %c0_1] : memref<1x1x8xf32, #tpu.memory_space<vmem>>, vector<1x1x8xf32>
    %1 = vector.shape_cast %0 : vector<1x1x8xf32> to vector<1x8xf32>
    %cst = arith.constant 5.000000e-01 : f32
    %2 = vector.broadcast %cst : f32 to vector<1x8xf32>
    %3 = arith.cmpf ogt, %1, %2 : vector<1x8xf32>
    %cst_2 = arith.constant -1.000000e+30 : f32
    %cst_3 = arith.constant 0.000000e+00 : f32
    %4 = vector.broadcast %cst_2 : f32 to vector<1x8xf32>
    %5 = vector.broadcast %cst_3 : f32 to vector<1x8xf32>
    %6 = arith.select %3, %4, %5 : vector<1x8xi1>, vector<1x8xf32>
    %7 = vector.shape_cast %6 : vector<1x8xf32> to vector<1x8xf32>
    %8 = vector.broadcast %7 : vector<1x8xf32> to vector<8x8xf32>
    %9 = tpu.iota {dimensions = array<i32: 0>} : vector<8x8xi32>
    %c8_i32 = arith.constant 8 : i32
    %10 = arith.muli %arg1, %c8_i32 : i32
    %11 = vector.broadcast %10 : i32 to vector<8x8xi32>
    %12 = arith.addi %9, %11 : vector<8x8xi32>
    %13 = tpu.iota {dimensions = array<i32: 1>} : vector<8x8xi32>
    %14 = arith.cmpi sgt, %13, %12 : vector<8x8xi32>
    %cst_4 = arith.constant -1.000000e+30 : f32
    %cst_5 = arith.constant 0.000000e+00 : f32
    %15 = vector.broadcast %cst_4 : f32 to vector<8x8xf32>
    %16 = vector.broadcast %cst_5 : f32 to vector<8x8xf32>
    %17 = arith.select %14, %15, %16 : vector<8x8xi1>, vector<8x8xf32>
    %18 = arith.addf %8, %17 : vector<8x8xf32>
    %c0_6 = arith.constant 0 : index
    %c0_7 = arith.constant 0 : index
    %19 = vector.load %arg6[%c0_6, %c0_7] : memref<8x8xi32, #tpu.memory_space<vmem>>, vector<8x8xi32>
    %c0_8 = arith.constant 0 : index
    %c0_9 = arith.constant 0 : index
    %20 = vector.load %arg7[%c0_8, %c0_9] : memref<8x8xi32, #tpu.memory_space<vmem>>, vector<8x8xi32>
    %c0_i32 = arith.constant 0 : i32
    %21 = vector.broadcast %c0_i32 : i32 to vector<8x8xi32>
    %22 = arith.cmpi eq, %20, %21 : vector<8x8xi32>
    %c1_i32 = arith.constant 1 : i32
    %23 = vector.broadcast %c1_i32 : i32 to vector<8x8xi32>
    %24 = arith.cmpi eq, %20, %23 : vector<8x8xi32>
    %c2_i32 = arith.constant 2 : i32
    %25 = vector.broadcast %c2_i32 : i32 to vector<8x8xi32>
    %26 = arith.cmpi eq, %20, %25 : vector<8x8xi32>
    %c3_i32 = arith.constant 3 : i32
    %27 = vector.broadcast %c3_i32 : i32 to vector<8x8xi32>
    %28 = arith.cmpi eq, %20, %27 : vector<8x8xi32>
    %c4_i32 = arith.constant 4 : i32
    %29 = vector.broadcast %c4_i32 : i32 to vector<8x8xi32>
    %30 = arith.cmpi eq, %20, %29 : vector<8x8xi32>
    %c5_i32 = arith.constant 5 : i32
    %31 = vector.broadcast %c5_i32 : i32 to vector<8x8xi32>
    %32 = arith.cmpi eq, %20, %31 : vector<8x8xi32>
    %c6_i32 = arith.constant 6 : i32
    %33 = vector.broadcast %c6_i32 : i32 to vector<8x8xi32>
    %34 = arith.cmpi eq, %20, %33 : vector<8x8xi32>
    %c0_i32_10 = arith.constant 0 : i32
    %35 = vector.broadcast %c0_i32_10 : i32 to vector<8x8xi32>
    %36 = arith.cmpi eq, %19, %35 : vector<8x8xi32>
    %c1_i32_11 = arith.constant 1 : i32
    %37 = vector.broadcast %c1_i32_11 : i32 to vector<8x8xi32>
    %38 = arith.cmpi eq, %19, %37 : vector<8x8xi32>
    %c2_i32_12 = arith.constant 2 : i32
    %39 = vector.broadcast %c2_i32_12 : i32 to vector<8x8xi32>
    %40 = arith.cmpi eq, %19, %39 : vector<8x8xi32>
    %c3_i32_13 = arith.constant 3 : i32
    %41 = vector.broadcast %c3_i32_13 : i32 to vector<8x8xi32>
    %42 = arith.cmpi eq, %19, %41 : vector<8x8xi32>
    %c4_i32_14 = arith.constant 4 : i32
    %43 = vector.broadcast %c4_i32_14 : i32 to vector<8x8xi32>
    %44 = arith.cmpi eq, %19, %43 : vector<8x8xi32>
    %c5_i32_15 = arith.constant 5 : i32
    %45 = vector.broadcast %c5_i32_15 : i32 to vector<8x8xi32>
    %46 = arith.cmpi eq, %19, %45 : vector<8x8xi32>
    %c6_i32_16 = arith.constant 6 : i32
    %47 = vector.broadcast %c6_i32_16 : i32 to vector<8x8xi32>
    %48 = arith.cmpi eq, %19, %47 : vector<8x8xi32>
    %c0_17 = arith.constant 0 : index
    %c0_18 = arith.constant 0 : index
    %c0_19 = arith.constant 0 : index
    %49 = vector.load %arg9[%c0_17, %c0_18, %c0_19] : memref<1x8x32xf32, #tpu.memory_space<vmem>>, vector<1x8x32xf32>
    %50 = vector.shape_cast %49 : vector<1x8x32xf32> to vector<8x32xf32>
    %c0_20 = arith.constant 0 : index
    %c0_21 = arith.constant 0 : index
    %51 = vector.load %arg11[%c0_20, %c0_21] : memref<1x32xf32, #tpu.memory_space<vmem>>, vector<1x32xf32>
    %52 = vector.broadcast %51 : vector<1x32xf32> to vector<8x32xf32>
    %53 = arith.addf %50, %52 : vector<8x32xf32>
    %c0_22 = arith.constant 0 : index
    %c0_23 = arith.constant 0 : index
    %c0_24 = arith.constant 0 : index
    %54 = vector.load %arg2[%c0_22, %c0_23, %c0_24] : memref<1x8x96xf32, #tpu.memory_space<vmem>>, vector<1x8x8xf32>
    %55 = vector.shape_cast %54 : vector<1x8x8xf32> to vector<8x8xf32>
    %cst_25 = arith.constant 0.353553385 : f32
    %56 = vector.broadcast %cst_25 : f32 to vector<8x8xf32>
    %57 = arith.mulf %55, %56 : vector<8x8xf32>
    %58 = arith.truncf %57 : vector<8x8xf32> to vector<8x8xbf16>
    %c0_26 = arith.constant 0 : index
    %c0_27 = arith.constant 0 : index
    %c32 = arith.constant 32 : index
    %59 = vector.load %arg3[%c0_26, %c0_27, %c32] : memref<1x8x96xf32, #tpu.memory_space<vmem>>, vector<1x8x8xf32>
    %60 = vector.shape_cast %59 : vector<1x8x8xf32> to vector<8x8xf32>
    %61 = arith.truncf %60 : vector<8x8xf32> to vector<8x8xbf16>
    %c0_28 = arith.constant 0 : index
    %c0_29 = arith.constant 0 : index
    %62 = vector.load %arg4[%c0_28, %c0_29] : memref<7x32xf32, #tpu.memory_space<vmem>>, vector<7x8xf32>
    %cst_30 = arith.constant 0.353553385 : f32
    %63 = vector.broadcast %cst_30 : f32 to vector<7x8xf32>
    %64 = arith.mulf %62, %63 : vector<7x8xf32>
    %65 = arith.truncf %64 : vector<7x8xf32> to vector<7x8xbf16>
    %c0_31 = arith.constant 0 : index
    %c0_32 = arith.constant 0 : index
    %66 = vector.load %arg5[%c0_31, %c0_32] : memref<7x32xf32, #tpu.memory_space<vmem>>, vector<7x8xf32>
    %67 = arith.truncf %66 : vector<7x8xf32> to vector<7x8xbf16>
    %cst_33 = arith.constant dense<0.000000e+00> : vector<8x8xf32>
    %68 = tpu.matmul %58, %61, %cst_33 {dimension_numbers = #tpu.dot_dimension_numbers<[1], [1], [0], [0], [0, 0, 1, 0], [], []>} : vector<8x8xbf16>, vector<8x8xbf16>, vector<8x8xf32> -> vector<8x8xf32>
    %cst_34 = arith.constant dense<0.000000e+00> : vector<8x7xf32>
    %69 = tpu.matmul %58, %67, %cst_34 {dimension_numbers = #tpu.dot_dimension_numbers<[1], [1], [0], [0], [0, 0, 1, 0], [], []>} : vector<8x8xbf16>, vector<7x8xbf16>, vector<8x7xf32> -> vector<8x7xf32>
    %cst_35 = arith.constant dense<0.000000e+00> : vector<7x8xf32>
    %70 = tpu.matmul %65, %61, %cst_35 {dimension_numbers = #tpu.dot_dimension_numbers<[1], [1], [0], [0], [0, 0, 1, 0], [], []>} : vector<7x8xbf16>, vector<8x8xbf16>, vector<7x8xf32> -> vector<7x8xf32>
    %71 = vector.extract_strided_slice %69 {offsets = [0, 0], sizes = [8, 1], strides = [1, 1]} : vector<8x7xf32> to vector<8x1xf32>
    %cst_36 = arith.constant 0.000000e+00 : f32
    %72 = vector.shape_cast %71 : vector<8x1xf32> to vector<8x1xf32>
    %73 = vector.broadcast %72 : vector<8x1xf32> to vector<8x8xf32>
    %74 = vector.broadcast %cst_36 : f32 to vector<8x8xf32>
    %75 = arith.select %22, %73, %74 : vector<8x8xi1>, vector<8x8xf32>
    %76 = arith.addf %68, %75 : vector<8x8xf32>
    %77 = vector.extract_strided_slice %69 {offsets = [0, 1], sizes = [8, 1], strides = [1, 1]} : vector<8x7xf32> to vector<8x1xf32>
    %cst_37 = arith.constant 0.000000e+00 : f32
    %78 = vector.shape_cast %77 : vector<8x1xf32> to vector<8x1xf32>
    %79 = vector.broadcast %78 : vector<8x1xf32> to vector<8x8xf32>
    %80 = vector.broadcast %cst_37 : f32 to vector<8x8xf32>
    %81 = arith.select %24, %79, %80 : vector<8x8xi1>, vector<8x8xf32>
    %82 = arith.addf %76, %81 : vector<8x8xf32>
    %83 = vector.extract_strided_slice %69 {offsets = [0, 2], sizes = [8, 1], strides = [1, 1]} : vector<8x7xf32> to vector<8x1xf32>
    %cst_38 = arith.constant 0.000000e+00 : f32
    %84 = vector.shape_cast %83 : vector<8x1xf32> to vector<8x1xf32>
    %85 = vector.broadcast %84 : vector<8x1xf32> to vector<8x8xf32>
    %86 = vector.broadcast %cst_38 : f32 to vector<8x8xf32>
    %87 = arith.select %26, %85, %86 : vector<8x8xi1>, vector<8x8xf32>
    %88 = arith.addf %82, %87 : vector<8x8xf32>
    %89 = vector.extract_strided_slice %69 {offsets = [0, 3], sizes = [8, 1], strides = [1, 1]} : vector<8x7xf32> to vector<8x1xf32>
    %cst_39 = arith.constant 0.000000e+00 : f32
    %90 = vector.shape_cast %89 : vector<8x1xf32> to vector<8x1xf32>
    %91 = vector.broadcast %90 : vector<8x1xf32> to vector<8x8xf32>
    %92 = vector.broadcast %cst_39 : f32 to vector<8x8xf32>
    %93 = arith.select %28, %91, %92 : vector<8x8xi1>, vector<8x8xf32>
    %94 = arith.addf %88, %93 : vector<8x8xf32>
    %95 = vector.extract_strided_slice %69 {offsets = [0, 4], sizes = [8, 1], strides = [1, 1]} : vector<8x7xf32> to vector<8x1xf32>
    %cst_40 = arith.constant 0.000000e+00 : f32
    %96 = vector.shape_cast %95 : vector<8x1xf32> to vector<8x1xf32>
    %97 = vector.broadcast %96 : vector<8x1xf32> to vector<8x8xf32>
    %98 = vector.broadcast %cst_40 : f32 to vector<8x8xf32>
    %99 = arith.select %30, %97, %98 : vector<8x8xi1>, vector<8x8xf32>
    %100 = arith.addf %94, %99 : vector<8x8xf32>
    %101 = vector.extract_strided_slice %69 {offsets = [0, 5], sizes = [8, 1], strides = [1, 1]} : vector<8x7xf32> to vector<8x1xf32>
    %cst_41 = arith.constant 0.000000e+00 : f32
    %102 = vector.shape_cast %101 : vector<8x1xf32> to vector<8x1xf32>
    %103 = vector.broadcast %102 : vector<8x1xf32> to vector<8x8xf32>
    %104 = vector.broadcast %cst_41 : f32 to vector<8x8xf32>
    %105 = arith.select %32, %103, %104 : vector<8x8xi1>, vector<8x8xf32>
    %106 = arith.addf %100, %105 : vector<8x8xf32>
    %107 = vector.extract_strided_slice %69 {offsets = [0, 6], sizes = [8, 1], strides = [1, 1]} : vector<8x7xf32> to vector<8x1xf32>
    %cst_42 = arith.constant 0.000000e+00 : f32
    %108 = vector.shape_cast %107 : vector<8x1xf32> to vector<8x1xf32>
    %109 = vector.broadcast %108 : vector<8x1xf32> to vector<8x8xf32>
    %110 = vector.broadcast %cst_42 : f32 to vector<8x8xf32>
    %111 = arith.select %34, %109, %110 : vector<8x8xi1>, vector<8x8xf32>
    %112 = arith.addf %106, %111 : vector<8x8xf32>
    %113 = vector.extract_strided_slice %70 {offsets = [0, 0], sizes = [1, 8], strides = [1, 1]} : vector<7x8xf32> to vector<1x8xf32>
    %cst_43 = arith.constant 0.000000e+00 : f32
    %114 = vector.shape_cast %113 : vector<1x8xf32> to vector<1x8xf32>
    %115 = vector.broadcast %114 : vector<1x8xf32> to vector<8x8xf32>
    %116 = vector.broadcast %cst_43 : f32 to vector<8x8xf32>
    %117 = arith.select %36, %115, %116 : vector<8x8xi1>, vector<8x8xf32>
    %118 = arith.addf %112, %117 : vector<8x8xf32>
    %119 = vector.extract_strided_slice %70 {offsets = [1, 0], sizes = [1, 8], strides = [1, 1]} : vector<7x8xf32> to vector<1x8xf32>
    %cst_44 = arith.constant 0.000000e+00 : f32
    %120 = vector.shape_cast %119 : vector<1x8xf32> to vector<1x8xf32>
    %121 = vector.broadcast %120 : vector<1x8xf32> to vector<8x8xf32>
    %122 = vector.broadcast %cst_44 : f32 to vector<8x8xf32>
    %123 = arith.select %38, %121, %122 : vector<8x8xi1>, vector<8x8xf32>
    %124 = arith.addf %118, %123 : vector<8x8xf32>
    %125 = vector.extract_strided_slice %70 {offsets = [2, 0], sizes = [1, 8], strides = [1, 1]} : vector<7x8xf32> to vector<1x8xf32>
    %cst_45 = arith.constant 0.000000e+00 : f32
    %126 = vector.shape_cast %125 : vector<1x8xf32> to vector<1x8xf32>
    %127 = vector.broadcast %126 : vector<1x8xf32> to vector<8x8xf32>
    %128 = vector.broadcast %cst_45 : f32 to vector<8x8xf32>
    %129 = arith.select %40, %127, %128 : vector<8x8xi1>, vector<8x8xf32>
    %130 = arith.addf %124, %129 : vector<8x8xf32>
    %131 = vector.extract_strided_slice %70 {offsets = [3, 0], sizes = [1, 8], strides = [1, 1]} : vector<7x8xf32> to vector<1x8xf32>
    %cst_46 = arith.constant 0.000000e+00 : f32
    %132 = vector.shape_cast %131 : vector<1x8xf32> to vector<1x8xf32>
    %133 = vector.broadcast %132 : vector<1x8xf32> to vector<8x8xf32>
    %134 = vector.broadcast %cst_46 : f32 to vector<8x8xf32>
    %135 = arith.select %42, %133, %134 : vector<8x8xi1>, vector<8x8xf32>
    %136 = arith.addf %130, %135 : vector<8x8xf32>
    %137 = vector.extract_strided_slice %70 {offsets = [4, 0], sizes = [1, 8], strides = [1, 1]} : vector<7x8xf32> to vector<1x8xf32>
    %cst_47 = arith.constant 0.000000e+00 : f32
    %138 = vector.shape_cast %137 : vector<1x8xf32> to vector<1x8xf32>
    %139 = vector.broadcast %138 : vector<1x8xf32> to vector<8x8xf32>
    %140 = vector.broadcast %cst_47 : f32 to vector<8x8xf32>
    %141 = arith.select %44, %139, %140 : vector<8x8xi1>, vector<8x8xf32>
    %142 = arith.addf %136, %141 : vector<8x8xf32>
    %143 = vector.extract_strided_slice %70 {offsets = [5, 0], sizes = [1, 8], strides = [1, 1]} : vector<7x8xf32> to vector<1x8xf32>
    %cst_48 = arith.constant 0.000000e+00 : f32
    %144 = vector.shape_cast %143 : vector<1x8xf32> to vector<1x8xf32>
    %145 = vector.broadcast %144 : vector<1x8xf32> to vector<8x8xf32>
    %146 = vector.broadcast %cst_48 : f32 to vector<8x8xf32>
    %147 = arith.select %46, %145, %146 : vector<8x8xi1>, vector<8x8xf32>
    %148 = arith.addf %142, %147 : vector<8x8xf32>
    %149 = vector.extract_strided_slice %70 {offsets = [6, 0], sizes = [1, 8], strides = [1, 1]} : vector<7x8xf32> to vector<1x8xf32>
    %cst_49 = arith.constant 0.000000e+00 : f32
    %150 = vector.shape_cast %149 : vector<1x8xf32> to vector<1x8xf32>
    %151 = vector.broadcast %150 : vector<1x8xf32> to vector<8x8xf32>
    %152 = vector.broadcast %cst_49 : f32 to vector<8x8xf32>
    %153 = arith.select %48, %151, %152 : vector<8x8xi1>, vector<8x8xf32>
    %154 = arith.addf %148, %153 : vector<8x8xf32>
    %155 = arith.addf %154, %18 : vector<8x8xf32>
    %cst_50 = arith.constant dense<0xFF800000> : vector<8xf32>
    %156 = vector.multi_reduction <maximumf>, %155, %cst_50 [1] : vector<8x8xf32> to vector<8xf32>
    %157 = vector.shape_cast %156 : vector<8xf32> to vector<8x1xf32>
    %158 = vector.broadcast %157 : vector<8x1xf32> to vector<8x8xf32>
    %159 = arith.subf %155, %158 : vector<8x8xf32>
    %160 = math.exp %159 : vector<8x8xf32>
    %cst_51 = arith.constant dense<0.000000e+00> : vector<8xf32>
    %161 = vector.multi_reduction <add>, %160, %cst_51 [1] : vector<8x8xf32> to vector<8xf32>
    %162 = vector.shape_cast %161 : vector<8xf32> to vector<8x1xf32>
    %c0_52 = arith.constant 0 : index
    %c0_53 = arith.constant 0 : index
    %c64 = arith.constant 64 : index
    %163 = vector.load %arg3[%c0_52, %c0_53, %c64] : memref<1x8x96xf32, #tpu.memory_space<vmem>>, vector<1x8x8xf32>
    %164 = vector.shape_cast %163 : vector<1x8x8xf32> to vector<8x8xf32>
    %165 = arith.truncf %164 : vector<8x8xf32> to vector<8x8xbf16>
    %166 = arith.truncf %160 : vector<8x8xf32> to vector<8x8xbf16>
    %cst_54 = arith.constant dense<0.000000e+00> : vector<8x8xf32>
    %167 = tpu.matmul %166, %165, %cst_54 {dimension_numbers = #tpu.dot_dimension_numbers<[1], [0], [0], [1], [0, 0, 1, 1], [], []>} : vector<8x8xbf16>, vector<8x8xbf16>, vector<8x8xf32> -> vector<8x8xf32>
    %168 = vector.broadcast %162 : vector<8x1xf32> to vector<8x8xf32>
    %169 = arith.divf %167, %168 : vector<8x8xf32>
    %170 = arith.truncf %169 : vector<8x8xf32> to vector<8x8xbf16>
    %c0_55 = arith.constant 0 : index
    %c0_56 = arith.constant 0 : index
    %171 = vector.load %arg10[%c0_55, %c0_56] : memref<32x32xbf16, #tpu.memory_space<vmem>>, vector<8x32xbf16>
    %cst_57 = arith.constant dense<0.000000e+00> : vector<8x32xf32>
    %172 = tpu.matmul %170, %171, %cst_57 {dimension_numbers = #tpu.dot_dimension_numbers<[1], [0], [0], [1], [0, 0, 1, 1], [], []>} : vector<8x8xbf16>, vector<8x32xbf16>, vector<8x32xf32> -> vector<8x32xf32>
    %173 = arith.addf %53, %172 : vector<8x32xf32>
    %c0_58 = arith.constant 0 : index
    %c0_59 = arith.constant 0 : index
    %c8 = arith.constant 8 : index
    %174 = vector.load %arg2[%c0_58, %c0_59, %c8] : memref<1x8x96xf32, #tpu.memory_space<vmem>>, vector<1x8x8xf32>
    %175 = vector.shape_cast %174 : vector<1x8x8xf32> to vector<8x8xf32>
    %cst_60 = arith.constant 0.353553385 : f32
    %176 = vector.broadcast %cst_60 : f32 to vector<8x8xf32>
    %177 = arith.mulf %175, %176 : vector<8x8xf32>
    %178 = arith.truncf %177 : vector<8x8xf32> to vector<8x8xbf16>
    %c0_61 = arith.constant 0 : index
    %c0_62 = arith.constant 0 : index
    %c40 = arith.constant 40 : index
    %179 = vector.load %arg3[%c0_61, %c0_62, %c40] : memref<1x8x96xf32, #tpu.memory_space<vmem>>, vector<1x8x8xf32>
    %180 = vector.shape_cast %179 : vector<1x8x8xf32> to vector<8x8xf32>
    %181 = arith.truncf %180 : vector<8x8xf32> to vector<8x8xbf16>
    %c0_63 = arith.constant 0 : index
    %c8_64 = arith.constant 8 : index
    %182 = vector.load %arg4[%c0_63, %c8_64] : memref<7x32xf32, #tpu.memory_space<vmem>>, vector<7x8xf32>
    %cst_65 = arith.constant 0.353553385 : f32
    %183 = vector.broadcast %cst_65 : f32 to vector<7x8xf32>
    %184 = arith.mulf %182, %183 : vector<7x8xf32>
    %185 = arith.truncf %184 : vector<7x8xf32> to vector<7x8xbf16>
    %c0_66 = arith.constant 0 : index
    %c8_67 = arith.constant 8 : index
    %186 = vector.load %arg5[%c0_66, %c8_67] : memref<7x32xf32, #tpu.memory_space<vmem>>, vector<7x8xf32>
    %187 = arith.truncf %186 : vector<7x8xf32> to vector<7x8xbf16>
    %cst_68 = arith.constant dense<0.000000e+00> : vector<8x8xf32>
    %188 = tpu.matmul %178, %181, %cst_68 {dimension_numbers = #tpu.dot_dimension_numbers<[1], [1], [0], [0], [0, 0, 1, 0], [], []>} : vector<8x8xbf16>, vector<8x8xbf16>, vector<8x8xf32> -> vector<8x8xf32>
    %cst_69 = arith.constant dense<0.000000e+00> : vector<8x7xf32>
    %189 = tpu.matmul %178, %187, %cst_69 {dimension_numbers = #tpu.dot_dimension_numbers<[1], [1], [0], [0], [0, 0, 1, 0], [], []>} : vector<8x8xbf16>, vector<7x8xbf16>, vector<8x7xf32> -> vector<8x7xf32>
    %cst_70 = arith.constant dense<0.000000e+00> : vector<7x8xf32>
    %190 = tpu.matmul %185, %181, %cst_70 {dimension_numbers = #tpu.dot_dimension_numbers<[1], [1], [0], [0], [0, 0, 1, 0], [], []>} : vector<7x8xbf16>, vector<8x8xbf16>, vector<7x8xf32> -> vector<7x8xf32>
    %191 = vector.extract_strided_slice %189 {offsets = [0, 0], sizes = [8, 1], strides = [1, 1]} : vector<8x7xf32> to vector<8x1xf32>
    %cst_71 = arith.constant 0.000000e+00 : f32
    %192 = vector.shape_cast %191 : vector<8x1xf32> to vector<8x1xf32>
    %193 = vector.broadcast %192 : vector<8x1xf32> to vector<8x8xf32>
    %194 = vector.broadcast %cst_71 : f32 to vector<8x8xf32>
    %195 = arith.select %22, %193, %194 : vector<8x8xi1>, vector<8x8xf32>
    %196 = arith.addf %188, %195 : vector<8x8xf32>
    %197 = vector.extract_strided_slice %189 {offsets = [0, 1], sizes = [8, 1], strides = [1, 1]} : vector<8x7xf32> to vector<8x1xf32>
    %cst_72 = arith.constant 0.000000e+00 : f32
    %198 = vector.shape_cast %197 : vector<8x1xf32> to vector<8x1xf32>
    %199 = vector.broadcast %198 : vector<8x1xf32> to vector<8x8xf32>
    %200 = vector.broadcast %cst_72 : f32 to vector<8x8xf32>
    %201 = arith.select %24, %199, %200 : vector<8x8xi1>, vector<8x8xf32>
    %202 = arith.addf %196, %201 : vector<8x8xf32>
    %203 = vector.extract_strided_slice %189 {offsets = [0, 2], sizes = [8, 1], strides = [1, 1]} : vector<8x7xf32> to vector<8x1xf32>
    %cst_73 = arith.constant 0.000000e+00 : f32
    %204 = vector.shape_cast %203 : vector<8x1xf32> to vector<8x1xf32>
    %205 = vector.broadcast %204 : vector<8x1xf32> to vector<8x8xf32>
    %206 = vector.broadcast %cst_73 : f32 to vector<8x8xf32>
    %207 = arith.select %26, %205, %206 : vector<8x8xi1>, vector<8x8xf32>
    %208 = arith.addf %202, %207 : vector<8x8xf32>
    %209 = vector.extract_strided_slice %189 {offsets = [0, 3], sizes = [8, 1], strides = [1, 1]} : vector<8x7xf32> to vector<8x1xf32>
    %cst_74 = arith.constant 0.000000e+00 : f32
    %210 = vector.shape_cast %209 : vector<8x1xf32> to vector<8x1xf32>
    %211 = vector.broadcast %210 : vector<8x1xf32> to vector<8x8xf32>
    %212 = vector.broadcast %cst_74 : f32 to vector<8x8xf32>
    %213 = arith.select %28, %211, %212 : vector<8x8xi1>, vector<8x8xf32>
    %214 = arith.addf %208, %213 : vector<8x8xf32>
    %215 = vector.extract_strided_slice %189 {offsets = [0, 4], sizes = [8, 1], strides = [1, 1]} : vector<8x7xf32> to vector<8x1xf32>
    %cst_75 = arith.constant 0.000000e+00 : f32
    %216 = vector.shape_cast %215 : vector<8x1xf32> to vector<8x1xf32>
    %217 = vector.broadcast %216 : vector<8x1xf32> to vector<8x8xf32>
    %218 = vector.broadcast %cst_75 : f32 to vector<8x8xf32>
    %219 = arith.select %30, %217, %218 : vector<8x8xi1>, vector<8x8xf32>
    %220 = arith.addf %214, %219 : vector<8x8xf32>
    %221 = vector.extract_strided_slice %189 {offsets = [0, 5], sizes = [8, 1], strides = [1, 1]} : vector<8x7xf32> to vector<8x1xf32>
    %cst_76 = arith.constant 0.000000e+00 : f32
    %222 = vector.shape_cast %221 : vector<8x1xf32> to vector<8x1xf32>
    %223 = vector.broadcast %222 : vector<8x1xf32> to vector<8x8xf32>
    %224 = vector.broadcast %cst_76 : f32 to vector<8x8xf32>
    %225 = arith.select %32, %223, %224 : vector<8x8xi1>, vector<8x8xf32>
    %226 = arith.addf %220, %225 : vector<8x8xf32>
    %227 = vector.extract_strided_slice %189 {offsets = [0, 6], sizes = [8, 1], strides = [1, 1]} : vector<8x7xf32> to vector<8x1xf32>
    %cst_77 = arith.constant 0.000000e+00 : f32
    %228 = vector.shape_cast %227 : vector<8x1xf32> to vector<8x1xf32>
    %229 = vector.broadcast %228 : vector<8x1xf32> to vector<8x8xf32>
    %230 = vector.broadcast %cst_77 : f32 to vector<8x8xf32>
    %231 = arith.select %34, %229, %230 : vector<8x8xi1>, vector<8x8xf32>
    %232 = arith.addf %226, %231 : vector<8x8xf32>
    %233 = vector.extract_strided_slice %190 {offsets = [0, 0], sizes = [1, 8], strides = [1, 1]} : vector<7x8xf32> to vector<1x8xf32>
    %cst_78 = arith.constant 0.000000e+00 : f32
    %234 = vector.shape_cast %233 : vector<1x8xf32> to vector<1x8xf32>
    %235 = vector.broadcast %234 : vector<1x8xf32> to vector<8x8xf32>
    %236 = vector.broadcast %cst_78 : f32 to vector<8x8xf32>
    %237 = arith.select %36, %235, %236 : vector<8x8xi1>, vector<8x8xf32>
    %238 = arith.addf %232, %237 : vector<8x8xf32>
    %239 = vector.extract_strided_slice %190 {offsets = [1, 0], sizes = [1, 8], strides = [1, 1]} : vector<7x8xf32> to vector<1x8xf32>
    %cst_79 = arith.constant 0.000000e+00 : f32
    %240 = vector.shape_cast %239 : vector<1x8xf32> to vector<1x8xf32>
    %241 = vector.broadcast %240 : vector<1x8xf32> to vector<8x8xf32>
    %242 = vector.broadcast %cst_79 : f32 to vector<8x8xf32>
    %243 = arith.select %38, %241, %242 : vector<8x8xi1>, vector<8x8xf32>
    %244 = arith.addf %238, %243 : vector<8x8xf32>
    %245 = vector.extract_strided_slice %190 {offsets = [2, 0], sizes = [1, 8], strides = [1, 1]} : vector<7x8xf32> to vector<1x8xf32>
    %cst_80 = arith.constant 0.000000e+00 : f32
    %246 = vector.shape_cast %245 : vector<1x8xf32> to vector<1x8xf32>
    %247 = vector.broadcast %246 : vector<1x8xf32> to vector<8x8xf32>
    %248 = vector.broadcast %cst_80 : f32 to vector<8x8xf32>
    %249 = arith.select %40, %247, %248 : vector<8x8xi1>, vector<8x8xf32>
    %250 = arith.addf %244, %249 : vector<8x8xf32>
    %251 = vector.extract_strided_slice %190 {offsets = [3, 0], sizes = [1, 8], strides = [1, 1]} : vector<7x8xf32> to vector<1x8xf32>
    %cst_81 = arith.constant 0.000000e+00 : f32
    %252 = vector.shape_cast %251 : vector<1x8xf32> to vector<1x8xf32>
    %253 = vector.broadcast %252 : vector<1x8xf32> to vector<8x8xf32>
    %254 = vector.broadcast %cst_81 : f32 to vector<8x8xf32>
    %255 = arith.select %42, %253, %254 : vector<8x8xi1>, vector<8x8xf32>
    %256 = arith.addf %250, %255 : vector<8x8xf32>
    %257 = vector.extract_strided_slice %190 {offsets = [4, 0], sizes = [1, 8], strides = [1, 1]} : vector<7x8xf32> to vector<1x8xf32>
    %cst_82 = arith.constant 0.000000e+00 : f32
    %258 = vector.shape_cast %257 : vector<1x8xf32> to vector<1x8xf32>
    %259 = vector.broadcast %258 : vector<1x8xf32> to vector<8x8xf32>
    %260 = vector.broadcast %cst_82 : f32 to vector<8x8xf32>
    %261 = arith.select %44, %259, %260 : vector<8x8xi1>, vector<8x8xf32>
    %262 = arith.addf %256, %261 : vector<8x8xf32>
    %263 = vector.extract_strided_slice %190 {offsets = [5, 0], sizes = [1, 8], strides = [1, 1]} : vector<7x8xf32> to vector<1x8xf32>
    %cst_83 = arith.constant 0.000000e+00 : f32
    %264 = vector.shape_cast %263 : vector<1x8xf32> to vector<1x8xf32>
    %265 = vector.broadcast %264 : vector<1x8xf32> to vector<8x8xf32>
    %266 = vector.broadcast %cst_83 : f32 to vector<8x8xf32>
    %267 = arith.select %46, %265, %266 : vector<8x8xi1>, vector<8x8xf32>
    %268 = arith.addf %262, %267 : vector<8x8xf32>
    %269 = vector.extract_strided_slice %190 {offsets = [6, 0], sizes = [1, 8], strides = [1, 1]} : vector<7x8xf32> to vector<1x8xf32>
    %cst_84 = arith.constant 0.000000e+00 : f32
    %270 = vector.shape_cast %269 : vector<1x8xf32> to vector<1x8xf32>
    %271 = vector.broadcast %270 : vector<1x8xf32> to vector<8x8xf32>
    %272 = vector.broadcast %cst_84 : f32 to vector<8x8xf32>
    %273 = arith.select %48, %271, %272 : vector<8x8xi1>, vector<8x8xf32>
    %274 = arith.addf %268, %273 : vector<8x8xf32>
    %275 = arith.addf %274, %18 : vector<8x8xf32>
    %cst_85 = arith.constant dense<0xFF800000> : vector<8xf32>
    %276 = vector.multi_reduction <maximumf>, %275, %cst_85 [1] : vector<8x8xf32> to vector<8xf32>
    %277 = vector.shape_cast %276 : vector<8xf32> to vector<8x1xf32>
    %278 = vector.broadcast %277 : vector<8x1xf32> to vector<8x8xf32>
    %279 = arith.subf %275, %278 : vector<8x8xf32>
    %280 = math.exp %279 : vector<8x8xf32>
    %cst_86 = arith.constant dense<0.000000e+00> : vector<8xf32>
    %281 = vector.multi_reduction <add>, %280, %cst_86 [1] : vector<8x8xf32> to vector<8xf32>
    %282 = vector.shape_cast %281 : vector<8xf32> to vector<8x1xf32>
    %c0_87 = arith.constant 0 : index
    %c0_88 = arith.constant 0 : index
    %c72 = arith.constant 72 : index
    %283 = vector.load %arg3[%c0_87, %c0_88, %c72] : memref<1x8x96xf32, #tpu.memory_space<vmem>>, vector<1x8x8xf32>
    %284 = vector.shape_cast %283 : vector<1x8x8xf32> to vector<8x8xf32>
    %285 = arith.truncf %284 : vector<8x8xf32> to vector<8x8xbf16>
    %286 = arith.truncf %280 : vector<8x8xf32> to vector<8x8xbf16>
    %cst_89 = arith.constant dense<0.000000e+00> : vector<8x8xf32>
    %287 = tpu.matmul %286, %285, %cst_89 {dimension_numbers = #tpu.dot_dimension_numbers<[1], [0], [0], [1], [0, 0, 1, 1], [], []>} : vector<8x8xbf16>, vector<8x8xbf16>, vector<8x8xf32> -> vector<8x8xf32>
    %288 = vector.broadcast %282 : vector<8x1xf32> to vector<8x8xf32>
    %289 = arith.divf %287, %288 : vector<8x8xf32>
    %290 = arith.truncf %289 : vector<8x8xf32> to vector<8x8xbf16>
    %c8_90 = arith.constant 8 : index
    %c0_91 = arith.constant 0 : index
    %291 = vector.load %arg10[%c8_90, %c0_91] : memref<32x32xbf16, #tpu.memory_space<vmem>>, vector<8x32xbf16>
    %cst_92 = arith.constant dense<0.000000e+00> : vector<8x32xf32>
    %292 = tpu.matmul %290, %291, %cst_92 {dimension_numbers = #tpu.dot_dimension_numbers<[1], [0], [0], [1], [0, 0, 1, 1], [], []>} : vector<8x8xbf16>, vector<8x32xbf16>, vector<8x32xf32> -> vector<8x32xf32>
    %293 = arith.addf %173, %292 : vector<8x32xf32>
    %c0_93 = arith.constant 0 : index
    %c0_94 = arith.constant 0 : index
    %c16 = arith.constant 16 : index
    %294 = vector.load %arg2[%c0_93, %c0_94, %c16] : memref<1x8x96xf32, #tpu.memory_space<vmem>>, vector<1x8x8xf32>
    %295 = vector.shape_cast %294 : vector<1x8x8xf32> to vector<8x8xf32>
    %cst_95 = arith.constant 0.353553385 : f32
    %296 = vector.broadcast %cst_95 : f32 to vector<8x8xf32>
    %297 = arith.mulf %295, %296 : vector<8x8xf32>
    %298 = arith.truncf %297 : vector<8x8xf32> to vector<8x8xbf16>
    %c0_96 = arith.constant 0 : index
    %c0_97 = arith.constant 0 : index
    %c48 = arith.constant 48 : index
    %299 = vector.load %arg3[%c0_96, %c0_97, %c48] : memref<1x8x96xf32, #tpu.memory_space<vmem>>, vector<1x8x8xf32>
    %300 = vector.shape_cast %299 : vector<1x8x8xf32> to vector<8x8xf32>
    %301 = arith.truncf %300 : vector<8x8xf32> to vector<8x8xbf16>
    %c0_98 = arith.constant 0 : index
    %c16_99 = arith.constant 16 : index
    %302 = vector.load %arg4[%c0_98, %c16_99] : memref<7x32xf32, #tpu.memory_space<vmem>>, vector<7x8xf32>
    %cst_100 = arith.constant 0.353553385 : f32
    %303 = vector.broadcast %cst_100 : f32 to vector<7x8xf32>
    %304 = arith.mulf %302, %303 : vector<7x8xf32>
    %305 = arith.truncf %304 : vector<7x8xf32> to vector<7x8xbf16>
    %c0_101 = arith.constant 0 : index
    %c16_102 = arith.constant 16 : index
    %306 = vector.load %arg5[%c0_101, %c16_102] : memref<7x32xf32, #tpu.memory_space<vmem>>, vector<7x8xf32>
    %307 = arith.truncf %306 : vector<7x8xf32> to vector<7x8xbf16>
    %cst_103 = arith.constant dense<0.000000e+00> : vector<8x8xf32>
    %308 = tpu.matmul %298, %301, %cst_103 {dimension_numbers = #tpu.dot_dimension_numbers<[1], [1], [0], [0], [0, 0, 1, 0], [], []>} : vector<8x8xbf16>, vector<8x8xbf16>, vector<8x8xf32> -> vector<8x8xf32>
    %cst_104 = arith.constant dense<0.000000e+00> : vector<8x7xf32>
    %309 = tpu.matmul %298, %307, %cst_104 {dimension_numbers = #tpu.dot_dimension_numbers<[1], [1], [0], [0], [0, 0, 1, 0], [], []>} : vector<8x8xbf16>, vector<7x8xbf16>, vector<8x7xf32> -> vector<8x7xf32>
    %cst_105 = arith.constant dense<0.000000e+00> : vector<7x8xf32>
    %310 = tpu.matmul %305, %301, %cst_105 {dimension_numbers = #tpu.dot_dimension_numbers<[1], [1], [0], [0], [0, 0, 1, 0], [], []>} : vector<7x8xbf16>, vector<8x8xbf16>, vector<7x8xf32> -> vector<7x8xf32>
    %311 = vector.extract_strided_slice %309 {offsets = [0, 0], sizes = [8, 1], strides = [1, 1]} : vector<8x7xf32> to vector<8x1xf32>
    %cst_106 = arith.constant 0.000000e+00 : f32
    %312 = vector.shape_cast %311 : vector<8x1xf32> to vector<8x1xf32>
    %313 = vector.broadcast %312 : vector<8x1xf32> to vector<8x8xf32>
    %314 = vector.broadcast %cst_106 : f32 to vector<8x8xf32>
    %315 = arith.select %22, %313, %314 : vector<8x8xi1>, vector<8x8xf32>
    %316 = arith.addf %308, %315 : vector<8x8xf32>
    %317 = vector.extract_strided_slice %309 {offsets = [0, 1], sizes = [8, 1], strides = [1, 1]} : vector<8x7xf32> to vector<8x1xf32>
    %cst_107 = arith.constant 0.000000e+00 : f32
    %318 = vector.shape_cast %317 : vector<8x1xf32> to vector<8x1xf32>
    %319 = vector.broadcast %318 : vector<8x1xf32> to vector<8x8xf32>
    %320 = vector.broadcast %cst_107 : f32 to vector<8x8xf32>
    %321 = arith.select %24, %319, %320 : vector<8x8xi1>, vector<8x8xf32>
    %322 = arith.addf %316, %321 : vector<8x8xf32>
    %323 = vector.extract_strided_slice %309 {offsets = [0, 2], sizes = [8, 1], strides = [1, 1]} : vector<8x7xf32> to vector<8x1xf32>
    %cst_108 = arith.constant 0.000000e+00 : f32
    %324 = vector.shape_cast %323 : vector<8x1xf32> to vector<8x1xf32>
    %325 = vector.broadcast %324 : vector<8x1xf32> to vector<8x8xf32>
    %326 = vector.broadcast %cst_108 : f32 to vector<8x8xf32>
    %327 = arith.select %26, %325, %326 : vector<8x8xi1>, vector<8x8xf32>
    %328 = arith.addf %322, %327 : vector<8x8xf32>
    %329 = vector.extract_strided_slice %309 {offsets = [0, 3], sizes = [8, 1], strides = [1, 1]} : vector<8x7xf32> to vector<8x1xf32>
    %cst_109 = arith.constant 0.000000e+00 : f32
    %330 = vector.shape_cast %329 : vector<8x1xf32> to vector<8x1xf32>
    %331 = vector.broadcast %330 : vector<8x1xf32> to vector<8x8xf32>
    %332 = vector.broadcast %cst_109 : f32 to vector<8x8xf32>
    %333 = arith.select %28, %331, %332 : vector<8x8xi1>, vector<8x8xf32>
    %334 = arith.addf %328, %333 : vector<8x8xf32>
    %335 = vector.extract_strided_slice %309 {offsets = [0, 4], sizes = [8, 1], strides = [1, 1]} : vector<8x7xf32> to vector<8x1xf32>
    %cst_110 = arith.constant 0.000000e+00 : f32
    %336 = vector.shape_cast %335 : vector<8x1xf32> to vector<8x1xf32>
    %337 = vector.broadcast %336 : vector<8x1xf32> to vector<8x8xf32>
    %338 = vector.broadcast %cst_110 : f32 to vector<8x8xf32>
    %339 = arith.select %30, %337, %338 : vector<8x8xi1>, vector<8x8xf32>
    %340 = arith.addf %334, %339 : vector<8x8xf32>
    %341 = vector.extract_strided_slice %309 {offsets = [0, 5], sizes = [8, 1], strides = [1, 1]} : vector<8x7xf32> to vector<8x1xf32>
    %cst_111 = arith.constant 0.000000e+00 : f32
    %342 = vector.shape_cast %341 : vector<8x1xf32> to vector<8x1xf32>
    %343 = vector.broadcast %342 : vector<8x1xf32> to vector<8x8xf32>
    %344 = vector.broadcast %cst_111 : f32 to vector<8x8xf32>
    %345 = arith.select %32, %343, %344 : vector<8x8xi1>, vector<8x8xf32>
    %346 = arith.addf %340, %345 : vector<8x8xf32>
    %347 = vector.extract_strided_slice %309 {offsets = [0, 6], sizes = [8, 1], strides = [1, 1]} : vector<8x7xf32> to vector<8x1xf32>
    %cst_112 = arith.constant 0.000000e+00 : f32
    %348 = vector.shape_cast %347 : vector<8x1xf32> to vector<8x1xf32>
    %349 = vector.broadcast %348 : vector<8x1xf32> to vector<8x8xf32>
    %350 = vector.broadcast %cst_112 : f32 to vector<8x8xf32>
    %351 = arith.select %34, %349, %350 : vector<8x8xi1>, vector<8x8xf32>
    %352 = arith.addf %346, %351 : vector<8x8xf32>
    %353 = vector.extract_strided_slice %310 {offsets = [0, 0], sizes = [1, 8], strides = [1, 1]} : vector<7x8xf32> to vector<1x8xf32>
    %cst_113 = arith.constant 0.000000e+00 : f32
    %354 = vector.shape_cast %353 : vector<1x8xf32> to vector<1x8xf32>
    %355 = vector.broadcast %354 : vector<1x8xf32> to vector<8x8xf32>
    %356 = vector.broadcast %cst_113 : f32 to vector<8x8xf32>
    %357 = arith.select %36, %355, %356 : vector<8x8xi1>, vector<8x8xf32>
    %358 = arith.addf %352, %357 : vector<8x8xf32>
    %359 = vector.extract_strided_slice %310 {offsets = [1, 0], sizes = [1, 8], strides = [1, 1]} : vector<7x8xf32> to vector<1x8xf32>
    %cst_114 = arith.constant 0.000000e+00 : f32
    %360 = vector.shape_cast %359 : vector<1x8xf32> to vector<1x8xf32>
    %361 = vector.broadcast %360 : vector<1x8xf32> to vector<8x8xf32>
    %362 = vector.broadcast %cst_114 : f32 to vector<8x8xf32>
    %363 = arith.select %38, %361, %362 : vector<8x8xi1>, vector<8x8xf32>
    %364 = arith.addf %358, %363 : vector<8x8xf32>
    %365 = vector.extract_strided_slice %310 {offsets = [2, 0], sizes = [1, 8], strides = [1, 1]} : vector<7x8xf32> to vector<1x8xf32>
    %cst_115 = arith.constant 0.000000e+00 : f32
    %366 = vector.shape_cast %365 : vector<1x8xf32> to vector<1x8xf32>
    %367 = vector.broadcast %366 : vector<1x8xf32> to vector<8x8xf32>
    %368 = vector.broadcast %cst_115 : f32 to vector<8x8xf32>
    %369 = arith.select %40, %367, %368 : vector<8x8xi1>, vector<8x8xf32>
    %370 = arith.addf %364, %369 : vector<8x8xf32>
    %371 = vector.extract_strided_slice %310 {offsets = [3, 0], sizes = [1, 8], strides = [1, 1]} : vector<7x8xf32> to vector<1x8xf32>
    %cst_116 = arith.constant 0.000000e+00 : f32
    %372 = vector.shape_cast %371 : vector<1x8xf32> to vector<1x8xf32>
    %373 = vector.broadcast %372 : vector<1x8xf32> to vector<8x8xf32>
    %374 = vector.broadcast %cst_116 : f32 to vector<8x8xf32>
    %375 = arith.select %42, %373, %374 : vector<8x8xi1>, vector<8x8xf32>
    %376 = arith.addf %370, %375 : vector<8x8xf32>
    %377 = vector.extract_strided_slice %310 {offsets = [4, 0], sizes = [1, 8], strides = [1, 1]} : vector<7x8xf32> to vector<1x8xf32>
    %cst_117 = arith.constant 0.000000e+00 : f32
    %378 = vector.shape_cast %377 : vector<1x8xf32> to vector<1x8xf32>
    %379 = vector.broadcast %378 : vector<1x8xf32> to vector<8x8xf32>
    %380 = vector.broadcast %cst_117 : f32 to vector<8x8xf32>
    %381 = arith.select %44, %379, %380 : vector<8x8xi1>, vector<8x8xf32>
    %382 = arith.addf %376, %381 : vector<8x8xf32>
    %383 = vector.extract_strided_slice %310 {offsets = [5, 0], sizes = [1, 8], strides = [1, 1]} : vector<7x8xf32> to vector<1x8xf32>
    %cst_118 = arith.constant 0.000000e+00 : f32
    %384 = vector.shape_cast %383 : vector<1x8xf32> to vector<1x8xf32>
    %385 = vector.broadcast %384 : vector<1x8xf32> to vector<8x8xf32>
    %386 = vector.broadcast %cst_118 : f32 to vector<8x8xf32>
    %387 = arith.select %46, %385, %386 : vector<8x8xi1>, vector<8x8xf32>
    %388 = arith.addf %382, %387 : vector<8x8xf32>
    %389 = vector.extract_strided_slice %310 {offsets = [6, 0], sizes = [1, 8], strides = [1, 1]} : vector<7x8xf32> to vector<1x8xf32>
    %cst_119 = arith.constant 0.000000e+00 : f32
    %390 = vector.shape_cast %389 : vector<1x8xf32> to vector<1x8xf32>
    %391 = vector.broadcast %390 : vector<1x8xf32> to vector<8x8xf32>
    %392 = vector.broadcast %cst_119 : f32 to vector<8x8xf32>
    %393 = arith.select %48, %391, %392 : vector<8x8xi1>, vector<8x8xf32>
    %394 = arith.addf %388, %393 : vector<8x8xf32>
    %395 = arith.addf %394, %18 : vector<8x8xf32>
    %cst_120 = arith.constant dense<0xFF800000> : vector<8xf32>
    %396 = vector.multi_reduction <maximumf>, %395, %cst_120 [1] : vector<8x8xf32> to vector<8xf32>
    %397 = vector.shape_cast %396 : vector<8xf32> to vector<8x1xf32>
    %398 = vector.broadcast %397 : vector<8x1xf32> to vector<8x8xf32>
    %399 = arith.subf %395, %398 : vector<8x8xf32>
    %400 = math.exp %399 : vector<8x8xf32>
    %cst_121 = arith.constant dense<0.000000e+00> : vector<8xf32>
    %401 = vector.multi_reduction <add>, %400, %cst_121 [1] : vector<8x8xf32> to vector<8xf32>
    %402 = vector.shape_cast %401 : vector<8xf32> to vector<8x1xf32>
    %c0_122 = arith.constant 0 : index
    %c0_123 = arith.constant 0 : index
    %c80 = arith.constant 80 : index
    %403 = vector.load %arg3[%c0_122, %c0_123, %c80] : memref<1x8x96xf32, #tpu.memory_space<vmem>>, vector<1x8x8xf32>
    %404 = vector.shape_cast %403 : vector<1x8x8xf32> to vector<8x8xf32>
    %405 = arith.truncf %404 : vector<8x8xf32> to vector<8x8xbf16>
    %406 = arith.truncf %400 : vector<8x8xf32> to vector<8x8xbf16>
    %cst_124 = arith.constant dense<0.000000e+00> : vector<8x8xf32>
    %407 = tpu.matmul %406, %405, %cst_124 {dimension_numbers = #tpu.dot_dimension_numbers<[1], [0], [0], [1], [0, 0, 1, 1], [], []>} : vector<8x8xbf16>, vector<8x8xbf16>, vector<8x8xf32> -> vector<8x8xf32>
    %408 = vector.broadcast %402 : vector<8x1xf32> to vector<8x8xf32>
    %409 = arith.divf %407, %408 : vector<8x8xf32>
    %410 = arith.truncf %409 : vector<8x8xf32> to vector<8x8xbf16>
    %c16_125 = arith.constant 16 : index
    %c0_126 = arith.constant 0 : index
    %411 = vector.load %arg10[%c16_125, %c0_126] : memref<32x32xbf16, #tpu.memory_space<vmem>>, vector<8x32xbf16>
    %cst_127 = arith.constant dense<0.000000e+00> : vector<8x32xf32>
    %412 = tpu.matmul %410, %411, %cst_127 {dimension_numbers = #tpu.dot_dimension_numbers<[1], [0], [0], [1], [0, 0, 1, 1], [], []>} : vector<8x8xbf16>, vector<8x32xbf16>, vector<8x32xf32> -> vector<8x32xf32>
    %413 = arith.addf %293, %412 : vector<8x32xf32>
    %c0_128 = arith.constant 0 : index
    %c0_129 = arith.constant 0 : index
    %c24 = arith.constant 24 : index
    %414 = vector.load %arg2[%c0_128, %c0_129, %c24] : memref<1x8x96xf32, #tpu.memory_space<vmem>>, vector<1x8x8xf32>
    %415 = vector.shape_cast %414 : vector<1x8x8xf32> to vector<8x8xf32>
    %cst_130 = arith.constant 0.353553385 : f32
    %416 = vector.broadcast %cst_130 : f32 to vector<8x8xf32>
    %417 = arith.mulf %415, %416 : vector<8x8xf32>
    %418 = arith.truncf %417 : vector<8x8xf32> to vector<8x8xbf16>
    %c0_131 = arith.constant 0 : index
    %c0_132 = arith.constant 0 : index
    %c56 = arith.constant 56 : index
    %419 = vector.load %arg3[%c0_131, %c0_132, %c56] : memref<1x8x96xf32, #tpu.memory_space<vmem>>, vector<1x8x8xf32>
    %420 = vector.shape_cast %419 : vector<1x8x8xf32> to vector<8x8xf32>
    %421 = arith.truncf %420 : vector<8x8xf32> to vector<8x8xbf16>
    %c0_133 = arith.constant 0 : index
    %c24_134 = arith.constant 24 : index
    %422 = vector.load %arg4[%c0_133, %c24_134] : memref<7x32xf32, #tpu.memory_space<vmem>>, vector<7x8xf32>
    %cst_135 = arith.constant 0.353553385 : f32
    %423 = vector.broadcast %cst_135 : f32 to vector<7x8xf32>
    %424 = arith.mulf %422, %423 : vector<7x8xf32>
    %425 = arith.truncf %424 : vector<7x8xf32> to vector<7x8xbf16>
    %c0_136 = arith.constant 0 : index
    %c24_137 = arith.constant 24 : index
    %426 = vector.load %arg5[%c0_136, %c24_137] : memref<7x32xf32, #tpu.memory_space<vmem>>, vector<7x8xf32>
    %427 = arith.truncf %426 : vector<7x8xf32> to vector<7x8xbf16>
    %cst_138 = arith.constant dense<0.000000e+00> : vector<8x8xf32>
    %428 = tpu.matmul %418, %421, %cst_138 {dimension_numbers = #tpu.dot_dimension_numbers<[1], [1], [0], [0], [0, 0, 1, 0], [], []>} : vector<8x8xbf16>, vector<8x8xbf16>, vector<8x8xf32> -> vector<8x8xf32>
    %cst_139 = arith.constant dense<0.000000e+00> : vector<8x7xf32>
    %429 = tpu.matmul %418, %427, %cst_139 {dimension_numbers = #tpu.dot_dimension_numbers<[1], [1], [0], [0], [0, 0, 1, 0], [], []>} : vector<8x8xbf16>, vector<7x8xbf16>, vector<8x7xf32> -> vector<8x7xf32>
    %cst_140 = arith.constant dense<0.000000e+00> : vector<7x8xf32>
    %430 = tpu.matmul %425, %421, %cst_140 {dimension_numbers = #tpu.dot_dimension_numbers<[1], [1], [0], [0], [0, 0, 1, 0], [], []>} : vector<7x8xbf16>, vector<8x8xbf16>, vector<7x8xf32> -> vector<7x8xf32>
    %431 = vector.extract_strided_slice %429 {offsets = [0, 0], sizes = [8, 1], strides = [1, 1]} : vector<8x7xf32> to vector<8x1xf32>
    %cst_141 = arith.constant 0.000000e+00 : f32
    %432 = vector.shape_cast %431 : vector<8x1xf32> to vector<8x1xf32>
    %433 = vector.broadcast %432 : vector<8x1xf32> to vector<8x8xf32>
    %434 = vector.broadcast %cst_141 : f32 to vector<8x8xf32>
    %435 = arith.select %22, %433, %434 : vector<8x8xi1>, vector<8x8xf32>
    %436 = arith.addf %428, %435 : vector<8x8xf32>
    %437 = vector.extract_strided_slice %429 {offsets = [0, 1], sizes = [8, 1], strides = [1, 1]} : vector<8x7xf32> to vector<8x1xf32>
    %cst_142 = arith.constant 0.000000e+00 : f32
    %438 = vector.shape_cast %437 : vector<8x1xf32> to vector<8x1xf32>
    %439 = vector.broadcast %438 : vector<8x1xf32> to vector<8x8xf32>
    %440 = vector.broadcast %cst_142 : f32 to vector<8x8xf32>
    %441 = arith.select %24, %439, %440 : vector<8x8xi1>, vector<8x8xf32>
    %442 = arith.addf %436, %441 : vector<8x8xf32>
    %443 = vector.extract_strided_slice %429 {offsets = [0, 2], sizes = [8, 1], strides = [1, 1]} : vector<8x7xf32> to vector<8x1xf32>
    %cst_143 = arith.constant 0.000000e+00 : f32
    %444 = vector.shape_cast %443 : vector<8x1xf32> to vector<8x1xf32>
    %445 = vector.broadcast %444 : vector<8x1xf32> to vector<8x8xf32>
    %446 = vector.broadcast %cst_143 : f32 to vector<8x8xf32>
    %447 = arith.select %26, %445, %446 : vector<8x8xi1>, vector<8x8xf32>
    %448 = arith.addf %442, %447 : vector<8x8xf32>
    %449 = vector.extract_strided_slice %429 {offsets = [0, 3], sizes = [8, 1], strides = [1, 1]} : vector<8x7xf32> to vector<8x1xf32>
    %cst_144 = arith.constant 0.000000e+00 : f32
    %450 = vector.shape_cast %449 : vector<8x1xf32> to vector<8x1xf32>
    %451 = vector.broadcast %450 : vector<8x1xf32> to vector<8x8xf32>
    %452 = vector.broadcast %cst_144 : f32 to vector<8x8xf32>
    %453 = arith.select %28, %451, %452 : vector<8x8xi1>, vector<8x8xf32>
    %454 = arith.addf %448, %453 : vector<8x8xf32>
    %455 = vector.extract_strided_slice %429 {offsets = [0, 4], sizes = [8, 1], strides = [1, 1]} : vector<8x7xf32> to vector<8x1xf32>
    %cst_145 = arith.constant 0.000000e+00 : f32
    %456 = vector.shape_cast %455 : vector<8x1xf32> to vector<8x1xf32>
    %457 = vector.broadcast %456 : vector<8x1xf32> to vector<8x8xf32>
    %458 = vector.broadcast %cst_145 : f32 to vector<8x8xf32>
    %459 = arith.select %30, %457, %458 : vector<8x8xi1>, vector<8x8xf32>
    %460 = arith.addf %454, %459 : vector<8x8xf32>
    %461 = vector.extract_strided_slice %429 {offsets = [0, 5], sizes = [8, 1], strides = [1, 1]} : vector<8x7xf32> to vector<8x1xf32>
    %cst_146 = arith.constant 0.000000e+00 : f32
    %462 = vector.shape_cast %461 : vector<8x1xf32> to vector<8x1xf32>
    %463 = vector.broadcast %462 : vector<8x1xf32> to vector<8x8xf32>
    %464 = vector.broadcast %cst_146 : f32 to vector<8x8xf32>
    %465 = arith.select %32, %463, %464 : vector<8x8xi1>, vector<8x8xf32>
    %466 = arith.addf %460, %465 : vector<8x8xf32>
    %467 = vector.extract_strided_slice %429 {offsets = [0, 6], sizes = [8, 1], strides = [1, 1]} : vector<8x7xf32> to vector<8x1xf32>
    %cst_147 = arith.constant 0.000000e+00 : f32
    %468 = vector.shape_cast %467 : vector<8x1xf32> to vector<8x1xf32>
    %469 = vector.broadcast %468 : vector<8x1xf32> to vector<8x8xf32>
    %470 = vector.broadcast %cst_147 : f32 to vector<8x8xf32>
    %471 = arith.select %34, %469, %470 : vector<8x8xi1>, vector<8x8xf32>
    %472 = arith.addf %466, %471 : vector<8x8xf32>
    %473 = vector.extract_strided_slice %430 {offsets = [0, 0], sizes = [1, 8], strides = [1, 1]} : vector<7x8xf32> to vector<1x8xf32>
    %cst_148 = arith.constant 0.000000e+00 : f32
    %474 = vector.shape_cast %473 : vector<1x8xf32> to vector<1x8xf32>
    %475 = vector.broadcast %474 : vector<1x8xf32> to vector<8x8xf32>
    %476 = vector.broadcast %cst_148 : f32 to vector<8x8xf32>
    %477 = arith.select %36, %475, %476 : vector<8x8xi1>, vector<8x8xf32>
    %478 = arith.addf %472, %477 : vector<8x8xf32>
    %479 = vector.extract_strided_slice %430 {offsets = [1, 0], sizes = [1, 8], strides = [1, 1]} : vector<7x8xf32> to vector<1x8xf32>
    %cst_149 = arith.constant 0.000000e+00 : f32
    %480 = vector.shape_cast %479 : vector<1x8xf32> to vector<1x8xf32>
    %481 = vector.broadcast %480 : vector<1x8xf32> to vector<8x8xf32>
    %482 = vector.broadcast %cst_149 : f32 to vector<8x8xf32>
    %483 = arith.select %38, %481, %482 : vector<8x8xi1>, vector<8x8xf32>
    %484 = arith.addf %478, %483 : vector<8x8xf32>
    %485 = vector.extract_strided_slice %430 {offsets = [2, 0], sizes = [1, 8], strides = [1, 1]} : vector<7x8xf32> to vector<1x8xf32>
    %cst_150 = arith.constant 0.000000e+00 : f32
    %486 = vector.shape_cast %485 : vector<1x8xf32> to vector<1x8xf32>
    %487 = vector.broadcast %486 : vector<1x8xf32> to vector<8x8xf32>
    %488 = vector.broadcast %cst_150 : f32 to vector<8x8xf32>
    %489 = arith.select %40, %487, %488 : vector<8x8xi1>, vector<8x8xf32>
    %490 = arith.addf %484, %489 : vector<8x8xf32>
    %491 = vector.extract_strided_slice %430 {offsets = [3, 0], sizes = [1, 8], strides = [1, 1]} : vector<7x8xf32> to vector<1x8xf32>
    %cst_151 = arith.constant 0.000000e+00 : f32
    %492 = vector.shape_cast %491 : vector<1x8xf32> to vector<1x8xf32>
    %493 = vector.broadcast %492 : vector<1x8xf32> to vector<8x8xf32>
    %494 = vector.broadcast %cst_151 : f32 to vector<8x8xf32>
    %495 = arith.select %42, %493, %494 : vector<8x8xi1>, vector<8x8xf32>
    %496 = arith.addf %490, %495 : vector<8x8xf32>
    %497 = vector.extract_strided_slice %430 {offsets = [4, 0], sizes = [1, 8], strides = [1, 1]} : vector<7x8xf32> to vector<1x8xf32>
    %cst_152 = arith.constant 0.000000e+00 : f32
    %498 = vector.shape_cast %497 : vector<1x8xf32> to vector<1x8xf32>
    %499 = vector.broadcast %498 : vector<1x8xf32> to vector<8x8xf32>
    %500 = vector.broadcast %cst_152 : f32 to vector<8x8xf32>
    %501 = arith.select %44, %499, %500 : vector<8x8xi1>, vector<8x8xf32>
    %502 = arith.addf %496, %501 : vector<8x8xf32>
    %503 = vector.extract_strided_slice %430 {offsets = [5, 0], sizes = [1, 8], strides = [1, 1]} : vector<7x8xf32> to vector<1x8xf32>
    %cst_153 = arith.constant 0.000000e+00 : f32
    %504 = vector.shape_cast %503 : vector<1x8xf32> to vector<1x8xf32>
    %505 = vector.broadcast %504 : vector<1x8xf32> to vector<8x8xf32>
    %506 = vector.broadcast %cst_153 : f32 to vector<8x8xf32>
    %507 = arith.select %46, %505, %506 : vector<8x8xi1>, vector<8x8xf32>
    %508 = arith.addf %502, %507 : vector<8x8xf32>
    %509 = vector.extract_strided_slice %430 {offsets = [6, 0], sizes = [1, 8], strides = [1, 1]} : vector<7x8xf32> to vector<1x8xf32>
    %cst_154 = arith.constant 0.000000e+00 : f32
    %510 = vector.shape_cast %509 : vector<1x8xf32> to vector<1x8xf32>
    %511 = vector.broadcast %510 : vector<1x8xf32> to vector<8x8xf32>
    %512 = vector.broadcast %cst_154 : f32 to vector<8x8xf32>
    %513 = arith.select %48, %511, %512 : vector<8x8xi1>, vector<8x8xf32>
    %514 = arith.addf %508, %513 : vector<8x8xf32>
    %515 = arith.addf %514, %18 : vector<8x8xf32>
    %cst_155 = arith.constant dense<0xFF800000> : vector<8xf32>
    %516 = vector.multi_reduction <maximumf>, %515, %cst_155 [1] : vector<8x8xf32> to vector<8xf32>
    %517 = vector.shape_cast %516 : vector<8xf32> to vector<8x1xf32>
    %518 = vector.broadcast %517 : vector<8x1xf32> to vector<8x8xf32>
    %519 = arith.subf %515, %518 : vector<8x8xf32>
    %520 = math.exp %519 : vector<8x8xf32>
    %cst_156 = arith.constant dense<0.000000e+00> : vector<8xf32>
    %521 = vector.multi_reduction <add>, %520, %cst_156 [1] : vector<8x8xf32> to vector<8xf32>
    %522 = vector.shape_cast %521 : vector<8xf32> to vector<8x1xf32>
    %c0_157 = arith.constant 0 : index
    %c0_158 = arith.constant 0 : index
    %c88 = arith.constant 88 : index
    %523 = vector.load %arg3[%c0_157, %c0_158, %c88] : memref<1x8x96xf32, #tpu.memory_space<vmem>>, vector<1x8x8xf32>
    %524 = vector.shape_cast %523 : vector<1x8x8xf32> to vector<8x8xf32>
    %525 = arith.truncf %524 : vector<8x8xf32> to vector<8x8xbf16>
    %526 = arith.truncf %520 : vector<8x8xf32> to vector<8x8xbf16>
    %cst_159 = arith.constant dense<0.000000e+00> : vector<8x8xf32>
    %527 = tpu.matmul %526, %525, %cst_159 {dimension_numbers = #tpu.dot_dimension_numbers<[1], [0], [0], [1], [0, 0, 1, 1], [], []>} : vector<8x8xbf16>, vector<8x8xbf16>, vector<8x8xf32> -> vector<8x8xf32>
    %528 = vector.broadcast %522 : vector<8x1xf32> to vector<8x8xf32>
    %529 = arith.divf %527, %528 : vector<8x8xf32>
    %530 = arith.truncf %529 : vector<8x8xf32> to vector<8x8xbf16>
    %c24_160 = arith.constant 24 : index
    %c0_161 = arith.constant 0 : index
    %531 = vector.load %arg10[%c24_160, %c0_161] : memref<32x32xbf16, #tpu.memory_space<vmem>>, vector<8x32xbf16>
    %cst_162 = arith.constant dense<0.000000e+00> : vector<8x32xf32>
    %532 = tpu.matmul %530, %531, %cst_162 {dimension_numbers = #tpu.dot_dimension_numbers<[1], [0], [0], [1], [0, 0, 1, 1], [], []>} : vector<8x8xbf16>, vector<8x32xbf16>, vector<8x32xf32> -> vector<8x32xf32>
    %533 = arith.addf %413, %532 : vector<8x32xf32>
    %c0_163 = arith.constant 0 : index
    %c0_164 = arith.constant 0 : index
    %c0_165 = arith.constant 0 : index
    %534 = vector.load %arg12[%c0_163, %c0_164, %c0_165] : memref<1x8x32xf32, #tpu.memory_space<vmem>>, vector<1x8x32xf32>
    %535 = vector.shape_cast %534 : vector<1x8x32xf32> to vector<8x32xf32>
    %536 = vector.shape_cast %533 : vector<8x32xf32> to vector<1x8x32xf32>
    tpu.vector_store %arg12[%c0_163, %c0_164, %c0_165], %536 {strides = array<i32>} : memref<1x8x32xf32, #tpu.memory_space<vmem>>, vector<1x8x32xf32>,
    return
  }
  func.func @transform_0(%arg0: i32, %arg1: i32) -> (i32, i32, i32) {
    %c0_i32 = arith.constant 0 : i32
    %c0_i32_0 = arith.constant 0 : i32
    return %arg0, %arg1, %c0_i32 : i32, i32, i32
  }
  func.func @transform_1(%arg0: i32, %arg1: i32) -> (i32, i32, i32) {
    %c0_i32 = arith.constant 0 : i32
    %c0_i32_0 = arith.constant 0 : i32
    %c0_i32_1 = arith.constant 0 : i32
    return %arg0, %c0_i32, %c0_i32_0 : i32, i32, i32
  }
  func.func @transform_2(%arg0: i32, %arg1: i32) -> (i32, i32) {
    %c0_i32 = arith.constant 0 : i32
    %c0_i32_0 = arith.constant 0 : i32
    %c0_i32_1 = arith.constant 0 : i32
    return %c0_i32, %c0_i32_0 : i32, i32
  }
  func.func @transform_3(%arg0: i32, %arg1: i32) -> (i32, i32) {
    %c0_i32 = arith.constant 0 : i32
    %c0_i32_0 = arith.constant 0 : i32
    %c0_i32_1 = arith.constant 0 : i32
    return %c0_i32, %c0_i32_0 : i32, i32
  }
  func.func @transform_4(%arg0: i32, %arg1: i32) -> (i32, i32) {
    %c0_i32 = arith.constant 0 : i32
    %c0_i32_0 = arith.constant 0 : i32
    return %arg1, %c0_i32 : i32, i32
  }
  func.func @transform_5(%arg0: i32, %arg1: i32) -> (i32, i32) {
    %c0_i32 = arith.constant 0 : i32
    %c0_i32_0 = arith.constant 0 : i32
    return %arg1, %c0_i32 : i32, i32
  }
  func.func @transform_6(%arg0: i32, %arg1: i32) -> (i32, i32, i32) {
    %c0_i32 = arith.constant 0 : i32
    %c0_i32_0 = arith.constant 0 : i32
    %c0_i32_1 = arith.constant 0 : i32
    return %arg0, %c0_i32, %c0_i32_0 : i32, i32, i32
  }
  func.func @transform_7(%arg0: i32, %arg1: i32) -> (i32, i32, i32) {
    %c0_i32 = arith.constant 0 : i32
    %c0_i32_0 = arith.constant 0 : i32
    return %arg0, %arg1, %c0_i32 : i32, i32, i32
  }
  func.func @transform_8(%arg0: i32, %arg1: i32) -> (i32, i32) {
    %c0_i32 = arith.constant 0 : i32
    %c0_i32_0 = arith.constant 0 : i32
    %c0_i32_1 = arith.constant 0 : i32
    return %c0_i32, %c0_i32_0 : i32, i32
  }
  func.func @transform_9(%arg0: i32, %arg1: i32) -> (i32, i32) {
    %c0_i32 = arith.constant 0 : i32
    %c0_i32_0 = arith.constant 0 : i32
    %c0_i32_1 = arith.constant 0 : i32
    return %c0_i32, %c0_i32_0 : i32, i32
  }
  func.func @transform_10(%arg0: i32, %arg1: i32) -> (i32, i32, i32) {
    %c0_i32 = arith.constant 0 : i32
    %c0_i32_0 = arith.constant 0 : i32
    return %arg0, %arg1, %c0_i32 : i32, i32, i32
  }
}

module attributes {stable_mosaic.version = 11 : i64} {
  func.func @_matmul_bias_kernel(%arg0: i32, %arg1: i32, %arg2: memref<24x32xf32, #tpu.memory_space<vmem>>, %arg3: memref<32x64xbf16, #tpu.memory_space<vmem>>, %arg4: memref<1x64xf32, #tpu.memory_space<vmem>>, %arg5: memref<24x64xf32, #tpu.memory_space<vmem>>) attributes {dimension_semantics = [#tpu.dimension_semantics<parallel>, #tpu.dimension_semantics<parallel>], iteration_bounds = array<i64: 1, 1>, scalar_prefetch = 0 : i64, scratch_operands = 0 : i64, tpu.core_type = #tpu.core_type<tc>, window_params = [{transform_indices = @transform_0, window_bounds = array<i64: 24, 32>}, {transform_indices = @transform_1, window_bounds = array<i64: 32, 64>}, {transform_indices = @transform_2, window_bounds = array<i64: 1, 64>}, {transform_indices = @transform_3, window_bounds = array<i64: 24, 64>}]} {
    %c0 = arith.constant 0 : index
    %c0_0 = arith.constant 0 : index
    %0 = vector.load %arg2[%c0, %c0_0] : memref<24x32xf32, #tpu.memory_space<vmem>>, vector<24x32xf32>
    %1 = arith.truncf %0 : vector<24x32xf32> to vector<24x32xbf16>
    %c0_1 = arith.constant 0 : index
    %c0_2 = arith.constant 0 : index
    %2 = vector.load %arg3[%c0_1, %c0_2] : memref<32x64xbf16, #tpu.memory_space<vmem>>, vector<32x64xbf16>
    %cst = arith.constant dense<0.000000e+00> : vector<24x64xf32>
    %3 = tpu.matmul %1, %2, %cst {dimension_numbers = #tpu.dot_dimension_numbers<[1], [0], [0], [1], [0, 0, 1, 1], [], []>} : vector<24x32xbf16>, vector<32x64xbf16>, vector<24x64xf32> -> vector<24x64xf32>
    %c0_3 = arith.constant 0 : index
    %c0_4 = arith.constant 0 : index
    %4 = vector.load %arg4[%c0_3, %c0_4] : memref<1x64xf32, #tpu.memory_space<vmem>>, vector<1x64xf32>
    %5 = vector.broadcast %4 : vector<1x64xf32> to vector<24x64xf32>
    %6 = arith.addf %3, %5 : vector<24x64xf32>
    %c0_5 = arith.constant 0 : index
    %c0_6 = arith.constant 0 : index
    %7 = vector.load %arg5[%c0_5, %c0_6] : memref<24x64xf32, #tpu.memory_space<vmem>>, vector<24x64xf32>
    tpu.vector_store %arg5[%c0_5, %c0_6], %6 {strides = array<i32>} : memref<24x64xf32, #tpu.memory_space<vmem>>, vector<24x64xf32>,
    return
  }
  func.func @transform_0(%arg0: i32, %arg1: i32) -> (i32, i32) {
    %c0_i32 = arith.constant 0 : i32
    %c0_i32_0 = arith.constant 0 : i32
    return %arg0, %c0_i32 : i32, i32
  }
  func.func @transform_1(%arg0: i32, %arg1: i32) -> (i32, i32) {
    %c0_i32 = arith.constant 0 : i32
    %c0_i32_0 = arith.constant 0 : i32
    return %c0_i32, %arg1 : i32, i32
  }
  func.func @transform_2(%arg0: i32, %arg1: i32) -> (i32, i32) {
    %c0_i32 = arith.constant 0 : i32
    %c0_i32_0 = arith.constant 0 : i32
    return %c0_i32, %arg1 : i32, i32
  }
  func.func @transform_3(%arg0: i32, %arg1: i32) -> (i32, i32) {
    %c0_i32 = arith.constant 0 : i32
    return %arg0, %arg1 : i32, i32
  }
}

module attributes {stable_mosaic.version = 11 : i64} {
  func.func @_layernorm_kernel(%arg0: i32, %arg1: memref<16x32xf32, #tpu.memory_space<vmem>>, %arg2: memref<1x32xf32, #tpu.memory_space<vmem>>, %arg3: memref<1x32xf32, #tpu.memory_space<vmem>>, %arg4: memref<16x32xf32, #tpu.memory_space<vmem>>) attributes {dimension_semantics = [#tpu.dimension_semantics<parallel>], iteration_bounds = array<i64: 1>, scalar_prefetch = 0 : i64, scratch_operands = 0 : i64, tpu.core_type = #tpu.core_type<tc>, window_params = [{transform_indices = @transform_0, window_bounds = array<i64: 16, 32>}, {pipeline_mode = #tpu.pipeline_mode<synchronous>, transform_indices = @transform_1, window_bounds = array<i64: 1, 32>}, {pipeline_mode = #tpu.pipeline_mode<synchronous>, transform_indices = @transform_2, window_bounds = array<i64: 1, 32>}, {transform_indices = @transform_3, window_bounds = array<i64: 16, 32>}]} {
    %c0 = arith.constant 0 : index
    %c0_0 = arith.constant 0 : index
    %0 = vector.load %arg1[%c0, %c0_0] : memref<16x32xf32, #tpu.memory_space<vmem>>, vector<16x32xf32>
    %cst = arith.constant dense<0.000000e+00> : vector<16xf32>
    %1 = vector.multi_reduction <add>, %0, %cst [1] : vector<16x32xf32> to vector<16xf32>
    %2 = vector.shape_cast %1 : vector<16xf32> to vector<16x1xf32>
    %cst_1 = arith.constant 3.200000e+01 : f32
    %3 = vector.broadcast %cst_1 : f32 to vector<16x1xf32>
    %4 = arith.divf %2, %3 : vector<16x1xf32>
    %5 = vector.broadcast %4 : vector<16x1xf32> to vector<16x32xf32>
    %6 = arith.subf %0, %5 : vector<16x32xf32>
    %7 = arith.mulf %6, %6 : vector<16x32xf32>
    %cst_2 = arith.constant dense<0.000000e+00> : vector<16xf32>
    %8 = vector.multi_reduction <add>, %7, %cst_2 [1] : vector<16x32xf32> to vector<16xf32>
    %9 = vector.shape_cast %8 : vector<16xf32> to vector<16x1xf32>
    %cst_3 = arith.constant 3.200000e+01 : f32
    %10 = vector.broadcast %cst_3 : f32 to vector<16x1xf32>
    %11 = arith.divf %9, %10 : vector<16x1xf32>
    %12 = vector.broadcast %4 : vector<16x1xf32> to vector<16x32xf32>
    %13 = arith.subf %0, %12 : vector<16x32xf32>
    %cst_4 = arith.constant 9.99999974E-6 : f32
    %14 = vector.broadcast %cst_4 : f32 to vector<16x1xf32>
    %15 = arith.addf %11, %14 : vector<16x1xf32>
    %16 = math.rsqrt %15 : vector<16x1xf32>
    %17 = vector.broadcast %16 : vector<16x1xf32> to vector<16x32xf32>
    %18 = arith.mulf %13, %17 : vector<16x32xf32>
    %c0_5 = arith.constant 0 : index
    %c0_6 = arith.constant 0 : index
    %19 = vector.load %arg2[%c0_5, %c0_6] : memref<1x32xf32, #tpu.memory_space<vmem>>, vector<1x32xf32>
    %20 = vector.broadcast %19 : vector<1x32xf32> to vector<16x32xf32>
    %21 = arith.mulf %18, %20 : vector<16x32xf32>
    %c0_7 = arith.constant 0 : index
    %c0_8 = arith.constant 0 : index
    %22 = vector.load %arg3[%c0_7, %c0_8] : memref<1x32xf32, #tpu.memory_space<vmem>>, vector<1x32xf32>
    %23 = vector.broadcast %22 : vector<1x32xf32> to vector<16x32xf32>
    %24 = arith.addf %21, %23 : vector<16x32xf32>
    %c0_9 = arith.constant 0 : index
    %c0_10 = arith.constant 0 : index
    %25 = vector.load %arg4[%c0_9, %c0_10] : memref<16x32xf32, #tpu.memory_space<vmem>>, vector<16x32xf32>
    tpu.vector_store %arg4[%c0_9, %c0_10], %24 {strides = array<i32>} : memref<16x32xf32, #tpu.memory_space<vmem>>, vector<16x32xf32>,
    return
  }
  func.func @transform_0(%arg0: i32) -> (i32, i32) {
    %c0_i32 = arith.constant 0 : i32
    %c0_i32_0 = arith.constant 0 : i32
    return %arg0, %c0_i32 : i32, i32
  }
  func.func @transform_1(%arg0: i32) -> (i32, i32) {
    %c0_i32 = arith.constant 0 : i32
    %c0_i32_0 = arith.constant 0 : i32
    %c0_i32_1 = arith.constant 0 : i32
    return %c0_i32, %c0_i32_0 : i32, i32
  }
  func.func @transform_2(%arg0: i32) -> (i32, i32) {
    %c0_i32 = arith.constant 0 : i32
    %c0_i32_0 = arith.constant 0 : i32
    %c0_i32_1 = arith.constant 0 : i32
    return %c0_i32, %c0_i32_0 : i32, i32
  }
  func.func @transform_3(%arg0: i32) -> (i32, i32) {
    %c0_i32 = arith.constant 0 : i32
    %c0_i32_0 = arith.constant 0 : i32
    return %arg0, %c0_i32 : i32, i32
  }
}

module attributes {stable_mosaic.version = 11 : i64} {
  func.func @_ln_geglu_ffn_kernel(%arg0: i32, %arg1: i32, %arg2: memref<16x32xf32, #tpu.memory_space<vmem>>, %arg3: memref<1x32xf32, #tpu.memory_space<vmem>>, %arg4: memref<1x32xf32, #tpu.memory_space<vmem>>, %arg5: memref<32x128xbf16, #tpu.memory_space<vmem>>, %arg6: memref<1x128xf32, #tpu.memory_space<vmem>>, %arg7: memref<32x128xbf16, #tpu.memory_space<vmem>>, %arg8: memref<1x128xf32, #tpu.memory_space<vmem>>, %arg9: memref<128x32xbf16, #tpu.memory_space<vmem>>, %arg10: memref<1x32xf32, #tpu.memory_space<vmem>>, %arg11: memref<16x32xf32, #tpu.memory_space<vmem>>, %arg12: memref<16x32xf32, #tpu.memory_space<vmem>>, %arg13: memref<16x32xf32, #tpu.memory_space<vmem>>) attributes {dimension_semantics = [#tpu.dimension_semantics<parallel>, #tpu.dimension_semantics<arbitrary>], iteration_bounds = array<i64: 1, 1>, scalar_prefetch = 0 : i64, scratch_operands = 2 : i64, tpu.core_type = #tpu.core_type<tc>, window_params = [{transform_indices = @transform_0, window_bounds = array<i64: 16, 32>}, {pipeline_mode = #tpu.pipeline_mode<synchronous>, transform_indices = @transform_1, window_bounds = array<i64: 1, 32>}, {pipeline_mode = #tpu.pipeline_mode<synchronous>, transform_indices = @transform_2, window_bounds = array<i64: 1, 32>}, {transform_indices = @transform_3, window_bounds = array<i64: 32, 128>}, {transform_indices = @transform_4, window_bounds = array<i64: 1, 128>}, {transform_indices = @transform_5, window_bounds = array<i64: 32, 128>}, {transform_indices = @transform_6, window_bounds = array<i64: 1, 128>}, {transform_indices = @transform_7, window_bounds = array<i64: 128, 32>}, {pipeline_mode = #tpu.pipeline_mode<synchronous>, transform_indices = @transform_8, window_bounds = array<i64: 1, 32>}, {transform_indices = @transform_9, window_bounds = array<i64: 16, 32>}]} {
    %c0_i32 = arith.constant 0 : i32
    %0 = arith.cmpi eq, %arg1, %c0_i32 : i32
    %1 = arith.extui %0 : i1 to i32
    %c0_i32_0 = arith.constant 0 : i32
    %2 = arith.cmpi ne, %1, %c0_i32_0 : i32
    scf.if %2 {
      %c0_24 = arith.constant 0 : index
      %c0_25 = arith.constant 0 : index
      %38 = vector.load %arg2[%c0_24, %c0_25] : memref<16x32xf32, #tpu.memory_space<vmem>>, vector<16x32xf32>
      %cst_26 = arith.constant dense<0.000000e+00> : vector<16xf32>
      %39 = vector.multi_reduction <add>, %38, %cst_26 [1] : vector<16x32xf32> to vector<16xf32>
      %40 = vector.shape_cast %39 : vector<16xf32> to vector<16x1xf32>
      %cst_27 = arith.constant 3.200000e+01 : f32
      %41 = vector.broadcast %cst_27 : f32 to vector<16x1xf32>
      %42 = arith.divf %40, %41 : vector<16x1xf32>
      %43 = vector.broadcast %42 : vector<16x1xf32> to vector<16x32xf32>
      %44 = arith.subf %38, %43 : vector<16x32xf32>
      %45 = arith.mulf %44, %44 : vector<16x32xf32>
      %cst_28 = arith.constant dense<0.000000e+00> : vector<16xf32>
      %46 = vector.multi_reduction <add>, %45, %cst_28 [1] : vector<16x32xf32> to vector<16xf32>
      %47 = vector.shape_cast %46 : vector<16xf32> to vector<16x1xf32>
      %cst_29 = arith.constant 3.200000e+01 : f32
      %48 = vector.broadcast %cst_29 : f32 to vector<16x1xf32>
      %49 = arith.divf %47, %48 : vector<16x1xf32>
      %50 = vector.broadcast %42 : vector<16x1xf32> to vector<16x32xf32>
      %51 = arith.subf %38, %50 : vector<16x32xf32>
      %cst_30 = arith.constant 9.99999974E-6 : f32
      %52 = vector.broadcast %cst_30 : f32 to vector<16x1xf32>
      %53 = arith.addf %49, %52 : vector<16x1xf32>
      %54 = math.rsqrt %53 : vector<16x1xf32>
      %55 = vector.broadcast %54 : vector<16x1xf32> to vector<16x32xf32>
      %56 = arith.mulf %51, %55 : vector<16x32xf32>
      %c0_31 = arith.constant 0 : index
      %c0_32 = arith.constant 0 : index
      %57 = vector.load %arg3[%c0_31, %c0_32] : memref<1x32xf32, #tpu.memory_space<vmem>>, vector<1x32xf32>
      %58 = vector.broadcast %57 : vector<1x32xf32> to vector<16x32xf32>
      %59 = arith.mulf %56, %58 : vector<16x32xf32>
      %c0_33 = arith.constant 0 : index
      %c0_34 = arith.constant 0 : index
      %60 = vector.load %arg4[%c0_33, %c0_34] : memref<1x32xf32, #tpu.memory_space<vmem>>, vector<1x32xf32>
      %61 = vector.broadcast %60 : vector<1x32xf32> to vector<16x32xf32>
      %62 = arith.addf %59, %61 : vector<16x32xf32>
      %c0_35 = arith.constant 0 : index
      %c0_36 = arith.constant 0 : index
      %63 = vector.load %arg13[%c0_35, %c0_36] : memref<16x32xf32, #tpu.memory_space<vmem>>, vector<16x32xf32>
      tpu.vector_store %arg13[%c0_35, %c0_36], %62 {strides = array<i32>} : memref<16x32xf32, #tpu.memory_space<vmem>>, vector<16x32xf32>,
      %cst_37 = arith.constant 0.000000e+00 : f32
      %64 = vector.broadcast %cst_37 : f32 to vector<16x32xf32>
      %c0_38 = arith.constant 0 : index
      %c0_39 = arith.constant 0 : index
      %65 = vector.load %arg12[%c0_38, %c0_39] : memref<16x32xf32, #tpu.memory_space<vmem>>, vector<16x32xf32>
      tpu.vector_store %arg12[%c0_38, %c0_39], %64 {strides = array<i32>} : memref<16x32xf32, #tpu.memory_space<vmem>>, vector<16x32xf32>,
    } else {
    }
    %c0 = arith.constant 0 : index
    %c0_1 = arith.constant 0 : index
    %3 = vector.load %arg13[%c0, %c0_1] : memref<16x32xf32, #tpu.memory_space<vmem>>, vector<16x32xf32>
    %4 = arith.truncf %3 : vector<16x32xf32> to vector<16x32xbf16>
    %c0_2 = arith.constant 0 : index
    %c0_3 = arith.constant 0 : index
    %5 = vector.load %arg5[%c0_2, %c0_3] : memref<32x128xbf16, #tpu.memory_space<vmem>>, vector<32x128xbf16>
    %cst = arith.constant dense<0.000000e+00> : vector<16x128xf32>
    %6 = tpu.matmul %4, %5, %cst {dimension_numbers = #tpu.dot_dimension_numbers<[1], [0], [0], [1], [0, 0, 1, 1], [], []>} : vector<16x32xbf16>, vector<32x128xbf16>, vector<16x128xf32> -> vector<16x128xf32>
    %c0_4 = arith.constant 0 : index
    %c0_5 = arith.constant 0 : index
    %7 = vector.load %arg6[%c0_4, %c0_5] : memref<1x128xf32, #tpu.memory_space<vmem>>, vector<1x128xf32>
    %8 = vector.broadcast %7 : vector<1x128xf32> to vector<16x128xf32>
    %9 = arith.addf %6, %8 : vector<16x128xf32>
    %c0_6 = arith.constant 0 : index
    %c0_7 = arith.constant 0 : index
    %10 = vector.load %arg7[%c0_6, %c0_7] : memref<32x128xbf16, #tpu.memory_space<vmem>>, vector<32x128xbf16>
    %cst_8 = arith.constant dense<0.000000e+00> : vector<16x128xf32>
    %11 = tpu.matmul %4, %10, %cst_8 {dimension_numbers = #tpu.dot_dimension_numbers<[1], [0], [0], [1], [0, 0, 1, 1], [], []>} : vector<16x32xbf16>, vector<32x128xbf16>, vector<16x128xf32> -> vector<16x128xf32>
    %c0_9 = arith.constant 0 : index
    %c0_10 = arith.constant 0 : index
    %12 = vector.load %arg8[%c0_9, %c0_10] : memref<1x128xf32, #tpu.memory_space<vmem>>, vector<1x128xf32>
    %13 = vector.broadcast %12 : vector<1x128xf32> to vector<16x128xf32>
    %14 = arith.addf %11, %13 : vector<16x128xf32>
    %15 = arith.mulf %14, %14 : vector<16x128xf32>
    %16 = arith.mulf %14, %15 : vector<16x128xf32>
    %cst_11 = arith.constant 4.471500e-02 : f32
    %17 = vector.broadcast %cst_11 : f32 to vector<16x128xf32>
    %18 = arith.mulf %17, %16 : vector<16x128xf32>
    %19 = arith.addf %14, %18 : vector<16x128xf32>
    %cst_12 = arith.constant 0.797884583 : f32
    %20 = vector.broadcast %cst_12 : f32 to vector<16x128xf32>
    %21 = arith.mulf %20, %19 : vector<16x128xf32>
    %22 = math.tanh %21 : vector<16x128xf32>
    %cst_13 = arith.constant 1.000000e+00 : f32
    %23 = vector.broadcast %cst_13 : f32 to vector<16x128xf32>
    %24 = arith.addf %23, %22 : vector<16x128xf32>
    %cst_14 = arith.constant 5.000000e-01 : f32
    %25 = vector.broadcast %cst_14 : f32 to vector<16x128xf32>
    %26 = arith.mulf %25, %24 : vector<16x128xf32>
    %27 = arith.mulf %14, %26 : vector<16x128xf32>
    %28 = arith.mulf %9, %27 : vector<16x128xf32>
    %29 = arith.truncf %28 : vector<16x128xf32> to vector<16x128xbf16>
    %c0_15 = arith.constant 0 : index
    %c0_16 = arith.constant 0 : index
    %30 = vector.load %arg12[%c0_15, %c0_16] : memref<16x32xf32, #tpu.memory_space<vmem>>, vector<16x32xf32>
    %c0_17 = arith.constant 0 : index
    %c0_18 = arith.constant 0 : index
    %31 = vector.load %arg9[%c0_17, %c0_18] : memref<128x32xbf16, #tpu.memory_space<vmem>>, vector<128x32xbf16>
    %cst_19 = arith.constant dense<0.000000e+00> : vector<16x32xf32>
    %32 = tpu.matmul %29, %31, %cst_19 {dimension_numbers = #tpu.dot_dimension_numbers<[1], [0], [0], [1], [0, 0, 1, 1], [], []>} : vector<16x128xbf16>, vector<128x32xbf16>, vector<16x32xf32> -> vector<16x32xf32>
    %33 = arith.addf %30, %32 : vector<16x32xf32>
    %c0_20 = arith.constant 0 : index
    %c0_21 = arith.constant 0 : index
    %34 = vector.load %arg12[%c0_20, %c0_21] : memref<16x32xf32, #tpu.memory_space<vmem>>, vector<16x32xf32>
    tpu.vector_store %arg12[%c0_20, %c0_21], %33 {strides = array<i32>} : memref<16x32xf32, #tpu.memory_space<vmem>>, vector<16x32xf32>,
    %c0_i32_22 = arith.constant 0 : i32
    %35 = arith.cmpi eq, %arg1, %c0_i32_22 : i32
    %36 = arith.extui %35 : i1 to i32
    %c0_i32_23 = arith.constant 0 : i32
    %37 = arith.cmpi ne, %36, %c0_i32_23 : i32
    scf.if %37 {
      %c0_24 = arith.constant 0 : index
      %c0_25 = arith.constant 0 : index
      %38 = vector.load %arg12[%c0_24, %c0_25] : memref<16x32xf32, #tpu.memory_space<vmem>>, vector<16x32xf32>
      %c0_26 = arith.constant 0 : index
      %c0_27 = arith.constant 0 : index
      %39 = vector.load %arg10[%c0_26, %c0_27] : memref<1x32xf32, #tpu.memory_space<vmem>>, vector<1x32xf32>
      %40 = vector.broadcast %39 : vector<1x32xf32> to vector<16x32xf32>
      %41 = arith.addf %38, %40 : vector<16x32xf32>
      %c0_28 = arith.constant 0 : index
      %c0_29 = arith.constant 0 : index
      %42 = vector.load %arg2[%c0_28, %c0_29] : memref<16x32xf32, #tpu.memory_space<vmem>>, vector<16x32xf32>
      %43 = arith.addf %41, %42 : vector<16x32xf32>
      %c0_30 = arith.constant 0 : index
      %c0_31 = arith.constant 0 : index
      %44 = vector.load %arg11[%c0_30, %c0_31] : memref<16x32xf32, #tpu.memory_space<vmem>>, vector<16x32xf32>
      tpu.vector_store %arg11[%c0_30, %c0_31], %43 {strides = array<i32>} : memref<16x32xf32, #tpu.memory_space<vmem>>, vector<16x32xf32>,
    } else {
    }
    return
  }
  func.func @transform_0(%arg0: i32, %arg1: i32) -> (i32, i32) {
    %c0_i32 = arith.constant 0 : i32
    %c0_i32_0 = arith.constant 0 : i32
    return %arg0, %c0_i32 : i32, i32
  }
  func.func @transform_1(%arg0: i32, %arg1: i32) -> (i32, i32) {
    %c0_i32 = arith.constant 0 : i32
    %c0_i32_0 = arith.constant 0 : i32
    %c0_i32_1 = arith.constant 0 : i32
    return %c0_i32, %c0_i32_0 : i32, i32
  }
  func.func @transform_2(%arg0: i32, %arg1: i32) -> (i32, i32) {
    %c0_i32 = arith.constant 0 : i32
    %c0_i32_0 = arith.constant 0 : i32
    %c0_i32_1 = arith.constant 0 : i32
    return %c0_i32, %c0_i32_0 : i32, i32
  }
  func.func @transform_3(%arg0: i32, %arg1: i32) -> (i32, i32) {
    %c0_i32 = arith.constant 0 : i32
    %c0_i32_0 = arith.constant 0 : i32
    return %c0_i32, %arg1 : i32, i32
  }
  func.func @transform_4(%arg0: i32, %arg1: i32) -> (i32, i32) {
    %c0_i32 = arith.constant 0 : i32
    %c0_i32_0 = arith.constant 0 : i32
    return %c0_i32, %arg1 : i32, i32
  }
  func.func @transform_5(%arg0: i32, %arg1: i32) -> (i32, i32) {
    %c0_i32 = arith.constant 0 : i32
    %c0_i32_0 = arith.constant 0 : i32
    return %c0_i32, %arg1 : i32, i32
  }
  func.func @transform_6(%arg0: i32, %arg1: i32) -> (i32, i32) {
    %c0_i32 = arith.constant 0 : i32
    %c0_i32_0 = arith.constant 0 : i32
    return %c0_i32, %arg1 : i32, i32
  }
  func.func @transform_7(%arg0: i32, %arg1: i32) -> (i32, i32) {
    %c0_i32 = arith.constant 0 : i32
    %c0_i32_0 = arith.constant 0 : i32
    return %arg1, %c0_i32 : i32, i32
  }
  func.func @transform_8(%arg0: i32, %arg1: i32) -> (i32, i32) {
    %c0_i32 = arith.constant 0 : i32
    %c0_i32_0 = arith.constant 0 : i32
    %c0_i32_1 = arith.constant 0 : i32
    return %c0_i32, %c0_i32_0 : i32, i32
  }
  func.func @transform_9(%arg0: i32, %arg1: i32) -> (i32, i32) {
    %c0_i32 = arith.constant 0 : i32
    %c0_i32_0 = arith.constant 0 : i32
    return %arg0, %c0_i32 : i32, i32
  }
}

module attributes {stable_mosaic.version = 11 : i64} {
  func.func @_fused_rel_attention_kernel(%arg0: i32, %arg1: i32, %arg2: memref<1x8x32xf32, #tpu.memory_space<vmem>>, %arg3: memref<1x12x64xf32, #tpu.memory_space<vmem>>, %arg4: memref<7x32xf32, #tpu.memory_space<vmem>>, %arg5: memref<15x32xf32, #tpu.memory_space<vmem>>, %arg6: memref<8x12xi32, #tpu.memory_space<vmem>>, %arg7: memref<8x12xi32, #tpu.memory_space<vmem>>, %arg8: memref<1x1x12xf32, #tpu.memory_space<vmem>>, %arg9: memref<1x8x32xf32, #tpu.memory_space<vmem>>, %arg10: memref<32x32xbf16, #tpu.memory_space<vmem>>, %arg11: memref<1x32xf32, #tpu.memory_space<vmem>>, %arg12: memref<1x8x32xf32, #tpu.memory_space<vmem>>) attributes {dimension_semantics = [#tpu.dimension_semantics<parallel>, #tpu.dimension_semantics<parallel>], iteration_bounds = array<i64: 2, 1>, scalar_prefetch = 0 : i64, scratch_operands = 0 : i64, tpu.core_type = #tpu.core_type<tc>, window_params = [{transform_indices = @transform_0, window_bounds = array<i64: 1, 8, 32>}, {transform_indices = @transform_1, window_bounds = array<i64: 1, 12, 64>}, {pipeline_mode = #tpu.pipeline_mode<synchronous>, transform_indices = @transform_2, window_bounds = array<i64: 7, 32>}, {pipeline_mode = #tpu.pipeline_mode<synchronous>, transform_indices = @transform_3, window_bounds = array<i64: 15, 32>}, {transform_indices = @transform_4, window_bounds = array<i64: 8, 12>}, {transform_indices = @transform_5, window_bounds = array<i64: 8, 12>}, {transform_indices = @transform_6, window_bounds = array<i64: 1, 1, 12>}, {transform_indices = @transform_7, window_bounds = array<i64: 1, 8, 32>}, {pipeline_mode = #tpu.pipeline_mode<synchronous>, transform_indices = @transform_8, window_bounds = array<i64: 32, 32>}, {pipeline_mode = #tpu.pipeline_mode<synchronous>, transform_indices = @transform_9, window_bounds = array<i64: 1, 32>}, {transform_indices = @transform_10, window_bounds = array<i64: 1, 8, 32>}]} {
    %c0 = arith.constant 0 : index
    %c0_0 = arith.constant 0 : index
    %c0_1 = arith.constant 0 : index
    %0 = vector.load %arg8[%c0, %c0_0, %c0_1] : memref<1x1x12xf32, #tpu.memory_space<vmem>>, vector<1x1x12xf32>
    %1 = vector.shape_cast %0 : vector<1x1x12xf32> to vector<1x12xf32>
    %cst = arith.constant 5.000000e-01 : f32
    %2 = vector.broadcast %cst : f32 to vector<1x12xf32>
    %3 = arith.cmpf ogt, %1, %2 : vector<1x12xf32>
    %cst_2 = arith.constant -1.000000e+30 : f32
    %cst_3 = arith.constant 0.000000e+00 : f32
    %4 = vector.broadcast %cst_2 : f32 to vector<1x12xf32>
    %5 = vector.broadcast %cst_3 : f32 to vector<1x12xf32>
    %6 = arith.select %3, %4, %5 : vector<1x12xi1>, vector<1x12xf32>
    %7 = vector.shape_cast %6 : vector<1x12xf32> to vector<1x12xf32>
    %8 = vector.broadcast %7 : vector<1x12xf32> to vector<8x12xf32>
    %c0_4 = arith.constant 0 : index
    %c0_5 = arith.constant 0 : index
    %9 = vector.load %arg6[%c0_4, %c0_5] : memref<8x12xi32, #tpu.memory_space<vmem>>, vector<8x12xi32>
    %c0_6 = arith.constant 0 : index
    %c0_7 = arith.constant 0 : index
    %10 = vector.load %arg7[%c0_6, %c0_7] : memref<8x12xi32, #tpu.memory_space<vmem>>, vector<8x12xi32>
    %c0_i32 = arith.constant 0 : i32
    %11 = vector.broadcast %c0_i32 : i32 to vector<8x12xi32>
    %12 = arith.cmpi eq, %10, %11 : vector<8x12xi32>
    %c1_i32 = arith.constant 1 : i32
    %13 = vector.broadcast %c1_i32 : i32 to vector<8x12xi32>
    %14 = arith.cmpi eq, %10, %13 : vector<8x12xi32>
    %c2_i32 = arith.constant 2 : i32
    %15 = vector.broadcast %c2_i32 : i32 to vector<8x12xi32>
    %16 = arith.cmpi eq, %10, %15 : vector<8x12xi32>
    %c3_i32 = arith.constant 3 : i32
    %17 = vector.broadcast %c3_i32 : i32 to vector<8x12xi32>
    %18 = arith.cmpi eq, %10, %17 : vector<8x12xi32>
    %c4_i32 = arith.constant 4 : i32
    %19 = vector.broadcast %c4_i32 : i32 to vector<8x12xi32>
    %20 = arith.cmpi eq, %10, %19 : vector<8x12xi32>
    %c5_i32 = arith.constant 5 : i32
    %21 = vector.broadcast %c5_i32 : i32 to vector<8x12xi32>
    %22 = arith.cmpi eq, %10, %21 : vector<8x12xi32>
    %c6_i32 = arith.constant 6 : i32
    %23 = vector.broadcast %c6_i32 : i32 to vector<8x12xi32>
    %24 = arith.cmpi eq, %10, %23 : vector<8x12xi32>
    %c7_i32 = arith.constant 7 : i32
    %25 = vector.broadcast %c7_i32 : i32 to vector<8x12xi32>
    %26 = arith.cmpi eq, %10, %25 : vector<8x12xi32>
    %c8_i32 = arith.constant 8 : i32
    %27 = vector.broadcast %c8_i32 : i32 to vector<8x12xi32>
    %28 = arith.cmpi eq, %10, %27 : vector<8x12xi32>
    %c9_i32 = arith.constant 9 : i32
    %29 = vector.broadcast %c9_i32 : i32 to vector<8x12xi32>
    %30 = arith.cmpi eq, %10, %29 : vector<8x12xi32>
    %c10_i32 = arith.constant 10 : i32
    %31 = vector.broadcast %c10_i32 : i32 to vector<8x12xi32>
    %32 = arith.cmpi eq, %10, %31 : vector<8x12xi32>
    %c11_i32 = arith.constant 11 : i32
    %33 = vector.broadcast %c11_i32 : i32 to vector<8x12xi32>
    %34 = arith.cmpi eq, %10, %33 : vector<8x12xi32>
    %c12_i32 = arith.constant 12 : i32
    %35 = vector.broadcast %c12_i32 : i32 to vector<8x12xi32>
    %36 = arith.cmpi eq, %10, %35 : vector<8x12xi32>
    %c13_i32 = arith.constant 13 : i32
    %37 = vector.broadcast %c13_i32 : i32 to vector<8x12xi32>
    %38 = arith.cmpi eq, %10, %37 : vector<8x12xi32>
    %c14_i32 = arith.constant 14 : i32
    %39 = vector.broadcast %c14_i32 : i32 to vector<8x12xi32>
    %40 = arith.cmpi eq, %10, %39 : vector<8x12xi32>
    %c0_i32_8 = arith.constant 0 : i32
    %41 = vector.broadcast %c0_i32_8 : i32 to vector<8x12xi32>
    %42 = arith.cmpi eq, %9, %41 : vector<8x12xi32>
    %c1_i32_9 = arith.constant 1 : i32
    %43 = vector.broadcast %c1_i32_9 : i32 to vector<8x12xi32>
    %44 = arith.cmpi eq, %9, %43 : vector<8x12xi32>
    %c2_i32_10 = arith.constant 2 : i32
    %45 = vector.broadcast %c2_i32_10 : i32 to vector<8x12xi32>
    %46 = arith.cmpi eq, %9, %45 : vector<8x12xi32>
    %c3_i32_11 = arith.constant 3 : i32
    %47 = vector.broadcast %c3_i32_11 : i32 to vector<8x12xi32>
    %48 = arith.cmpi eq, %9, %47 : vector<8x12xi32>
    %c4_i32_12 = arith.constant 4 : i32
    %49 = vector.broadcast %c4_i32_12 : i32 to vector<8x12xi32>
    %50 = arith.cmpi eq, %9, %49 : vector<8x12xi32>
    %c5_i32_13 = arith.constant 5 : i32
    %51 = vector.broadcast %c5_i32_13 : i32 to vector<8x12xi32>
    %52 = arith.cmpi eq, %9, %51 : vector<8x12xi32>
    %c6_i32_14 = arith.constant 6 : i32
    %53 = vector.broadcast %c6_i32_14 : i32 to vector<8x12xi32>
    %54 = arith.cmpi eq, %9, %53 : vector<8x12xi32>
    %c0_15 = arith.constant 0 : index
    %c0_16 = arith.constant 0 : index
    %c0_17 = arith.constant 0 : index
    %55 = vector.load %arg9[%c0_15, %c0_16, %c0_17] : memref<1x8x32xf32, #tpu.memory_space<vmem>>, vector<1x8x32xf32>
    %56 = vector.shape_cast %55 : vector<1x8x32xf32> to vector<8x32xf32>
    %c0_18 = arith.constant 0 : index
    %c0_19 = arith.constant 0 : index
    %57 = vector.load %arg11[%c0_18, %c0_19] : memref<1x32xf32, #tpu.memory_space<vmem>>, vector<1x32xf32>
    %58 = vector.broadcast %57 : vector<1x32xf32> to vector<8x32xf32>
    %59 = arith.addf %56, %58 : vector<8x32xf32>
    %c0_20 = arith.constant 0 : index
    %c0_21 = arith.constant 0 : index
    %c0_22 = arith.constant 0 : index
    %60 = vector.load %arg2[%c0_20, %c0_21, %c0_22] : memref<1x8x32xf32, #tpu.memory_space<vmem>>, vector<1x8x8xf32>
    %61 = vector.shape_cast %60 : vector<1x8x8xf32> to vector<8x8xf32>
    %cst_23 = arith.constant 0.353553385 : f32
    %62 = vector.broadcast %cst_23 : f32 to vector<8x8xf32>
    %63 = arith.mulf %61, %62 : vector<8x8xf32>
    %64 = arith.truncf %63 : vector<8x8xf32> to vector<8x8xbf16>
    %c0_24 = arith.constant 0 : index
    %c0_25 = arith.constant 0 : index
    %c0_26 = arith.constant 0 : index
    %65 = vector.load %arg3[%c0_24, %c0_25, %c0_26] : memref<1x12x64xf32, #tpu.memory_space<vmem>>, vector<1x12x8xf32>
    %66 = vector.shape_cast %65 : vector<1x12x8xf32> to vector<12x8xf32>
    %67 = arith.truncf %66 : vector<12x8xf32> to vector<12x8xbf16>
    %c0_27 = arith.constant 0 : index
    %c0_28 = arith.constant 0 : index
    %68 = vector.load %arg4[%c0_27, %c0_28] : memref<7x32xf32, #tpu.memory_space<vmem>>, vector<7x8xf32>
    %cst_29 = arith.constant 0.353553385 : f32
    %69 = vector.broadcast %cst_29 : f32 to vector<7x8xf32>
    %70 = arith.mulf %68, %69 : vector<7x8xf32>
    %71 = arith.truncf %70 : vector<7x8xf32> to vector<7x8xbf16>
    %c0_30 = arith.constant 0 : index
    %c0_31 = arith.constant 0 : index
    %72 = vector.load %arg5[%c0_30, %c0_31] : memref<15x32xf32, #tpu.memory_space<vmem>>, vector<15x8xf32>
    %73 = arith.truncf %72 : vector<15x8xf32> to vector<15x8xbf16>
    %cst_32 = arith.constant dense<0.000000e+00> : vector<8x12xf32>
    %74 = tpu.matmul %64, %67, %cst_32 {dimension_numbers = #tpu.dot_dimension_numbers<[1], [1], [0], [0], [0, 0, 1, 0], [], []>} : vector<8x8xbf16>, vector<12x8xbf16>, vector<8x12xf32> -> vector<8x12xf32>
    %cst_33 = arith.constant dense<0.000000e+00> : vector<8x15xf32>
    %75 = tpu.matmul %64, %73, %cst_33 {dimension_numbers = #tpu.dot_dimension_numbers<[1], [1], [0], [0], [0, 0, 1, 0], [], []>} : vector<8x8xbf16>, vector<15x8xbf16>, vector<8x15xf32> -> vector<8x15xf32>
    %cst_34 = arith.constant dense<0.000000e+00> : vector<7x12xf32>
    %76 = tpu.matmul %71, %67, %cst_34 {dimension_numbers = #tpu.dot_dimension_numbers<[1], [1], [0], [0], [0, 0, 1, 0], [], []>} : vector<7x8xbf16>, vector<12x8xbf16>, vector<7x12xf32> -> vector<7x12xf32>
    %77 = vector.extract_strided_slice %75 {offsets = [0, 0], sizes = [8, 1], strides = [1, 1]} : vector<8x15xf32> to vector<8x1xf32>
    %cst_35 = arith.constant 0.000000e+00 : f32
    %78 = vector.shape_cast %77 : vector<8x1xf32> to vector<8x1xf32>
    %79 = vector.broadcast %78 : vector<8x1xf32> to vector<8x12xf32>
    %80 = vector.broadcast %cst_35 : f32 to vector<8x12xf32>
    %81 = arith.select %12, %79, %80 : vector<8x12xi1>, vector<8x12xf32>
    %82 = arith.addf %74, %81 : vector<8x12xf32>
    %83 = vector.extract_strided_slice %75 {offsets = [0, 1], sizes = [8, 1], strides = [1, 1]} : vector<8x15xf32> to vector<8x1xf32>
    %cst_36 = arith.constant 0.000000e+00 : f32
    %84 = vector.shape_cast %83 : vector<8x1xf32> to vector<8x1xf32>
    %85 = vector.broadcast %84 : vector<8x1xf32> to vector<8x12xf32>
    %86 = vector.broadcast %cst_36 : f32 to vector<8x12xf32>
    %87 = arith.select %14, %85, %86 : vector<8x12xi1>, vector<8x12xf32>
    %88 = arith.addf %82, %87 : vector<8x12xf32>
    %89 = vector.extract_strided_slice %75 {offsets = [0, 2], sizes = [8, 1], strides = [1, 1]} : vector<8x15xf32> to vector<8x1xf32>
    %cst_37 = arith.constant 0.000000e+00 : f32
    %90 = vector.shape_cast %89 : vector<8x1xf32> to vector<8x1xf32>
    %91 = vector.broadcast %90 : vector<8x1xf32> to vector<8x12xf32>
    %92 = vector.broadcast %cst_37 : f32 to vector<8x12xf32>
    %93 = arith.select %16, %91, %92 : vector<8x12xi1>, vector<8x12xf32>
    %94 = arith.addf %88, %93 : vector<8x12xf32>
    %95 = vector.extract_strided_slice %75 {offsets = [0, 3], sizes = [8, 1], strides = [1, 1]} : vector<8x15xf32> to vector<8x1xf32>
    %cst_38 = arith.constant 0.000000e+00 : f32
    %96 = vector.shape_cast %95 : vector<8x1xf32> to vector<8x1xf32>
    %97 = vector.broadcast %96 : vector<8x1xf32> to vector<8x12xf32>
    %98 = vector.broadcast %cst_38 : f32 to vector<8x12xf32>
    %99 = arith.select %18, %97, %98 : vector<8x12xi1>, vector<8x12xf32>
    %100 = arith.addf %94, %99 : vector<8x12xf32>
    %101 = vector.extract_strided_slice %75 {offsets = [0, 4], sizes = [8, 1], strides = [1, 1]} : vector<8x15xf32> to vector<8x1xf32>
    %cst_39 = arith.constant 0.000000e+00 : f32
    %102 = vector.shape_cast %101 : vector<8x1xf32> to vector<8x1xf32>
    %103 = vector.broadcast %102 : vector<8x1xf32> to vector<8x12xf32>
    %104 = vector.broadcast %cst_39 : f32 to vector<8x12xf32>
    %105 = arith.select %20, %103, %104 : vector<8x12xi1>, vector<8x12xf32>
    %106 = arith.addf %100, %105 : vector<8x12xf32>
    %107 = vector.extract_strided_slice %75 {offsets = [0, 5], sizes = [8, 1], strides = [1, 1]} : vector<8x15xf32> to vector<8x1xf32>
    %cst_40 = arith.constant 0.000000e+00 : f32
    %108 = vector.shape_cast %107 : vector<8x1xf32> to vector<8x1xf32>
    %109 = vector.broadcast %108 : vector<8x1xf32> to vector<8x12xf32>
    %110 = vector.broadcast %cst_40 : f32 to vector<8x12xf32>
    %111 = arith.select %22, %109, %110 : vector<8x12xi1>, vector<8x12xf32>
    %112 = arith.addf %106, %111 : vector<8x12xf32>
    %113 = vector.extract_strided_slice %75 {offsets = [0, 6], sizes = [8, 1], strides = [1, 1]} : vector<8x15xf32> to vector<8x1xf32>
    %cst_41 = arith.constant 0.000000e+00 : f32
    %114 = vector.shape_cast %113 : vector<8x1xf32> to vector<8x1xf32>
    %115 = vector.broadcast %114 : vector<8x1xf32> to vector<8x12xf32>
    %116 = vector.broadcast %cst_41 : f32 to vector<8x12xf32>
    %117 = arith.select %24, %115, %116 : vector<8x12xi1>, vector<8x12xf32>
    %118 = arith.addf %112, %117 : vector<8x12xf32>
    %119 = vector.extract_strided_slice %75 {offsets = [0, 7], sizes = [8, 1], strides = [1, 1]} : vector<8x15xf32> to vector<8x1xf32>
    %cst_42 = arith.constant 0.000000e+00 : f32
    %120 = vector.shape_cast %119 : vector<8x1xf32> to vector<8x1xf32>
    %121 = vector.broadcast %120 : vector<8x1xf32> to vector<8x12xf32>
    %122 = vector.broadcast %cst_42 : f32 to vector<8x12xf32>
    %123 = arith.select %26, %121, %122 : vector<8x12xi1>, vector<8x12xf32>
    %124 = arith.addf %118, %123 : vector<8x12xf32>
    %125 = vector.extract_strided_slice %75 {offsets = [0, 8], sizes = [8, 1], strides = [1, 1]} : vector<8x15xf32> to vector<8x1xf32>
    %cst_43 = arith.constant 0.000000e+00 : f32
    %126 = vector.shape_cast %125 : vector<8x1xf32> to vector<8x1xf32>
    %127 = vector.broadcast %126 : vector<8x1xf32> to vector<8x12xf32>
    %128 = vector.broadcast %cst_43 : f32 to vector<8x12xf32>
    %129 = arith.select %28, %127, %128 : vector<8x12xi1>, vector<8x12xf32>
    %130 = arith.addf %124, %129 : vector<8x12xf32>
    %131 = vector.extract_strided_slice %75 {offsets = [0, 9], sizes = [8, 1], strides = [1, 1]} : vector<8x15xf32> to vector<8x1xf32>
    %cst_44 = arith.constant 0.000000e+00 : f32
    %132 = vector.shape_cast %131 : vector<8x1xf32> to vector<8x1xf32>
    %133 = vector.broadcast %132 : vector<8x1xf32> to vector<8x12xf32>
    %134 = vector.broadcast %cst_44 : f32 to vector<8x12xf32>
    %135 = arith.select %30, %133, %134 : vector<8x12xi1>, vector<8x12xf32>
    %136 = arith.addf %130, %135 : vector<8x12xf32>
    %137 = vector.extract_strided_slice %75 {offsets = [0, 10], sizes = [8, 1], strides = [1, 1]} : vector<8x15xf32> to vector<8x1xf32>
    %cst_45 = arith.constant 0.000000e+00 : f32
    %138 = vector.shape_cast %137 : vector<8x1xf32> to vector<8x1xf32>
    %139 = vector.broadcast %138 : vector<8x1xf32> to vector<8x12xf32>
    %140 = vector.broadcast %cst_45 : f32 to vector<8x12xf32>
    %141 = arith.select %32, %139, %140 : vector<8x12xi1>, vector<8x12xf32>
    %142 = arith.addf %136, %141 : vector<8x12xf32>
    %143 = vector.extract_strided_slice %75 {offsets = [0, 11], sizes = [8, 1], strides = [1, 1]} : vector<8x15xf32> to vector<8x1xf32>
    %cst_46 = arith.constant 0.000000e+00 : f32
    %144 = vector.shape_cast %143 : vector<8x1xf32> to vector<8x1xf32>
    %145 = vector.broadcast %144 : vector<8x1xf32> to vector<8x12xf32>
    %146 = vector.broadcast %cst_46 : f32 to vector<8x12xf32>
    %147 = arith.select %34, %145, %146 : vector<8x12xi1>, vector<8x12xf32>
    %148 = arith.addf %142, %147 : vector<8x12xf32>
    %149 = vector.extract_strided_slice %75 {offsets = [0, 12], sizes = [8, 1], strides = [1, 1]} : vector<8x15xf32> to vector<8x1xf32>
    %cst_47 = arith.constant 0.000000e+00 : f32
    %150 = vector.shape_cast %149 : vector<8x1xf32> to vector<8x1xf32>
    %151 = vector.broadcast %150 : vector<8x1xf32> to vector<8x12xf32>
    %152 = vector.broadcast %cst_47 : f32 to vector<8x12xf32>
    %153 = arith.select %36, %151, %152 : vector<8x12xi1>, vector<8x12xf32>
    %154 = arith.addf %148, %153 : vector<8x12xf32>
    %155 = vector.extract_strided_slice %75 {offsets = [0, 13], sizes = [8, 1], strides = [1, 1]} : vector<8x15xf32> to vector<8x1xf32>
    %cst_48 = arith.constant 0.000000e+00 : f32
    %156 = vector.shape_cast %155 : vector<8x1xf32> to vector<8x1xf32>
    %157 = vector.broadcast %156 : vector<8x1xf32> to vector<8x12xf32>
    %158 = vector.broadcast %cst_48 : f32 to vector<8x12xf32>
    %159 = arith.select %38, %157, %158 : vector<8x12xi1>, vector<8x12xf32>
    %160 = arith.addf %154, %159 : vector<8x12xf32>
    %161 = vector.extract_strided_slice %75 {offsets = [0, 14], sizes = [8, 1], strides = [1, 1]} : vector<8x15xf32> to vector<8x1xf32>
    %cst_49 = arith.constant 0.000000e+00 : f32
    %162 = vector.shape_cast %161 : vector<8x1xf32> to vector<8x1xf32>
    %163 = vector.broadcast %162 : vector<8x1xf32> to vector<8x12xf32>
    %164 = vector.broadcast %cst_49 : f32 to vector<8x12xf32>
    %165 = arith.select %40, %163, %164 : vector<8x12xi1>, vector<8x12xf32>
    %166 = arith.addf %160, %165 : vector<8x12xf32>
    %167 = vector.extract_strided_slice %76 {offsets = [0, 0], sizes = [1, 12], strides = [1, 1]} : vector<7x12xf32> to vector<1x12xf32>
    %cst_50 = arith.constant 0.000000e+00 : f32
    %168 = vector.shape_cast %167 : vector<1x12xf32> to vector<1x12xf32>
    %169 = vector.broadcast %168 : vector<1x12xf32> to vector<8x12xf32>
    %170 = vector.broadcast %cst_50 : f32 to vector<8x12xf32>
    %171 = arith.select %42, %169, %170 : vector<8x12xi1>, vector<8x12xf32>
    %172 = arith.addf %166, %171 : vector<8x12xf32>
    %173 = vector.extract_strided_slice %76 {offsets = [1, 0], sizes = [1, 12], strides = [1, 1]} : vector<7x12xf32> to vector<1x12xf32>
    %cst_51 = arith.constant 0.000000e+00 : f32
    %174 = vector.shape_cast %173 : vector<1x12xf32> to vector<1x12xf32>
    %175 = vector.broadcast %174 : vector<1x12xf32> to vector<8x12xf32>
    %176 = vector.broadcast %cst_51 : f32 to vector<8x12xf32>
    %177 = arith.select %44, %175, %176 : vector<8x12xi1>, vector<8x12xf32>
    %178 = arith.addf %172, %177 : vector<8x12xf32>
    %179 = vector.extract_strided_slice %76 {offsets = [2, 0], sizes = [1, 12], strides = [1, 1]} : vector<7x12xf32> to vector<1x12xf32>
    %cst_52 = arith.constant 0.000000e+00 : f32
    %180 = vector.shape_cast %179 : vector<1x12xf32> to vector<1x12xf32>
    %181 = vector.broadcast %180 : vector<1x12xf32> to vector<8x12xf32>
    %182 = vector.broadcast %cst_52 : f32 to vector<8x12xf32>
    %183 = arith.select %46, %181, %182 : vector<8x12xi1>, vector<8x12xf32>
    %184 = arith.addf %178, %183 : vector<8x12xf32>
    %185 = vector.extract_strided_slice %76 {offsets = [3, 0], sizes = [1, 12], strides = [1, 1]} : vector<7x12xf32> to vector<1x12xf32>
    %cst_53 = arith.constant 0.000000e+00 : f32
    %186 = vector.shape_cast %185 : vector<1x12xf32> to vector<1x12xf32>
    %187 = vector.broadcast %186 : vector<1x12xf32> to vector<8x12xf32>
    %188 = vector.broadcast %cst_53 : f32 to vector<8x12xf32>
    %189 = arith.select %48, %187, %188 : vector<8x12xi1>, vector<8x12xf32>
    %190 = arith.addf %184, %189 : vector<8x12xf32>
    %191 = vector.extract_strided_slice %76 {offsets = [4, 0], sizes = [1, 12], strides = [1, 1]} : vector<7x12xf32> to vector<1x12xf32>
    %cst_54 = arith.constant 0.000000e+00 : f32
    %192 = vector.shape_cast %191 : vector<1x12xf32> to vector<1x12xf32>
    %193 = vector.broadcast %192 : vector<1x12xf32> to vector<8x12xf32>
    %194 = vector.broadcast %cst_54 : f32 to vector<8x12xf32>
    %195 = arith.select %50, %193, %194 : vector<8x12xi1>, vector<8x12xf32>
    %196 = arith.addf %190, %195 : vector<8x12xf32>
    %197 = vector.extract_strided_slice %76 {offsets = [5, 0], sizes = [1, 12], strides = [1, 1]} : vector<7x12xf32> to vector<1x12xf32>
    %cst_55 = arith.constant 0.000000e+00 : f32
    %198 = vector.shape_cast %197 : vector<1x12xf32> to vector<1x12xf32>
    %199 = vector.broadcast %198 : vector<1x12xf32> to vector<8x12xf32>
    %200 = vector.broadcast %cst_55 : f32 to vector<8x12xf32>
    %201 = arith.select %52, %199, %200 : vector<8x12xi1>, vector<8x12xf32>
    %202 = arith.addf %196, %201 : vector<8x12xf32>
    %203 = vector.extract_strided_slice %76 {offsets = [6, 0], sizes = [1, 12], strides = [1, 1]} : vector<7x12xf32> to vector<1x12xf32>
    %cst_56 = arith.constant 0.000000e+00 : f32
    %204 = vector.shape_cast %203 : vector<1x12xf32> to vector<1x12xf32>
    %205 = vector.broadcast %204 : vector<1x12xf32> to vector<8x12xf32>
    %206 = vector.broadcast %cst_56 : f32 to vector<8x12xf32>
    %207 = arith.select %54, %205, %206 : vector<8x12xi1>, vector<8x12xf32>
    %208 = arith.addf %202, %207 : vector<8x12xf32>
    %209 = arith.addf %208, %8 : vector<8x12xf32>
    %cst_57 = arith.constant dense<0xFF800000> : vector<8xf32>
    %210 = vector.multi_reduction <maximumf>, %209, %cst_57 [1] : vector<8x12xf32> to vector<8xf32>
    %211 = vector.shape_cast %210 : vector<8xf32> to vector<8x1xf32>
    %212 = vector.broadcast %211 : vector<8x1xf32> to vector<8x12xf32>
    %213 = arith.subf %209, %212 : vector<8x12xf32>
    %214 = math.exp %213 : vector<8x12xf32>
    %cst_58 = arith.constant dense<0.000000e+00> : vector<8xf32>
    %215 = vector.multi_reduction <add>, %214, %cst_58 [1] : vector<8x12xf32> to vector<8xf32>
    %216 = vector.shape_cast %215 : vector<8xf32> to vector<8x1xf32>
    %c0_59 = arith.constant 0 : index
    %c0_60 = arith.constant 0 : index
    %c32 = arith.constant 32 : index
    %217 = vector.load %arg3[%c0_59, %c0_60, %c32] : memref<1x12x64xf32, #tpu.memory_space<vmem>>, vector<1x12x8xf32>
    %218 = vector.shape_cast %217 : vector<1x12x8xf32> to vector<12x8xf32>
    %219 = arith.truncf %218 : vector<12x8xf32> to vector<12x8xbf16>
    %220 = arith.truncf %214 : vector<8x12xf32> to vector<8x12xbf16>
    %cst_61 = arith.constant dense<0.000000e+00> : vector<8x8xf32>
    %221 = tpu.matmul %220, %219, %cst_61 {dimension_numbers = #tpu.dot_dimension_numbers<[1], [0], [0], [1], [0, 0, 1, 1], [], []>} : vector<8x12xbf16>, vector<12x8xbf16>, vector<8x8xf32> -> vector<8x8xf32>
    %222 = vector.broadcast %216 : vector<8x1xf32> to vector<8x8xf32>
    %223 = arith.divf %221, %222 : vector<8x8xf32>
    %224 = arith.truncf %223 : vector<8x8xf32> to vector<8x8xbf16>
    %c0_62 = arith.constant 0 : index
    %c0_63 = arith.constant 0 : index
    %225 = vector.load %arg10[%c0_62, %c0_63] : memref<32x32xbf16, #tpu.memory_space<vmem>>, vector<8x32xbf16>
    %cst_64 = arith.constant dense<0.000000e+00> : vector<8x32xf32>
    %226 = tpu.matmul %224, %225, %cst_64 {dimension_numbers = #tpu.dot_dimension_numbers<[1], [0], [0], [1], [0, 0, 1, 1], [], []>} : vector<8x8xbf16>, vector<8x32xbf16>, vector<8x32xf32> -> vector<8x32xf32>
    %227 = arith.addf %59, %226 : vector<8x32xf32>
    %c0_65 = arith.constant 0 : index
    %c0_66 = arith.constant 0 : index
    %c8 = arith.constant 8 : index
    %228 = vector.load %arg2[%c0_65, %c0_66, %c8] : memref<1x8x32xf32, #tpu.memory_space<vmem>>, vector<1x8x8xf32>
    %229 = vector.shape_cast %228 : vector<1x8x8xf32> to vector<8x8xf32>
    %cst_67 = arith.constant 0.353553385 : f32
    %230 = vector.broadcast %cst_67 : f32 to vector<8x8xf32>
    %231 = arith.mulf %229, %230 : vector<8x8xf32>
    %232 = arith.truncf %231 : vector<8x8xf32> to vector<8x8xbf16>
    %c0_68 = arith.constant 0 : index
    %c0_69 = arith.constant 0 : index
    %c8_70 = arith.constant 8 : index
    %233 = vector.load %arg3[%c0_68, %c0_69, %c8_70] : memref<1x12x64xf32, #tpu.memory_space<vmem>>, vector<1x12x8xf32>
    %234 = vector.shape_cast %233 : vector<1x12x8xf32> to vector<12x8xf32>
    %235 = arith.truncf %234 : vector<12x8xf32> to vector<12x8xbf16>
    %c0_71 = arith.constant 0 : index
    %c8_72 = arith.constant 8 : index
    %236 = vector.load %arg4[%c0_71, %c8_72] : memref<7x32xf32, #tpu.memory_space<vmem>>, vector<7x8xf32>
    %cst_73 = arith.constant 0.353553385 : f32
    %237 = vector.broadcast %cst_73 : f32 to vector<7x8xf32>
    %238 = arith.mulf %236, %237 : vector<7x8xf32>
    %239 = arith.truncf %238 : vector<7x8xf32> to vector<7x8xbf16>
    %c0_74 = arith.constant 0 : index
    %c8_75 = arith.constant 8 : index
    %240 = vector.load %arg5[%c0_74, %c8_75] : memref<15x32xf32, #tpu.memory_space<vmem>>, vector<15x8xf32>
    %241 = arith.truncf %240 : vector<15x8xf32> to vector<15x8xbf16>
    %cst_76 = arith.constant dense<0.000000e+00> : vector<8x12xf32>
    %242 = tpu.matmul %232, %235, %cst_76 {dimension_numbers = #tpu.dot_dimension_numbers<[1], [1], [0], [0], [0, 0, 1, 0], [], []>} : vector<8x8xbf16>, vector<12x8xbf16>, vector<8x12xf32> -> vector<8x12xf32>
    %cst_77 = arith.constant dense<0.000000e+00> : vector<8x15xf32>
    %243 = tpu.matmul %232, %241, %cst_77 {dimension_numbers = #tpu.dot_dimension_numbers<[1], [1], [0], [0], [0, 0, 1, 0], [], []>} : vector<8x8xbf16>, vector<15x8xbf16>, vector<8x15xf32> -> vector<8x15xf32>
    %cst_78 = arith.constant dense<0.000000e+00> : vector<7x12xf32>
    %244 = tpu.matmul %239, %235, %cst_78 {dimension_numbers = #tpu.dot_dimension_numbers<[1], [1], [0], [0], [0, 0, 1, 0], [], []>} : vector<7x8xbf16>, vector<12x8xbf16>, vector<7x12xf32> -> vector<7x12xf32>
    %245 = vector.extract_strided_slice %243 {offsets = [0, 0], sizes = [8, 1], strides = [1, 1]} : vector<8x15xf32> to vector<8x1xf32>
    %cst_79 = arith.constant 0.000000e+00 : f32
    %246 = vector.shape_cast %245 : vector<8x1xf32> to vector<8x1xf32>
    %247 = vector.broadcast %246 : vector<8x1xf32> to vector<8x12xf32>
    %248 = vector.broadcast %cst_79 : f32 to vector<8x12xf32>
    %249 = arith.select %12, %247, %248 : vector<8x12xi1>, vector<8x12xf32>
    %250 = arith.addf %242, %249 : vector<8x12xf32>
    %251 = vector.extract_strided_slice %243 {offsets = [0, 1], sizes = [8, 1], strides = [1, 1]} : vector<8x15xf32> to vector<8x1xf32>
    %cst_80 = arith.constant 0.000000e+00 : f32
    %252 = vector.shape_cast %251 : vector<8x1xf32> to vector<8x1xf32>
    %253 = vector.broadcast %252 : vector<8x1xf32> to vector<8x12xf32>
    %254 = vector.broadcast %cst_80 : f32 to vector<8x12xf32>
    %255 = arith.select %14, %253, %254 : vector<8x12xi1>, vector<8x12xf32>
    %256 = arith.addf %250, %255 : vector<8x12xf32>
    %257 = vector.extract_strided_slice %243 {offsets = [0, 2], sizes = [8, 1], strides = [1, 1]} : vector<8x15xf32> to vector<8x1xf32>
    %cst_81 = arith.constant 0.000000e+00 : f32
    %258 = vector.shape_cast %257 : vector<8x1xf32> to vector<8x1xf32>
    %259 = vector.broadcast %258 : vector<8x1xf32> to vector<8x12xf32>
    %260 = vector.broadcast %cst_81 : f32 to vector<8x12xf32>
    %261 = arith.select %16, %259, %260 : vector<8x12xi1>, vector<8x12xf32>
    %262 = arith.addf %256, %261 : vector<8x12xf32>
    %263 = vector.extract_strided_slice %243 {offsets = [0, 3], sizes = [8, 1], strides = [1, 1]} : vector<8x15xf32> to vector<8x1xf32>
    %cst_82 = arith.constant 0.000000e+00 : f32
    %264 = vector.shape_cast %263 : vector<8x1xf32> to vector<8x1xf32>
    %265 = vector.broadcast %264 : vector<8x1xf32> to vector<8x12xf32>
    %266 = vector.broadcast %cst_82 : f32 to vector<8x12xf32>
    %267 = arith.select %18, %265, %266 : vector<8x12xi1>, vector<8x12xf32>
    %268 = arith.addf %262, %267 : vector<8x12xf32>
    %269 = vector.extract_strided_slice %243 {offsets = [0, 4], sizes = [8, 1], strides = [1, 1]} : vector<8x15xf32> to vector<8x1xf32>
    %cst_83 = arith.constant 0.000000e+00 : f32
    %270 = vector.shape_cast %269 : vector<8x1xf32> to vector<8x1xf32>
    %271 = vector.broadcast %270 : vector<8x1xf32> to vector<8x12xf32>
    %272 = vector.broadcast %cst_83 : f32 to vector<8x12xf32>
    %273 = arith.select %20, %271, %272 : vector<8x12xi1>, vector<8x12xf32>
    %274 = arith.addf %268, %273 : vector<8x12xf32>
    %275 = vector.extract_strided_slice %243 {offsets = [0, 5], sizes = [8, 1], strides = [1, 1]} : vector<8x15xf32> to vector<8x1xf32>
    %cst_84 = arith.constant 0.000000e+00 : f32
    %276 = vector.shape_cast %275 : vector<8x1xf32> to vector<8x1xf32>
    %277 = vector.broadcast %276 : vector<8x1xf32> to vector<8x12xf32>
    %278 = vector.broadcast %cst_84 : f32 to vector<8x12xf32>
    %279 = arith.select %22, %277, %278 : vector<8x12xi1>, vector<8x12xf32>
    %280 = arith.addf %274, %279 : vector<8x12xf32>
    %281 = vector.extract_strided_slice %243 {offsets = [0, 6], sizes = [8, 1], strides = [1, 1]} : vector<8x15xf32> to vector<8x1xf32>
    %cst_85 = arith.constant 0.000000e+00 : f32
    %282 = vector.shape_cast %281 : vector<8x1xf32> to vector<8x1xf32>
    %283 = vector.broadcast %282 : vector<8x1xf32> to vector<8x12xf32>
    %284 = vector.broadcast %cst_85 : f32 to vector<8x12xf32>
    %285 = arith.select %24, %283, %284 : vector<8x12xi1>, vector<8x12xf32>
    %286 = arith.addf %280, %285 : vector<8x12xf32>
    %287 = vector.extract_strided_slice %243 {offsets = [0, 7], sizes = [8, 1], strides = [1, 1]} : vector<8x15xf32> to vector<8x1xf32>
    %cst_86 = arith.constant 0.000000e+00 : f32
    %288 = vector.shape_cast %287 : vector<8x1xf32> to vector<8x1xf32>
    %289 = vector.broadcast %288 : vector<8x1xf32> to vector<8x12xf32>
    %290 = vector.broadcast %cst_86 : f32 to vector<8x12xf32>
    %291 = arith.select %26, %289, %290 : vector<8x12xi1>, vector<8x12xf32>
    %292 = arith.addf %286, %291 : vector<8x12xf32>
    %293 = vector.extract_strided_slice %243 {offsets = [0, 8], sizes = [8, 1], strides = [1, 1]} : vector<8x15xf32> to vector<8x1xf32>
    %cst_87 = arith.constant 0.000000e+00 : f32
    %294 = vector.shape_cast %293 : vector<8x1xf32> to vector<8x1xf32>
    %295 = vector.broadcast %294 : vector<8x1xf32> to vector<8x12xf32>
    %296 = vector.broadcast %cst_87 : f32 to vector<8x12xf32>
    %297 = arith.select %28, %295, %296 : vector<8x12xi1>, vector<8x12xf32>
    %298 = arith.addf %292, %297 : vector<8x12xf32>
    %299 = vector.extract_strided_slice %243 {offsets = [0, 9], sizes = [8, 1], strides = [1, 1]} : vector<8x15xf32> to vector<8x1xf32>
    %cst_88 = arith.constant 0.000000e+00 : f32
    %300 = vector.shape_cast %299 : vector<8x1xf32> to vector<8x1xf32>
    %301 = vector.broadcast %300 : vector<8x1xf32> to vector<8x12xf32>
    %302 = vector.broadcast %cst_88 : f32 to vector<8x12xf32>
    %303 = arith.select %30, %301, %302 : vector<8x12xi1>, vector<8x12xf32>
    %304 = arith.addf %298, %303 : vector<8x12xf32>
    %305 = vector.extract_strided_slice %243 {offsets = [0, 10], sizes = [8, 1], strides = [1, 1]} : vector<8x15xf32> to vector<8x1xf32>
    %cst_89 = arith.constant 0.000000e+00 : f32
    %306 = vector.shape_cast %305 : vector<8x1xf32> to vector<8x1xf32>
    %307 = vector.broadcast %306 : vector<8x1xf32> to vector<8x12xf32>
    %308 = vector.broadcast %cst_89 : f32 to vector<8x12xf32>
    %309 = arith.select %32, %307, %308 : vector<8x12xi1>, vector<8x12xf32>
    %310 = arith.addf %304, %309 : vector<8x12xf32>
    %311 = vector.extract_strided_slice %243 {offsets = [0, 11], sizes = [8, 1], strides = [1, 1]} : vector<8x15xf32> to vector<8x1xf32>
    %cst_90 = arith.constant 0.000000e+00 : f32
    %312 = vector.shape_cast %311 : vector<8x1xf32> to vector<8x1xf32>
    %313 = vector.broadcast %312 : vector<8x1xf32> to vector<8x12xf32>
    %314 = vector.broadcast %cst_90 : f32 to vector<8x12xf32>
    %315 = arith.select %34, %313, %314 : vector<8x12xi1>, vector<8x12xf32>
    %316 = arith.addf %310, %315 : vector<8x12xf32>
    %317 = vector.extract_strided_slice %243 {offsets = [0, 12], sizes = [8, 1], strides = [1, 1]} : vector<8x15xf32> to vector<8x1xf32>
    %cst_91 = arith.constant 0.000000e+00 : f32
    %318 = vector.shape_cast %317 : vector<8x1xf32> to vector<8x1xf32>
    %319 = vector.broadcast %318 : vector<8x1xf32> to vector<8x12xf32>
    %320 = vector.broadcast %cst_91 : f32 to vector<8x12xf32>
    %321 = arith.select %36, %319, %320 : vector<8x12xi1>, vector<8x12xf32>
    %322 = arith.addf %316, %321 : vector<8x12xf32>
    %323 = vector.extract_strided_slice %243 {offsets = [0, 13], sizes = [8, 1], strides = [1, 1]} : vector<8x15xf32> to vector<8x1xf32>
    %cst_92 = arith.constant 0.000000e+00 : f32
    %324 = vector.shape_cast %323 : vector<8x1xf32> to vector<8x1xf32>
    %325 = vector.broadcast %324 : vector<8x1xf32> to vector<8x12xf32>
    %326 = vector.broadcast %cst_92 : f32 to vector<8x12xf32>
    %327 = arith.select %38, %325, %326 : vector<8x12xi1>, vector<8x12xf32>
    %328 = arith.addf %322, %327 : vector<8x12xf32>
    %329 = vector.extract_strided_slice %243 {offsets = [0, 14], sizes = [8, 1], strides = [1, 1]} : vector<8x15xf32> to vector<8x1xf32>
    %cst_93 = arith.constant 0.000000e+00 : f32
    %330 = vector.shape_cast %329 : vector<8x1xf32> to vector<8x1xf32>
    %331 = vector.broadcast %330 : vector<8x1xf32> to vector<8x12xf32>
    %332 = vector.broadcast %cst_93 : f32 to vector<8x12xf32>
    %333 = arith.select %40, %331, %332 : vector<8x12xi1>, vector<8x12xf32>
    %334 = arith.addf %328, %333 : vector<8x12xf32>
    %335 = vector.extract_strided_slice %244 {offsets = [0, 0], sizes = [1, 12], strides = [1, 1]} : vector<7x12xf32> to vector<1x12xf32>
    %cst_94 = arith.constant 0.000000e+00 : f32
    %336 = vector.shape_cast %335 : vector<1x12xf32> to vector<1x12xf32>
    %337 = vector.broadcast %336 : vector<1x12xf32> to vector<8x12xf32>
    %338 = vector.broadcast %cst_94 : f32 to vector<8x12xf32>
    %339 = arith.select %42, %337, %338 : vector<8x12xi1>, vector<8x12xf32>
    %340 = arith.addf %334, %339 : vector<8x12xf32>
    %341 = vector.extract_strided_slice %244 {offsets = [1, 0], sizes = [1, 12], strides = [1, 1]} : vector<7x12xf32> to vector<1x12xf32>
    %cst_95 = arith.constant 0.000000e+00 : f32
    %342 = vector.shape_cast %341 : vector<1x12xf32> to vector<1x12xf32>
    %343 = vector.broadcast %342 : vector<1x12xf32> to vector<8x12xf32>
    %344 = vector.broadcast %cst_95 : f32 to vector<8x12xf32>
    %345 = arith.select %44, %343, %344 : vector<8x12xi1>, vector<8x12xf32>
    %346 = arith.addf %340, %345 : vector<8x12xf32>
    %347 = vector.extract_strided_slice %244 {offsets = [2, 0], sizes = [1, 12], strides = [1, 1]} : vector<7x12xf32> to vector<1x12xf32>
    %cst_96 = arith.constant 0.000000e+00 : f32
    %348 = vector.shape_cast %347 : vector<1x12xf32> to vector<1x12xf32>
    %349 = vector.broadcast %348 : vector<1x12xf32> to vector<8x12xf32>
    %350 = vector.broadcast %cst_96 : f32 to vector<8x12xf32>
    %351 = arith.select %46, %349, %350 : vector<8x12xi1>, vector<8x12xf32>
    %352 = arith.addf %346, %351 : vector<8x12xf32>
    %353 = vector.extract_strided_slice %244 {offsets = [3, 0], sizes = [1, 12], strides = [1, 1]} : vector<7x12xf32> to vector<1x12xf32>
    %cst_97 = arith.constant 0.000000e+00 : f32
    %354 = vector.shape_cast %353 : vector<1x12xf32> to vector<1x12xf32>
    %355 = vector.broadcast %354 : vector<1x12xf32> to vector<8x12xf32>
    %356 = vector.broadcast %cst_97 : f32 to vector<8x12xf32>
    %357 = arith.select %48, %355, %356 : vector<8x12xi1>, vector<8x12xf32>
    %358 = arith.addf %352, %357 : vector<8x12xf32>
    %359 = vector.extract_strided_slice %244 {offsets = [4, 0], sizes = [1, 12], strides = [1, 1]} : vector<7x12xf32> to vector<1x12xf32>
    %cst_98 = arith.constant 0.000000e+00 : f32
    %360 = vector.shape_cast %359 : vector<1x12xf32> to vector<1x12xf32>
    %361 = vector.broadcast %360 : vector<1x12xf32> to vector<8x12xf32>
    %362 = vector.broadcast %cst_98 : f32 to vector<8x12xf32>
    %363 = arith.select %50, %361, %362 : vector<8x12xi1>, vector<8x12xf32>
    %364 = arith.addf %358, %363 : vector<8x12xf32>
    %365 = vector.extract_strided_slice %244 {offsets = [5, 0], sizes = [1, 12], strides = [1, 1]} : vector<7x12xf32> to vector<1x12xf32>
    %cst_99 = arith.constant 0.000000e+00 : f32
    %366 = vector.shape_cast %365 : vector<1x12xf32> to vector<1x12xf32>
    %367 = vector.broadcast %366 : vector<1x12xf32> to vector<8x12xf32>
    %368 = vector.broadcast %cst_99 : f32 to vector<8x12xf32>
    %369 = arith.select %52, %367, %368 : vector<8x12xi1>, vector<8x12xf32>
    %370 = arith.addf %364, %369 : vector<8x12xf32>
    %371 = vector.extract_strided_slice %244 {offsets = [6, 0], sizes = [1, 12], strides = [1, 1]} : vector<7x12xf32> to vector<1x12xf32>
    %cst_100 = arith.constant 0.000000e+00 : f32
    %372 = vector.shape_cast %371 : vector<1x12xf32> to vector<1x12xf32>
    %373 = vector.broadcast %372 : vector<1x12xf32> to vector<8x12xf32>
    %374 = vector.broadcast %cst_100 : f32 to vector<8x12xf32>
    %375 = arith.select %54, %373, %374 : vector<8x12xi1>, vector<8x12xf32>
    %376 = arith.addf %370, %375 : vector<8x12xf32>
    %377 = arith.addf %376, %8 : vector<8x12xf32>
    %cst_101 = arith.constant dense<0xFF800000> : vector<8xf32>
    %378 = vector.multi_reduction <maximumf>, %377, %cst_101 [1] : vector<8x12xf32> to vector<8xf32>
    %379 = vector.shape_cast %378 : vector<8xf32> to vector<8x1xf32>
    %380 = vector.broadcast %379 : vector<8x1xf32> to vector<8x12xf32>
    %381 = arith.subf %377, %380 : vector<8x12xf32>
    %382 = math.exp %381 : vector<8x12xf32>
    %cst_102 = arith.constant dense<0.000000e+00> : vector<8xf32>
    %383 = vector.multi_reduction <add>, %382, %cst_102 [1] : vector<8x12xf32> to vector<8xf32>
    %384 = vector.shape_cast %383 : vector<8xf32> to vector<8x1xf32>
    %c0_103 = arith.constant 0 : index
    %c0_104 = arith.constant 0 : index
    %c40 = arith.constant 40 : index
    %385 = vector.load %arg3[%c0_103, %c0_104, %c40] : memref<1x12x64xf32, #tpu.memory_space<vmem>>, vector<1x12x8xf32>
    %386 = vector.shape_cast %385 : vector<1x12x8xf32> to vector<12x8xf32>
    %387 = arith.truncf %386 : vector<12x8xf32> to vector<12x8xbf16>
    %388 = arith.truncf %382 : vector<8x12xf32> to vector<8x12xbf16>
    %cst_105 = arith.constant dense<0.000000e+00> : vector<8x8xf32>
    %389 = tpu.matmul %388, %387, %cst_105 {dimension_numbers = #tpu.dot_dimension_numbers<[1], [0], [0], [1], [0, 0, 1, 1], [], []>} : vector<8x12xbf16>, vector<12x8xbf16>, vector<8x8xf32> -> vector<8x8xf32>
    %390 = vector.broadcast %384 : vector<8x1xf32> to vector<8x8xf32>
    %391 = arith.divf %389, %390 : vector<8x8xf32>
    %392 = arith.truncf %391 : vector<8x8xf32> to vector<8x8xbf16>
    %c8_106 = arith.constant 8 : index
    %c0_107 = arith.constant 0 : index
    %393 = vector.load %arg10[%c8_106, %c0_107] : memref<32x32xbf16, #tpu.memory_space<vmem>>, vector<8x32xbf16>
    %cst_108 = arith.constant dense<0.000000e+00> : vector<8x32xf32>
    %394 = tpu.matmul %392, %393, %cst_108 {dimension_numbers = #tpu.dot_dimension_numbers<[1], [0], [0], [1], [0, 0, 1, 1], [], []>} : vector<8x8xbf16>, vector<8x32xbf16>, vector<8x32xf32> -> vector<8x32xf32>
    %395 = arith.addf %227, %394 : vector<8x32xf32>
    %c0_109 = arith.constant 0 : index
    %c0_110 = arith.constant 0 : index
    %c16 = arith.constant 16 : index
    %396 = vector.load %arg2[%c0_109, %c0_110, %c16] : memref<1x8x32xf32, #tpu.memory_space<vmem>>, vector<1x8x8xf32>
    %397 = vector.shape_cast %396 : vector<1x8x8xf32> to vector<8x8xf32>
    %cst_111 = arith.constant 0.353553385 : f32
    %398 = vector.broadcast %cst_111 : f32 to vector<8x8xf32>
    %399 = arith.mulf %397, %398 : vector<8x8xf32>
    %400 = arith.truncf %399 : vector<8x8xf32> to vector<8x8xbf16>
    %c0_112 = arith.constant 0 : index
    %c0_113 = arith.constant 0 : index
    %c16_114 = arith.constant 16 : index
    %401 = vector.load %arg3[%c0_112, %c0_113, %c16_114] : memref<1x12x64xf32, #tpu.memory_space<vmem>>, vector<1x12x8xf32>
    %402 = vector.shape_cast %401 : vector<1x12x8xf32> to vector<12x8xf32>
    %403 = arith.truncf %402 : vector<12x8xf32> to vector<12x8xbf16>
    %c0_115 = arith.constant 0 : index
    %c16_116 = arith.constant 16 : index
    %404 = vector.load %arg4[%c0_115, %c16_116] : memref<7x32xf32, #tpu.memory_space<vmem>>, vector<7x8xf32>
    %cst_117 = arith.constant 0.353553385 : f32
    %405 = vector.broadcast %cst_117 : f32 to vector<7x8xf32>
    %406 = arith.mulf %404, %405 : vector<7x8xf32>
    %407 = arith.truncf %406 : vector<7x8xf32> to vector<7x8xbf16>
    %c0_118 = arith.constant 0 : index
    %c16_119 = arith.constant 16 : index
    %408 = vector.load %arg5[%c0_118, %c16_119] : memref<15x32xf32, #tpu.memory_space<vmem>>, vector<15x8xf32>
    %409 = arith.truncf %408 : vector<15x8xf32> to vector<15x8xbf16>
    %cst_120 = arith.constant dense<0.000000e+00> : vector<8x12xf32>
    %410 = tpu.matmul %400, %403, %cst_120 {dimension_numbers = #tpu.dot_dimension_numbers<[1], [1], [0], [0], [0, 0, 1, 0], [], []>} : vector<8x8xbf16>, vector<12x8xbf16>, vector<8x12xf32> -> vector<8x12xf32>
    %cst_121 = arith.constant dense<0.000000e+00> : vector<8x15xf32>
    %411 = tpu.matmul %400, %409, %cst_121 {dimension_numbers = #tpu.dot_dimension_numbers<[1], [1], [0], [0], [0, 0, 1, 0], [], []>} : vector<8x8xbf16>, vector<15x8xbf16>, vector<8x15xf32> -> vector<8x15xf32>
    %cst_122 = arith.constant dense<0.000000e+00> : vector<7x12xf32>
    %412 = tpu.matmul %407, %403, %cst_122 {dimension_numbers = #tpu.dot_dimension_numbers<[1], [1], [0], [0], [0, 0, 1, 0], [], []>} : vector<7x8xbf16>, vector<12x8xbf16>, vector<7x12xf32> -> vector<7x12xf32>
    %413 = vector.extract_strided_slice %411 {offsets = [0, 0], sizes = [8, 1], strides = [1, 1]} : vector<8x15xf32> to vector<8x1xf32>
    %cst_123 = arith.constant 0.000000e+00 : f32
    %414 = vector.shape_cast %413 : vector<8x1xf32> to vector<8x1xf32>
    %415 = vector.broadcast %414 : vector<8x1xf32> to vector<8x12xf32>
    %416 = vector.broadcast %cst_123 : f32 to vector<8x12xf32>
    %417 = arith.select %12, %415, %416 : vector<8x12xi1>, vector<8x12xf32>
    %418 = arith.addf %410, %417 : vector<8x12xf32>
    %419 = vector.extract_strided_slice %411 {offsets = [0, 1], sizes = [8, 1], strides = [1, 1]} : vector<8x15xf32> to vector<8x1xf32>
    %cst_124 = arith.constant 0.000000e+00 : f32
    %420 = vector.shape_cast %419 : vector<8x1xf32> to vector<8x1xf32>
    %421 = vector.broadcast %420 : vector<8x1xf32> to vector<8x12xf32>
    %422 = vector.broadcast %cst_124 : f32 to vector<8x12xf32>
    %423 = arith.select %14, %421, %422 : vector<8x12xi1>, vector<8x12xf32>
    %424 = arith.addf %418, %423 : vector<8x12xf32>
    %425 = vector.extract_strided_slice %411 {offsets = [0, 2], sizes = [8, 1], strides = [1, 1]} : vector<8x15xf32> to vector<8x1xf32>
    %cst_125 = arith.constant 0.000000e+00 : f32
    %426 = vector.shape_cast %425 : vector<8x1xf32> to vector<8x1xf32>
    %427 = vector.broadcast %426 : vector<8x1xf32> to vector<8x12xf32>
    %428 = vector.broadcast %cst_125 : f32 to vector<8x12xf32>
    %429 = arith.select %16, %427, %428 : vector<8x12xi1>, vector<8x12xf32>
    %430 = arith.addf %424, %429 : vector<8x12xf32>
    %431 = vector.extract_strided_slice %411 {offsets = [0, 3], sizes = [8, 1], strides = [1, 1]} : vector<8x15xf32> to vector<8x1xf32>
    %cst_126 = arith.constant 0.000000e+00 : f32
    %432 = vector.shape_cast %431 : vector<8x1xf32> to vector<8x1xf32>
    %433 = vector.broadcast %432 : vector<8x1xf32> to vector<8x12xf32>
    %434 = vector.broadcast %cst_126 : f32 to vector<8x12xf32>
    %435 = arith.select %18, %433, %434 : vector<8x12xi1>, vector<8x12xf32>
    %436 = arith.addf %430, %435 : vector<8x12xf32>
    %437 = vector.extract_strided_slice %411 {offsets = [0, 4], sizes = [8, 1], strides = [1, 1]} : vector<8x15xf32> to vector<8x1xf32>
    %cst_127 = arith.constant 0.000000e+00 : f32
    %438 = vector.shape_cast %437 : vector<8x1xf32> to vector<8x1xf32>
    %439 = vector.broadcast %438 : vector<8x1xf32> to vector<8x12xf32>
    %440 = vector.broadcast %cst_127 : f32 to vector<8x12xf32>
    %441 = arith.select %20, %439, %440 : vector<8x12xi1>, vector<8x12xf32>
    %442 = arith.addf %436, %441 : vector<8x12xf32>
    %443 = vector.extract_strided_slice %411 {offsets = [0, 5], sizes = [8, 1], strides = [1, 1]} : vector<8x15xf32> to vector<8x1xf32>
    %cst_128 = arith.constant 0.000000e+00 : f32
    %444 = vector.shape_cast %443 : vector<8x1xf32> to vector<8x1xf32>
    %445 = vector.broadcast %444 : vector<8x1xf32> to vector<8x12xf32>
    %446 = vector.broadcast %cst_128 : f32 to vector<8x12xf32>
    %447 = arith.select %22, %445, %446 : vector<8x12xi1>, vector<8x12xf32>
    %448 = arith.addf %442, %447 : vector<8x12xf32>
    %449 = vector.extract_strided_slice %411 {offsets = [0, 6], sizes = [8, 1], strides = [1, 1]} : vector<8x15xf32> to vector<8x1xf32>
    %cst_129 = arith.constant 0.000000e+00 : f32
    %450 = vector.shape_cast %449 : vector<8x1xf32> to vector<8x1xf32>
    %451 = vector.broadcast %450 : vector<8x1xf32> to vector<8x12xf32>
    %452 = vector.broadcast %cst_129 : f32 to vector<8x12xf32>
    %453 = arith.select %24, %451, %452 : vector<8x12xi1>, vector<8x12xf32>
    %454 = arith.addf %448, %453 : vector<8x12xf32>
    %455 = vector.extract_strided_slice %411 {offsets = [0, 7], sizes = [8, 1], strides = [1, 1]} : vector<8x15xf32> to vector<8x1xf32>
    %cst_130 = arith.constant 0.000000e+00 : f32
    %456 = vector.shape_cast %455 : vector<8x1xf32> to vector<8x1xf32>
    %457 = vector.broadcast %456 : vector<8x1xf32> to vector<8x12xf32>
    %458 = vector.broadcast %cst_130 : f32 to vector<8x12xf32>
    %459 = arith.select %26, %457, %458 : vector<8x12xi1>, vector<8x12xf32>
    %460 = arith.addf %454, %459 : vector<8x12xf32>
    %461 = vector.extract_strided_slice %411 {offsets = [0, 8], sizes = [8, 1], strides = [1, 1]} : vector<8x15xf32> to vector<8x1xf32>
    %cst_131 = arith.constant 0.000000e+00 : f32
    %462 = vector.shape_cast %461 : vector<8x1xf32> to vector<8x1xf32>
    %463 = vector.broadcast %462 : vector<8x1xf32> to vector<8x12xf32>
    %464 = vector.broadcast %cst_131 : f32 to vector<8x12xf32>
    %465 = arith.select %28, %463, %464 : vector<8x12xi1>, vector<8x12xf32>
    %466 = arith.addf %460, %465 : vector<8x12xf32>
    %467 = vector.extract_strided_slice %411 {offsets = [0, 9], sizes = [8, 1], strides = [1, 1]} : vector<8x15xf32> to vector<8x1xf32>
    %cst_132 = arith.constant 0.000000e+00 : f32
    %468 = vector.shape_cast %467 : vector<8x1xf32> to vector<8x1xf32>
    %469 = vector.broadcast %468 : vector<8x1xf32> to vector<8x12xf32>
    %470 = vector.broadcast %cst_132 : f32 to vector<8x12xf32>
    %471 = arith.select %30, %469, %470 : vector<8x12xi1>, vector<8x12xf32>
    %472 = arith.addf %466, %471 : vector<8x12xf32>
    %473 = vector.extract_strided_slice %411 {offsets = [0, 10], sizes = [8, 1], strides = [1, 1]} : vector<8x15xf32> to vector<8x1xf32>
    %cst_133 = arith.constant 0.000000e+00 : f32
    %474 = vector.shape_cast %473 : vector<8x1xf32> to vector<8x1xf32>
    %475 = vector.broadcast %474 : vector<8x1xf32> to vector<8x12xf32>
    %476 = vector.broadcast %cst_133 : f32 to vector<8x12xf32>
    %477 = arith.select %32, %475, %476 : vector<8x12xi1>, vector<8x12xf32>
    %478 = arith.addf %472, %477 : vector<8x12xf32>
    %479 = vector.extract_strided_slice %411 {offsets = [0, 11], sizes = [8, 1], strides = [1, 1]} : vector<8x15xf32> to vector<8x1xf32>
    %cst_134 = arith.constant 0.000000e+00 : f32
    %480 = vector.shape_cast %479 : vector<8x1xf32> to vector<8x1xf32>
    %481 = vector.broadcast %480 : vector<8x1xf32> to vector<8x12xf32>
    %482 = vector.broadcast %cst_134 : f32 to vector<8x12xf32>
    %483 = arith.select %34, %481, %482 : vector<8x12xi1>, vector<8x12xf32>
    %484 = arith.addf %478, %483 : vector<8x12xf32>
    %485 = vector.extract_strided_slice %411 {offsets = [0, 12], sizes = [8, 1], strides = [1, 1]} : vector<8x15xf32> to vector<8x1xf32>
    %cst_135 = arith.constant 0.000000e+00 : f32
    %486 = vector.shape_cast %485 : vector<8x1xf32> to vector<8x1xf32>
    %487 = vector.broadcast %486 : vector<8x1xf32> to vector<8x12xf32>
    %488 = vector.broadcast %cst_135 : f32 to vector<8x12xf32>
    %489 = arith.select %36, %487, %488 : vector<8x12xi1>, vector<8x12xf32>
    %490 = arith.addf %484, %489 : vector<8x12xf32>
    %491 = vector.extract_strided_slice %411 {offsets = [0, 13], sizes = [8, 1], strides = [1, 1]} : vector<8x15xf32> to vector<8x1xf32>
    %cst_136 = arith.constant 0.000000e+00 : f32
    %492 = vector.shape_cast %491 : vector<8x1xf32> to vector<8x1xf32>
    %493 = vector.broadcast %492 : vector<8x1xf32> to vector<8x12xf32>
    %494 = vector.broadcast %cst_136 : f32 to vector<8x12xf32>
    %495 = arith.select %38, %493, %494 : vector<8x12xi1>, vector<8x12xf32>
    %496 = arith.addf %490, %495 : vector<8x12xf32>
    %497 = vector.extract_strided_slice %411 {offsets = [0, 14], sizes = [8, 1], strides = [1, 1]} : vector<8x15xf32> to vector<8x1xf32>
    %cst_137 = arith.constant 0.000000e+00 : f32
    %498 = vector.shape_cast %497 : vector<8x1xf32> to vector<8x1xf32>
    %499 = vector.broadcast %498 : vector<8x1xf32> to vector<8x12xf32>
    %500 = vector.broadcast %cst_137 : f32 to vector<8x12xf32>
    %501 = arith.select %40, %499, %500 : vector<8x12xi1>, vector<8x12xf32>
    %502 = arith.addf %496, %501 : vector<8x12xf32>
    %503 = vector.extract_strided_slice %412 {offsets = [0, 0], sizes = [1, 12], strides = [1, 1]} : vector<7x12xf32> to vector<1x12xf32>
    %cst_138 = arith.constant 0.000000e+00 : f32
    %504 = vector.shape_cast %503 : vector<1x12xf32> to vector<1x12xf32>
    %505 = vector.broadcast %504 : vector<1x12xf32> to vector<8x12xf32>
    %506 = vector.broadcast %cst_138 : f32 to vector<8x12xf32>
    %507 = arith.select %42, %505, %506 : vector<8x12xi1>, vector<8x12xf32>
    %508 = arith.addf %502, %507 : vector<8x12xf32>
    %509 = vector.extract_strided_slice %412 {offsets = [1, 0], sizes = [1, 12], strides = [1, 1]} : vector<7x12xf32> to vector<1x12xf32>
    %cst_139 = arith.constant 0.000000e+00 : f32
    %510 = vector.shape_cast %509 : vector<1x12xf32> to vector<1x12xf32>
    %511 = vector.broadcast %510 : vector<1x12xf32> to vector<8x12xf32>
    %512 = vector.broadcast %cst_139 : f32 to vector<8x12xf32>
    %513 = arith.select %44, %511, %512 : vector<8x12xi1>, vector<8x12xf32>
    %514 = arith.addf %508, %513 : vector<8x12xf32>
    %515 = vector.extract_strided_slice %412 {offsets = [2, 0], sizes = [1, 12], strides = [1, 1]} : vector<7x12xf32> to vector<1x12xf32>
    %cst_140 = arith.constant 0.000000e+00 : f32
    %516 = vector.shape_cast %515 : vector<1x12xf32> to vector<1x12xf32>
    %517 = vector.broadcast %516 : vector<1x12xf32> to vector<8x12xf32>
    %518 = vector.broadcast %cst_140 : f32 to vector<8x12xf32>
    %519 = arith.select %46, %517, %518 : vector<8x12xi1>, vector<8x12xf32>
    %520 = arith.addf %514, %519 : vector<8x12xf32>
    %521 = vector.extract_strided_slice %412 {offsets = [3, 0], sizes = [1, 12], strides = [1, 1]} : vector<7x12xf32> to vector<1x12xf32>
    %cst_141 = arith.constant 0.000000e+00 : f32
    %522 = vector.shape_cast %521 : vector<1x12xf32> to vector<1x12xf32>
    %523 = vector.broadcast %522 : vector<1x12xf32> to vector<8x12xf32>
    %524 = vector.broadcast %cst_141 : f32 to vector<8x12xf32>
    %525 = arith.select %48, %523, %524 : vector<8x12xi1>, vector<8x12xf32>
    %526 = arith.addf %520, %525 : vector<8x12xf32>
    %527 = vector.extract_strided_slice %412 {offsets = [4, 0], sizes = [1, 12], strides = [1, 1]} : vector<7x12xf32> to vector<1x12xf32>
    %cst_142 = arith.constant 0.000000e+00 : f32
    %528 = vector.shape_cast %527 : vector<1x12xf32> to vector<1x12xf32>
    %529 = vector.broadcast %528 : vector<1x12xf32> to vector<8x12xf32>
    %530 = vector.broadcast %cst_142 : f32 to vector<8x12xf32>
    %531 = arith.select %50, %529, %530 : vector<8x12xi1>, vector<8x12xf32>
    %532 = arith.addf %526, %531 : vector<8x12xf32>
    %533 = vector.extract_strided_slice %412 {offsets = [5, 0], sizes = [1, 12], strides = [1, 1]} : vector<7x12xf32> to vector<1x12xf32>
    %cst_143 = arith.constant 0.000000e+00 : f32
    %534 = vector.shape_cast %533 : vector<1x12xf32> to vector<1x12xf32>
    %535 = vector.broadcast %534 : vector<1x12xf32> to vector<8x12xf32>
    %536 = vector.broadcast %cst_143 : f32 to vector<8x12xf32>
    %537 = arith.select %52, %535, %536 : vector<8x12xi1>, vector<8x12xf32>
    %538 = arith.addf %532, %537 : vector<8x12xf32>
    %539 = vector.extract_strided_slice %412 {offsets = [6, 0], sizes = [1, 12], strides = [1, 1]} : vector<7x12xf32> to vector<1x12xf32>
    %cst_144 = arith.constant 0.000000e+00 : f32
    %540 = vector.shape_cast %539 : vector<1x12xf32> to vector<1x12xf32>
    %541 = vector.broadcast %540 : vector<1x12xf32> to vector<8x12xf32>
    %542 = vector.broadcast %cst_144 : f32 to vector<8x12xf32>
    %543 = arith.select %54, %541, %542 : vector<8x12xi1>, vector<8x12xf32>
    %544 = arith.addf %538, %543 : vector<8x12xf32>
    %545 = arith.addf %544, %8 : vector<8x12xf32>
    %cst_145 = arith.constant dense<0xFF800000> : vector<8xf32>
    %546 = vector.multi_reduction <maximumf>, %545, %cst_145 [1] : vector<8x12xf32> to vector<8xf32>
    %547 = vector.shape_cast %546 : vector<8xf32> to vector<8x1xf32>
    %548 = vector.broadcast %547 : vector<8x1xf32> to vector<8x12xf32>
    %549 = arith.subf %545, %548 : vector<8x12xf32>
    %550 = math.exp %549 : vector<8x12xf32>
    %cst_146 = arith.constant dense<0.000000e+00> : vector<8xf32>
    %551 = vector.multi_reduction <add>, %550, %cst_146 [1] : vector<8x12xf32> to vector<8xf32>
    %552 = vector.shape_cast %551 : vector<8xf32> to vector<8x1xf32>
    %c0_147 = arith.constant 0 : index
    %c0_148 = arith.constant 0 : index
    %c48 = arith.constant 48 : index
    %553 = vector.load %arg3[%c0_147, %c0_148, %c48] : memref<1x12x64xf32, #tpu.memory_space<vmem>>, vector<1x12x8xf32>
    %554 = vector.shape_cast %553 : vector<1x12x8xf32> to vector<12x8xf32>
    %555 = arith.truncf %554 : vector<12x8xf32> to vector<12x8xbf16>
    %556 = arith.truncf %550 : vector<8x12xf32> to vector<8x12xbf16>
    %cst_149 = arith.constant dense<0.000000e+00> : vector<8x8xf32>
    %557 = tpu.matmul %556, %555, %cst_149 {dimension_numbers = #tpu.dot_dimension_numbers<[1], [0], [0], [1], [0, 0, 1, 1], [], []>} : vector<8x12xbf16>, vector<12x8xbf16>, vector<8x8xf32> -> vector<8x8xf32>
    %558 = vector.broadcast %552 : vector<8x1xf32> to vector<8x8xf32>
    %559 = arith.divf %557, %558 : vector<8x8xf32>
    %560 = arith.truncf %559 : vector<8x8xf32> to vector<8x8xbf16>
    %c16_150 = arith.constant 16 : index
    %c0_151 = arith.constant 0 : index
    %561 = vector.load %arg10[%c16_150, %c0_151] : memref<32x32xbf16, #tpu.memory_space<vmem>>, vector<8x32xbf16>
    %cst_152 = arith.constant dense<0.000000e+00> : vector<8x32xf32>
    %562 = tpu.matmul %560, %561, %cst_152 {dimension_numbers = #tpu.dot_dimension_numbers<[1], [0], [0], [1], [0, 0, 1, 1], [], []>} : vector<8x8xbf16>, vector<8x32xbf16>, vector<8x32xf32> -> vector<8x32xf32>
    %563 = arith.addf %395, %562 : vector<8x32xf32>
    %c0_153 = arith.constant 0 : index
    %c0_154 = arith.constant 0 : index
    %c24 = arith.constant 24 : index
    %564 = vector.load %arg2[%c0_153, %c0_154, %c24] : memref<1x8x32xf32, #tpu.memory_space<vmem>>, vector<1x8x8xf32>
    %565 = vector.shape_cast %564 : vector<1x8x8xf32> to vector<8x8xf32>
    %cst_155 = arith.constant 0.353553385 : f32
    %566 = vector.broadcast %cst_155 : f32 to vector<8x8xf32>
    %567 = arith.mulf %565, %566 : vector<8x8xf32>
    %568 = arith.truncf %567 : vector<8x8xf32> to vector<8x8xbf16>
    %c0_156 = arith.constant 0 : index
    %c0_157 = arith.constant 0 : index
    %c24_158 = arith.constant 24 : index
    %569 = vector.load %arg3[%c0_156, %c0_157, %c24_158] : memref<1x12x64xf32, #tpu.memory_space<vmem>>, vector<1x12x8xf32>
    %570 = vector.shape_cast %569 : vector<1x12x8xf32> to vector<12x8xf32>
    %571 = arith.truncf %570 : vector<12x8xf32> to vector<12x8xbf16>
    %c0_159 = arith.constant 0 : index
    %c24_160 = arith.constant 24 : index
    %572 = vector.load %arg4[%c0_159, %c24_160] : memref<7x32xf32, #tpu.memory_space<vmem>>, vector<7x8xf32>
    %cst_161 = arith.constant 0.353553385 : f32
    %573 = vector.broadcast %cst_161 : f32 to vector<7x8xf32>
    %574 = arith.mulf %572, %573 : vector<7x8xf32>
    %575 = arith.truncf %574 : vector<7x8xf32> to vector<7x8xbf16>
    %c0_162 = arith.constant 0 : index
    %c24_163 = arith.constant 24 : index
    %576 = vector.load %arg5[%c0_162, %c24_163] : memref<15x32xf32, #tpu.memory_space<vmem>>, vector<15x8xf32>
    %577 = arith.truncf %576 : vector<15x8xf32> to vector<15x8xbf16>
    %cst_164 = arith.constant dense<0.000000e+00> : vector<8x12xf32>
    %578 = tpu.matmul %568, %571, %cst_164 {dimension_numbers = #tpu.dot_dimension_numbers<[1], [1], [0], [0], [0, 0, 1, 0], [], []>} : vector<8x8xbf16>, vector<12x8xbf16>, vector<8x12xf32> -> vector<8x12xf32>
    %cst_165 = arith.constant dense<0.000000e+00> : vector<8x15xf32>
    %579 = tpu.matmul %568, %577, %cst_165 {dimension_numbers = #tpu.dot_dimension_numbers<[1], [1], [0], [0], [0, 0, 1, 0], [], []>} : vector<8x8xbf16>, vector<15x8xbf16>, vector<8x15xf32> -> vector<8x15xf32>
    %cst_166 = arith.constant dense<0.000000e+00> : vector<7x12xf32>
    %580 = tpu.matmul %575, %571, %cst_166 {dimension_numbers = #tpu.dot_dimension_numbers<[1], [1], [0], [0], [0, 0, 1, 0], [], []>} : vector<7x8xbf16>, vector<12x8xbf16>, vector<7x12xf32> -> vector<7x12xf32>
    %581 = vector.extract_strided_slice %579 {offsets = [0, 0], sizes = [8, 1], strides = [1, 1]} : vector<8x15xf32> to vector<8x1xf32>
    %cst_167 = arith.constant 0.000000e+00 : f32
    %582 = vector.shape_cast %581 : vector<8x1xf32> to vector<8x1xf32>
    %583 = vector.broadcast %582 : vector<8x1xf32> to vector<8x12xf32>
    %584 = vector.broadcast %cst_167 : f32 to vector<8x12xf32>
    %585 = arith.select %12, %583, %584 : vector<8x12xi1>, vector<8x12xf32>
    %586 = arith.addf %578, %585 : vector<8x12xf32>
    %587 = vector.extract_strided_slice %579 {offsets = [0, 1], sizes = [8, 1], strides = [1, 1]} : vector<8x15xf32> to vector<8x1xf32>
    %cst_168 = arith.constant 0.000000e+00 : f32
    %588 = vector.shape_cast %587 : vector<8x1xf32> to vector<8x1xf32>
    %589 = vector.broadcast %588 : vector<8x1xf32> to vector<8x12xf32>
    %590 = vector.broadcast %cst_168 : f32 to vector<8x12xf32>
    %591 = arith.select %14, %589, %590 : vector<8x12xi1>, vector<8x12xf32>
    %592 = arith.addf %586, %591 : vector<8x12xf32>
    %593 = vector.extract_strided_slice %579 {offsets = [0, 2], sizes = [8, 1], strides = [1, 1]} : vector<8x15xf32> to vector<8x1xf32>
    %cst_169 = arith.constant 0.000000e+00 : f32
    %594 = vector.shape_cast %593 : vector<8x1xf32> to vector<8x1xf32>
    %595 = vector.broadcast %594 : vector<8x1xf32> to vector<8x12xf32>
    %596 = vector.broadcast %cst_169 : f32 to vector<8x12xf32>
    %597 = arith.select %16, %595, %596 : vector<8x12xi1>, vector<8x12xf32>
    %598 = arith.addf %592, %597 : vector<8x12xf32>
    %599 = vector.extract_strided_slice %579 {offsets = [0, 3], sizes = [8, 1], strides = [1, 1]} : vector<8x15xf32> to vector<8x1xf32>
    %cst_170 = arith.constant 0.000000e+00 : f32
    %600 = vector.shape_cast %599 : vector<8x1xf32> to vector<8x1xf32>
    %601 = vector.broadcast %600 : vector<8x1xf32> to vector<8x12xf32>
    %602 = vector.broadcast %cst_170 : f32 to vector<8x12xf32>
    %603 = arith.select %18, %601, %602 : vector<8x12xi1>, vector<8x12xf32>
    %604 = arith.addf %598, %603 : vector<8x12xf32>
    %605 = vector.extract_strided_slice %579 {offsets = [0, 4], sizes = [8, 1], strides = [1, 1]} : vector<8x15xf32> to vector<8x1xf32>
    %cst_171 = arith.constant 0.000000e+00 : f32
    %606 = vector.shape_cast %605 : vector<8x1xf32> to vector<8x1xf32>
    %607 = vector.broadcast %606 : vector<8x1xf32> to vector<8x12xf32>
    %608 = vector.broadcast %cst_171 : f32 to vector<8x12xf32>
    %609 = arith.select %20, %607, %608 : vector<8x12xi1>, vector<8x12xf32>
    %610 = arith.addf %604, %609 : vector<8x12xf32>
    %611 = vector.extract_strided_slice %579 {offsets = [0, 5], sizes = [8, 1], strides = [1, 1]} : vector<8x15xf32> to vector<8x1xf32>
    %cst_172 = arith.constant 0.000000e+00 : f32
    %612 = vector.shape_cast %611 : vector<8x1xf32> to vector<8x1xf32>
    %613 = vector.broadcast %612 : vector<8x1xf32> to vector<8x12xf32>
    %614 = vector.broadcast %cst_172 : f32 to vector<8x12xf32>
    %615 = arith.select %22, %613, %614 : vector<8x12xi1>, vector<8x12xf32>
    %616 = arith.addf %610, %615 : vector<8x12xf32>
    %617 = vector.extract_strided_slice %579 {offsets = [0, 6], sizes = [8, 1], strides = [1, 1]} : vector<8x15xf32> to vector<8x1xf32>
    %cst_173 = arith.constant 0.000000e+00 : f32
    %618 = vector.shape_cast %617 : vector<8x1xf32> to vector<8x1xf32>
    %619 = vector.broadcast %618 : vector<8x1xf32> to vector<8x12xf32>
    %620 = vector.broadcast %cst_173 : f32 to vector<8x12xf32>
    %621 = arith.select %24, %619, %620 : vector<8x12xi1>, vector<8x12xf32>
    %622 = arith.addf %616, %621 : vector<8x12xf32>
    %623 = vector.extract_strided_slice %579 {offsets = [0, 7], sizes = [8, 1], strides = [1, 1]} : vector<8x15xf32> to vector<8x1xf32>
    %cst_174 = arith.constant 0.000000e+00 : f32
    %624 = vector.shape_cast %623 : vector<8x1xf32> to vector<8x1xf32>
    %625 = vector.broadcast %624 : vector<8x1xf32> to vector<8x12xf32>
    %626 = vector.broadcast %cst_174 : f32 to vector<8x12xf32>
    %627 = arith.select %26, %625, %626 : vector<8x12xi1>, vector<8x12xf32>
    %628 = arith.addf %622, %627 : vector<8x12xf32>
    %629 = vector.extract_strided_slice %579 {offsets = [0, 8], sizes = [8, 1], strides = [1, 1]} : vector<8x15xf32> to vector<8x1xf32>
    %cst_175 = arith.constant 0.000000e+00 : f32
    %630 = vector.shape_cast %629 : vector<8x1xf32> to vector<8x1xf32>
    %631 = vector.broadcast %630 : vector<8x1xf32> to vector<8x12xf32>
    %632 = vector.broadcast %cst_175 : f32 to vector<8x12xf32>
    %633 = arith.select %28, %631, %632 : vector<8x12xi1>, vector<8x12xf32>
    %634 = arith.addf %628, %633 : vector<8x12xf32>
    %635 = vector.extract_strided_slice %579 {offsets = [0, 9], sizes = [8, 1], strides = [1, 1]} : vector<8x15xf32> to vector<8x1xf32>
    %cst_176 = arith.constant 0.000000e+00 : f32
    %636 = vector.shape_cast %635 : vector<8x1xf32> to vector<8x1xf32>
    %637 = vector.broadcast %636 : vector<8x1xf32> to vector<8x12xf32>
    %638 = vector.broadcast %cst_176 : f32 to vector<8x12xf32>
    %639 = arith.select %30, %637, %638 : vector<8x12xi1>, vector<8x12xf32>
    %640 = arith.addf %634, %639 : vector<8x12xf32>
    %641 = vector.extract_strided_slice %579 {offsets = [0, 10], sizes = [8, 1], strides = [1, 1]} : vector<8x15xf32> to vector<8x1xf32>
    %cst_177 = arith.constant 0.000000e+00 : f32
    %642 = vector.shape_cast %641 : vector<8x1xf32> to vector<8x1xf32>
    %643 = vector.broadcast %642 : vector<8x1xf32> to vector<8x12xf32>
    %644 = vector.broadcast %cst_177 : f32 to vector<8x12xf32>
    %645 = arith.select %32, %643, %644 : vector<8x12xi1>, vector<8x12xf32>
    %646 = arith.addf %640, %645 : vector<8x12xf32>
    %647 = vector.extract_strided_slice %579 {offsets = [0, 11], sizes = [8, 1], strides = [1, 1]} : vector<8x15xf32> to vector<8x1xf32>
    %cst_178 = arith.constant 0.000000e+00 : f32
    %648 = vector.shape_cast %647 : vector<8x1xf32> to vector<8x1xf32>
    %649 = vector.broadcast %648 : vector<8x1xf32> to vector<8x12xf32>
    %650 = vector.broadcast %cst_178 : f32 to vector<8x12xf32>
    %651 = arith.select %34, %649, %650 : vector<8x12xi1>, vector<8x12xf32>
    %652 = arith.addf %646, %651 : vector<8x12xf32>
    %653 = vector.extract_strided_slice %579 {offsets = [0, 12], sizes = [8, 1], strides = [1, 1]} : vector<8x15xf32> to vector<8x1xf32>
    %cst_179 = arith.constant 0.000000e+00 : f32
    %654 = vector.shape_cast %653 : vector<8x1xf32> to vector<8x1xf32>
    %655 = vector.broadcast %654 : vector<8x1xf32> to vector<8x12xf32>
    %656 = vector.broadcast %cst_179 : f32 to vector<8x12xf32>
    %657 = arith.select %36, %655, %656 : vector<8x12xi1>, vector<8x12xf32>
    %658 = arith.addf %652, %657 : vector<8x12xf32>
    %659 = vector.extract_strided_slice %579 {offsets = [0, 13], sizes = [8, 1], strides = [1, 1]} : vector<8x15xf32> to vector<8x1xf32>
    %cst_180 = arith.constant 0.000000e+00 : f32
    %660 = vector.shape_cast %659 : vector<8x1xf32> to vector<8x1xf32>
    %661 = vector.broadcast %660 : vector<8x1xf32> to vector<8x12xf32>
    %662 = vector.broadcast %cst_180 : f32 to vector<8x12xf32>
    %663 = arith.select %38, %661, %662 : vector<8x12xi1>, vector<8x12xf32>
    %664 = arith.addf %658, %663 : vector<8x12xf32>
    %665 = vector.extract_strided_slice %579 {offsets = [0, 14], sizes = [8, 1], strides = [1, 1]} : vector<8x15xf32> to vector<8x1xf32>
    %cst_181 = arith.constant 0.000000e+00 : f32
    %666 = vector.shape_cast %665 : vector<8x1xf32> to vector<8x1xf32>
    %667 = vector.broadcast %666 : vector<8x1xf32> to vector<8x12xf32>
    %668 = vector.broadcast %cst_181 : f32 to vector<8x12xf32>
    %669 = arith.select %40, %667, %668 : vector<8x12xi1>, vector<8x12xf32>
    %670 = arith.addf %664, %669 : vector<8x12xf32>
    %671 = vector.extract_strided_slice %580 {offsets = [0, 0], sizes = [1, 12], strides = [1, 1]} : vector<7x12xf32> to vector<1x12xf32>
    %cst_182 = arith.constant 0.000000e+00 : f32
    %672 = vector.shape_cast %671 : vector<1x12xf32> to vector<1x12xf32>
    %673 = vector.broadcast %672 : vector<1x12xf32> to vector<8x12xf32>
    %674 = vector.broadcast %cst_182 : f32 to vector<8x12xf32>
    %675 = arith.select %42, %673, %674 : vector<8x12xi1>, vector<8x12xf32>
    %676 = arith.addf %670, %675 : vector<8x12xf32>
    %677 = vector.extract_strided_slice %580 {offsets = [1, 0], sizes = [1, 12], strides = [1, 1]} : vector<7x12xf32> to vector<1x12xf32>
    %cst_183 = arith.constant 0.000000e+00 : f32
    %678 = vector.shape_cast %677 : vector<1x12xf32> to vector<1x12xf32>
    %679 = vector.broadcast %678 : vector<1x12xf32> to vector<8x12xf32>
    %680 = vector.broadcast %cst_183 : f32 to vector<8x12xf32>
    %681 = arith.select %44, %679, %680 : vector<8x12xi1>, vector<8x12xf32>
    %682 = arith.addf %676, %681 : vector<8x12xf32>
    %683 = vector.extract_strided_slice %580 {offsets = [2, 0], sizes = [1, 12], strides = [1, 1]} : vector<7x12xf32> to vector<1x12xf32>
    %cst_184 = arith.constant 0.000000e+00 : f32
    %684 = vector.shape_cast %683 : vector<1x12xf32> to vector<1x12xf32>
    %685 = vector.broadcast %684 : vector<1x12xf32> to vector<8x12xf32>
    %686 = vector.broadcast %cst_184 : f32 to vector<8x12xf32>
    %687 = arith.select %46, %685, %686 : vector<8x12xi1>, vector<8x12xf32>
    %688 = arith.addf %682, %687 : vector<8x12xf32>
    %689 = vector.extract_strided_slice %580 {offsets = [3, 0], sizes = [1, 12], strides = [1, 1]} : vector<7x12xf32> to vector<1x12xf32>
    %cst_185 = arith.constant 0.000000e+00 : f32
    %690 = vector.shape_cast %689 : vector<1x12xf32> to vector<1x12xf32>
    %691 = vector.broadcast %690 : vector<1x12xf32> to vector<8x12xf32>
    %692 = vector.broadcast %cst_185 : f32 to vector<8x12xf32>
    %693 = arith.select %48, %691, %692 : vector<8x12xi1>, vector<8x12xf32>
    %694 = arith.addf %688, %693 : vector<8x12xf32>
    %695 = vector.extract_strided_slice %580 {offsets = [4, 0], sizes = [1, 12], strides = [1, 1]} : vector<7x12xf32> to vector<1x12xf32>
    %cst_186 = arith.constant 0.000000e+00 : f32
    %696 = vector.shape_cast %695 : vector<1x12xf32> to vector<1x12xf32>
    %697 = vector.broadcast %696 : vector<1x12xf32> to vector<8x12xf32>
    %698 = vector.broadcast %cst_186 : f32 to vector<8x12xf32>
    %699 = arith.select %50, %697, %698 : vector<8x12xi1>, vector<8x12xf32>
    %700 = arith.addf %694, %699 : vector<8x12xf32>
    %701 = vector.extract_strided_slice %580 {offsets = [5, 0], sizes = [1, 12], strides = [1, 1]} : vector<7x12xf32> to vector<1x12xf32>
    %cst_187 = arith.constant 0.000000e+00 : f32
    %702 = vector.shape_cast %701 : vector<1x12xf32> to vector<1x12xf32>
    %703 = vector.broadcast %702 : vector<1x12xf32> to vector<8x12xf32>
    %704 = vector.broadcast %cst_187 : f32 to vector<8x12xf32>
    %705 = arith.select %52, %703, %704 : vector<8x12xi1>, vector<8x12xf32>
    %706 = arith.addf %700, %705 : vector<8x12xf32>
    %707 = vector.extract_strided_slice %580 {offsets = [6, 0], sizes = [1, 12], strides = [1, 1]} : vector<7x12xf32> to vector<1x12xf32>
    %cst_188 = arith.constant 0.000000e+00 : f32
    %708 = vector.shape_cast %707 : vector<1x12xf32> to vector<1x12xf32>
    %709 = vector.broadcast %708 : vector<1x12xf32> to vector<8x12xf32>
    %710 = vector.broadcast %cst_188 : f32 to vector<8x12xf32>
    %711 = arith.select %54, %709, %710 : vector<8x12xi1>, vector<8x12xf32>
    %712 = arith.addf %706, %711 : vector<8x12xf32>
    %713 = arith.addf %712, %8 : vector<8x12xf32>
    %cst_189 = arith.constant dense<0xFF800000> : vector<8xf32>
    %714 = vector.multi_reduction <maximumf>, %713, %cst_189 [1] : vector<8x12xf32> to vector<8xf32>
    %715 = vector.shape_cast %714 : vector<8xf32> to vector<8x1xf32>
    %716 = vector.broadcast %715 : vector<8x1xf32> to vector<8x12xf32>
    %717 = arith.subf %713, %716 : vector<8x12xf32>
    %718 = math.exp %717 : vector<8x12xf32>
    %cst_190 = arith.constant dense<0.000000e+00> : vector<8xf32>
    %719 = vector.multi_reduction <add>, %718, %cst_190 [1] : vector<8x12xf32> to vector<8xf32>
    %720 = vector.shape_cast %719 : vector<8xf32> to vector<8x1xf32>
    %c0_191 = arith.constant 0 : index
    %c0_192 = arith.constant 0 : index
    %c56 = arith.constant 56 : index
    %721 = vector.load %arg3[%c0_191, %c0_192, %c56] : memref<1x12x64xf32, #tpu.memory_space<vmem>>, vector<1x12x8xf32>
    %722 = vector.shape_cast %721 : vector<1x12x8xf32> to vector<12x8xf32>
    %723 = arith.truncf %722 : vector<12x8xf32> to vector<12x8xbf16>
    %724 = arith.truncf %718 : vector<8x12xf32> to vector<8x12xbf16>
    %cst_193 = arith.constant dense<0.000000e+00> : vector<8x8xf32>
    %725 = tpu.matmul %724, %723, %cst_193 {dimension_numbers = #tpu.dot_dimension_numbers<[1], [0], [0], [1], [0, 0, 1, 1], [], []>} : vector<8x12xbf16>, vector<12x8xbf16>, vector<8x8xf32> -> vector<8x8xf32>
    %726 = vector.broadcast %720 : vector<8x1xf32> to vector<8x8xf32>
    %727 = arith.divf %725, %726 : vector<8x8xf32>
    %728 = arith.truncf %727 : vector<8x8xf32> to vector<8x8xbf16>
    %c24_194 = arith.constant 24 : index
    %c0_195 = arith.constant 0 : index
    %729 = vector.load %arg10[%c24_194, %c0_195] : memref<32x32xbf16, #tpu.memory_space<vmem>>, vector<8x32xbf16>
    %cst_196 = arith.constant dense<0.000000e+00> : vector<8x32xf32>
    %730 = tpu.matmul %728, %729, %cst_196 {dimension_numbers = #tpu.dot_dimension_numbers<[1], [0], [0], [1], [0, 0, 1, 1], [], []>} : vector<8x8xbf16>, vector<8x32xbf16>, vector<8x32xf32> -> vector<8x32xf32>
    %731 = arith.addf %563, %730 : vector<8x32xf32>
    %c0_197 = arith.constant 0 : index
    %c0_198 = arith.constant 0 : index
    %c0_199 = arith.constant 0 : index
    %732 = vector.load %arg12[%c0_197, %c0_198, %c0_199] : memref<1x8x32xf32, #tpu.memory_space<vmem>>, vector<1x8x32xf32>
    %733 = vector.shape_cast %732 : vector<1x8x32xf32> to vector<8x32xf32>
    %734 = vector.shape_cast %731 : vector<8x32xf32> to vector<1x8x32xf32>
    tpu.vector_store %arg12[%c0_197, %c0_198, %c0_199], %734 {strides = array<i32>} : memref<1x8x32xf32, #tpu.memory_space<vmem>>, vector<1x8x32xf32>,
    return
  }
  func.func @transform_0(%arg0: i32, %arg1: i32) -> (i32, i32, i32) {
    %c0_i32 = arith.constant 0 : i32
    %c0_i32_0 = arith.constant 0 : i32
    return %arg0, %arg1, %c0_i32 : i32, i32, i32
  }
  func.func @transform_1(%arg0: i32, %arg1: i32) -> (i32, i32, i32) {
    %c0_i32 = arith.constant 0 : i32
    %c0_i32_0 = arith.constant 0 : i32
    %c0_i32_1 = arith.constant 0 : i32
    return %arg0, %c0_i32, %c0_i32_0 : i32, i32, i32
  }
  func.func @transform_2(%arg0: i32, %arg1: i32) -> (i32, i32) {
    %c0_i32 = arith.constant 0 : i32
    %c0_i32_0 = arith.constant 0 : i32
    %c0_i32_1 = arith.constant 0 : i32
    return %c0_i32, %c0_i32_0 : i32, i32
  }
  func.func @transform_3(%arg0: i32, %arg1: i32) -> (i32, i32) {
    %c0_i32 = arith.constant 0 : i32
    %c0_i32_0 = arith.constant 0 : i32
    %c0_i32_1 = arith.constant 0 : i32
    return %c0_i32, %c0_i32_0 : i32, i32
  }
  func.func @transform_4(%arg0: i32, %arg1: i32) -> (i32, i32) {
    %c0_i32 = arith.constant 0 : i32
    %c0_i32_0 = arith.constant 0 : i32
    return %arg1, %c0_i32 : i32, i32
  }
  func.func @transform_5(%arg0: i32, %arg1: i32) -> (i32, i32) {
    %c0_i32 = arith.constant 0 : i32
    %c0_i32_0 = arith.constant 0 : i32
    return %arg1, %c0_i32 : i32, i32
  }
  func.func @transform_6(%arg0: i32, %arg1: i32) -> (i32, i32, i32) {
    %c0_i32 = arith.constant 0 : i32
    %c0_i32_0 = arith.constant 0 : i32
    %c0_i32_1 = arith.constant 0 : i32
    return %arg0, %c0_i32, %c0_i32_0 : i32, i32, i32
  }
  func.func @transform_7(%arg0: i32, %arg1: i32) -> (i32, i32, i32) {
    %c0_i32 = arith.constant 0 : i32
    %c0_i32_0 = arith.constant 0 : i32
    return %arg0, %arg1, %c0_i32 : i32, i32, i32
  }
  func.func @transform_8(%arg0: i32, %arg1: i32) -> (i32, i32) {
    %c0_i32 = arith.constant 0 : i32
    %c0_i32_0 = arith.constant 0 : i32
    %c0_i32_1 = arith.constant 0 : i32
    return %c0_i32, %c0_i32_0 : i32, i32
  }
  func.func @transform_9(%arg0: i32, %arg1: i32) -> (i32, i32) {
    %c0_i32 = arith.constant 0 : i32
    %c0_i32_0 = arith.constant 0 : i32
    %c0_i32_1 = arith.constant 0 : i32
    return %c0_i32, %c0_i32_0 : i32, i32
  }
  func.func @transform_10(%arg0: i32, %arg1: i32) -> (i32, i32, i32) {
    %c0_i32 = arith.constant 0 : i32
    %c0_i32_0 = arith.constant 0 : i32
    return %arg0, %arg1, %c0_i32 : i32, i32, i32
  }
}

</mosaic_0001>

<bundles_post_ra>
// kernel: decoder_forward.13
= control target key start
LH: loop header
LB: loop body
LE: loop exit
PB: predicated region body
PF: predicated region fallthrough
CT: control target
= control target key end

     0   :  { %vm27_vm0 = vcmask 261120   ;;  %v178_v14 = vmov 0.0   ;;  %vm179_vm1 = vmmov 0   ;;  %vm146_vm2 = vcmask 785408   ;;  %s244_s0 = inlined_call_operand.vmem [shape: f32[16,32], index: 0, kind: input, shape index: {}]   ;;  %s245_s3 = inlined_call_operand.vmem [shape: bf16[32,96], index: 3, kind: input, shape index: {}]   ;;  %s246_s1 = inlined_call_operand.vmem [shape: f32[1,32], index: 1, kind: input, shape index: {}]   ;;  %s247_s2 = inlined_call_operand.vmem [shape: f32[1,32], index: 2, kind: input, shape index: {}]   ;;  %s248_s4 = inlined_call_operand.vmem [shape: f32[1,96], index: 4, kind: input, shape index: {}]   ;;  %s249_s5 = inlined_call_operand.vmem [shape: f32[16,96], index: 5, kind: output, shape index: {}]  }
   0x1   :  { %v25_v0 = vld [vmem:[%s244_s0] sm:$0xff]  ;;  %v26_v1 = vld [vmem:[%s244_s0 + $0x8] sm:$0xff]  ;;  %162 = vmatprep.subr.bf16.mxu0 %v178_v14  ;;  %166 = vmatprep.mubr.msk.bf16.mxu0 %vm179_vm1, %v178_v14 }
   0x2   :  { %v28_v2 = vsel %vm27_vm0, %v25_v0, 0.0  ;;  %v31_v3 = vsel %vm27_vm0, %v26_v1, 0.0  ;;  %v172_v15 = vld [vmem:[%s245_s3] sm:$0xff]   ;;  %v173_v16 = vld [vmem:[%s245_s3 + $0x8] sm:$0xff]  }
   0x3   :  { %29 = vadd.xlane.f32.xlu0 %v28_v2  ;;  %163 = vmatpush3.bf16.msra.mxu0 %v172_v15  ;;  %v153_v24 = vld [vmem:[%s246_s1] ss:$0 sm:$0xff] }
   0x4   :  { %164 = vmatprep.subr.bf16.mxu0 %v178_v14  ;;  %v154_v26 = vld [vmem:[%s247_s2] ss:$0 sm:$0xff] }
   0x5   :  { %v155_v36 = vld [vmem:[%s248_s4] ss:$0 sm:$0xff] }
   0x7   :  { %32 = vadd.xlane.f32.xlu0 %v31_v3  ;;  %165 = vmatpush3.bf16.msra.mxu0 %v173_v16 }
  0x90   :  { %v30_v4 = vpop.xlane.xlu0 %29 }
  0x91   :  { %v35_v5 = vmul.f32 0.03125, %v30_v4 }
  0x93   :  { %v37_v6 = vsub.f32 %v25_v0, %v35_v5 }
  0x94   :  { %v33_v7 = vpop.xlane.xlu0 %32 }
  0x95   :  { %v36_v8 = vmul.f32 0.03125, %v33_v7  ;;  %v39_v9 = vmul.f32 %v37_v6, %v37_v6 }
  0x97   :  { %v38_v10 = vsub.f32 %v26_v1, %v36_v8  ;;  %v41_v11 = vsel %vm27_vm0, %v39_v9, 0.0 }
  0x98   :  { %42 = vadd.xlane.f32.xlu1 %v41_v11 }
  0x99   :  { %v40_v12 = vmul.f32 %v38_v10, %v38_v10 }
  0x9b   :  { %v44_v13 = vsel %vm27_vm0, %v40_v12, 0.0 }
  0x9c   :  { %45 = vadd.xlane.f32.xlu1 %v44_v13 }
 0x125   :  { %v43_v17 = vpop.xlane.xlu1 %42 }
 0x126   :  { %v47_v18 = vmul.f32 0.03125, %v43_v17 }
 0x128   :  { %v49_v19 = vadd.f32 1e-05, %v47_v18 }
 0x129   :  { %v46_v20 = vpop.xlane.xlu1 %45 }
 0x12a   :  { %174 = vrsqrt.f32 %v49_v19  ;;  %v48_v21 = vmul.f32 0.03125, %v46_v20 }
 0x12c   :  { %v50_v22 = vadd.f32 1e-05, %v48_v21 }
 0x12e   :  { %176 = vrsqrt.f32 %v50_v22 }
 0x134   :  { %v175_v23 = vpop.eup %174 }
 0x135   :  { %v53_v25 = vmul.f32 %v175_v23, %v37_v6 }
 0x137   :  { %v62_v27 = vmul.f32 %v153_v24, %v53_v25 }
 0x138   :  { %v177_v28 = vpop.eup %176 }
 0x139   :  { %v71_v29 = vadd.f32 %v154_v26, %v62_v27  ;;  %v54_v30 = vmul.f32 %v177_v28, %v38_v10 }
 0x13b   :  { %73 = vst.msk [vmem:[#allocation2] sm:$0xff] %vm27_vm0, %v71_v29  ;;  %v63_v31 = vmul.f32 %v153_v24, %v54_v30 }
 0x13d   :  { %v72_v32 = vadd.f32 %v154_v26, %v63_v31 }
 0x13f   :  { %74 = vst.msk [vmem:[#allocation2 + $0x8] sm:$0xff] %vm27_vm0, %v72_v32 }
 0x142   :  { %v75_v33 = vld [vmem:[#allocation2] sm:$0xff] }
 0x146   :  { %v76_v34 = vld [vmem:[#allocation2 + $0x8] sm:$0xff] }
 0x147   :  { %v77_v35 = vpack.c.bf16 %v76_v34, %v75_v33 }
 0x149   :  { %167 = vmatmul.mubr.msk.bf16.vlgmr.msra.gmra.mrb[0].mxu0 %vm27_vm0, %v77_v35 }
 0x21c   :  { %v139_v37 = vpop.f32.mrb[0].mxu0 }
 0x21d   :  { %v140_v38 = vadd.f32 %v155_v36, %v139_v37  ;;  %v168_v39 = vpop.f32.mrb[1].mxu0 }
 0x21e   :  { %v142_v40 = vpop.f32.mrb[2].mxu0 }
 0x21f   :  { %147 = vst.msk [vmem:[%s249_s5] sm:$0xff] %vm146_vm2, %v140_v38  ;;  %v143_v41 = vadd.f32 %v155_v36, %v142_v40  ;;  %v169_v42 = vpop.f32.mrb[3].mxu0 }
 0x221   :  { %148 = vst.msk [vmem:[%s249_s5 + $0x8] sm:$0xff] %vm146_vm2, %v143_v41 }

// kernel: decoder_forward.15
= control target key start
LH: loop header
LB: loop body
LE: loop exit
PB: predicated region body
PF: predicated region fallthrough
CT: control target
= control target key end

     0   :  { %vm27_vm0 = vcmask 261120   ;;  %v177_v14 = vmov 0.0   ;;  %vm178_vm1 = vmmov 0   ;;  %s245_s0 = inlined_call_operand.vmem [shape: f32[16,32], index: 0, kind: input, shape index: {}]   ;;  %s246_s3 = inlined_call_operand.vmem [shape: bf16[32,32], index: 3, kind: input, shape index: {}]   ;;  %s247_s1 = inlined_call_operand.vmem [shape: f32[1,32], index: 1, kind: input, shape index: {}]   ;;  %s248_s2 = inlined_call_operand.vmem [shape: f32[1,32], index: 2, kind: input, shape index: {}]   ;;  %s249_s4 = inlined_call_operand.vmem [shape: f32[1,32], index: 4, kind: input, shape index: {}]   ;;  %s250_s5 = inlined_call_operand.vmem [shape: f32[16,32], index: 5, kind: output, shape index: {}]  }
   0x1   :  { %v25_v0 = vld [vmem:[%s245_s0] sm:$0xff]  ;;  %v26_v1 = vld [vmem:[%s245_s0 + $0x8] sm:$0xff]  ;;  %161 = vmatprep.subr.bf16.mxu0 %v177_v14  ;;  %165 = vmatprep.mubr.msk.bf16.mxu0 %vm178_vm1, %v177_v14 }
   0x2   :  { %v28_v2 = vsel %vm27_vm0, %v25_v0, 0.0  ;;  %v31_v3 = vsel %vm27_vm0, %v26_v1, 0.0  ;;  %v171_v15 = vld [vmem:[%s246_s3] sm:$0xff]   ;;  %v172_v16 = vld [vmem:[%s246_s3 + $0x8] sm:$0xff]  }
   0x3   :  { %29 = vadd.xlane.f32.xlu0 %v28_v2  ;;  %162 = vmatpush3.bf16.msra.mxu0 %v171_v15  ;;  %v152_v24 = vld [vmem:[%s247_s1] ss:$0 sm:$0xff] }
   0x4   :  { %163 = vmatprep.subr.bf16.mxu0 %v177_v14  ;;  %v153_v26 = vld [vmem:[%s248_s2] ss:$0 sm:$0xff] }
   0x5   :  { %v154_v36 = vld [vmem:[%s249_s4] ss:$0 sm:$0xff] }
   0x7   :  { %32 = vadd.xlane.f32.xlu0 %v31_v3  ;;  %164 = vmatpush3.bf16.msra.mxu0 %v172_v16 }
  0x90   :  { %v30_v4 = vpop.xlane.xlu0 %29 }
  0x91   :  { %v35_v5 = vmul.f32 0.03125, %v30_v4 }
  0x93   :  { %v37_v6 = vsub.f32 %v25_v0, %v35_v5 }
  0x94   :  { %v33_v7 = vpop.xlane.xlu0 %32 }
  0x95   :  { %v36_v8 = vmul.f32 0.03125, %v33_v7  ;;  %v39_v9 = vmul.f32 %v37_v6, %v37_v6 }
  0x97   :  { %v38_v10 = vsub.f32 %v26_v1, %v36_v8  ;;  %v41_v11 = vsel %vm27_vm0, %v39_v9, 0.0 }
  0x98   :  { %42 = vadd.xlane.f32.xlu1 %v41_v11 }
  0x99   :  { %v40_v12 = vmul.f32 %v38_v10, %v38_v10 }
  0x9b   :  { %v44_v13 = vsel %vm27_vm0, %v40_v12, 0.0 }
  0x9c   :  { %45 = vadd.xlane.f32.xlu1 %v44_v13 }
 0x125   :  { %v43_v17 = vpop.xlane.xlu1 %42 }
 0x126   :  { %v47_v18 = vmul.f32 0.03125, %v43_v17 }
 0x128   :  { %v49_v19 = vadd.f32 1e-05, %v47_v18 }
 0x129   :  { %v46_v20 = vpop.xlane.xlu1 %45 }
 0x12a   :  { %173 = vrsqrt.f32 %v49_v19  ;;  %v48_v21 = vmul.f32 0.03125, %v46_v20 }
 0x12c   :  { %v50_v22 = vadd.f32 1e-05, %v48_v21 }
 0x12e   :  { %175 = vrsqrt.f32 %v50_v22 }
 0x134   :  { %v174_v23 = vpop.eup %173 }
 0x135   :  { %v53_v25 = vmul.f32 %v174_v23, %v37_v6 }
 0x137   :  { %v62_v27 = vmul.f32 %v152_v24, %v53_v25 }
 0x138   :  { %v176_v28 = vpop.eup %175 }
 0x139   :  { %v71_v29 = vadd.f32 %v153_v26, %v62_v27  ;;  %v54_v30 = vmul.f32 %v176_v28, %v38_v10 }
 0x13b   :  { %73 = vst.msk [vmem:[#allocation2] sm:$0xff] %vm27_vm0, %v71_v29  ;;  %v63_v31 = vmul.f32 %v152_v24, %v54_v30 }
 0x13d   :  { %v72_v32 = vadd.f32 %v153_v26, %v63_v31 }
 0x13f   :  { %74 = vst.msk [vmem:[#allocation2 + $0x8] sm:$0xff] %vm27_vm0, %v72_v32 }
 0x142   :  { %v75_v33 = vld [vmem:[#allocation2] sm:$0xff] }
 0x146   :  { %v76_v34 = vld [vmem:[#allocation2 + $0x8] sm:$0xff] }
 0x147   :  { %v77_v35 = vpack.c.bf16 %v76_v34, %v75_v33 }
 0x149   :  { %166 = vmatmul.mubr.msk.bf16.vlgmr.msra.gmra.mrb[0].mxu0 %vm27_vm0, %v77_v35 }
 0x21c   :  { %v139_v37 = vpop.f32.mrb[0].mxu0 }
 0x21d   :  { %v140_v38 = vadd.f32 %v154_v36, %v139_v37  ;;  %v167_v39 = vpop.f32.mrb[1].mxu0 }
 0x21e   :  { %v142_v40 = vpop.f32.mrb[2].mxu0 }
 0x21f   :  { %146 = vst.msk [vmem:[%s250_s5] sm:$0xff] %vm27_vm0, %v140_v38  ;;  %v143_v41 = vadd.f32 %v154_v36, %v142_v40  ;;  %v168_v42 = vpop.f32.mrb[3].mxu0 }
 0x221   :  { %147 = vst.msk [vmem:[%s250_s5 + $0x8] sm:$0xff] %vm27_vm0, %v143_v41 }

// kernel: decoder_forward.16
= control target key start
LH: loop header
LB: loop body
LE: loop exit
PB: predicated region body
PF: predicated region fallthrough
CT: control target
= control target key end

     0   :  { %vm43_vm0 = vcmask 261120   ;;  %vm98_vm1 = vcmask 523264   ;;  %s172_s1 = inlined_call_operand.vmem [shape: bf16[32,64], index: 1, kind: input, shape index: {}]   ;;  %s173_s0 = inlined_call_operand.vmem [shape: f32[24,32], index: 0, kind: input, shape index: {}]   ;;  %s174_s2 = inlined_call_operand.vmem [shape: f32[1,64], index: 2, kind: input, shape index: {}]   ;;  %s175_s3 = inlined_call_operand.vmem [shape: f32[24,64], index: 3, kind: output, shape index: {}]  }
   0x1   :  { %v123_v0 = vld [vmem:[%s172_s1] sm:$0xff]   ;;  %v124_v1 = vld [vmem:[%s172_s1 + $0x8] sm:$0xff]   ;;  %v17_v4 = vld [vmem:[%s173_s0 + $0x10] sm:$0xff] }
   0x2   :  { %115 = vmatprep.subr.bf16.mxu0 %v123_v0  ;;  %v15_v2 = vld [vmem:[%s173_s0] sm:$0xff]  ;;  %v16_v3 = vld [vmem:[%s173_s0 + $0x8] sm:$0xff]  ;;  %v19_v6 = vpack.c.bf16 %v17_v4, %v17_v4 }
   0x3   :  { %116 = vmatpush3.bf16.msra.mxu0 %v123_v0  ;;  %v18_v5 = vpack.c.bf16 %v16_v3, %v15_v2  ;;  %v106_v7 = vld [vmem:[%s174_s2] ss:$0 sm:$0xff] }
   0x4   :  { %117 = vmatprep.subr.bf16.mxu0 %v124_v1 }
   0x5   :  { %119 = vmatprep.mubr.msk.bf16.mxu0 %vm43_vm0, %v18_v5 }
   0x7   :  { %118 = vmatpush3.bf16.msra.mxu0 %v124_v1 }
   0xa   :  { %120 = vmatmul.mubr.msk.bf16.vlgmr.msra.gmra.mrb[0].mxu0 %vm43_vm0, %v19_v6 }
  0xdd   :  { %v121_v8 = vpop.f32.mrb[0].mxu0 }
  0xde   :  { %v93_v9 = vadd.f32 %v121_v8, %v106_v7  ;;  %v84_v10 = vpop.f32.mrb[1].mxu0 }
  0xdf   :  { %v85_v11 = vadd.f32 %v106_v7, %v84_v10  ;;  %v122_v12 = vpop.f32.mrb[2].mxu0 }
  0xe0   :  { %101 = vst.msk [vmem:[%s175_s3 + $0x10] sm:$0xff] %vm98_vm1, %v93_v9  ;;  %v87_v13 = vpop.f32.mrb[3].mxu0 }
  0xe1   :  { %99 = vst.msk [vmem:[%s175_s3] sm:$0xff] %vm98_vm1, %v85_v11  ;;  %v88_v14 = vadd.f32 %v106_v7, %v87_v13 }
  0xe3   :  { %100 = vst.msk [vmem:[%s175_s3 + $0x8] sm:$0xff] %vm98_vm1, %v88_v14 }

// kernel: decoder_forward.25
= control target key start
LH: loop header
LB: loop body
LE: loop exit
PB: predicated region body
PF: predicated region fallthrough
CT: control target
= control target key end

     0   :  { %vm17_vm0 = vcmask 261120   ;;  %s167_s0 = inlined_call_operand.vmem [shape: f32[16,32], index: 0, kind: input, shape index: {}]   ;;  %s168_s1 = inlined_call_operand.vmem [shape: f32[1,32], index: 1, kind: input, shape index: {}]   ;;  %s169_s2 = inlined_call_operand.vmem [shape: f32[1,32], index: 2, kind: input, shape index: {}]   ;;  %s170_s3 = inlined_call_operand.hbm [shape: f32[16,32], index: 3, kind: output, shape index: {}]  }
   0x1   :  { %v15_v0 = vld [vmem:[%s167_s0] sm:$0xff]  ;;  %v16_v1 = vld [vmem:[%s167_s0 + $0x8] sm:$0xff] }
   0x2   :  { %8 = vsyncpa [#allocation3], 0  ;;  %v18_v2 = vsel %vm17_vm0, %v15_v0, 0.0  ;;  %v21_v3 = vsel %vm17_vm0, %v16_v1, 0.0  ;;  %v81_v21 = vld [vmem:[%s168_s1] ss:$0 sm:$0xff] }
   0x3   :  { %19 = vadd.xlane.f32.xlu0 %v18_v2  ;;  %v82_v23 = vld [vmem:[%s169_s2] ss:$0 sm:$0xff]  ;;  %s114_s19 = smov [#allocation2]  }
   0x4   :  { %s70_s20 = sshll.u32 %s114_s19, 4  ;;  %s71_s20 = int_to_ptr.vmem [resolvable:$true] %s70_s20 }
   0x5   :  { %s90_s21 = scalar_lea.vmem %s71_s20, 256  ;;  %p95_p1 = scmp.lt.s32.totalorder %s71_s20, %s71_s20 }
   0x6   :  { %p91_p0 = scmp.ne.s32.totalorder %s71_s20, %s90_s21  ;;  %p96_p2 = scmp.lt.s32.totalorder %s90_s21, %s90_s21 }
   0x7   :  { %22 = vadd.xlane.f32.xlu0 %v21_v3 }
   0x8   :  { %p97_p3 = por %p96_p2, %p95_p1 }
   0xa   :  { %p98_p4 = pnand %p97_p3, %p91_p0 }
  0x90   :  { %v20_v4 = vpop.xlane.xlu0 %19 }
  0x91   :  { %v25_v5 = vmul.f32 0.03125, %v20_v4 }
  0x93   :  { %v27_v6 = vsub.f32 %v15_v0, %v25_v5 }
  0x94   :  { %v23_v7 = vpop.xlane.xlu0 %22 }
  0x95   :  { %v26_v8 = vmul.f32 0.03125, %v23_v7  ;;  %v29_v9 = vmul.f32 %v27_v6, %v27_v6 }
  0x97   :  { %v28_v10 = vsub.f32 %v16_v1, %v26_v8  ;;  %v31_v11 = vsel %vm17_vm0, %v29_v9, 0.0 }
  0x98   :  { %32 = vadd.xlane.f32.xlu1 %v31_v11 }
  0x99   :  { %v30_v12 = vmul.f32 %v28_v10, %v28_v10 }
  0x9b   :  { %v34_v13 = vsel %vm17_vm0, %v30_v12, 0.0 }
  0x9c   :  { %35 = vadd.xlane.f32.xlu1 %v34_v13 }
 0x125   :  { %v33_v14 = vpop.xlane.xlu1 %32 }
 0x126   :  { %v37_v15 = vmul.f32 0.03125, %v33_v14 }
 0x128   :  { %v39_v16 = vadd.f32 1e-05, %v37_v15 }
 0x129   :  { %v36_v17 = vpop.xlane.xlu1 %35 }
 0x12a   :  { %86 = vrsqrt.f32 %v39_v16  ;;  %v38_v18 = vmul.f32 0.03125, %v36_v17 }
 0x12c   :  { %v40_v19 = vadd.f32 1e-05, %v38_v18 }
 0x12e   :  { %88 = vrsqrt.f32 %v40_v19 }
 0x134   :  { %v87_v20 = vpop.eup %86 }
 0x135   :  { %v43_v22 = vmul.f32 %v87_v20, %v27_v6 }
 0x137   :  { %v52_v24 = vmul.f32 %v81_v21, %v43_v22 }
 0x138   :  { %v89_v25 = vpop.eup %88 }
 0x139   :  { %v44_v26 = vmul.f32 %v89_v25, %v28_v10  ;;  %v61_v27 = vadd.f32 %v82_v23, %v52_v24 }
 0x13b   :  { %v53_v28 = vmul.f32 %v81_v21, %v44_v26  ;;  %63 = vst.msk [vmem:[#allocation2] sm:$0xff] %vm17_vm0, %v61_v27 }
 0x13d   :  { %v62_v29 = vadd.f32 %v82_v23, %v53_v28 }
 0x13f   :  { %64 = vst.msk [vmem:[#allocation2 + $0x8] sm:$0xff] %vm17_vm0, %v62_v29 }
 0x140   :  { %101 = shalt.err (!%p98_p4)
}
 0x141   :  { %s102_s22 = scalar_lea.hbm %s170_s3, 256 }
 0x142   :  { %p103_p5 = scmp.ne.s32.totalorder %s170_s3, %s102_s22  ;;  %p106_p6 = scmp.lt.u32.totalorder %s102_s22, %s170_s3 }
 0x144   :  { %p108_p7 = pnand %p106_p6, %p103_p5 }
 0x146   :  { %111 = shalt.err (!%p108_p7)
}
 0x147   :  { %s115_s27 = smov 128   ;;  %s116_s28 = smov 8  }
 0x148   :  { %76 = dma.vmem_to_hbm [thread:$0]  %s71_s20, 256, %s170_s3, [#allocation3], %s115_s27, %s115_s27, %s116_s28  }
 0x149   :  { %112 = dma.done.wait [#allocation3], 256  }
 0x14a   :  { %113 = vsyncadd [#allocation3], 4294967040 }
 0x14b   :  { %80 = vsyncpa [#allocation3], 1 }

// kernel: decoder_forward.14
= control target key start
LH: loop header
LB: loop body
LE: loop exit
PB: predicated region body
PF: predicated region fallthrough
CT: control target
= control target key end

     0   :  { %s2408_s13 = smov 0   ;;  %s2410_s14 = smov 0   ;;  %s2848_s0 = inlined_call_operand.vmem [shape: f32[2,8,96], index: 0, kind: input, shape index: {}, may-alias: {0,1}]   ;;  %s2849_s1 = inlined_call_operand.vmem [shape: f32[2,8,96], index: 1, kind: input, shape index: {}, may-alias: {0,1}]   ;;  %s2850_s2 = inlined_call_operand.vmem [shape: f32[7,32], index: 2, kind: input, shape index: {}]   ;;  %s2851_s3 = inlined_call_operand.vmem [shape: f32[7,32], index: 3, kind: input, shape index: {}]   ;;  %s2852_s4 = inlined_call_operand.vmem [shape: s32[8,8], index: 4, kind: input, shape index: {}, may-alias: {4,5}]   ;;  %s2853_s5 = inlined_call_operand.vmem [shape: s32[8,8], index: 5, kind: input, shape index: {}, may-alias: {4,5}]   ;;  %s2854_s6 = inlined_call_operand.vmem [shape: f32[2,1,8], index: 6, kind: input, shape index: {}]   ;;  %s2855_s7 = inlined_call_operand.vmem [shape: f32[2,8,32], index: 7, kind: input, shape index: {}]   ;;  %s2856_s8 = inlined_call_operand.vmem [shape: bf16[32,32], index: 8, kind: input, shape index: {}]   ;;  %s2857_s9 = inlined_call_operand.vmem [shape: f32[1,32], index: 9, kind: input, shape index: {}]   ;;  %s2858_s10 = inlined_call_operand.vmem [shape: f32[2,8,32], index: 10, kind: output, shape index: {}]  }
   0x1   :  { %s2412_s15 = smov 0  }
   0x2 LB: > { %s32_s16 = sadd.s32 1, %s2327_s14  ;;  %p2019_p0 = scmp.ge.s32.totalorder %s2331_s15, 1  ;;  %s2331_s15 = sphi %s2412_s15, %s20_s15   ;;  %s2327_s14 = sphi %s2410_s14, %s2869_s14   ;;  %s2323_s13 = sphi %s2408_s13, %s2868_s13  }
   0x3   : > { %p34_p1 = scmp.ge.s32.totalorder %s32_s16, 2  ;;  %p379_p2 = scmp.lt.s32.totalorder %s2331_s15, 3 }
   0x5   : > { %s2871_s16 = smov (%p34_p1, %s32_s16), 0  ;;  %p380_p3 = pnand %p2019_p0, %p379_p2 }
   0x6   : > { %v532_v0 = vld [vmem:[%s2851_s3] sm:$0x7f] (!%p380_p3)  ;;  %vm534_vm0 = vcmask (!%p380_p3), 64512   ;;  %p443_p4 = scmp.lt.s32.totalorder (!%p380_p3), %s2323_s13, 1  ;;  %v2333_v1 = vmov (!%p380_p3), 0.0   ;;  %vm2334_vm1 = vmmov (!%p380_p3), 0   ;;  %v484_v40 = vlaneseq (!%p380_p3) }
   0x7   : > { %383 = sbr.rel (%p380_p3) target bundleno = 2848 (0xb20), region = 60  ;;  %2087 = vmatprep.subr.bf16.mxu1 (!%p380_p3), %v2333_v1  ;;  %v2430_v2 = vpack.c.bf16 (!%p380_p3), %v532_v0, %v532_v0  ;;  %2089 = vmatprep.mubr.msk.bf16.mxu1 (!%p380_p3), %vm2334_vm1, %v2333_v1  ;;  %v2335_v4 = vmov (!%p380_p3), 1   ;;  %v2336_v7 = vmov (!%p380_p3), 0   ;;  %s2337_s26 = smov (!%p380_p3), 96   ;;  %v529_v11 = vld [vmem:[%s2850_s2] sm:$0x7f] (!%p380_p3) }
   0x8   : > { %2099 = vmatprep.subr.bf16.mxu0 (!%p380_p3), %v2333_v1  ;;  %2101 = vmatprep.mubr.msk.bf16.mxu0 (!%p380_p3), %vm2334_vm1, %v2333_v1  ;;  %v530_v14 = vmul.f32 (!%p380_p3), 0.35355338, %v529_v11  ;;  %v2338_v20 = vmov (!%p380_p3), 2   ;;  %v2339_v21 = vmov (!%p380_p3), 4   ;;  %v2340_v22 = vmov (!%p380_p3), 3   ;;  %s2343_s29 = smov (!%p380_p3), 64  }
   0x9   : > { %v539_v3 = vsel (!%p380_p3), %vm534_vm0, %v2430_v2, 0  ;;  %2265 = vset.pattern.permute.xlu1 (!%p380_p3), %v2335_v4  ;;  %2264 = vset.pattern.permute.xlu0 (!%p380_p3), %v2336_v7  ;;  %v2341_v23 = vmov (!%p380_p3), 5   ;;  %v2342_v24 = vmov (!%p380_p3), 6   ;;  %s2344_s30 = smov (!%p380_p3), 120   ;;  %v2497_v29 = vld [vmem:[%s2853_s5] sm:$0xff] (!%p380_p3)  ;;  %v485_v43 = vshrl.u32 (!%p380_p3), %v484_v40, 7 }
   0xa   : > { %2088 = vmatpush3.bf16.xpose.msra.mxu1 (!%p380_p3), %v539_v3  ;;  %v2470_v15 = vpack.c.bf16 (!%p380_p3), %v530_v14, %v530_v14  ;;  %vm501_vm2 = vcmp.eq.s32.totalorder (!%p380_p3), %v2497_v29, 0  ;;  %vm502_vm3 = vcmp.eq.s32.totalorder (!%p380_p3), %v2497_v29, 1  ;;  %vm503_vm4 = vcmp.eq.s32.totalorder (!%p380_p3), %v2497_v29, 2  ;;  %v2520_v52 = vld [vmem:[%s2852_s4] sm:$0xff] (!%p380_p3)  ;;  %s2348_s27 = smov (!%p380_p3), 80   ;;  %s2350_s11 = smov (!%p380_p3), 104  }
   0xb   : > { %2093 = vmatprep.subr.bf16.mxu1 (!%p380_p3), %v2333_v1  ;;  %vm504_vm5 = vcmp.eq.s32.totalorder (!%p380_p3), %v2497_v29, 3  ;;  %vm505_vm6 = vcmp.eq.s32.totalorder (!%p380_p3), %v2497_v29, 4  ;;  %v2512_v49 = vsub.s32 (!%p380_p3), 0, %v485_v43  ;;  %vm2861_vm7 = vcmp.eq.s32.totalorder (!%p380_p3), %v2497_v29, 5  ;;  %s2351_s12 = smov (!%p380_p3), 72   ;;  %s2352_s20 = smov (!%p380_p3), 40  }
   0xc   : > { %v2524_v55 = vsub.s32 (!%p380_p3), 1, %v485_v43  ;;  %vm2860_vm8 = vcmp.eq.s32.totalorder (!%p380_p3), %v2497_v29, 6  ;;  %vm508_vm9 = vcmp.eq.s32.totalorder (!%p380_p3), %v2520_v52, 0  ;;  %v2534_v57 = vsub.s32 (!%p380_p3), 2, %v485_v43 }
   0xd   : > { %v2536_v60 = vsub.s32 (!%p380_p3), 3, %v485_v43  ;;  %vm509_vm10 = vcmp.eq.s32.totalorder (!%p380_p3), %v2520_v52, 1  ;;  %vm2859_vm11 = vcmp.eq.s32.totalorder (!%p380_p3), %v2520_v52, 2  ;;  %v495_v11 = vand.u32 (!%p380_p3), 127, %v484_v40 }
   0xe   : > { %s2873_s13 = smov (!%p443_p4, %s2323_s13), 1  ;;  %v2554_v14 = vsub.s32 5, %v485_v43  ;;  %vm511_vm13 = vcmp.eq.s32.totalorder %v2520_v52, 3  ;;  %vm512_vm15 = vcmp.eq.s32.totalorder %v2520_v52, 4 }
   0xf   : > { %s2442_s19 = sshll.u32 %s2873_s13, 3  ;;  %vm496_vm14 = vcmp.gt.s32.totalorder %v495_v11, %v485_v43 }
  0x10   : > { %s449_s22 = scalar_lea.vmem %s2848_s0, %s2442_s19  ;;  %s453_s25 = scalar_lea.vmem %s2849_s1, %s2442_s19 }
  0x11   : > { %v524_v5 = vld [vmem:[%s449_s22] sm:$0xff]  ;;  %s464_s22 = scalar_lea.vmem %s2854_s6, %s2873_s13  ;;  %s2345_s13 = smov 88  }
  0x12   : > { %v527_v6 = vld [vmem:[%s453_s25] sm:$0xff]  ;;  %v525_v8 = vmul.f32 0.35355338, %v524_v5  ;;  %s2346_s25 = smov 56   ;;  %s471_s24 = scalar_lea.vmem %s2855_s7, %s2442_s19 }
  0x13   : > { %v2455_v9 = vpack.c.bf16 %v527_v6, %v527_v6  ;;  %v480_v0 = vld [vmem:[%s464_s22] sm:$0x1]  ;;  %v2547_v6 = vsub.s32 4, %v485_v43 }
  0x14   : > { %v2457_v10 = vpack.c.bf16 %v525_v8, %v525_v8  ;;  %vm481_vm12 = vcmp.gt.f32.partialorder %v480_v0, 0.5 }
  0x15   : > { %582 = vrot.lane.b32.xlu0 %v2455_v9, %s2337_s26  ;;  %s2347_s26 = smov 112  }
  0x16   : > { %2090 = vmatmul.mubr.msk.bf16.vlgmr.msra.gmra.mrb[0].mxu1 %vm534_vm0, %v2457_v10 }
  0x17   : > { %2095 = vmatprep.mubr.msk.bf16.mxu1 %vm2334_vm1, %v2333_v1 }
  0x87   : > { %v583_v12 = vpop.permute.xlu0 %582 }
  0x88   : > { %v588_v13 = vsel %vm534_vm0, %v583_v12, 0 }
  0x89   : > { %2100 = vmatpush3.bf16.xpose.msra.mxu0 %v588_v13  ;;  %2094 = vmatpush3.bf16.xpose.msra.mxu1 %v588_v13 }
  0x8a   : > { %2105 = vmatprep.subr.bf16.mxu1 %v2333_v1  ;;  %2111 = vmatprep.subr.bf16.mxu0 %v2333_v1 }
  0x90   : > { %2102 = vmatmul.mubr.msk.bf16.vlgmr.msra.gmra.mrb[0].mxu0 %vm534_vm0, %v2457_v10  ;;  %2096 = vmatmul.mubr.msk.bf16.vlgmr.msra.gmra.mrb[4].mxu1 %vm534_vm0, %v2470_v15 }
  0x91   : > { %2107 = vmatprep.mubr.msk.bf16.mxu1 %vm2334_vm1, %v2333_v1  ;;  %2113 = vmatprep.mubr.msk.bf16.mxu0 %vm2334_vm1, %v2333_v1 }
  0xe9   : > { %v575_v16 = vpop.f32.mrb[0].mxu1 }
  0xea   : > { %677 = vperm.xlu1 %2265, %v575_v16   ;;  %632 = vperm.xlu0 %2264, %v575_v16   ;;  %v2091_v17 = vpop.f32.mrb[1].mxu1 }
  0xeb   : > { %v578_v18 = vpop.f32.mrb[2].mxu1 }
  0xec   : > { %v2092_v19 = vpop.f32.mrb[3].mxu1  ;;  %v482_v18 = vsel %vm481_vm12, -1e+30, %v2333_v1  ;;  %vm513_vm12 = vcmp.eq.s32.totalorder %v2520_v52, 5 }
  0xee   : > { %2266 = vset.pattern.permute.xlu1 %v2338_v20  ;;  %2268 = vset.pattern.permute.xlu0 %v2339_v21 }
  0xef   : > { %683 = vperm.xlu1 %2266, %v575_v16   ;;  %695 = vperm.xlu0 %2268, %v575_v16  }
  0xf3   : > { %2267 = vset.pattern.permute.xlu1 %v2340_v22  ;;  %2271 = vset.pattern.permute.xlu0 %v2336_v7 }
  0xf4   : > { %689 = vperm.xlu1 %2267, %v575_v16  }
  0xf8   : > { %2269 = vset.pattern.permute.xlu1 %v2341_v23 }
  0xf9   : > { %701 = vperm.xlu1 %2269, %v575_v16  }
  0xfd   : > { %2270 = vset.pattern.permute.xlu1 %v2342_v24 }
  0xfe   : > { %707 = vperm.xlu1 %2270, %v575_v16  }
 0x102   : > { %2273 = vset.pattern.permute.xlu1 %v2338_v20 }
 0x103   : > { %765 = vrot.lane.b32.xlu1 %v2455_v9, %s2343_s29  ;;  %s478_s29 = scalar_lea.vmem %s2858_s10, %s2442_s19 }
 0x107   : > { %869 = vrot.lane.b32.xlu1 %v2430_v2, %s2344_s30 }
 0x10b   : > { %866 = vrot.lane.b32.xlu1 %v2457_v10, %s2344_s30 }
 0x163   : > { %v670_v25 = vpop.f32.mrb[0].mxu0  ;;  %v2492_v26 = vpop.f32.mrb[4].mxu1 }
 0x164   : > { %v2103_v27 = vpop.f32.mrb[1].mxu0  ;;  %v2097_v28 = vpop.f32.mrb[5].mxu1  ;;  %v715_v56 = vrot.slane %v2492_v26, %v2512_v49  ;;  %v721_v63 = vrot.slane %v2492_v26, %v2524_v55  ;;  %v727_v5 = vrot.slane %v2492_v26, %v2534_v57  ;;  %v733_v13 = vrot.slane %v2492_v26, %v2536_v60 }
 0x165   : > { %v673_v30 = vpop.f32.mrb[2].mxu0  ;;  %v627_v31 = vpop.f32.mrb[6].mxu1  ;;  %v739_v19 = vrot.slane %v2492_v26, %v2547_v6 }
 0x166   : > { %v2104_v32 = vpop.f32.mrb[3].mxu0  ;;  %v2098_v33 = vpop.f32.mrb[7].mxu1  ;;  %v716_v62 = vsel %vm508_vm9, %v715_v56, 0.0  ;;  %v722_v12 = vsel %vm509_vm10, %v721_v63, 0.0  ;;  %v728_v17 = vsel %vm2859_vm11, %v727_v5, 0.0  ;;  %v734_v28 = vsel %vm511_vm13, %v733_v13, 0.0 }
 0x167   : > { %v745_v30 = vrot.slane %v2492_v26, %v2554_v14  ;;  %v487_v32 = vrot.slane %v482_v18, %v2512_v49  ;;  %v497_v33 = vsel %vm496_vm14, -1e+30, %v2333_v1  ;;  %vm514_vm11 = vcmp.eq.s32.totalorder %v2520_v52, 6 }
 0x168   : > { %vm770_vm14 = vcmask 1043456  }
 0x169   : > { %v678_v34 = vpop.permute.xlu1 %677  ;;  %v633_v35 = vpop.permute.xlu0 %632 }
 0x16a   : > { %v635_v36 = vsel %vm501_vm2, %v633_v35, 0.0  ;;  %v680_v38 = vsel %vm502_vm3, %v678_v34, 0.0  ;;  %v740_v34 = vsel %vm512_vm15, %v739_v19, 0.0 }
 0x16b   : > { %v671_v37 = vadd.f32 %v670_v25, %v635_v36  ;;  %v2562_v25 = vsub.s32 6, %v485_v43 }
 0x16d   : > { %v681_v41 = vadd.f32 %v680_v38, %v671_v37  ;;  %v751_v35 = vrot.slane %v2492_v26, %v2562_v25  ;;  %v746_v37 = vsel %vm513_vm12, %v745_v30, 0.0  ;;  %v2579_v38 = vadd.f32 %v497_v33, %v487_v32 }
 0x16e   : > { %v684_v39 = vpop.permute.xlu1 %683  ;;  %v696_v47 = vpop.permute.xlu0 %695 }
 0x16f   : > { %v686_v42 = vsel %vm503_vm4, %v684_v39, 0.0  ;;  %v698_v50 = vsel %vm505_vm6, %v696_v47, 0.0  ;;  %v752_v40 = vsel %vm514_vm11, %v751_v35, 0.0 }
 0x170   : > { %v687_v44 = vadd.f32 %v686_v42, %v681_v41 }
 0x173   : > { %v690_v45 = vpop.permute.xlu1 %689 }
 0x174   : > { %v692_v46 = vsel %vm504_vm5, %v690_v45, 0.0 }
 0x175   : > { %v693_v48 = vadd.f32 %v692_v46, %v687_v44 }
 0x177   : > { %v699_v53 = vadd.f32 %v698_v50, %v693_v48 }
 0x178   : > { %v702_v51 = vpop.permute.xlu1 %701 }
 0x179   : > { %v704_v54 = vsel %vm2861_vm7, %v702_v51, 0.0 }
 0x17a   : > { %v705_v58 = vadd.f32 %v704_v54, %v699_v53 }
 0x17d   : > { %v708_v59 = vpop.permute.xlu1 %707 }
 0x17e   : > { %v710_v61 = vsel %vm2860_vm8, %v708_v59, 0.0 }
 0x17f   : > { %v711_v3 = vadd.f32 %v710_v61, %v705_v58  ;;  %v817_v61 = vld [vmem:[%s2856_s8] sm:$0xf] }
 0x181   : > { %v717_v8 = vadd.f32 %v716_v62, %v711_v3  ;;  %v766_v26 = vpop.permute.xlu1 %765  ;;  %v822_v62 = vsel %vm770_vm14, %v817_v61, 0 }
 0x182   : > { %v772_v44 = vsel %vm770_vm14, %v766_v26, 0  ;;  %2112 = vmatpush3.bf16.msra.mxu0 %v822_v62 }
 0x183   : > { %v723_v16 = vadd.f32 %v722_v12, %v717_v8  ;;  %2106 = vmatpush3.bf16.msra.mxu1 %v772_v44  ;;  %2123 = vmatprep.subr.bf16.mxu0 %v2333_v1 }
 0x184   : > { %2117 = vmatprep.subr.bf16.mxu1 %v2333_v1 }
 0x185   : > { %v729_v27 = vadd.f32 %v728_v17, %v723_v16  ;;  %v870_v48 = vpop.permute.xlu1 %869 }
 0x186   : > { %v875_v51 = vsel %vm534_vm0, %v870_v48, 0 }
 0x187   : > { %v735_v31 = vadd.f32 %v734_v28, %v729_v27 }
 0x189   : > { %v741_v36 = vadd.f32 %v740_v34, %v735_v31  ;;  %v867_v58 = vpop.permute.xlu1 %866 }
 0x18b   : > { %v747_v39 = vadd.f32 %v746_v37, %v741_v36 }
 0x18d   : > { %v753_v41 = vadd.f32 %v752_v40, %v747_v39 }
 0x18f   : > { %v754_v42 = vadd.f32 %v753_v41, %v2579_v38 }
 0x191   : > { %v755_v43 = vsel %vm534_vm0, %v754_v42, -inf }
 0x192   : > { %756 = vmax.xlane.f32.xlu0 %v755_v43 }
 0x1a8   : > { %920 = vrot.lane.b32.xlu0 %v2455_v9, %s2345_s13 }
 0x21f   : > { %v757_v45 = vpop.xlane.xlu0 %756 }
 0x220   : > { %v758_v46 = vsub.f32 %v754_v42, %v757_v45 }
 0x222   : > { %v759_v47 = vmul.f32 1.442695, %v758_v46 }
 0x223   : > { %v921_v56 = vpop.permute.xlu0 %920 }
 0x224   : > { %2293 = vpow2.f32 %v759_v47  ;;  %v926_v59 = vsel %vm534_vm0, %v921_v56, 0 }
 0x22e   : > { %v2294_v50 = vpop.eup %2293 }
 0x22f   : > { %v761_v53 = vsel %vm534_vm0, %v2294_v50, 0.0  ;;  %v764_v54 = vpack.c.bf16 %v2294_v50, %v2294_v50 }
 0x230   : > { %762 = vadd.xlane.f32.xlu1 %v761_v53 }
 0x231   : > { %2108 = vmatmul.mubr.msk.bf16.vlgmr.msra.gmra.mrb[8].mxu1 %vm534_vm0, %v764_v54 }
 0x232   : > { %2118 = vmatpush3.bf16.xpose.msra.mxu1 %v875_v51  ;;  %2119 = vmatprep.mubr.msk.bf16.mxu1 %vm2334_vm1, %v2333_v1 }
 0x233   : > { %2129 = vmatprep.subr.bf16.mxu1 %v2333_v1 }
 0x239   : > { %2120 = vmatmul.mubr.msk.bf16.vlgmr.msra.gmra.mrb[12].mxu1 %vm534_vm0, %v867_v58 }
 0x23a   : > { %2130 = vmatpush3.bf16.xpose.msra.mxu1 %v926_v59  ;;  %2131 = vmatprep.mubr.msk.bf16.mxu1 %vm2334_vm1, %v2333_v1 }
 0x23b   : > { %2147 = vmatprep.subr.bf16.mxu1 %v2333_v1 }
 0x241   : > { %2132 = vmatmul.mubr.msk.bf16.vlgmr.msra.gmra.mrb[16].mxu1 %vm534_vm0, %v867_v58  ;;  %918 = vrot.lane.b32.xlu1 %v2470_v15, %s2344_s30  ;;  %s2349_s30 = smov 48  }
 0x242   : > { %2149 = vmatprep.mubr.msk.bf16.mxu1 %vm2334_vm1, %v2333_v1 }
 0x2bd   : > { %v763_v63 = vpop.xlane.xlu1 %762 }
 0x2be   : > { %2295 = vrcp.f32 %v763_v63 }
 0x2c1   : > { %v919_v18 = vpop.permute.xlu1 %918 }
 0x2c8   : > { %v2296_v0 = vpop.eup %2295 }
 0x304   : > { %v808_v3 = vpop.f32.mrb[8].mxu1 }
 0x305   : > { %v815_v5 = vmul.f32 %v2296_v0, %v808_v3  ;;  %v2109_v8 = vpop.f32.mrb[9].mxu1 }
 0x306   : > { %v811_v11 = vpop.f32.mrb[10].mxu1 }
 0x307   : > { %v816_v12 = vpack.c.bf16 %v815_v5, %v815_v5  ;;  %v2110_v13 = vpop.f32.mrb[11].mxu1 }
 0x309   : > { %2114 = vmatmul.mubr.msk.bf16.vlgmr.msra.gmra.mrb[4].mxu0 %vm534_vm0, %v816_v12 }
 0x30a   : > { %2124 = vmatpush3.bf16.xpose.msra.mxu0 %v926_v59  ;;  %2125 = vmatprep.mubr.msk.bf16.mxu0 %vm2334_vm1, %v2333_v1 }
 0x30b   : > { %2135 = vmatprep.subr.bf16.mxu0 %v2333_v1 }
 0x30c   : > { %v911_v16 = vpop.f32.mrb[12].mxu1 }
 0x30d   : > { %970 = vperm.xlu0 %2271, %v911_v16   ;;  %1021 = vperm.xlu1 %2273, %v911_v16   ;;  %v2121_v17 = vpop.f32.mrb[13].mxu1 }
 0x30e   : > { %v914_v19 = vpop.f32.mrb[14].mxu1 }
 0x30f   : > { %v2122_v27 = vpop.f32.mrb[15].mxu1 }
 0x311   : > { %2126 = vmatmul.mubr.msk.bf16.vlgmr.msra.gmra.mrb[8].mxu0 %vm534_vm0, %v919_v18  ;;  %2272 = vset.pattern.permute.xlu0 %v2335_v4 }
 0x312   : > { %1015 = vperm.xlu0 %2272, %v911_v16   ;;  %2275 = vset.pattern.permute.xlu1 %v2339_v21 }
 0x313   : > { %1033 = vperm.xlu1 %2275, %v911_v16   ;;  %2137 = vmatprep.mubr.msk.bf16.mxu0 %vm2334_vm1, %v2333_v1 }
 0x314   : > { %v1008_v28 = vpop.f32.mrb[16].mxu1 }
 0x315   : > { %v2133_v30 = vpop.f32.mrb[17].mxu1 }
 0x316   : > { %2274 = vset.pattern.permute.xlu0 %v2340_v22  ;;  %v1011_v31 = vpop.f32.mrb[18].mxu1 }
 0x317   : > { %1027 = vperm.xlu0 %2274, %v911_v16   ;;  %2276 = vset.pattern.permute.xlu1 %v2341_v23  ;;  %v2134_v32 = vpop.f32.mrb[19].mxu1 }
 0x318   : > { %1039 = vperm.xlu1 %2276, %v911_v16  }
 0x31b   : > { %2277 = vset.pattern.permute.xlu0 %v2342_v24 }
 0x31c   : > { %1045 = vperm.xlu0 %2277, %v911_v16   ;;  %2278 = vset.pattern.permute.xlu1 %v2336_v7 }
 0x320   : > { %2283 = vset.pattern.permute.xlu0 %v2341_v23 }
 0x321   : > { %1103 = vrot.lane.b32.xlu0 %v2455_v9, %s2346_s25 }
 0x325   : > { %1204 = vrot.lane.b32.xlu0 %v2430_v2, %s2347_s26 }
 0x329   : > { %1202 = vrot.lane.b32.xlu0 %v2457_v10, %s2347_s26 }
 0x38c   : > { %v971_v33 = vpop.permute.xlu0 %970  ;;  %v1022_v39 = vpop.permute.xlu1 %1021 }
 0x38d   : > { %v973_v35 = vsel %vm501_vm2, %v971_v33, 0.0  ;;  %v1024_v41 = vsel %vm503_vm4, %v1022_v39, 0.0 }
 0x38e   : > { %v1009_v37 = vadd.f32 %v1008_v28, %v973_v35 }
 0x391   : > { %v1016_v34 = vpop.permute.xlu0 %1015 }
 0x392   : > { %v1018_v36 = vsel %vm502_vm3, %v1016_v34, 0.0  ;;  %v1034_v26 = vpop.permute.xlu1 %1033 }
 0x393   : > { %v1019_v40 = vadd.f32 %v1018_v36, %v1009_v37  ;;  %v1036_v46 = vsel %vm505_vm6, %v1034_v26, 0.0 }
 0x395   : > { %v1025_v43 = vadd.f32 %v1024_v41, %v1019_v40 }
 0x396   : > { %v1028_v42 = vpop.permute.xlu0 %1027 }
 0x397   : > { %v1030_v44 = vsel %vm504_vm5, %v1028_v42, 0.0  ;;  %v1040_v47 = vpop.permute.xlu1 %1039 }
 0x398   : > { %v1031_v45 = vadd.f32 %v1030_v44, %v1025_v43  ;;  %v1042_v50 = vsel %vm2861_vm7, %v1040_v47, 0.0 }
 0x39a   : > { %v1037_v48 = vadd.f32 %v1036_v46, %v1031_v45 }
 0x39b   : > { %v1046_v51 = vpop.permute.xlu0 %1045 }
 0x39c   : > { %v1043_v53 = vadd.f32 %v1042_v50, %v1037_v48  ;;  %v1048_v54 = vsel %vm2860_vm8, %v1046_v51, 0.0  ;;  %vm2862_vm8 = vcmp.eq.s32.totalorder %v2520_v52, 2  ;;  %v1154_v51 = vld [vmem:[%s2856_s8 + $0x4] sm:$0xf] }
 0x39e   : > { %v1049_v62 = vadd.f32 %v1048_v54, %v1043_v53  ;;  %v1159_v53 = vsel %vm770_vm14, %v1154_v51, 0 }
 0x39f   : > { %v1104_v40 = vpop.permute.xlu0 %1103 }
 0x3a0   : > { %v1109_v41 = vsel %vm770_vm14, %v1104_v40, 0 }
 0x3a1   : > { %2136 = vmatpush3.bf16.msra.mxu0 %v1109_v41 }
 0x3a2   : > { %2141 = vmatprep.subr.bf16.mxu0 %v2333_v1 }
 0x3a3   : > { %v1205_v42 = vpop.permute.xlu0 %1204 }
 0x3a4   : > { %v1210_v43 = vsel %vm534_vm0, %v1205_v42, 0 }
 0x3a5   : > { %2148 = vmatpush3.bf16.xpose.msra.mxu1 %v1210_v43 }
 0x3a6   : > { %2153 = vmatprep.subr.bf16.mxu1 %v2333_v1 }
 0x3a7   : > { %v1203_v26 = vpop.permute.xlu0 %1202 }
 0x3ac   : > { %2150 = vmatmul.mubr.msk.bf16.vlgmr.msra.gmra.mrb[20].mxu1 %vm534_vm0, %v1203_v26 }
 0x3ad   : > { %2155 = vmatprep.mubr.msk.bf16.mxu1 %vm2334_vm1, %v2333_v1 }
 0x3e4   : > { %v962_v56 = vpop.f32.mrb[8].mxu0 }
 0x3e5   : > { %v1053_v58 = vrot.slane %v962_v56, %v2512_v49  ;;  %v1059_v59 = vrot.slane %v962_v56, %v2524_v55  ;;  %v2127_v61 = vpop.f32.mrb[9].mxu0  ;;  %v1065_v5 = vrot.slane %v962_v56, %v2534_v57  ;;  %v1071_v12 = vrot.slane %v962_v56, %v2536_v60 }
 0x3e6   : > { %v965_v63 = vpop.f32.mrb[10].mxu0  ;;  %v1077_v17 = vrot.slane %v962_v56, %v2547_v6  ;;  %v1083_v27 = vrot.slane %v962_v56, %v2554_v14  ;;  %v1089_v31 = vrot.slane %v962_v56, %v2562_v25 }
 0x3e7   : > { %v2128_v0 = vpop.f32.mrb[11].mxu0  ;;  %v1054_v3 = vsel %vm508_vm9, %v1053_v58, 0.0  ;;  %v1060_v11 = vsel %vm509_vm10, %v1059_v59, 0.0  ;;  %v1066_v16 = vsel %vm2862_vm8, %v1065_v5, 0.0  ;;  %v1072_v19 = vsel %vm511_vm13, %v1071_v12, 0.0 }
 0x3e8   : > { %v1055_v8 = vadd.f32 %v1054_v3, %v1049_v62  ;;  %v1078_v30 = vsel %vm512_vm15, %v1077_v17, 0.0  ;;  %v1084_v33 = vsel %vm513_vm12, %v1083_v27, 0.0  ;;  %v1090_v35 = vsel %vm514_vm11, %v1089_v31, 0.0 }
 0x3e9   : > { %vm2863_vm8 = vcmp.eq.s32.totalorder %v2497_v29, 6 }
 0x3ea   : > { %v1061_v13 = vadd.f32 %v1060_v11, %v1055_v8 }
 0x3ec   : > { %v1067_v18 = vadd.f32 %v1066_v16, %v1061_v13 }
 0x3ee   : > { %v1073_v28 = vadd.f32 %v1072_v19, %v1067_v18 }
 0x3f0   : > { %v1079_v32 = vadd.f32 %v1078_v30, %v1073_v28 }
 0x3f2   : > { %v1085_v34 = vadd.f32 %v1084_v33, %v1079_v32 }
 0x3f4   : > { %v1091_v36 = vadd.f32 %v1090_v35, %v1085_v34 }
 0x3f6   : > { %v1092_v37 = vadd.f32 %v1091_v36, %v2579_v38 }
 0x3f8   : > { %v1093_v39 = vsel %vm534_vm0, %v1092_v37, -inf }
 0x3f9   : > { %1094 = vmax.xlane.f32.xlu1 %v1093_v39 }
 0x40a   : > { %1254 = vrot.lane.b32.xlu1 %v2455_v9, %s2348_s27 }
 0x47f   : > { %v1246_v58 = vpop.f32.mrb[20].mxu1 }
 0x480   : > { %1304 = vperm.xlu1 %2278, %v1246_v58   ;;  %v2151_v59 = vpop.f32.mrb[21].mxu1 }
 0x481   : > { %v1249_v61 = vpop.f32.mrb[22].mxu1 }
 0x482   : > { %v2152_v62 = vpop.f32.mrb[23].mxu1 }
 0x484   : > { %2279 = vset.pattern.permute.xlu1 %v2335_v4 }
 0x485   : > { %1349 = vperm.xlu1 %2279, %v1246_v58  }
 0x486   : > { %v1095_v44 = vpop.xlane.xlu1 %1094 }
 0x487   : > { %v1096_v45 = vsub.f32 %v1092_v37, %v1095_v44 }
 0x489   : > { %v1097_v46 = vmul.f32 1.442695, %v1096_v45  ;;  %2280 = vset.pattern.permute.xlu1 %v2338_v20 }
 0x48a   : > { %v1255_v54 = vpop.permute.xlu1 %1254  ;;  %1355 = vperm.xlu1 %2280, %v1246_v58  }
 0x48b   : > { %2297 = vpow2.f32 %v1097_v46  ;;  %v1260_v56 = vsel %vm534_vm0, %v1255_v54, 0 }
 0x48c   : > { %2154 = vmatpush3.bf16.xpose.msra.mxu1 %v1260_v56 }
 0x48d   : > { %2165 = vmatprep.subr.bf16.mxu1 %v2333_v1 }
 0x48e   : > { %2281 = vset.pattern.permute.xlu1 %v2340_v22 }
 0x48f   : > { %1361 = vperm.xlu1 %2281, %v1246_v58  }
 0x493   : > { %2282 = vset.pattern.permute.xlu1 %v2339_v21 }
 0x494   : > { %1367 = vperm.xlu1 %2282, %v1246_v58  }
 0x495   : > { %v2298_v47 = vpop.eup %2297 }
 0x496   : > { %v1099_v48 = vsel %vm534_vm0, %v2298_v47, 0.0  ;;  %v1102_v50 = vpack.c.bf16 %v2298_v47, %v2298_v47 }
 0x497   : > { %1100 = vadd.xlane.f32.xlu0 %v1099_v48 }
 0x498   : > { %2138 = vmatmul.mubr.msk.bf16.vlgmr.msra.gmra.mrb[12].mxu0 %vm534_vm0, %v1102_v50  ;;  %2284 = vset.pattern.permute.xlu1 %v2342_v24 }
 0x499   : > { %2143 = vmatprep.mubr.msk.bf16.mxu0 %vm2334_vm1, %v2333_v1  ;;  %2142 = vmatpush3.bf16.msra.mxu0 %v1159_v53 }
 0x49a   : > { %2159 = vmatprep.subr.bf16.mxu0 %v2333_v1  ;;  %1379 = vperm.xlu1 %2284, %v1246_v58  }
 0x49e   : > { %2285 = vset.pattern.permute.xlu1 %v2336_v7 }
 0x4ad   : > { %1252 = vrot.lane.b32.xlu0 %v2470_v15, %s2347_s26 }
 0x4b1   : > { %1373 = vperm.xlu0 %2283, %v1246_v58  }
 0x4b5   : > { %2289 = vset.pattern.permute.xlu0 %v2339_v21 }
 0x4b6   : > { %1437 = vrot.lane.b32.xlu0 %v2455_v9, %s2349_s30 }
 0x4ba   : > { %1538 = vrot.lane.b32.xlu0 %v2430_v2, %s2350_s11 }
 0x4be   : > { %1536 = vrot.lane.b32.xlu0 %v2457_v10, %s2350_s11 }
 0x4ff   : > { %v1305_v19 = vpop.permute.xlu1 %1304 }
 0x500   : > { %v1307_v31 = vsel %vm501_vm2, %v1305_v19, 0.0 }
 0x504   : > { %v1350_v27 = vpop.permute.xlu1 %1349 }
 0x505   : > { %v1352_v2 = vsel %vm502_vm3, %v1350_v27, 0.0 }
 0x509   : > { %v1356_v28 = vpop.permute.xlu1 %1355 }
 0x50a   : > { %v1358_v39 = vsel %vm503_vm4, %v1356_v28, 0.0 }
 0x50e   : > { %v1362_v30 = vpop.permute.xlu1 %1361 }
 0x50f   : > { %v1364_v41 = vsel %vm504_vm5, %v1362_v30, 0.0 }
 0x513   : > { %v1368_v36 = vpop.permute.xlu1 %1367 }
 0x519   : > { %v1380_v45 = vpop.permute.xlu1 %1379 }
 0x51a   : > { %v1382_v50 = vsel %vm2863_vm8, %v1380_v45, 0.0 }
 0x524   : > { %v1101_v63 = vpop.xlane.xlu0 %1100 }
 0x525   : > { %2299 = vrcp.f32 %v1101_v63 }
 0x528   : > { %v1253_v0 = vpop.permute.xlu0 %1252 }
 0x529   : > { %2156 = vmatmul.mubr.msk.bf16.vlgmr.msra.gmra.mrb[24].mxu1 %vm534_vm0, %v1253_v0 }
 0x52a   : > { %2167 = vmatprep.mubr.msk.bf16.mxu1 %vm2334_vm1, %v2333_v1 }
 0x52f   : > { %v2300_v3 = vpop.eup %2299 }
 0x530   : > { %v1374_v42 = vpop.permute.xlu0 %1373 }
 0x531   : > { %v1376_v47 = vsel %vm2861_vm7, %v1374_v42, 0.0  ;;  %vm2864_vm7 = vcmp.eq.s32.totalorder %v2520_v52, 2 }
 0x534   : > { %v1438_v30 = vpop.permute.xlu0 %1437 }
 0x56b   : > { %v1145_v5 = vpop.f32.mrb[12].mxu0 }
 0x56c   : > { %v1152_v8 = vmul.f32 %v2300_v3, %v1145_v5  ;;  %v2139_v11 = vpop.f32.mrb[13].mxu0 }
 0x56d   : > { %v1148_v12 = vpop.f32.mrb[14].mxu0 }
 0x56e   : > { %v1153_v21 = vpack.c.bf16 %v1152_v8, %v1152_v8  ;;  %v2140_v13 = vpop.f32.mrb[15].mxu0 }
 0x570   : > { %2144 = vmatmul.mubr.msk.bf16.vlgmr.msra.gmra.mrb[4].mxu0 %vm534_vm0, %v1153_v21 }
 0x571   : > { %2160 = vmatpush3.bf16.xpose.msra.mxu0 %v1260_v56  ;;  %2161 = vmatprep.mubr.msk.bf16.mxu0 %vm2334_vm1, %v2333_v1 }
 0x572   : > { %2171 = vmatprep.subr.bf16.mxu0 %v2333_v1 }
 0x578   : > { %2162 = vmatmul.mubr.msk.bf16.vlgmr.msra.gmra.mrb[16].mxu0 %vm534_vm0, %v1203_v26  ;;  %v1370_v26 = vsel %vm505_vm6, %v1368_v36, 0.0 }
 0x579   : > { %2173 = vmatprep.mubr.msk.bf16.mxu0 %vm2334_vm1, %v2333_v1 }
 0x5fc   : > { %v1296_v7 = vpop.f32.mrb[24].mxu1 }
 0x5fd   : > { %v2157_v16 = vpop.f32.mrb[25].mxu1  ;;  %v1387_v44 = vrot.slane %v1296_v7, %v2512_v49  ;;  %v1393_v51 = vrot.slane %v1296_v7, %v2524_v55  ;;  %v1399_v56 = vrot.slane %v1296_v7, %v2534_v57  ;;  %v1405_v61 = vrot.slane %v1296_v7, %v2536_v60 }
 0x5fe   : > { %v1299_v17 = vpop.f32.mrb[26].mxu1  ;;  %v1411_v0 = vrot.slane %v1296_v7, %v2547_v6  ;;  %v1417_v8 = vrot.slane %v1296_v7, %v2554_v14  ;;  %v1423_v21 = vrot.slane %v1296_v7, %v2562_v25  ;;  %v1443_v7 = vsel %vm770_vm14, %v1438_v30, 0 }
 0x5ff   : > { %v2158_v18 = vpop.f32.mrb[27].mxu1  ;;  %v1388_v53 = vsel %vm508_vm9, %v1387_v44, 0.0  ;;  %v1394_v59 = vsel %vm509_vm10, %v1393_v51, 0.0  ;;  %v1400_v63 = vsel %vm2864_vm7, %v1399_v56, 0.0  ;;  %v1406_v5 = vsel %vm511_vm13, %v1405_v61, 0.0  ;;  %2166 = vmatpush3.bf16.msra.mxu1 %v1443_v7 }
 0x600   : > { %v1412_v12 = vsel %vm512_vm15, %v1411_v0, 0.0  ;;  %v1418_v16 = vsel %vm513_vm12, %v1417_v8, 0.0  ;;  %v1424_v18 = vsel %vm514_vm11, %v1423_v21, 0.0  ;;  %2177 = vmatprep.subr.bf16.mxu1 %v2333_v1 }
 0x64b   : > { %v1342_v32 = vpop.f32.mrb[16].mxu0 }
 0x64c   : > { %v1343_v33 = vadd.f32 %v1342_v32, %v1307_v31  ;;  %v2163_v34 = vpop.f32.mrb[17].mxu0 }
 0x64d   : > { %v1345_v35 = vpop.f32.mrb[18].mxu0  ;;  %v1539_v34 = vpop.permute.xlu0 %1538 }
 0x64e   : > { %v1353_v10 = vadd.f32 %v1352_v2, %v1343_v33  ;;  %v2164_v37 = vpop.f32.mrb[19].mxu0  ;;  %v1544_v35 = vsel %vm534_vm0, %v1539_v34, 0 }
 0x650   : > { %v1359_v40 = vadd.f32 %v1358_v39, %v1353_v10 }
 0x651   : > { %v1537_v39 = vpop.permute.xlu0 %1536 }
 0x652   : > { %v1365_v43 = vadd.f32 %v1364_v41, %v1359_v40  ;;  %v1488_v41 = vld [vmem:[%s2856_s8 + $0x8] sm:$0xf] }
 0x653   : > { %v1493_v42 = vsel %vm770_vm14, %v1488_v41, 0 }
 0x654   : > { %v1371_v46 = vadd.f32 %v1370_v26, %v1365_v43  ;;  %2172 = vmatpush3.bf16.msra.mxu0 %v1493_v42 }
 0x655   : > { %2183 = vmatprep.subr.bf16.mxu0 %v2333_v1 }
 0x656   : > { %v1377_v48 = vadd.f32 %v1376_v47, %v1371_v46 }
 0x658   : > { %v1383_v54 = vadd.f32 %v1382_v50, %v1377_v48 }
 0x65a   : > { %v1389_v58 = vadd.f32 %v1388_v53, %v1383_v54 }
 0x65c   : > { %v1395_v62 = vadd.f32 %v1394_v59, %v1389_v58 }
 0x65e   : > { %v1401_v3 = vadd.f32 %v1400_v63, %v1395_v62 }
 0x660   : > { %v1407_v11 = vadd.f32 %v1406_v5, %v1401_v3 }
 0x662   : > { %v1413_v13 = vadd.f32 %v1412_v12, %v1407_v11 }
 0x664   : > { %v1419_v17 = vadd.f32 %v1418_v16, %v1413_v13 }
 0x666   : > { %v1425_v19 = vadd.f32 %v1424_v18, %v1419_v17 }
 0x668   : > { %v1426_v27 = vadd.f32 %v1425_v19, %v2579_v38 }
 0x66a   : > { %v1427_v28 = vsel %vm534_vm0, %v1426_v27, -inf }
 0x66b   : > { %1428 = vmax.xlane.f32.xlu1 %v1427_v28 }
 0x67c   : > { %1588 = vrot.lane.b32.xlu1 %v2455_v9, %s2351_s12 }
 0x6f8   : > { %v1429_v31 = vpop.xlane.xlu1 %1428 }
 0x6f9   : > { %v1430_v32 = vsub.f32 %v1426_v27, %v1429_v31 }
 0x6fb   : > { %v1431_v33 = vmul.f32 1.442695, %v1430_v32 }
 0x6fc   : > { %v1589_v37 = vpop.permute.xlu1 %1588 }
 0x6fd   : > { %2301 = vpow2.f32 %v1431_v33  ;;  %v1594_v40 = vsel %vm534_vm0, %v1589_v37, 0 }
 0x707   : > { %v2302_v2 = vpop.eup %2301 }
 0x708   : > { %v1433_v36 = vsel %vm534_vm0, %v2302_v2, 0.0  ;;  %v1436_v10 = vpack.c.bf16 %v2302_v2, %v2302_v2 }
 0x709   : > { %1434 = vadd.xlane.f32.xlu0 %v1433_v36 }
 0x70a   : > { %2168 = vmatmul.mubr.msk.bf16.vlgmr.msra.gmra.mrb[28].mxu1 %vm534_vm0, %v1436_v10 }
 0x70b   : > { %2178 = vmatpush3.bf16.xpose.msra.mxu1 %v1544_v35  ;;  %2179 = vmatprep.mubr.msk.bf16.mxu1 %vm2334_vm1, %v2333_v1 }
 0x70c   : > { %2189 = vmatprep.subr.bf16.mxu1 %v2333_v1 }
 0x712   : > { %2180 = vmatmul.mubr.msk.bf16.vlgmr.msra.gmra.mrb[32].mxu1 %vm534_vm0, %v1537_v39 }
 0x713   : > { %2190 = vmatpush3.bf16.xpose.msra.mxu1 %v1594_v40  ;;  %2191 = vmatprep.mubr.msk.bf16.mxu1 %vm2334_vm1, %v2333_v1 }
 0x71a   : > { %2192 = vmatmul.mubr.msk.bf16.vlgmr.msra.gmra.mrb[36].mxu1 %vm534_vm0, %v1537_v39 }
 0x71f   : > { %1586 = vrot.lane.b32.xlu0 %v2470_v15, %s2350_s11 }
 0x796   : > { %v1435_v43 = vpop.xlane.xlu0 %1434 }
 0x797   : > { %2303 = vrcp.f32 %v1435_v43 }
 0x79a   : > { %v1587_v53 = vpop.permute.xlu0 %1586 }
 0x7a1   : > { %v2304_v26 = vpop.eup %2303 }
 0x7dd   : > { %v1479_v44 = vpop.f32.mrb[28].mxu1 }
 0x7de   : > { %v1486_v45 = vmul.f32 %v2304_v26, %v1479_v44  ;;  %v2169_v46 = vpop.f32.mrb[29].mxu1 }
 0x7df   : > { %v1482_v47 = vpop.f32.mrb[30].mxu1 }
 0x7e0   : > { %v1487_v48 = vpack.c.bf16 %v1486_v45, %v1486_v45  ;;  %v2170_v50 = vpop.f32.mrb[31].mxu1 }
 0x7e2   : > { %2174 = vmatmul.mubr.msk.bf16.vlgmr.msra.gmra.mrb[4].mxu0 %vm534_vm0, %v1487_v48 }
 0x7e3   : > { %2184 = vmatpush3.bf16.xpose.msra.mxu0 %v1594_v40  ;;  %2185 = vmatprep.mubr.msk.bf16.mxu0 %vm2334_vm1, %v2333_v1 }
 0x7e4   : > { %2195 = vmatprep.subr.bf16.mxu0 %v2333_v1 }
 0x7e5   : > { %v1580_v51 = vpop.f32.mrb[32].mxu1 }
 0x7e6   : > { %1638 = vperm.xlu1 %2285, %v1580_v51   ;;  %1701 = vperm.xlu0 %2289, %v1580_v51   ;;  %v2181_v15 = vpop.f32.mrb[33].mxu1 }
 0x7e7   : > { %v1583_v54 = vpop.f32.mrb[34].mxu1 }
 0x7e8   : > { %v2182_v56 = vpop.f32.mrb[35].mxu1 }
 0x7ea   : > { %2186 = vmatmul.mubr.msk.bf16.vlgmr.msra.gmra.mrb[20].mxu0 %vm534_vm0, %v1587_v53  ;;  %2286 = vset.pattern.permute.xlu1 %v2335_v4 }
 0x7eb   : > { %1683 = vperm.xlu1 %2286, %v1580_v51   ;;  %2197 = vmatprep.mubr.msk.bf16.mxu0 %vm2334_vm1, %v2333_v1 }
 0x7ec   : > { %2292 = vset.pattern.permute.xlu0 %v2342_v24 }
 0x7ed   : > { %v1676_v58 = vpop.f32.mrb[36].mxu1 }
 0x7ee   : > { %v2193_v59 = vpop.f32.mrb[37].mxu1 }
 0x7ef   : > { %2287 = vset.pattern.permute.xlu1 %v2338_v20  ;;  %v1679_v61 = vpop.f32.mrb[38].mxu1 }
 0x7f0   : > { %1689 = vperm.xlu1 %2287, %v1580_v51   ;;  %v2194_v62 = vpop.f32.mrb[39].mxu1 }
 0x7f4   : > { %2288 = vset.pattern.permute.xlu1 %v2340_v22 }
 0x7f5   : > { %1695 = vperm.xlu1 %2288, %v1580_v51  }
 0x7f9   : > { %2290 = vset.pattern.permute.xlu1 %v2341_v23 }
 0x7fa   : > { %1707 = vperm.xlu1 %2290, %v1580_v51  }
 0x7fe   : > { %2291 = vset.pattern.permute.xlu1 %v2342_v24 }
 0x7ff   : > { %1713 = vperm.xlu1 %2291, %v1580_v51  }
 0x803   : > { %1771 = vrot.lane.b32.xlu1 %v2455_v9, %s2352_s20 }
 0x865   : > { %v1639_v4 = vpop.permute.xlu1 %1638  ;;  %v1702_v9 = vpop.permute.xlu0 %1701 }
 0x866   : > { %v1641_v20 = vsel %vm501_vm2, %v1639_v4, 0.0  ;;  %v1704_v13 = vsel %vm505_vm6, %v1702_v9, 0.0  ;;  %vm2865_vm2 = vcmp.eq.s32.totalorder %v2497_v29, 5 }
 0x867   : > { %v1677_v5 = vadd.f32 %v1676_v58, %v1641_v20  ;;  %v2024_v20 = vld [vmem:[%s2857_s9] ss:$0 sm:$0xff] }
 0x86a   : > { %v1684_v63 = vpop.permute.xlu1 %1683 }
 0x86b   : > { %v1686_v22 = vsel %vm502_vm3, %v1684_v63, 0.0  ;;  %vm2866_vm3 = vmmov %vm2863_vm8 }
 0x86c   : > { %v1687_v8 = vadd.f32 %v1686_v22, %v1677_v5 }
 0x86f   : > { %v1690_v0 = vpop.permute.xlu1 %1689 }
 0x870   : > { %v1692_v23 = vsel %vm503_vm4, %v1690_v0, 0.0  ;;  %vm2867_vm4 = vmmov %vm2864_vm7 }
 0x871   : > { %v1693_v11 = vadd.f32 %v1692_v23, %v1687_v8 }
 0x874   : > { %v1696_v3 = vpop.permute.xlu1 %1695 }
 0x875   : > { %v1698_v24 = vsel %vm504_vm5, %v1696_v3, 0.0 }
 0x876   : > { %v1699_v21 = vadd.f32 %v1698_v24, %v1693_v11 }
 0x878   : > { %v1705_v16 = vadd.f32 %v1704_v13, %v1699_v21 }
 0x879   : > { %v1708_v12 = vpop.permute.xlu1 %1707 }
 0x87a   : > { %v1710_v18 = vsel %vm2865_vm2, %v1708_v12, 0.0 }
 0x87b   : > { %v1711_v27 = vadd.f32 %v1710_v18, %v1705_v16 }
 0x87e   : > { %v1714_v17 = vpop.permute.xlu1 %1713 }
 0x87f   : > { %v1716_v19 = vsel %vm2866_vm3, %v1714_v17, 0.0 }
 0x880   : > { %v1717_v32 = vadd.f32 %v1716_v19, %v1711_v27 }
 0x8bd   : > { %v1630_v28 = vpop.f32.mrb[20].mxu0 }
 0x8be   : > { %v1721_v30 = vrot.slane %v1630_v28, %v2512_v49  ;;  %v1727_v7 = vrot.slane %v1630_v28, %v2524_v55  ;;  %v2187_v31 = vpop.f32.mrb[21].mxu0  ;;  %v1733_v35 = vrot.slane %v1630_v28, %v2534_v57  ;;  %v1739_v10 = vrot.slane %v1630_v28, %v2536_v60 }
 0x8bf   : > { %v1633_v33 = vpop.f32.mrb[22].mxu0  ;;  %v1745_v55 = vrot.slane %v1630_v28, %v2547_v6  ;;  %v1751_v41 = vrot.slane %v1630_v28, %v2554_v14  ;;  %v1757_v43 = vrot.slane %v1630_v28, %v2562_v25  ;;  %v1772_v14 = vpop.permute.xlu1 %1771 }
 0x8c0   : > { %v2188_v34 = vpop.f32.mrb[23].mxu0  ;;  %v1722_v2 = vsel %vm508_vm9, %v1721_v30, 0.0  ;;  %v1728_v29 = vsel %vm509_vm10, %v1727_v7, 0.0  ;;  %v1734_v49 = vsel %vm2867_vm4, %v1733_v35, 0.0  ;;  %v1740_v40 = vsel %vm511_vm13, %v1739_v10, 0.0 }
 0x8c1   : > { %v1723_v36 = vadd.f32 %v1722_v2, %v1717_v32  ;;  %v1746_v57 = vsel %vm512_vm15, %v1745_v55, 0.0  ;;  %v1752_v60 = vsel %vm513_vm12, %v1751_v41, 0.0  ;;  %v1758_v6 = vsel %vm514_vm11, %v1757_v43, 0.0 }
 0x8c2   : > { %v1777_v48 = vsel %vm770_vm14, %v1772_v14, 0 }
 0x8c3   : > { %v1729_v37 = vadd.f32 %v1728_v29, %v1723_v36  ;;  %2196 = vmatpush3.bf16.msra.mxu0 %v1777_v48 }
 0x8c4   : > { %2201 = vmatprep.subr.bf16.mxu0 %v2333_v1 }
 0x8c5   : > { %v1735_v39 = vadd.f32 %v1734_v49, %v1729_v37 }
 0x8c7   : > { %v1741_v42 = vadd.f32 %v1740_v40, %v1735_v39 }
 0x8c9   : > { %v1747_v26 = vadd.f32 %v1746_v57, %v1741_v42 }
 0x8cb   : > { %v1753_v44 = vadd.f32 %v1752_v60, %v1747_v26 }
 0x8cd   : > { %v1759_v45 = vadd.f32 %v1758_v6, %v1753_v44 }
 0x8cf   : > { %v1760_v46 = vadd.f32 %v1759_v45, %v2579_v38  ;;  %v1822_v38 = vld [vmem:[%s2856_s8 + $0xc] sm:$0xf] }
 0x8d0   : > { %v1827_v54 = vsel %vm770_vm14, %v1822_v38, 0 }
 0x8d1   : > { %v1761_v47 = vsel %vm534_vm0, %v1760_v46, -inf }
 0x8d2   : > { %1762 = vmax.xlane.f32.xlu0 %v1761_v47 }
 0x95f   : > { %v1763_v25 = vpop.xlane.xlu0 %1762 }
 0x960   : > { %v1764_v50 = vsub.f32 %v1760_v46, %v1763_v25 }
 0x962   : > { %v1765_v51 = vmul.f32 1.442695, %v1764_v50 }
 0x964   : > { %2305 = vpow2.f32 %v1765_v51 }
 0x96e   : > { %v2306_v15 = vpop.eup %2305 }
 0x96f   : > { %v1767_v52 = vsel %vm534_vm0, %v2306_v15, 0.0  ;;  %v1770_v53 = vpack.c.bf16 %v2306_v15, %v2306_v15 }
 0x970   : > { %1768 = vadd.xlane.f32.xlu1 %v1767_v52 }
 0x971   : > { %2198 = vmatmul.mubr.msk.bf16.vlgmr.msra.gmra.mrb[24].mxu0 %vm534_vm0, %v1770_v53 }
 0x972   : > { %2203 = vmatprep.mubr.msk.bf16.mxu0 %vm2334_vm1, %v2333_v1  ;;  %2202 = vmatpush3.bf16.msra.mxu0 %v1827_v54  ;;  %v515_v1 = vld [vmem:[%s471_s24] sm:$0xff]  ;;  %vm1870_vm1 = vcmask 261120  }
 0x973   : > { %v523_v3 = vadd.f32 %v2024_v20, %v515_v1 }
 0x9fd   : > { %v1769_v56 = vpop.xlane.xlu1 %1768 }
 0x9fe   : > { %2307 = vrcp.f32 %v1769_v56 }
 0xa08   : > { %v2308_v58 = vpop.eup %2307 }
 0xa44   : > { %v1813_v59 = vpop.f32.mrb[24].mxu0 }
 0xa45   : > { %v1820_v61 = vmul.f32 %v2308_v58, %v1813_v59  ;;  %v2199_v62 = vpop.f32.mrb[25].mxu0 }
 0xa46   : > { %v1816_v4 = vpop.f32.mrb[26].mxu0 }
 0xa47   : > { %v1821_v63 = vpack.c.bf16 %v1820_v61, %v1820_v61  ;;  %v2200_v0 = vpop.f32.mrb[27].mxu0 }
 0xa49   : > { %2204 = vmatmul.mubr.msk.bf16.vlgmr.msra.gmra.mrb[4].mxu0 %vm534_vm0, %v1821_v63 }
 0xb1c   : > { %v1863_v22 = vpop.f32.mrb[4].mxu0 }
 0xb1d   : > { %v2207_v5 = vadd.f32 %v1863_v22, %v523_v3  ;;  %v2205_v23 = vpop.f32.mrb[5].mxu0 }
 0xb1e   : > { %v1866_v8 = vpop.f32.mrb[6].mxu0 }
 0xb1f   : > { %1871 = vst.msk [vmem:[%s478_s29] sm:$0xff] %vm1870_vm1, %v2207_v5  ;;  %v2206_v24 = vpop.f32.mrb[7].mxu0 }
 0xb20 PF: > { %s20_s15 = sadd.s32 1, %s2331_s15   ;;  %s2868_s13 = smov %s2327_s14 }
 0xb21   : > { %p17_p5 = scmp.ge.s32.totalorder %s20_s15, 4   ;;  %s2869_s14 = smov %s2871_s16 }
 0xb23   :  { %19 = sbr.rel (!%p17_p5) target bundleno = 2 (0x2), region = 105 }

// kernel: decoder_forward.18
= control target key start
LH: loop header
LB: loop body
LE: loop exit
PB: predicated region body
PF: predicated region fallthrough
CT: control target
= control target key end

     0   :  { %vm39_vm0 = vcmask 261120   ;;  %v472_v14 = vmov 0.0   ;;  %vm473_vm1 = vmmov 0   ;;  %s631_s0 = inlined_call_operand.vmem [shape: f32[16,32], index: 0, kind: input, shape index: {}]   ;;  %s632_s3 = inlined_call_operand.vmem [shape: bf16[32,128], index: 3, kind: input, shape index: {}]   ;;  %s633_s5 = inlined_call_operand.vmem [shape: bf16[32,128], index: 5, kind: input, shape index: {}]   ;;  %s634_s1 = inlined_call_operand.vmem [shape: f32[1,32], index: 1, kind: input, shape index: {}]   ;;  %s635_s2 = inlined_call_operand.vmem [shape: f32[1,32], index: 2, kind: input, shape index: {}]   ;;  %s636_s7 = inlined_call_operand.vmem [shape: bf16[128,32], index: 7, kind: input, shape index: {}]   ;;  %s637_s6 = inlined_call_operand.vmem [shape: f32[1,128], index: 6, kind: input, shape index: {}]   ;;  %s638_s4 = inlined_call_operand.vmem [shape: f32[1,128], index: 4, kind: input, shape index: {}]   ;;  %s639_s8 = inlined_call_operand.vmem [shape: f32[1,32], index: 8, kind: input, shape index: {}]   ;;  %s640_s9 = inlined_call_operand.vmem [shape: f32[16,32], index: 9, kind: output, shape index: {}]  }
   0x1   :  { %v527_v0 = vld [vmem:[%s631_s0] sm:$0xff]  ;;  %v532_v1 = vld [vmem:[%s631_s0 + $0x8] sm:$0xff]  ;;  %414 = vmatprep.subr.bf16.mxu1 %v472_v14  ;;  %87 = vst.msk [vmem:[#allocation2] sm:$0xff] %vm39_vm0, %v472_v14  ;;  %88 = vst.msk [vmem:[#allocation2 + $0x8] sm:$0xff] %vm39_vm0, %v472_v14  ;;  %418 = vmatprep.mubr.msk.bf16.mxu1 %vm473_vm1, %v472_v14 }
   0x2   :  { %v40_v2 = vsel %vm39_vm0, %v527_v0, 0.0  ;;  %v43_v3 = vsel %vm39_vm0, %v532_v1, 0.0  ;;  %v452_v15 = vld [vmem:[%s632_s3] sm:$0xff]   ;;  %430 = vmatprep.subr.bf16.mxu0 %v472_v14  ;;  %446 = vmatprep.mubr.msk.bf16.mxu0 %vm473_vm1, %v472_v14  ;;  %v453_v16 = vld [vmem:[%s632_s3 + $0x8] sm:$0xff]   ;;  %v458_v40 = vld [vmem:[%s636_s7 + $0x10] sm:$0xff]  }
   0x3   :  { %41 = vadd.xlane.f32.xlu0 %v40_v2  ;;  %415 = vmatpush3.bf16.msra.mxu1 %v452_v15  ;;  %v380_v24 = vld [vmem:[%s634_s1] ss:$0 sm:$0xff]  ;;  %v455_v37 = vld [vmem:[%s633_s5 + $0x8] sm:$0xff]   ;;  %v459_v41 = vld [vmem:[%s636_s7 + $0x18] sm:$0xff]  }
   0x4   :  { %416 = vmatprep.subr.bf16.mxu1 %v472_v14  ;;  %v381_v26 = vld [vmem:[%s635_s2] ss:$0 sm:$0xff]  ;;  %v457_v39 = vld [vmem:[%s636_s7 + $0x8] sm:$0xff]   ;;  %v462_v44 = vld [vmem:[%s636_s7 + $0x30] sm:$0xff]  }
   0x5   :  { %v454_v35 = vld [vmem:[%s633_s5] sm:$0xff]   ;;  %v461_v43 = vld [vmem:[%s636_s7 + $0x28] sm:$0xff]   ;;  %v463_v45 = vld [vmem:[%s636_s7 + $0x38] sm:$0xff]  }
   0x6   :  { %v456_v38 = vld [vmem:[%s636_s7] sm:$0xff]  }
   0x7   :  { %44 = vadd.xlane.f32.xlu0 %v43_v3  ;;  %417 = vmatpush3.bf16.msra.mxu1 %v453_v16  ;;  %v460_v42 = vld [vmem:[%s636_s7 + $0x20] sm:$0xff]  }
   0x8   :  { %422 = vmatprep.subr.bf16.mxu1 %v472_v14  ;;  %431 = vmatpush3.bf16.msra.mxu0 %v456_v38  ;;  %v386_v50 = vld [vmem:[%s637_s6] ss:$0 sm:$0xff] }
   0x9   :  { %432 = vmatprep.subr.bf16.mxu0 %v472_v14 }
   0xc   :  { %433 = vmatpush3.bf16.msra.mxu0 %v457_v39 }
   0xd   :  { %434 = vmatprep.subr.bf16.mxu0 %v472_v14 }
  0x10   :  { %435 = vmatpush3.bf16.msra.mxu0 %v458_v40 }
  0x11   :  { %436 = vmatprep.subr.bf16.mxu0 %v472_v14 }
  0x14   :  { %437 = vmatpush3.bf16.msra.mxu0 %v459_v41 }
  0x15   :  { %438 = vmatprep.subr.bf16.mxu0 %v472_v14 }
  0x18   :  { %439 = vmatpush3.bf16.msra.mxu0 %v460_v42 }
  0x19   :  { %440 = vmatprep.subr.bf16.mxu0 %v472_v14 }
  0x1c   :  { %441 = vmatpush3.bf16.msra.mxu0 %v461_v43 }
  0x1d   :  { %442 = vmatprep.subr.bf16.mxu0 %v472_v14 }
  0x20   :  { %443 = vmatpush3.bf16.msra.mxu0 %v462_v44 }
  0x21   :  { %444 = vmatprep.subr.bf16.mxu0 %v472_v14 }
  0x24   :  { %445 = vmatpush3.bf16.msra.mxu0 %v463_v45 }
  0x90   :  { %v42_v4 = vpop.xlane.xlu0 %41 }
  0x91   :  { %v47_v5 = vmul.f32 0.03125, %v42_v4 }
  0x93   :  { %v49_v6 = vsub.f32 %v527_v0, %v47_v5 }
  0x94   :  { %v45_v7 = vpop.xlane.xlu0 %44 }
  0x95   :  { %v48_v8 = vmul.f32 0.03125, %v45_v7  ;;  %v51_v9 = vmul.f32 %v49_v6, %v49_v6 }
  0x97   :  { %v50_v10 = vsub.f32 %v532_v1, %v48_v8  ;;  %v53_v11 = vsel %vm39_vm0, %v51_v9, 0.0  ;;  %v382_v8 = vld [vmem:[%s638_s4] ss:$0 sm:$0xff] }
  0x98   :  { %54 = vadd.xlane.f32.xlu1 %v53_v11 }
  0x99   :  { %v52_v12 = vmul.f32 %v50_v10, %v50_v10 }
  0x9b   :  { %v56_v13 = vsel %vm39_vm0, %v52_v12, 0.0 }
  0x9c   :  { %57 = vadd.xlane.f32.xlu1 %v56_v13 }
 0x125   :  { %v55_v17 = vpop.xlane.xlu1 %54 }
 0x126   :  { %v59_v18 = vmul.f32 0.03125, %v55_v17 }
 0x128   :  { %v61_v19 = vadd.f32 1e-05, %v59_v18 }
 0x129   :  { %v58_v20 = vpop.xlane.xlu1 %57 }
 0x12a   :  { %464 = vrsqrt.f32 %v61_v19  ;;  %v60_v21 = vmul.f32 0.03125, %v58_v20  ;;  %v245_v19 = vld [vmem:[#allocation2] sm:$0xff] }
 0x12c   :  { %v62_v22 = vadd.f32 1e-05, %v60_v21  ;;  %v246_v21 = vld [vmem:[#allocation2 + $0x8] sm:$0xff] }
 0x12e   :  { %466 = vrsqrt.f32 %v62_v22 }
 0x134   :  { %v465_v23 = vpop.eup %464 }
 0x135   :  { %v65_v25 = vmul.f32 %v465_v23, %v49_v6 }
 0x137   :  { %v74_v27 = vmul.f32 %v380_v24, %v65_v25 }
 0x138   :  { %v467_v28 = vpop.eup %466 }
 0x139   :  { %v83_v29 = vadd.f32 %v381_v26, %v74_v27  ;;  %v66_v30 = vmul.f32 %v467_v28, %v50_v10  ;;  %v398_v27 = vld [vmem:[%s639_s8] ss:$0 sm:$0xff] }
 0x13b   :  { %85 = vst.msk [vmem:[#allocation3] sm:$0xff] %vm39_vm0, %v83_v29  ;;  %v75_v31 = vmul.f32 %v380_v24, %v66_v30 }
 0x13d   :  { %v84_v32 = vadd.f32 %v381_v26, %v75_v31 }
 0x13f   :  { %86 = vst.msk [vmem:[#allocation3 + $0x8] sm:$0xff] %vm39_vm0, %v84_v32 }
 0x142   :  { %v89_v33 = vld [vmem:[#allocation3] sm:$0xff] }
 0x146   :  { %v90_v34 = vld [vmem:[#allocation3 + $0x8] sm:$0xff] }
 0x147   :  { %v91_v36 = vpack.c.bf16 %v90_v34, %v89_v33 }
 0x149   :  { %419 = vmatmul.mubr.msk.bf16.vlgmr.msra.gmra.mrb[0].mxu1 %vm39_vm0, %v91_v36 }
 0x14a   :  { %423 = vmatpush3.bf16.msra.mxu1 %v454_v35  ;;  %426 = vmatprep.mubr.msk.bf16.mxu1 %vm473_vm1, %v472_v14 }
 0x14b   :  { %424 = vmatprep.subr.bf16.mxu1 %v472_v14 }
 0x14e   :  { %425 = vmatpush3.bf16.msra.mxu1 %v455_v37 }
 0x151   :  { %427 = vmatmul.mubr.msk.bf16.vlgmr.msra.gmra.mrb[4].mxu1 %vm39_vm0, %v91_v36 }
 0x21c   :  { %v153_v46 = vpop.f32.mrb[0].mxu1 }
 0x21d   :  { %v420_v47 = vpop.f32.mrb[1].mxu1  ;;  %v154_v11 = vadd.f32 %v382_v8, %v153_v46 }
 0x21e   :  { %v156_v48 = vpop.f32.mrb[2].mxu1 }
 0x21f   :  { %v421_v49 = vpop.f32.mrb[3].mxu1  ;;  %v157_v14 = vadd.f32 %v382_v8, %v156_v48 }
 0x224   :  { %v217_v51 = vpop.f32.mrb[4].mxu1 }
 0x225   :  { %v218_v52 = vadd.f32 %v386_v50, %v217_v51  ;;  %v428_v53 = vpop.f32.mrb[5].mxu1 }
 0x226   :  { %v220_v54 = vpop.f32.mrb[6].mxu1 }
 0x227   :  { %v224_v55 = vmul.f32 %v218_v52, %v218_v52  ;;  %v221_v56 = vadd.f32 %v386_v50, %v220_v54  ;;  %v429_v57 = vpop.f32.mrb[7].mxu1 }
 0x229   :  { %v226_v58 = vmul.f32 %v224_v55, %v218_v52  ;;  %v225_v59 = vmul.f32 %v221_v56, %v221_v56 }
 0x22b   :  { %v228_v60 = vmul.f32 0.044715, %v226_v58  ;;  %v227_v61 = vmul.f32 %v225_v59, %v221_v56 }
 0x22d   :  { %v230_v62 = vadd.f32 %v228_v60, %v218_v52  ;;  %v229_v63 = vmul.f32 0.044715, %v227_v61 }
 0x22f   :  { %v232_v2 = vmul.f32 0.7978846, %v230_v62  ;;  %v231_v3 = vadd.f32 %v229_v63, %v221_v56 }
 0x231   :  { %468 = vtanh.f32 %v232_v2  ;;  %v233_v4 = vmul.f32 0.7978846, %v231_v3 }
 0x233   :  { %470 = vtanh.f32 %v233_v4 }
 0x23b   :  { %v469_v5 = vpop.eup %468 }
 0x23c   :  { %v236_v6 = vadd.f32 1.0, %v469_v5 }
 0x23d   :  { %v471_v7 = vpop.eup %470 }
 0x23e   :  { %v237_v9 = vadd.f32 1.0, %v471_v7  ;;  %v238_v10 = vmul.f32 0.5, %v236_v6 }
 0x240   :  { %v239_v12 = vmul.f32 0.5, %v237_v9  ;;  %v240_v13 = vmul.f32 %v238_v10, %v218_v52 }
 0x242   :  { %v241_v15 = vmul.f32 %v239_v12, %v221_v56  ;;  %v242_v16 = vmul.f32 %v240_v13, %v154_v11 }
 0x244   :  { %v243_v17 = vmul.f32 %v241_v15, %v157_v14 }
 0x246   :  { %v244_v18 = vpack.c.bf16 %v243_v17, %v242_v16 }
 0x248   :  { %447 = vmatmul.mubr.bf16.vlgmr.msra.gmra.mrb[0].mxu0 %v244_v18 }
 0x31b   :  { %v345_v20 = vpop.f32.mrb[0].mxu0 }
 0x31c   :  { %v352_v22 = vadd.f32 %v345_v20, %v245_v19  ;;  %v448_v23 = vpop.f32.mrb[1].mxu0 }
 0x31d   :  { %v348_v24 = vpop.f32.mrb[2].mxu0 }
 0x31e   :  { %354 = vst.msk [vmem:[#allocation2] sm:$0xff] %vm39_vm0, %v352_v22  ;;  %v353_v25 = vadd.f32 %v348_v24, %v246_v21  ;;  %v449_v26 = vpop.f32.mrb[3].mxu0 }
 0x320   :  { %355 = vst.msk [vmem:[#allocation2 + $0x8] sm:$0xff] %vm39_vm0, %v353_v25 }
 0x325   :  { %v359_v28 = vld [vmem:[#allocation2] sm:$0xff] }
 0x326   :  { %v368_v29 = vadd.f32 %v398_v27, %v359_v28 }
 0x327   :  { %v360_v30 = vld [vmem:[#allocation2 + $0x8] sm:$0xff] }
 0x328   :  { %v372_v31 = vadd.f32 %v368_v29, %v527_v0  ;;  %v369_v32 = vadd.f32 %v398_v27, %v360_v30 }
 0x32a   :  { %374 = vst.msk [vmem:[%s640_s9] sm:$0xff] %vm39_vm0, %v372_v31  ;;  %v373_v33 = vadd.f32 %v532_v1, %v369_v32 }
 0x32c   :  { %375 = vst.msk [vmem:[%s640_s9 + $0x8] sm:$0xff] %vm39_vm0, %v373_v33 }

// kernel: decoder_forward.17
= control target key start
LH: loop header
LB: loop body
LE: loop exit
PB: predicated region body
PF: predicated region fallthrough
CT: control target
= control target key end

     0   :  { %s2644_s13 = smov 0   ;;  %s2646_s14 = smov 0   ;;  %s3205_s0 = inlined_call_operand.vmem [shape: f32[2,8,32], index: 0, kind: input, shape index: {}]   ;;  %s3206_s1 = inlined_call_operand.vmem [shape: f32[2,12,64], index: 1, kind: input, shape index: {}]   ;;  %s3207_s2 = inlined_call_operand.vmem [shape: f32[7,32], index: 2, kind: input, shape index: {}]   ;;  %s3208_s3 = inlined_call_operand.vmem [shape: f32[15,32], index: 3, kind: input, shape index: {}]   ;;  %s3209_s4 = inlined_call_operand.vmem [shape: s32[8,12], index: 4, kind: input, shape index: {}]   ;;  %s3210_s5 = inlined_call_operand.vmem [shape: s32[8,12], index: 5, kind: input, shape index: {}]   ;;  %s3211_s6 = inlined_call_operand.vmem [shape: f32[2,1,12], index: 6, kind: input, shape index: {}]   ;;  %s3212_s7 = inlined_call_operand.vmem [shape: f32[2,8,32], index: 7, kind: input, shape index: {}]   ;;  %s3213_s8 = inlined_call_operand.vmem [shape: bf16[32,32], index: 8, kind: input, shape index: {}]   ;;  %s3214_s9 = inlined_call_operand.vmem [shape: f32[1,32], index: 9, kind: input, shape index: {}]   ;;  %s3215_s10 = inlined_call_operand.vmem [shape: f32[2,8,32], index: 10, kind: output, shape index: {}]  }
   0x1   :  { %s2648_s15 = smov 0  }
   0x2 LB: > { %s32_s16 = sadd.s32 1, %s2559_s14  ;;  %p2214_p0 = scmp.ge.s32.totalorder %s2563_s15, 1  ;;  %s2563_s15 = sphi %s2648_s15, %s20_s15   ;;  %s2559_s14 = sphi %s2646_s14, %s3276_s14   ;;  %s2555_s13 = sphi %s2644_s13, %s3275_s13  }
   0x3   : > { %p34_p1 = scmp.ge.s32.totalorder %s32_s16, 2  ;;  %p380_p2 = scmp.lt.s32.totalorder %s2563_s15, 3 }
   0x5   : > { %s3278_s16 = smov (%p34_p1, %s32_s16), 0  ;;  %p381_p3 = pnand %p2214_p0, %p380_p2 }
   0x6   : > { %v534_v0 = vld [vmem:[%s3208_s3] sm:$0xff] (!%p381_p3)  ;;  %v535_v1 = vld [vmem:[%s3208_s3 + $0x8] sm:$0x7f] (!%p381_p3)  ;;  %vm537_vm0 = vcmask (!%p381_p3), 64512   ;;  %v2565_v2 = vmov (!%p381_p3), 0.0   ;;  %vm2566_vm1 = vmmov (!%p381_p3), 0  }
   0x7   : > { %384 = sbr.rel (%p381_p3) target bundleno = 2886 (0xb46), region = 60  ;;  %2284 = vmatprep.subr.bf16.mxu1 (!%p381_p3), %v2565_v2  ;;  %v2669_v3 = vpack.c.bf16 (!%p381_p3), %v535_v1, %v534_v0  ;;  %2286 = vmatprep.mubr.msk.bf16.mxu1 (!%p381_p3), %vm2566_vm1, %v2565_v2  ;;  %p445_p4 = scmp.lt.s32.totalorder (!%p381_p3), %s2555_s13, 1  ;;  %v2567_v5 = vmov (!%p381_p3), 2   ;;  %v2568_v6 = vmov (!%p381_p3), 0   ;;  %v531_v12 = vld [vmem:[%s3207_s2] sm:$0x7f] (!%p381_p3) }
   0x8   : > { %2296 = vmatprep.subr.bf16.mxu0 (!%p381_p3), %v2565_v2  ;;  %2298 = vmatprep.mubr.msk.bf16.mxu0 (!%p381_p3), %vm2566_vm1, %v2565_v2  ;;  %v532_v15 = vmul.f32 (!%p381_p3), 0.35355338, %v531_v12  ;;  %v2569_v21 = vmov (!%p381_p3), 3   ;;  %v2570_v22 = vmov (!%p381_p3), 1   ;;  %v2571_v27 = vmov (!%p381_p3), 4   ;;  %s2582_s11 = smov (!%p381_p3), 96  }
   0x9   : > { %v542_v4 = vsel (!%p381_p3), %vm537_vm0, %v2669_v3, 0  ;;  %2467 = vset.pattern.permute.xlu1 (!%p381_p3), %v2567_v5  ;;  %2465 = vset.pattern.permute.xlu0 (!%p381_p3), %v2568_v6  ;;  %v2572_v28 = vmov (!%p381_p3), 5   ;;  %v2573_v29 = vmov (!%p381_p3), 6   ;;  %v2574_v30 = vmov (!%p381_p3), 8   ;;  %s2583_s12 = smov (!%p381_p3), 120   ;;  %v2744_v42 = vld [vmem:[%s3210_s5] sm:$0xff] (!%p381_p3) }
   0xa   : > { %2285 = vmatpush3.bf16.xpose.msra.mxu1 (!%p381_p3), %v542_v4  ;;  %v2709_v16 = vpack.c.bf16 (!%p381_p3), %v532_v15, %v532_v15  ;;  %v2575_v31 = vmov (!%p381_p3), 7   ;;  %v2576_v32 = vmov (!%p381_p3), 11   ;;  %v2577_v33 = vmov (!%p381_p3), 9   ;;  %s2584_s26 = smov (!%p381_p3), 88   ;;  %s2585_s27 = smov (!%p381_p3), 112  }
   0xb   : > { %2290 = vmatprep.subr.bf16.mxu1 (!%p381_p3), %v2565_v2  ;;  %v2578_v34 = vmov (!%p381_p3), 14   ;;  %v2579_v35 = vmov (!%p381_p3), 10   ;;  %v2580_v36 = vmov (!%p381_p3), 12   ;;  %v2581_v40 = vmov (!%p381_p3), 13   ;;  %s2586_s30 = smov (!%p381_p3), 80   ;;  %s2588_s18 = smov (!%p381_p3), 72  }
   0xc   : > { %vm494_vm2 = vcmp.eq.s32.totalorder (!%p381_p3), %v2744_v42, 0  ;;  %vm495_vm3 = vcmp.eq.s32.totalorder (!%p381_p3), %v2744_v42, 1  ;;  %vm496_vm4 = vcmp.eq.s32.totalorder (!%p381_p3), %v2744_v42, 2  ;;  %vm497_vm5 = vcmp.eq.s32.totalorder (!%p381_p3), %v2744_v42, 3 }
   0xd   : > { %vm3227_vm6 = vcmp.eq.s32.totalorder (!%p381_p3), %v2744_v42, 4  ;;  %vm3228_vm7 = vcmp.eq.s32.totalorder (!%p381_p3), %v2744_v42, 5  ;;  %vm3230_vm8 = vcmp.eq.s32.totalorder (!%p381_p3), %v2744_v42, 6  ;;  %vm3229_vm9 = vcmp.eq.s32.totalorder (!%p381_p3), %v2744_v42, 7 }
   0xe   : > { %s3280_s13 = smov (!%p445_p4, %s2555_s13), 1  ;;  %vm3231_vm10 = vcmp.eq.s32.totalorder %v2744_v42, 8  ;;  %vm3223_vm11 = vcmp.eq.s32.totalorder %v2744_v42, 9  ;;  %vm3217_vm12 = vcmp.eq.s32.totalorder %v2744_v42, 10  ;;  %vm3216_vm13 = vcmp.eq.s32.totalorder %v2744_v42, 11 }
   0xf   : > { %s2683_s21 = sshll.u32 %s3280_s13, 3  ;;  %s2243_s22 = sshll.u32 %s3280_s13, 4  ;;  %vm3218_vm14 = vcmp.eq.s32.totalorder %v2744_v42, 12  ;;  %vm3221_vm15 = vcmp.eq.s32.totalorder %v2744_v42, 13 }
  0x10   : > { %s451_s25 = scalar_lea.vmem %s3205_s0, %s2683_s21  ;;  %s456_s28 = scalar_lea.vmem %s3206_s1, %s2243_s22 }
  0x11   : > { %v525_v7 = vld [vmem:[%s451_s25] sm:$0xff]  ;;  %v529_v9 = vld [vmem:[%s456_s28 + $0x8] sm:$0xf]  ;;  %s467_s24 = scalar_lea.vmem %s3211_s6, %s3280_s13 }
  0x12   : > { %v528_v8 = vld [vmem:[%s456_s28] sm:$0xff]  ;;  %v526_v10 = vmul.f32 0.35355338, %v525_v7  ;;  %s481_s28 = scalar_lea.vmem %s3215_s10, %s2683_s21 }
  0x13   : > { %v2694_v11 = vpack.c.bf16 %v529_v9, %v528_v8 }
  0x14   : > { %v2699_v13 = vpack.c.bf16 %v526_v10, %v526_v10 }
  0x15   : > { %v588_v14 = vsel %vm537_vm0, %v2694_v11, 0 }
  0x16   : > { %2297 = vmatpush3.bf16.xpose.msra.mxu0 %v588_v14  ;;  %2287 = vmatmul.mubr.msk.bf16.vlgmr.msra.gmra.mrb[0].mxu1 %vm537_vm0, %v2699_v13 }
  0x17   : > { %2308 = vmatprep.subr.bf16.mxu0 %v2565_v2  ;;  %2291 = vmatpush3.bf16.xpose.msra.mxu1 %v588_v14  ;;  %v487_v14 = vlaneseq }
  0x18   : > { %2292 = vmatprep.mubr.msk.bf16.mxu1 %vm2566_vm1, %v2565_v2  ;;  %2302 = vmatprep.subr.bf16.mxu1 %v2565_v2 }
  0x1d   : > { %2299 = vmatmul.mubr.msk.bf16.vlgmr.msra.gmra.mrb[0].mxu0 %vm537_vm0, %v2699_v13 }
  0x1e   : > { %2310 = vmatprep.mubr.msk.bf16.mxu0 %vm2566_vm1, %v2565_v2  ;;  %2293 = vmatmul.mubr.msk.bf16.vlgmr.msra.gmra.mrb[4].mxu1 %vm537_vm0, %v2709_v16 }
  0x1f   : > { %2304 = vmatprep.mubr.msk.bf16.mxu1 %vm2566_vm1, %v2565_v2 }
  0xe9   : > { %v578_v17 = vpop.f32.mrb[0].mxu1 }
  0xea   : > { %683 = vperm.xlu1 %2467, %v578_v17   ;;  %632 = vperm.xlu0 %2465, %v578_v17   ;;  %v2288_v18 = vpop.f32.mrb[1].mxu1 }
  0xeb   : > { %v581_v19 = vpop.f32.mrb[2].mxu1 }
  0xec   : > { %v2289_v20 = vpop.f32.mrb[3].mxu1  ;;  %v488_v19 = vshrl.u32 %v487_v14, 7 }
  0xee   : > { %2468 = vset.pattern.permute.xlu1 %v2569_v21  ;;  %2466 = vset.pattern.permute.xlu0 %v2570_v22 }
  0xef   : > { %689 = vperm.xlu1 %2468, %v578_v17   ;;  %677 = vperm.xlu0 %2466, %v578_v17  }
  0xf0   : > { %v670_v23 = vpop.f32.mrb[0].mxu0 }
  0xf1   : > { %v2300_v24 = vpop.f32.mrb[1].mxu0  ;;  %v2732_v37 = vpop.f32.mrb[4].mxu1 }
  0xf2   : > { %v673_v25 = vpop.f32.mrb[2].mxu0  ;;  %v2294_v38 = vpop.f32.mrb[5].mxu1 }
  0xf3   : > { %v2301_v26 = vpop.f32.mrb[3].mxu0  ;;  %2469 = vset.pattern.permute.xlu1 %v2571_v27  ;;  %2470 = vset.pattern.permute.xlu0 %v2572_v28  ;;  %v627_v39 = vpop.f32.mrb[6].mxu1 }
  0xf4   : > { %695 = vperm.xlu1 %2469, %v578_v17   ;;  %701 = vperm.xlu0 %2470, %v578_v17   ;;  %v2295_v41 = vpop.f32.mrb[7].mxu1  ;;  %v2783_v26 = vsub.s32 0, %v488_v19 }
  0xf5   : > { %v2790_v41 = vld [vmem:[%s3209_s4] sm:$0xff] }
  0xf8   : > { %2471 = vset.pattern.permute.xlu1 %v2573_v29  ;;  %2473 = vset.pattern.permute.xlu0 %v2574_v30 }
  0xf9   : > { %707 = vperm.xlu1 %2471, %v578_v17   ;;  %719 = vperm.xlu0 %2473, %v578_v17  }
  0xfd   : > { %2472 = vset.pattern.permute.xlu1 %v2575_v31  ;;  %2476 = vset.pattern.permute.xlu0 %v2576_v32 }
  0xfe   : > { %713 = vperm.xlu1 %2472, %v578_v17   ;;  %737 = vperm.xlu0 %2476, %v578_v17  }
 0x102   : > { %2474 = vset.pattern.permute.xlu1 %v2577_v33  ;;  %2479 = vset.pattern.permute.xlu0 %v2578_v34 }
 0x103   : > { %725 = vperm.xlu1 %2474, %v578_v17   ;;  %755 = vperm.xlu0 %2479, %v578_v17  }
 0x107   : > { %2475 = vset.pattern.permute.xlu1 %v2579_v35  ;;  %2485 = vset.pattern.permute.xlu0 %v2572_v28 }
 0x108   : > { %731 = vperm.xlu1 %2475, %v578_v17   ;;  %815 = vrot.lane.b32.xlu0 %v2694_v11, %s2582_s11  ;;  %s2587_s11 = smov 104  }
 0x10c   : > { %2477 = vset.pattern.permute.xlu1 %v2580_v36  ;;  %920 = vrot.lane.b32.xlu0 %v2669_v3, %s2583_s12 }
 0x10d   : > { %743 = vperm.xlu1 %2477, %v578_v17  }
 0x110   : > { %917 = vrot.lane.b32.xlu0 %v2699_v13, %s2583_s12 }
 0x111   : > { %2478 = vset.pattern.permute.xlu1 %v2581_v40 }
 0x112   : > { %749 = vperm.xlu1 %2478, %v578_v17  }
 0x116   : > { %2480 = vset.pattern.permute.xlu1 %v2568_v6 }
 0x169   : > { %v684_v43 = vpop.permute.xlu1 %683  ;;  %v633_v44 = vpop.permute.xlu0 %632 }
 0x16a   : > { %v635_v45 = vsel %vm494_vm2, %v633_v44, 0.0  ;;  %v686_v51 = vsel %vm496_vm4, %v684_v43, 0.0  ;;  %v2793_v43 = vsub.s32 1, %v488_v19  ;;  %v763_v44 = vrot.slane %v2732_v37, %v2783_v26 }
 0x16b   : > { %v671_v46 = vadd.f32 %v670_v23, %v635_v45 }
 0x16e   : > { %v690_v47 = vpop.permute.xlu1 %689  ;;  %v678_v48 = vpop.permute.xlu0 %677 }
 0x16f   : > { %v680_v49 = vsel %vm495_vm3, %v678_v48, 0.0  ;;  %v692_v53 = vsel %vm497_vm5, %v690_v47, 0.0  ;;  %v2799_v48 = vsub.s32 2, %v488_v19 }
 0x170   : > { %v681_v50 = vadd.f32 %v680_v49, %v671_v46 }
 0x172   : > { %v687_v52 = vadd.f32 %v686_v51, %v681_v50 }
 0x173   : > { %v696_v54 = vpop.permute.xlu1 %695  ;;  %v702_v57 = vpop.permute.xlu0 %701 }
 0x174   : > { %v693_v55 = vadd.f32 %v692_v53, %v687_v52  ;;  %v698_v56 = vsel %vm3227_vm6, %v696_v54, 0.0  ;;  %v704_v59 = vsel %vm3228_vm7, %v702_v57, 0.0  ;;  %v769_v53 = vrot.slane %v2732_v37, %v2793_v43 }
 0x175   : > { %v2809_v54 = vsub.s32 3, %v488_v19  ;;  %v2818_v57 = vsub.s32 4, %v488_v19 }
 0x176   : > { %v699_v58 = vadd.f32 %v698_v56, %v693_v55  ;;  %v775_v56 = vrot.slane %v2732_v37, %v2799_v48 }
 0x178   : > { %v708_v60 = vpop.permute.xlu1 %707  ;;  %v705_v61 = vadd.f32 %v704_v59, %v699_v58  ;;  %v720_v4 = vpop.permute.xlu0 %719 }
 0x179   : > { %v710_v62 = vsel %vm3230_vm8, %v708_v60, 0.0  ;;  %v722_v8 = vsel %vm3231_vm10, %v720_v4, 0.0  ;;  %v483_v60 = vld [vmem:[%s467_s24] sm:$0x1]  ;;  %v2832_v4 = vsub.s32 6, %v488_v19  ;;  %s474_s24 = scalar_lea.vmem %s3212_s7, %s2683_s21 }
 0x17a   : > { %v711_v63 = vadd.f32 %v710_v62, %v705_v61  ;;  %v781_v61 = vrot.slane %v2732_v37, %v2809_v54  ;;  %v2825_v62 = vsub.s32 5, %v488_v19 }
 0x17d   : > { %v714_v0 = vpop.permute.xlu1 %713  ;;  %v738_v20 = vpop.permute.xlu0 %737 }
 0x17e   : > { %v716_v1 = vsel %vm3229_vm9, %v714_v0, 0.0  ;;  %v740_v24 = vsel %vm3216_vm13, %v738_v20, 0.0  ;;  %vm3219_vm13 = vcmp.eq.s32.totalorder %v2744_v42, 14 }
 0x17f   : > { %v717_v7 = vadd.f32 %v716_v1, %v711_v63  ;;  %v787_v1 = vrot.slane %v2732_v37, %v2818_v57 }
 0x181   : > { %v723_v10 = vadd.f32 %v722_v8, %v717_v7 }
 0x182   : > { %v726_v9 = vpop.permute.xlu1 %725  ;;  %v756_v45 = vpop.permute.xlu0 %755 }
 0x183   : > { %v728_v12 = vsel %vm3223_vm11, %v726_v9, 0.0  ;;  %v758_v51 = vsel %vm3219_vm13, %v756_v45, 0.0  ;;  %vm3224_vm13 = vcmp.eq.s32.totalorder %v2790_v41, 2  ;;  %v793_v9 = vrot.slane %v2732_v37, %v2825_v62 }
 0x184   : > { %v729_v15 = vadd.f32 %v728_v12, %v723_v10  ;;  %v776_v0 = vsel %vm3224_vm13, %v775_v56, 0.0  ;;  %vm514_vm11 = vcmp.eq.s32.totalorder %v2790_v41, 5  ;;  %vm515_vm13 = vcmp.eq.s32.totalorder %v2790_v41, 6 }
 0x187   : > { %v732_v17 = vpop.permute.xlu1 %731 }
 0x188   : > { %v734_v18 = vsel %vm3217_vm12, %v732_v17, 0.0  ;;  %vm3220_vm12 = vcmp.eq.s32.totalorder %v2790_v41, 0 }
 0x189   : > { %v735_v23 = vadd.f32 %v734_v18, %v729_v15  ;;  %v764_v52 = vsel %vm3220_vm12, %v763_v44, 0.0  ;;  %vm512_vm12 = vcmp.eq.s32.totalorder %v2790_v41, 3  ;;  %v799_v15 = vrot.slane %v2732_v37, %v2832_v4  ;;  %v816_v37 = vpop.permute.xlu0 %815 }
 0x18a   : > { %v782_v8 = vsel %vm512_vm12, %v781_v61, 0.0  ;;  %v794_v18 = vsel %vm514_vm11, %v793_v9, 0.0 }
 0x18b   : > { %v741_v38 = vadd.f32 %v740_v24, %v735_v23  ;;  %v800_v23 = vsel %vm515_vm13, %v799_v15, 0.0 }
 0x18c   : > { %v744_v25 = vpop.permute.xlu1 %743 }
 0x18d   : > { %v746_v39 = vsel %vm3218_vm14, %v744_v25, 0.0  ;;  %vm3222_vm14 = vcmp.eq.s32.totalorder %v2790_v41, 1 }
 0x18e   : > { %v747_v46 = vadd.f32 %v746_v39, %v741_v38  ;;  %v770_v59 = vsel %vm3222_vm14, %v769_v53, 0.0  ;;  %vm3225_vm14 = vcmp.eq.s32.totalorder %v2790_v41, 4 }
 0x18f   : > { %v788_v14 = vsel %vm3225_vm14, %v787_v1, 0.0  ;;  %vm3226_vm14 = vcmask 1045504  }
 0x190   : > { %v822_v39 = vsel %vm3226_vm14, %v816_v37, 0  ;;  %vm871_vm14 = vcmask 1043456  }
 0x191   : > { %v750_v47 = vpop.permute.xlu1 %749  ;;  %2303 = vmatpush3.bf16.msra.mxu1 %v822_v39 }
 0x192   : > { %v752_v49 = vsel %vm3221_vm15, %v750_v47, 0.0  ;;  %vm484_vm15 = vcmp.gt.f32.partialorder %v483_v60, 0.5  ;;  %2314 = vmatprep.subr.bf16.mxu1 %v2565_v2  ;;  %v921_v47 = vpop.permute.xlu0 %920 }
 0x193   : > { %v753_v50 = vadd.f32 %v752_v49, %v747_v46  ;;  %v485_v12 = vsel %vm484_vm15, -1e+30, %v2565_v2  ;;  %vm803_vm15 = vcmask 97280  }
 0x194   : > { %v2849_v19 = vrot.slane %v485_v12, %v2783_v26 }
 0x195   : > { %v759_v55 = vadd.f32 %v758_v51, %v753_v50  ;;  %v926_v50 = vsel %vm537_vm0, %v921_v47, 0 }
 0x197   : > { %v765_v58 = vadd.f32 %v764_v52, %v759_v55  ;;  %v918_v55 = vpop.permute.xlu0 %917 }
 0x199   : > { %v771_v63 = vadd.f32 %v770_v59, %v765_v58  ;;  %v867_v58 = vld [vmem:[%s3213_s8] sm:$0xf] }
 0x19a   : > { %v873_v59 = vsel %vm871_vm14, %v867_v58, 0 }
 0x19b   : > { %v777_v7 = vadd.f32 %v776_v0, %v771_v63  ;;  %2309 = vmatpush3.bf16.msra.mxu0 %v873_v59 }
 0x19c   : > { %2320 = vmatprep.subr.bf16.mxu0 %v2565_v2 }
 0x19d   : > { %v783_v10 = vadd.f32 %v782_v8, %v777_v7 }
 0x19f   : > { %v789_v17 = vadd.f32 %v788_v14, %v783_v10 }
 0x1a1   : > { %v795_v20 = vadd.f32 %v794_v18, %v789_v17 }
 0x1a3   : > { %v801_v24 = vadd.f32 %v800_v23, %v795_v20 }
 0x1a5   : > { %v802_v25 = vadd.f32 %v801_v24, %v2849_v19 }
 0x1a7   : > { %v804_v38 = vsel %vm803_vm15, %v802_v25, -inf }
 0x1a8   : > { %805 = vmax.xlane.f32.xlu1 %v804_v38 }
 0x1b9   : > { %971 = vrot.lane.b32.xlu1 %v2694_v11, %s2583_s12 }
 0x235   : > { %v806_v44 = vpop.xlane.xlu1 %805 }
 0x236   : > { %v807_v45 = vsub.f32 %v802_v25, %v806_v44 }
 0x238   : > { %v808_v46 = vmul.f32 1.442695, %v807_v45 }
 0x239   : > { %v972_v53 = vpop.permute.xlu1 %971 }
 0x23a   : > { %2525 = vpow2.f32 %v808_v46  ;;  %v977_v56 = vsel %vm537_vm0, %v972_v53, 0 }
 0x244   : > { %v2526_v49 = vpop.eup %2525 }
 0x245   : > { %v810_v51 = vsel %vm803_vm15, %v2526_v49, 0.0  ;;  %v813_v52 = vpack.c.bf16 %v2526_v49, %v2526_v49 }
 0x246   : > { %811 = vadd.xlane.f32.xlu0 %v810_v51 }
 0x247   : > { %2305 = vmatmul.mubr.msk.bf16.vlgmr.msra.gmra.mrb[8].mxu1 %vm803_vm15, %v813_v52 }
 0x248   : > { %2315 = vmatpush3.bf16.xpose.msra.mxu1 %v926_v50  ;;  %2316 = vmatprep.mubr.msk.bf16.mxu1 %vm2566_vm1, %v2565_v2 }
 0x249   : > { %2326 = vmatprep.subr.bf16.mxu1 %v2565_v2 }
 0x24f   : > { %2317 = vmatmul.mubr.msk.bf16.vlgmr.msra.gmra.mrb[12].mxu1 %vm537_vm0, %v918_v55 }
 0x250   : > { %2327 = vmatpush3.bf16.xpose.msra.mxu1 %v977_v56  ;;  %2328 = vmatprep.mubr.msk.bf16.mxu1 %vm2566_vm1, %v2565_v2 }
 0x251   : > { %2344 = vmatprep.subr.bf16.mxu1 %v2565_v2 }
 0x257   : > { %2329 = vmatmul.mubr.msk.bf16.vlgmr.msra.gmra.mrb[16].mxu1 %vm537_vm0, %v918_v55 }
 0x258   : > { %2346 = vmatprep.mubr.msk.bf16.mxu1 %vm2566_vm1, %v2565_v2 }
 0x25c   : > { %969 = vrot.lane.b32.xlu0 %v2709_v16, %s2583_s12 }
 0x2d3   : > { %v812_v60 = vpop.xlane.xlu0 %811 }
 0x2d4   : > { %2527 = vrcp.f32 %v812_v60 }
 0x2d7   : > { %v970_v14 = vpop.permute.xlu0 %969 }
 0x2de   : > { %v2528_v61 = vpop.eup %2527 }
 0x31a   : > { %v858_v63 = vpop.f32.mrb[8].mxu1 }
 0x31b   : > { %v865_v0 = vmul.f32 %v2528_v61, %v858_v63  ;;  %v2306_v1 = vpop.f32.mrb[9].mxu1 }
 0x31c   : > { %v861_v7 = vpop.f32.mrb[10].mxu1 }
 0x31d   : > { %v866_v8 = vpack.c.bf16 %v865_v0, %v865_v0  ;;  %v2307_v9 = vpop.f32.mrb[11].mxu1 }
 0x31f   : > { %2311 = vmatmul.mubr.msk.bf16.vlgmr.msra.gmra.mrb[4].mxu0 %vm537_vm0, %v866_v8 }
 0x320   : > { %2321 = vmatpush3.bf16.xpose.msra.mxu0 %v977_v56  ;;  %2322 = vmatprep.mubr.msk.bf16.mxu0 %vm2566_vm1, %v2565_v2 }
 0x321   : > { %2332 = vmatprep.subr.bf16.mxu0 %v2565_v2 }
 0x322   : > { %v962_v10 = vpop.f32.mrb[12].mxu1 }
 0x323   : > { %1021 = vperm.xlu1 %2480, %v962_v10   ;;  %1090 = vperm.xlu0 %2485, %v962_v10   ;;  %v2318_v12 = vpop.f32.mrb[13].mxu1 }
 0x324   : > { %v965_v15 = vpop.f32.mrb[14].mxu1 }
 0x325   : > { %v2319_v17 = vpop.f32.mrb[15].mxu1 }
 0x327   : > { %2323 = vmatmul.mubr.msk.bf16.vlgmr.msra.gmra.mrb[8].mxu0 %vm537_vm0, %v970_v14  ;;  %2481 = vset.pattern.permute.xlu1 %v2570_v22 }
 0x328   : > { %1066 = vperm.xlu1 %2481, %v962_v10   ;;  %2488 = vset.pattern.permute.xlu0 %v2574_v30 }
 0x329   : > { %1108 = vperm.xlu0 %2488, %v962_v10   ;;  %2334 = vmatprep.mubr.msk.bf16.mxu0 %vm2566_vm1, %v2565_v2 }
 0x32a   : > { %v1059_v18 = vpop.f32.mrb[16].mxu1 }
 0x32b   : > { %v2330_v20 = vpop.f32.mrb[17].mxu1 }
 0x32c   : > { %2482 = vset.pattern.permute.xlu1 %v2567_v5  ;;  %v1062_v23 = vpop.f32.mrb[18].mxu1 }
 0x32d   : > { %1072 = vperm.xlu1 %2482, %v962_v10   ;;  %2491 = vset.pattern.permute.xlu0 %v2576_v32  ;;  %v2331_v24 = vpop.f32.mrb[19].mxu1 }
 0x32e   : > { %1126 = vperm.xlu0 %2491, %v962_v10  }
 0x331   : > { %2483 = vset.pattern.permute.xlu1 %v2569_v21 }
 0x332   : > { %1078 = vperm.xlu1 %2483, %v962_v10   ;;  %2494 = vset.pattern.permute.xlu0 %v2578_v34 }
 0x333   : > { %1144 = vperm.xlu0 %2494, %v962_v10  }
 0x336   : > { %2484 = vset.pattern.permute.xlu1 %v2571_v27 }
 0x337   : > { %1084 = vperm.xlu1 %2484, %v962_v10   ;;  %2500 = vset.pattern.permute.xlu0 %v2572_v28 }
 0x338   : > { %1202 = vrot.lane.b32.xlu0 %v2694_v11, %s2584_s26 }
 0x33b   : > { %2486 = vset.pattern.permute.xlu1 %v2573_v29 }
 0x33c   : > { %1096 = vperm.xlu1 %2486, %v962_v10   ;;  %1303 = vrot.lane.b32.xlu0 %v2669_v3, %s2585_s27 }
 0x340   : > { %2487 = vset.pattern.permute.xlu1 %v2575_v31  ;;  %1301 = vrot.lane.b32.xlu0 %v2699_v13, %s2585_s27 }
 0x341   : > { %1102 = vperm.xlu1 %2487, %v962_v10  }
 0x345   : > { %2489 = vset.pattern.permute.xlu1 %v2577_v33 }
 0x346   : > { %1114 = vperm.xlu1 %2489, %v962_v10  }
 0x34a   : > { %2490 = vset.pattern.permute.xlu1 %v2579_v35 }
 0x34b   : > { %1120 = vperm.xlu1 %2490, %v962_v10  }
 0x34f   : > { %2492 = vset.pattern.permute.xlu1 %v2580_v36 }
 0x350   : > { %1132 = vperm.xlu1 %2492, %v962_v10  }
 0x354   : > { %2493 = vset.pattern.permute.xlu1 %v2581_v40 }
 0x355   : > { %1138 = vperm.xlu1 %2493, %v962_v10  }
 0x359   : > { %2495 = vset.pattern.permute.xlu1 %v2568_v6 }
 0x3a2   : > { %v1022_v25 = vpop.permute.xlu1 %1021  ;;  %v1091_v58 = vpop.permute.xlu0 %1090 }
 0x3a3   : > { %v1024_v45 = vsel %vm494_vm2, %v1022_v25, 0.0  ;;  %v1093_v61 = vsel %vm3228_vm7, %v1091_v58, 0.0  ;;  %vm3233_vm7 = vcmp.eq.s32.totalorder %v2744_v42, 10 }
 0x3a4   : > { %v1060_v47 = vadd.f32 %v1059_v18, %v1024_v45 }
 0x3a7   : > { %v1067_v38 = vpop.permute.xlu1 %1066 }
 0x3a8   : > { %v1069_v46 = vsel %vm495_vm3, %v1067_v38, 0.0  ;;  %v1109_v9 = vpop.permute.xlu0 %1108 }
 0x3a9   : > { %v1070_v50 = vadd.f32 %v1069_v46, %v1060_v47  ;;  %v1111_v12 = vsel %vm3231_vm10, %v1109_v9, 0.0  ;;  %vm3236_vm10 = vcmp.eq.s32.totalorder %v2744_v42, 13 }
 0x3ac   : > { %v1073_v37 = vpop.permute.xlu1 %1072 }
 0x3ad   : > { %v1075_v49 = vsel %vm496_vm4, %v1073_v37, 0.0  ;;  %v1127_v25 = vpop.permute.xlu0 %1126 }
 0x3ae   : > { %v1076_v53 = vadd.f32 %v1075_v49, %v1070_v50 }
 0x3b1   : > { %v1079_v39 = vpop.permute.xlu1 %1078 }
 0x3b2   : > { %v1081_v52 = vsel %vm497_vm5, %v1079_v39, 0.0  ;;  %v1145_v47 = vpop.permute.xlu0 %1144 }
 0x3b3   : > { %v1082_v56 = vadd.f32 %v1081_v52, %v1076_v53 }
 0x3b6   : > { %v1085_v44 = vpop.permute.xlu1 %1084 }
 0x3b7   : > { %v1087_v55 = vsel %vm3227_vm6, %v1085_v44, 0.0  ;;  %vm3232_vm6 = vcmp.eq.s32.totalorder %v2744_v42, 9 }
 0x3b8   : > { %v1088_v59 = vadd.f32 %v1087_v55, %v1082_v56 }
 0x3ba   : > { %v1094_v63 = vadd.f32 %v1093_v61, %v1088_v59 }
 0x3bb   : > { %v1097_v51 = vpop.permute.xlu1 %1096 }
 0x3bc   : > { %v1099_v0 = vsel %vm3230_vm8, %v1097_v51, 0.0  ;;  %vm3235_vm8 = vcmp.eq.s32.totalorder %v2744_v42, 12 }
 0x3bd   : > { %v1100_v8 = vadd.f32 %v1099_v0, %v1094_v63 }
 0x3c0   : > { %v1103_v60 = vpop.permute.xlu1 %1102 }
 0x3c1   : > { %v1105_v7 = vsel %vm3229_vm9, %v1103_v60, 0.0  ;;  %vm3234_vm9 = vcmp.eq.s32.totalorder %v2744_v42, 11 }
 0x3c2   : > { %v1106_v10 = vadd.f32 %v1105_v7, %v1100_v8  ;;  %v1129_v38 = vsel %vm3234_vm9, %v1127_v25, 0.0  ;;  %vm3240_vm9 = vcmp.eq.s32.totalorder %v2790_v41, 2 }
 0x3c4   : > { %v1112_v15 = vadd.f32 %v1111_v12, %v1106_v10 }
 0x3c5   : > { %v1115_v1 = vpop.permute.xlu1 %1114 }
 0x3c6   : > { %v1117_v17 = vsel %vm3232_vm6, %v1115_v1, 0.0  ;;  %vm3237_vm6 = vcmp.eq.s32.totalorder %v2744_v42, 14 }
 0x3c7   : > { %v1118_v20 = vadd.f32 %v1117_v17, %v1112_v15  ;;  %v1147_v51 = vsel %vm3237_vm6, %v1145_v47, 0.0  ;;  %vm3242_vm6 = vcmask 1045504  }
 0x3ca   : > { %v1121_v14 = vpop.permute.xlu1 %1120 }
 0x3cb   : > { %v1123_v18 = vsel %vm3233_vm7, %v1121_v14, 0.0  ;;  %vm3238_vm7 = vcmp.eq.s32.totalorder %v2790_v41, 0 }
 0x3cc   : > { %v1124_v24 = vadd.f32 %v1123_v18, %v1118_v20 }
 0x3ce   : > { %v1130_v37 = vadd.f32 %v1129_v38, %v1124_v24 }
 0x3cf   : > { %v1133_v23 = vpop.permute.xlu1 %1132 }
 0x3d0   : > { %v1135_v44 = vsel %vm3235_vm8, %v1133_v23, 0.0  ;;  %vm3239_vm8 = vcmp.eq.s32.totalorder %v2790_v41, 1 }
 0x3d1   : > { %v1136_v46 = vadd.f32 %v1135_v44, %v1130_v37  ;;  %v1203_v44 = vpop.permute.xlu0 %1202 }
 0x3d4   : > { %v1139_v39 = vpop.permute.xlu1 %1138 }
 0x3d5   : > { %v1141_v45 = vsel %vm3236_vm10, %v1139_v39, 0.0  ;;  %vm3241_vm10 = vcmp.eq.s32.totalorder %v2790_v41, 4 }
 0x3d6   : > { %v1142_v49 = vadd.f32 %v1141_v45, %v1136_v46  ;;  %v1208_v45 = vsel %vm3242_vm6, %v1203_v44, 0  ;;  %v1304_v46 = vpop.permute.xlu0 %1303  ;;  %vm3247_vm6 = vcmp.eq.s32.totalorder %v2744_v42, 8 }
 0x3d7   : > { %2333 = vmatpush3.bf16.msra.mxu0 %v1208_v45  ;;  %v1309_v47 = vsel %vm537_vm0, %v1304_v46, 0 }
 0x3d8   : > { %v1148_v56 = vadd.f32 %v1147_v51, %v1142_v49  ;;  %2338 = vmatprep.subr.bf16.mxu0 %v2565_v2  ;;  %2345 = vmatpush3.bf16.xpose.msra.mxu1 %v1309_v47 }
 0x3d9   : > { %2350 = vmatprep.subr.bf16.mxu1 %v2565_v2 }
 0x3da   : > { %v2966_v49 = vpop.permute.xlu0 %1301 }
 0x3df   : > { %2347 = vmatmul.mubr.msk.bf16.vlgmr.msra.gmra.mrb[20].mxu1 %vm537_vm0, %v2966_v49 }
 0x3e0   : > { %2352 = vmatprep.mubr.msk.bf16.mxu1 %vm2566_vm1, %v2565_v2 }
 0x3fa   : > { %v1013_v50 = vpop.f32.mrb[8].mxu0 }
 0x3fb   : > { %v1152_v52 = vrot.slane %v1013_v50, %v2783_v26  ;;  %v1158_v53 = vrot.slane %v1013_v50, %v2793_v43  ;;  %v2324_v55 = vpop.f32.mrb[9].mxu0  ;;  %v1164_v61 = vrot.slane %v1013_v50, %v2799_v48  ;;  %v1170_v1 = vrot.slane %v1013_v50, %v2809_v54 }
 0x3fc   : > { %v1016_v58 = vpop.f32.mrb[10].mxu0  ;;  %v1176_v9 = vrot.slane %v1013_v50, %v2818_v57  ;;  %v1182_v14 = vrot.slane %v1013_v50, %v2825_v62  ;;  %v1188_v18 = vrot.slane %v1013_v50, %v2832_v4 }
 0x3fd   : > { %v2325_v59 = vpop.f32.mrb[11].mxu0  ;;  %v1153_v60 = vsel %vm3238_vm7, %v1152_v52, 0.0  ;;  %v1159_v0 = vsel %vm3239_vm8, %v1158_v53, 0.0  ;;  %v1165_v8 = vsel %vm3240_vm9, %v1164_v61, 0.0  ;;  %v1171_v12 = vsel %vm512_vm12, %v1170_v1, 0.0 }
 0x3fe   : > { %v1154_v63 = vadd.f32 %v1153_v60, %v1148_v56  ;;  %v1177_v17 = vsel %vm3241_vm10, %v1176_v9, 0.0  ;;  %v1183_v23 = vsel %vm514_vm11, %v1182_v14, 0.0  ;;  %v1189_v25 = vsel %vm515_vm13, %v1188_v18, 0.0  ;;  %v1253_v58 = vld [vmem:[%s3213_s8 + $0x4] sm:$0xf] }
 0x3ff   : > { %v1258_v59 = vsel %vm871_vm14, %v1253_v58, 0  ;;  %vm3243_vm7 = vcmp.eq.s32.totalorder %v2744_v42, 4  ;;  %vm3244_vm8 = vcmp.eq.s32.totalorder %v2744_v42, 5  ;;  %vm3245_vm9 = vcmp.eq.s32.totalorder %v2744_v42, 6 }
 0x400   : > { %v1160_v7 = vadd.f32 %v1159_v0, %v1154_v63  ;;  %vm3246_vm10 = vcmp.eq.s32.totalorder %v2744_v42, 7 }
 0x402   : > { %v1166_v10 = vadd.f32 %v1165_v8, %v1160_v7 }
 0x404   : > { %v1172_v15 = vadd.f32 %v1171_v12, %v1166_v10 }
 0x406   : > { %v1178_v20 = vadd.f32 %v1177_v17, %v1172_v15 }
 0x408   : > { %v1184_v24 = vadd.f32 %v1183_v23, %v1178_v20 }
 0x40a   : > { %v1190_v38 = vadd.f32 %v1189_v25, %v1184_v24 }
 0x40c   : > { %v1191_v37 = vadd.f32 %v1190_v38, %v2849_v19 }
 0x40e   : > { %v1192_v39 = vsel %vm803_vm15, %v1191_v37, -inf }
 0x40f   : > { %1193 = vmax.xlane.f32.xlu1 %v1192_v39 }
 0x420   : > { %1353 = vrot.lane.b32.xlu1 %v2694_v11, %s2585_s27 }
 0x49c   : > { %v1194_v50 = vpop.xlane.xlu1 %1193 }
 0x49d   : > { %v1195_v51 = vsub.f32 %v1191_v37, %v1194_v50 }
 0x49f   : > { %v1196_v52 = vmul.f32 1.442695, %v1195_v51 }
 0x4a0   : > { %v1354_v60 = vpop.permute.xlu1 %1353 }
 0x4a1   : > { %2529 = vpow2.f32 %v1196_v52  ;;  %v1359_v61 = vsel %vm537_vm0, %v1354_v60, 0 }
 0x4a2   : > { %2351 = vmatpush3.bf16.xpose.msra.mxu1 %v1359_v61 }
 0x4a3   : > { %2362 = vmatprep.subr.bf16.mxu1 %v2565_v2 }
 0x4ab   : > { %v2530_v53 = vpop.eup %2529 }
 0x4ac   : > { %v1198_v55 = vsel %vm803_vm15, %v2530_v53, 0.0  ;;  %v1201_v56 = vpack.c.bf16 %v2530_v53, %v2530_v53 }
 0x4ad   : > { %1199 = vadd.xlane.f32.xlu0 %v1198_v55 }
 0x4ae   : > { %2335 = vmatmul.mubr.msk.bf16.vlgmr.msra.gmra.mrb[12].mxu0 %vm803_vm15, %v1201_v56 }
 0x4af   : > { %2340 = vmatprep.mubr.msk.bf16.mxu0 %vm2566_vm1, %v2565_v2  ;;  %2339 = vmatpush3.bf16.msra.mxu0 %v1258_v59 }
 0x4b0   : > { %2356 = vmatprep.subr.bf16.mxu0 %v2565_v2 }
 0x4b2   : > { %v1345_v63 = vpop.f32.mrb[20].mxu1 }
 0x4b3   : > { %1403 = vperm.xlu1 %2495, %v1345_v63   ;;  %v2348_v0 = vpop.f32.mrb[21].mxu1 }
 0x4b4   : > { %v1348_v1 = vpop.f32.mrb[22].mxu1 }
 0x4b5   : > { %v2349_v7 = vpop.f32.mrb[23].mxu1 }
 0x4b7   : > { %2496 = vset.pattern.permute.xlu1 %v2570_v22 }
 0x4b8   : > { %1448 = vperm.xlu1 %2496, %v1345_v63  }
 0x4bc   : > { %2497 = vset.pattern.permute.xlu1 %v2567_v5 }
 0x4bd   : > { %1454 = vperm.xlu1 %2497, %v1345_v63  }
 0x4c1   : > { %2498 = vset.pattern.permute.xlu1 %v2569_v21 }
 0x4c2   : > { %1460 = vperm.xlu1 %2498, %v1345_v63  }
 0x4c3   : > { %1351 = vrot.lane.b32.xlu0 %v2709_v16, %s2585_s27 }
 0x4c6   : > { %2499 = vset.pattern.permute.xlu1 %v2571_v27 }
 0x4c7   : > { %1472 = vperm.xlu0 %2500, %v1345_v63   ;;  %1466 = vperm.xlu1 %2499, %v1345_v63  }
 0x4cb   : > { %2503 = vset.pattern.permute.xlu0 %v2574_v30  ;;  %2501 = vset.pattern.permute.xlu1 %v2573_v29 }
 0x4cc   : > { %1490 = vperm.xlu0 %2503, %v1345_v63   ;;  %1478 = vperm.xlu1 %2501, %v1345_v63  }
 0x4d0   : > { %2506 = vset.pattern.permute.xlu0 %v2576_v32  ;;  %2502 = vset.pattern.permute.xlu1 %v2575_v31 }
 0x4d1   : > { %1508 = vperm.xlu0 %2506, %v1345_v63   ;;  %1484 = vperm.xlu1 %2502, %v1345_v63  }
 0x4d5   : > { %2509 = vset.pattern.permute.xlu0 %v2578_v34  ;;  %2504 = vset.pattern.permute.xlu1 %v2577_v33 }
 0x4d6   : > { %1526 = vperm.xlu0 %2509, %v1345_v63   ;;  %1496 = vperm.xlu1 %2504, %v1345_v63  }
 0x4da   : > { %2515 = vset.pattern.permute.xlu0 %v2572_v28  ;;  %2505 = vset.pattern.permute.xlu1 %v2579_v35 }
 0x4db   : > { %1502 = vperm.xlu1 %2505, %v1345_v63   ;;  %1584 = vrot.lane.b32.xlu0 %v2694_v11, %s2586_s30 }
 0x4df   : > { %2507 = vset.pattern.permute.xlu1 %v2580_v36  ;;  %1685 = vrot.lane.b32.xlu0 %v2669_v3, %s2587_s11 }
 0x4e0   : > { %1514 = vperm.xlu1 %2507, %v1345_v63  }
 0x4e3   : > { %1683 = vrot.lane.b32.xlu0 %v2699_v13, %s2587_s11 }
 0x4e4   : > { %2508 = vset.pattern.permute.xlu1 %v2581_v40 }
 0x4e5   : > { %1520 = vperm.xlu1 %2508, %v1345_v63  }
 0x4e9   : > { %2510 = vset.pattern.permute.xlu1 %v2568_v6 }
 0x532   : > { %v1404_v25 = vpop.permute.xlu1 %1403 }
 0x533   : > { %v1406_v47 = vsel %vm494_vm2, %v1404_v25, 0.0 }
 0x537   : > { %v1449_v38 = vpop.permute.xlu1 %1448 }
 0x538   : > { %v1451_v52 = vsel %vm495_vm3, %v1449_v38, 0.0 }
 0x53a   : > { %v1200_v8 = vpop.xlane.xlu0 %1199 }
 0x53b   : > { %2531 = vrcp.f32 %v1200_v8 }
 0x53c   : > { %v1455_v37 = vpop.permute.xlu1 %1454 }
 0x53d   : > { %v1457_v13 = vsel %vm496_vm4, %v1455_v37, 0.0 }
 0x53e   : > { %v1352_v9 = vpop.permute.xlu0 %1351 }
 0x53f   : > { %2353 = vmatmul.mubr.msk.bf16.vlgmr.msra.gmra.mrb[24].mxu1 %vm537_vm0, %v1352_v9 }
 0x540   : > { %2364 = vmatprep.mubr.msk.bf16.mxu1 %vm2566_vm1, %v2565_v2 }
 0x541   : > { %v1461_v39 = vpop.permute.xlu1 %1460 }
 0x542   : > { %v1463_v59 = vsel %vm497_vm5, %v1461_v39, 0.0 }
 0x545   : > { %v2532_v28 = vpop.eup %2531 }
 0x546   : > { %v1467_v44 = vpop.permute.xlu1 %1466  ;;  %v1473_v60 = vpop.permute.xlu0 %1472 }
 0x547   : > { %v1469_v63 = vsel %vm3243_vm7, %v1467_v44, 0.0  ;;  %v1475_v1 = vsel %vm3244_vm8, %v1473_v60, 0.0  ;;  %vm3248_vm7 = vcmp.eq.s32.totalorder %v2744_v42, 9  ;;  %vm3249_vm8 = vcmp.eq.s32.totalorder %v2744_v42, 10 }
 0x54b   : > { %v1479_v45 = vpop.permute.xlu1 %1478 }
 0x54c   : > { %v1481_v9 = vsel %vm3245_vm9, %v1479_v45, 0.0  ;;  %vm3250_vm9 = vcmp.eq.s32.totalorder %v2744_v42, 11 }
 0x550   : > { %v1485_v46 = vpop.permute.xlu1 %1484 }
 0x555   : > { %v1497_v56 = vpop.permute.xlu1 %1496 }
 0x55a   : > { %v1503_v7 = vpop.permute.xlu1 %1502 }
 0x55b   : > { %v1505_v25 = vsel %vm3249_vm8, %v1503_v7, 0.0  ;;  %vm3254_vm8 = vcmp.eq.s32.totalorder %v2790_v41, 0 }
 0x581   : > { %v1244_v10 = vpop.f32.mrb[12].mxu0 }
 0x582   : > { %v1251_v12 = vmul.f32 %v2532_v28, %v1244_v10  ;;  %v2336_v14 = vpop.f32.mrb[13].mxu0  ;;  %v1491_v28 = vpop.permute.xlu0 %1490 }
 0x583   : > { %v1247_v15 = vpop.f32.mrb[14].mxu0 }
 0x584   : > { %v1252_v17 = vpack.c.bf16 %v1251_v12, %v1251_v12  ;;  %v2337_v18 = vpop.f32.mrb[15].mxu0  ;;  %v1487_v12 = vsel %vm3246_vm10, %v1485_v46, 0.0  ;;  %v1493_v15 = vsel %vm3247_vm6, %v1491_v28, 0.0  ;;  %vm3251_vm10 = vcmp.eq.s32.totalorder %v2744_v42, 12 }
 0x585   : > { %vm3252_vm6 = vcmp.eq.s32.totalorder %v2744_v42, 13 }
 0x586   : > { %2341 = vmatmul.mubr.msk.bf16.vlgmr.msra.gmra.mrb[4].mxu0 %vm537_vm0, %v1252_v17  ;;  %v1515_v17 = vpop.permute.xlu1 %1514 }
 0x587   : > { %2357 = vmatpush3.bf16.xpose.msra.mxu0 %v1359_v61  ;;  %2358 = vmatprep.mubr.msk.bf16.mxu0 %vm2566_vm1, %v2565_v2  ;;  %v1517_v45 = vsel %vm3251_vm10, %v1515_v17, 0.0  ;;  %vm3256_vm10 = vcmp.eq.s32.totalorder %v2790_v41, 2 }
 0x588   : > { %2368 = vmatprep.subr.bf16.mxu0 %v2565_v2 }
 0x58a   : > { %v1521_v39 = vpop.permute.xlu1 %1520 }
 0x58e   : > { %2359 = vmatmul.mubr.msk.bf16.vlgmr.msra.gmra.mrb[16].mxu0 %vm537_vm0, %v2966_v49 }
 0x58f   : > { %2370 = vmatprep.mubr.msk.bf16.mxu0 %vm2566_vm1, %v2565_v2 }
 0x612   : > { %v3011_v6 = vpop.f32.mrb[24].mxu1 }
 0x613   : > { %v2354_v20 = vpop.f32.mrb[25].mxu1  ;;  %v1534_v46 = vrot.slane %v3011_v6, %v2783_v26  ;;  %v1564_v7 = vrot.slane %v3011_v6, %v2825_v62  ;;  %v1570_v28 = vrot.slane %v3011_v6, %v2832_v4 }
 0x614   : > { %v1398_v23 = vpop.f32.mrb[26].mxu1  ;;  %v1499_v20 = vsel %vm3248_vm7, %v1497_v56, 0.0  ;;  %vm3253_vm7 = vcmp.eq.s32.totalorder %v2744_v42, 14 }
 0x615   : > { %v2355_v24 = vpop.f32.mrb[27].mxu1  ;;  %v1509_v23 = vpop.permute.xlu0 %1508 }
 0x616   : > { %v1511_v37 = vsel %vm3250_vm9, %v1509_v23, 0.0  ;;  %vm3255_vm9 = vcmp.eq.s32.totalorder %v2790_v41, 1 }
 0x661   : > { %v1441_v49 = vpop.f32.mrb[16].mxu0 }
 0x662   : > { %v1442_v50 = vadd.f32 %v1441_v49, %v1406_v47  ;;  %v2360_v51 = vpop.f32.mrb[17].mxu0  ;;  %v1527_v47 = vpop.permute.xlu0 %1526 }
 0x663   : > { %v1444_v3 = vpop.f32.mrb[18].mxu0 }
 0x664   : > { %v1452_v53 = vadd.f32 %v1451_v52, %v1442_v50  ;;  %v2361_v55 = vpop.f32.mrb[19].mxu0  ;;  %v1523_v50 = vsel %vm3252_vm6, %v1521_v39, 0.0  ;;  %v1529_v52 = vsel %vm3253_vm7, %v1527_v47, 0.0  ;;  %v1540_v3 = vrot.slane %v3011_v6, %v2793_v43 }
 0x665   : > { %vm3257_vm6 = vcmp.eq.s32.totalorder %v2790_v41, 4  ;;  %vm3258_vm7 = vcmask 1045504  }
 0x666   : > { %v1458_v58 = vadd.f32 %v1457_v13, %v1452_v53  ;;  %v1535_v53 = vsel %vm3254_vm8, %v1534_v46, 0.0  ;;  %v1546_v13 = vrot.slane %v3011_v6, %v2799_v48  ;;  %v1585_v23 = vpop.permute.xlu0 %1584  ;;  %vm3259_vm8 = vcmp.eq.s32.totalorder %v2744_v42, 4 }
 0x668   : > { %v1464_v61 = vadd.f32 %v1463_v59, %v1458_v58  ;;  %v1541_v58 = vsel %vm3255_vm9, %v1540_v3, 0.0  ;;  %v1552_v59 = vrot.slane %v3011_v6, %v2809_v54  ;;  %vm3264_vm9 = vcmp.eq.s32.totalorder %v2744_v42, 9 }
 0x66a   : > { %v1470_v0 = vadd.f32 %v1469_v63, %v1464_v61  ;;  %v1547_v61 = vsel %vm3256_vm10, %v1546_v13, 0.0  ;;  %v1558_v63 = vrot.slane %v3011_v6, %v2818_v57  ;;  %v1590_v6 = vsel %vm3258_vm7, %v1585_v23, 0 }
 0x66b   : > { %2363 = vmatpush3.bf16.msra.mxu1 %v1590_v6  ;;  %vm3265_vm10 = vcmp.eq.s32.totalorder %v2744_v42, 10  ;;  %vm3267_vm7 = vcmp.eq.s32.totalorder %v2744_v42, 12 }
 0x66c   : > { %v1476_v8 = vadd.f32 %v1475_v1, %v1470_v0  ;;  %v1553_v1 = vsel %vm512_vm12, %v1552_v59, 0.0  ;;  %2374 = vmatprep.subr.bf16.mxu1 %v2565_v2 }
 0x66e   : > { %v1482_v10 = vadd.f32 %v1481_v9, %v1476_v8  ;;  %v1559_v9 = vsel %vm3257_vm6, %v1558_v63, 0.0  ;;  %vm3266_vm6 = vcmp.eq.s32.totalorder %v2744_v42, 11 }
 0x670   : > { %v1488_v14 = vadd.f32 %v1487_v12, %v1482_v10  ;;  %v1565_v12 = vsel %vm514_vm11, %v1564_v7, 0.0 }
 0x672   : > { %v1494_v18 = vadd.f32 %v1493_v15, %v1488_v14  ;;  %v1571_v15 = vsel %vm515_vm13, %v1570_v28, 0.0 }
 0x674   : > { %v1500_v24 = vadd.f32 %v1499_v20, %v1494_v18 }
 0x676   : > { %v1506_v38 = vadd.f32 %v1505_v25, %v1500_v24 }
 0x678   : > { %v1512_v44 = vadd.f32 %v1511_v37, %v1506_v38  ;;  %v1686_v37 = vpop.permute.xlu0 %1685 }
 0x67a   : > { %v1518_v49 = vadd.f32 %v1517_v45, %v1512_v44  ;;  %v1691_v44 = vsel %vm537_vm0, %v1686_v37, 0 }
 0x67c   : > { %v1524_v51 = vadd.f32 %v1523_v50, %v1518_v49  ;;  %v1684_v49 = vpop.permute.xlu0 %1683 }
 0x67e   : > { %v1530_v55 = vadd.f32 %v1529_v52, %v1524_v51  ;;  %v1635_v51 = vld [vmem:[%s3213_s8 + $0x8] sm:$0xf] }
 0x67f   : > { %v1640_v52 = vsel %vm871_vm14, %v1635_v51, 0 }
 0x680   : > { %v1536_v56 = vadd.f32 %v1535_v53, %v1530_v55  ;;  %2369 = vmatpush3.bf16.msra.mxu0 %v1640_v52 }
 0x681   : > { %2380 = vmatprep.subr.bf16.mxu0 %v2565_v2 }
 0x682   : > { %v1542_v60 = vadd.f32 %v1541_v58, %v1536_v56 }
 0x684   : > { %v1548_v0 = vadd.f32 %v1547_v61, %v1542_v60 }
 0x686   : > { %v1554_v8 = vadd.f32 %v1553_v1, %v1548_v0 }
 0x688   : > { %v1560_v10 = vadd.f32 %v1559_v9, %v1554_v8 }
 0x68a   : > { %v1566_v14 = vadd.f32 %v1565_v12, %v1560_v10 }
 0x68c   : > { %v1572_v17 = vadd.f32 %v1571_v15, %v1566_v14 }
 0x68e   : > { %v1573_v18 = vadd.f32 %v1572_v17, %v2849_v19 }
 0x690   : > { %v1574_v20 = vsel %vm803_vm15, %v1573_v18, -inf }
 0x691   : > { %1575 = vmax.xlane.f32.xlu1 %v1574_v20 }
 0x6a2   : > { %1735 = vrot.lane.b32.xlu1 %v2694_v11, %s2587_s11 }
 0x71e   : > { %v1576_v24 = vpop.xlane.xlu1 %1575 }
 0x71f   : > { %v1577_v25 = vsub.f32 %v1573_v18, %v1576_v24 }
 0x721   : > { %v1578_v38 = vmul.f32 1.442695, %v1577_v25 }
 0x722   : > { %v1736_v47 = vpop.permute.xlu1 %1735 }
 0x723   : > { %2533 = vpow2.f32 %v1578_v38  ;;  %v1741_v50 = vsel %vm537_vm0, %v1736_v47, 0 }
 0x72d   : > { %v2534_v39 = vpop.eup %2533 }
 0x72e   : > { %v1580_v45 = vsel %vm803_vm15, %v2534_v39, 0.0  ;;  %v1583_v46 = vpack.c.bf16 %v2534_v39, %v2534_v39 }
 0x72f   : > { %1581 = vadd.xlane.f32.xlu0 %v1580_v45 }
 0x730   : > { %2365 = vmatmul.mubr.msk.bf16.vlgmr.msra.gmra.mrb[28].mxu1 %vm803_vm15, %v1583_v46 }
 0x731   : > { %2375 = vmatpush3.bf16.xpose.msra.mxu1 %v1691_v44  ;;  %2376 = vmatprep.mubr.msk.bf16.mxu1 %vm2566_vm1, %v2565_v2 }
 0x732   : > { %2386 = vmatprep.subr.bf16.mxu1 %v2565_v2 }
 0x738   : > { %2377 = vmatmul.mubr.msk.bf16.vlgmr.msra.gmra.mrb[32].mxu1 %vm537_vm0, %v1684_v49 }
 0x739   : > { %2387 = vmatpush3.bf16.xpose.msra.mxu1 %v1741_v50  ;;  %2388 = vmatprep.mubr.msk.bf16.mxu1 %vm2566_vm1, %v2565_v2 }
 0x740   : > { %2389 = vmatmul.mubr.msk.bf16.vlgmr.msra.gmra.mrb[36].mxu1 %vm537_vm0, %v1684_v49 }
 0x745   : > { %1733 = vrot.lane.b32.xlu0 %v2709_v16, %s2587_s11 }
 0x7bc   : > { %v1582_v3 = vpop.xlane.xlu0 %1581 }
 0x7bd   : > { %2535 = vrcp.f32 %v1582_v3 }
 0x7c0   : > { %v1734_v63 = vpop.permute.xlu0 %1733 }
 0x7c7   : > { %v2536_v53 = vpop.eup %2535 }
 0x803   : > { %v1626_v55 = vpop.f32.mrb[28].mxu1 }
 0x804   : > { %v1633_v13 = vmul.f32 %v2536_v53, %v1626_v55  ;;  %v2366_v56 = vpop.f32.mrb[29].mxu1 }
 0x805   : > { %v1629_v58 = vpop.f32.mrb[30].mxu1 }
 0x806   : > { %v1634_v59 = vpack.c.bf16 %v1633_v13, %v1633_v13  ;;  %v2367_v60 = vpop.f32.mrb[31].mxu1 }
 0x808   : > { %2371 = vmatmul.mubr.msk.bf16.vlgmr.msra.gmra.mrb[4].mxu0 %vm537_vm0, %v1634_v59 }
 0x809   : > { %2381 = vmatpush3.bf16.xpose.msra.mxu0 %v1741_v50  ;;  %2382 = vmatprep.mubr.msk.bf16.mxu0 %vm2566_vm1, %v2565_v2 }
 0x80a   : > { %2392 = vmatprep.subr.bf16.mxu0 %v2565_v2 }
 0x80b   : > { %v1727_v61 = vpop.f32.mrb[32].mxu1 }
 0x80c   : > { %1785 = vperm.xlu1 %2510, %v1727_v61   ;;  %1854 = vperm.xlu0 %2515, %v1727_v61   ;;  %v2378_v16 = vpop.f32.mrb[33].mxu1 }
 0x80d   : > { %v1730_v0 = vpop.f32.mrb[34].mxu1 }
 0x80e   : > { %v2379_v1 = vpop.f32.mrb[35].mxu1 }
 0x810   : > { %2383 = vmatmul.mubr.msk.bf16.vlgmr.msra.gmra.mrb[20].mxu0 %vm537_vm0, %v1734_v63  ;;  %2511 = vset.pattern.permute.xlu1 %v2570_v22 }
 0x811   : > { %1830 = vperm.xlu1 %2511, %v1727_v61   ;;  %2518 = vset.pattern.permute.xlu0 %v2574_v30 }
 0x812   : > { %1872 = vperm.xlu0 %2518, %v1727_v61   ;;  %2394 = vmatprep.mubr.msk.bf16.mxu0 %vm2566_vm1, %v2565_v2 }
 0x813   : > { %v1823_v7 = vpop.f32.mrb[36].mxu1 }
 0x814   : > { %v2390_v8 = vpop.f32.mrb[37].mxu1 }
 0x815   : > { %2512 = vset.pattern.permute.xlu1 %v2567_v5  ;;  %v1826_v9 = vpop.f32.mrb[38].mxu1 }
 0x816   : > { %1836 = vperm.xlu1 %2512, %v1727_v61   ;;  %2521 = vset.pattern.permute.xlu0 %v2576_v32  ;;  %v2391_v28 = vpop.f32.mrb[39].mxu1 }
 0x817   : > { %1890 = vperm.xlu0 %2521, %v1727_v61  }
 0x81a   : > { %2513 = vset.pattern.permute.xlu1 %v2569_v21 }
 0x81b   : > { %1842 = vperm.xlu1 %2513, %v1727_v61   ;;  %2524 = vset.pattern.permute.xlu0 %v2578_v34 }
 0x81c   : > { %1908 = vperm.xlu0 %2524, %v1727_v61  }
 0x81f   : > { %2514 = vset.pattern.permute.xlu1 %v2571_v27 }
 0x820   : > { %1848 = vperm.xlu1 %2514, %v1727_v61   ;;  %1966 = vrot.lane.b32.xlu0 %v2694_v11, %s2588_s18 }
 0x824   : > { %2516 = vset.pattern.permute.xlu1 %v2573_v29 }
 0x825   : > { %1860 = vperm.xlu1 %2516, %v1727_v61  }
 0x829   : > { %2517 = vset.pattern.permute.xlu1 %v2575_v31 }
 0x82a   : > { %1866 = vperm.xlu1 %2517, %v1727_v61  }
 0x82e   : > { %2519 = vset.pattern.permute.xlu1 %v2577_v33 }
 0x82f   : > { %1878 = vperm.xlu1 %2519, %v1727_v61  }
 0x833   : > { %2520 = vset.pattern.permute.xlu1 %v2579_v35 }
 0x834   : > { %1884 = vperm.xlu1 %2520, %v1727_v61  }
 0x838   : > { %2522 = vset.pattern.permute.xlu1 %v2580_v36 }
 0x839   : > { %1896 = vperm.xlu1 %2522, %v1727_v61  }
 0x83d   : > { %2523 = vset.pattern.permute.xlu1 %v2581_v40 }
 0x83e   : > { %1902 = vperm.xlu1 %2523, %v1727_v61  }
 0x88b   : > { %v1786_v5 = vpop.permute.xlu1 %1785  ;;  %v1855_v12 = vpop.permute.xlu0 %1854 }
 0x88c   : > { %v1788_v30 = vsel %vm494_vm2, %v1786_v5, 0.0  ;;  %vm3260_vm2 = vcmp.eq.s32.totalorder %v2744_v42, 5 }
 0x88d   : > { %v1824_v32 = vadd.f32 %v1823_v7, %v1788_v30  ;;  %v1857_v17 = vsel %vm3260_vm2, %v1855_v12, 0.0  ;;  %vm3269_vm2 = vcmp.eq.s32.totalorder %v2744_v42, 14 }
 0x890   : > { %v1831_v21 = vpop.permute.xlu1 %1830 }
 0x891   : > { %v1833_v31 = vsel %vm495_vm3, %v1831_v21, 0.0  ;;  %vm3261_vm3 = vcmp.eq.s32.totalorder %v2744_v42, 6  ;;  %v1873_v25 = vpop.permute.xlu0 %1872 }
 0x892   : > { %v1834_v34 = vadd.f32 %v1833_v31, %v1824_v32 }
 0x895   : > { %v1837_v22 = vpop.permute.xlu1 %1836 }
 0x896   : > { %v1839_v33 = vsel %vm496_vm4, %v1837_v22, 0.0  ;;  %vm3262_vm4 = vcmp.eq.s32.totalorder %v2744_v42, 7  ;;  %v1891_v51 = vpop.permute.xlu0 %1890 }
 0x897   : > { %v1840_v36 = vadd.f32 %v1839_v33, %v1834_v34  ;;  %v1893_v52 = vsel %vm3266_vm6, %v1891_v51, 0.0 }
 0x89a   : > { %v1843_v27 = vpop.permute.xlu1 %1842 }
 0x89b   : > { %v1845_v11 = vsel %vm497_vm5, %v1843_v27, 0.0  ;;  %vm3263_vm5 = vcmp.eq.s32.totalorder %v2744_v42, 8  ;;  %v1909_v58 = vpop.permute.xlu0 %1908 }
 0x89c   : > { %v1846_v10 = vadd.f32 %v1845_v11, %v1840_v36  ;;  %v1875_v37 = vsel %vm3263_vm5, %v1873_v25, 0.0  ;;  %v1911_v61 = vsel %vm3269_vm2, %v1909_v58, 0.0  ;;  %vm3272_vm5 = vcmp.eq.s32.totalorder %v2790_v41, 2 }
 0x89f   : > { %v1849_v29 = vpop.permute.xlu1 %1848 }
 0x8a0   : > { %v1851_v40 = vsel %vm3259_vm8, %v1849_v29, 0.0  ;;  %vm3268_vm8 = vcmp.eq.s32.totalorder %v2744_v42, 13 }
 0x8a1   : > { %v1852_v14 = vadd.f32 %v1851_v40, %v1846_v10 }
 0x8a3   : > { %v1858_v18 = vadd.f32 %v1857_v17, %v1852_v14 }
 0x8a4   : > { %v1861_v35 = vpop.permute.xlu1 %1860 }
 0x8a5   : > { %v1863_v20 = vsel %vm3261_vm3, %v1861_v35, 0.0  ;;  %vm3270_vm3 = vcmp.eq.s32.totalorder %v2790_v41, 0 }
 0x8a6   : > { %v1864_v24 = vadd.f32 %v1863_v20, %v1858_v18 }
 0x8a9   : > { %v1867_v15 = vpop.permute.xlu1 %1866 }
 0x8aa   : > { %v1869_v6 = vsel %vm3262_vm4, %v1867_v15, 0.0  ;;  %vm3271_vm4 = vcmp.eq.s32.totalorder %v2790_v41, 1 }
 0x8ab   : > { %v1870_v38 = vadd.f32 %v1869_v6, %v1864_v24 }
 0x8ad   : > { %v1876_v44 = vadd.f32 %v1875_v37, %v1870_v38 }
 0x8ae   : > { %v1879_v23 = vpop.permute.xlu1 %1878 }
 0x8af   : > { %v1881_v45 = vsel %vm3264_vm9, %v1879_v23, 0.0  ;;  %vm3273_vm9 = vcmp.eq.s32.totalorder %v2790_v41, 4 }
 0x8b0   : > { %v1882_v47 = vadd.f32 %v1881_v45, %v1876_v44 }
 0x8b3   : > { %v1885_v39 = vpop.permute.xlu1 %1884 }
 0x8b4   : > { %v1887_v46 = vsel %vm3265_vm10, %v1885_v39, 0.0  ;;  %v2220_v39 = vld [vmem:[%s3214_s9] ss:$0 sm:$0xff] }
 0x8b5   : > { %v1888_v50 = vadd.f32 %v1887_v46, %v1882_v47 }
 0x8b7   : > { %v1894_v3 = vadd.f32 %v1893_v52, %v1888_v50 }
 0x8b8   : > { %v1897_v49 = vpop.permute.xlu1 %1896 }
 0x8b9   : > { %v1899_v55 = vsel %vm3267_vm7, %v1897_v49, 0.0 }
 0x8ba   : > { %v1900_v56 = vadd.f32 %v1899_v55, %v1894_v3 }
 0x8bd   : > { %v1903_v53 = vpop.permute.xlu1 %1902 }
 0x8be   : > { %v1905_v13 = vsel %vm3268_vm8, %v1903_v53, 0.0 }
 0x8bf   : > { %v1906_v59 = vadd.f32 %v1905_v13, %v1900_v56 }
 0x8c1   : > { %v1912_v1 = vadd.f32 %v1911_v61, %v1906_v59 }
 0x8e3   : > { %v1777_v60 = vpop.f32.mrb[20].mxu0 }
 0x8e4   : > { %v1916_v16 = vrot.slane %v1777_v60, %v2783_v26  ;;  %v1922_v63 = vrot.slane %v1777_v60, %v2793_v43  ;;  %v2384_v0 = vpop.f32.mrb[21].mxu0  ;;  %v1928_v28 = vrot.slane %v1777_v60, %v2799_v48  ;;  %v1934_v42 = vrot.slane %v1777_v60, %v2809_v54 }
 0x8e5   : > { %v1780_v7 = vpop.f32.mrb[22].mxu0  ;;  %v1940_v43 = vrot.slane %v1777_v60, %v2818_v57  ;;  %v1946_v30 = vrot.slane %v1777_v60, %v2825_v62  ;;  %v1952_v32 = vrot.slane %v1777_v60, %v2832_v4  ;;  %v1967_v62 = vpop.permute.xlu0 %1966 }
 0x8e6   : > { %v2385_v8 = vpop.f32.mrb[23].mxu0  ;;  %v1917_v9 = vsel %vm3270_vm3, %v1916_v16, 0.0  ;;  %v1923_v21 = vsel %vm3271_vm4, %v1922_v63, 0.0  ;;  %v1929_v26 = vsel %vm3272_vm5, %v1928_v28, 0.0  ;;  %v1935_v29 = vsel %vm512_vm12, %v1934_v42, 0.0 }
 0x8e7   : > { %v1918_v5 = vadd.f32 %v1917_v9, %v1912_v1  ;;  %v1941_v48 = vsel %vm3273_vm9, %v1940_v43, 0.0  ;;  %v1947_v54 = vsel %vm514_vm11, %v1946_v30, 0.0  ;;  %v1953_v57 = vsel %vm515_vm13, %v1952_v32, 0.0 }
 0x8e8   : > { %vm3274_vm12 = vcmask 1045504  }
 0x8e9   : > { %v1924_v22 = vadd.f32 %v1923_v21, %v1918_v5  ;;  %v1972_v40 = vsel %vm3274_vm12, %v1967_v62, 0 }
 0x8ea   : > { %2393 = vmatpush3.bf16.msra.mxu0 %v1972_v40 }
 0x8eb   : > { %v1930_v27 = vadd.f32 %v1929_v26, %v1924_v22  ;;  %2398 = vmatprep.subr.bf16.mxu0 %v2565_v2 }
 0x8ed   : > { %v1936_v31 = vadd.f32 %v1935_v29, %v1930_v27 }
 0x8ef   : > { %v1942_v33 = vadd.f32 %v1941_v48, %v1936_v31 }
 0x8f1   : > { %v1948_v34 = vadd.f32 %v1947_v54, %v1942_v33 }
 0x8f3   : > { %v1954_v35 = vadd.f32 %v1953_v57, %v1948_v34 }
 0x8f5   : > { %v1955_v11 = vadd.f32 %v1954_v35, %v2849_v19  ;;  %v2017_v19 = vld [vmem:[%s3213_s8 + $0xc] sm:$0xf] }
 0x8f6   : > { %v2022_v17 = vsel %vm871_vm14, %v2017_v19, 0 }
 0x8f7   : > { %v1956_v36 = vsel %vm803_vm15, %v1955_v11, -inf }
 0x8f8   : > { %1957 = vmax.xlane.f32.xlu1 %v1956_v36 }
 0x985   : > { %v1958_v4 = vpop.xlane.xlu1 %1957 }
 0x986   : > { %v1959_v10 = vsub.f32 %v1955_v11, %v1958_v4 }
 0x988   : > { %v1960_v12 = vmul.f32 1.442695, %v1959_v10 }
 0x98a   : > { %2537 = vpow2.f32 %v1960_v12 }
 0x994   : > { %v2538_v14 = vpop.eup %2537 }
 0x995   : > { %v1962_v41 = vsel %vm803_vm15, %v2538_v14, 0.0  ;;  %v1965_v15 = vpack.c.bf16 %v2538_v14, %v2538_v14 }
 0x996   : > { %1963 = vadd.xlane.f32.xlu0 %v1962_v41 }
 0x997   : > { %2395 = vmatmul.mubr.msk.bf16.vlgmr.msra.gmra.mrb[24].mxu0 %vm803_vm15, %v1965_v15 }
 0x998   : > { %2400 = vmatprep.mubr.msk.bf16.mxu0 %vm2566_vm1, %v2565_v2  ;;  %2399 = vmatpush3.bf16.msra.mxu0 %v2022_v17  ;;  %v516_v2 = vld [vmem:[%s474_s24] sm:$0xff]  ;;  %vm2065_vm1 = vcmask 261120  }
 0x999   : > { %v524_v44 = vadd.f32 %v2220_v39, %v516_v2 }
 0xa23   : > { %v1964_v18 = vpop.xlane.xlu0 %1963 }
 0xa24   : > { %2539 = vrcp.f32 %v1964_v18 }
 0xa2e   : > { %v2540_v20 = vpop.eup %2539 }
 0xa6a   : > { %v2008_v23 = vpop.f32.mrb[24].mxu0 }
 0xa6b   : > { %v2015_v6 = vmul.f32 %v2540_v20, %v2008_v23  ;;  %v2396_v24 = vpop.f32.mrb[25].mxu0 }
 0xa6c   : > { %v2011_v25 = vpop.f32.mrb[26].mxu0 }
 0xa6d   : > { %v2016_v38 = vpack.c.bf16 %v2015_v6, %v2015_v6  ;;  %v2397_v37 = vpop.f32.mrb[27].mxu0 }
 0xa6f   : > { %2401 = vmatmul.mubr.msk.bf16.vlgmr.msra.gmra.mrb[4].mxu0 %vm537_vm0, %v2016_v38 }
 0xb42   : > { %v2058_v45 = vpop.f32.mrb[4].mxu0 }
 0xb43   : > { %v2404_v46 = vadd.f32 %v2058_v45, %v524_v44  ;;  %v2402_v47 = vpop.f32.mrb[5].mxu0 }
 0xb44   : > { %v2061_v49 = vpop.f32.mrb[6].mxu0 }
 0xb45   : > { %2066 = vst.msk [vmem:[%s481_s28] sm:$0xff] %vm2065_vm1, %v2404_v46  ;;  %v2403_v50 = vpop.f32.mrb[7].mxu0 }
 0xb46 PF: > { %s20_s15 = sadd.s32 1, %s2563_s15   ;;  %s3275_s13 = smov %s2559_s14 }
 0xb47   : > { %p17_p5 = scmp.ge.s32.totalorder %s20_s15, 4   ;;  %s3276_s14 = smov %s3278_s16 }
 0xb49   :  { %19 = sbr.rel (!%p17_p5) target bundleno = 2 (0x2), region = 105 }

</bundles_post_ra>
